<compile_context>
chip_gen: v7x
topology: tpu7x:2x2x1
jax: 0.10.0
libtpu: 0.0.40
codegen_flags: <defaults>
</compile_context>

<pallas_src>
import jax
import jax.numpy as jnp
from jax import lax
from jax.experimental import pallas as pl
from jax.experimental.pallas import tpu as pltpu


# ---- model geometry (32x32 RGB input, as implied by the 128*4*4 classifier) ----
H1, W1, C0, C1 = 32, 32, 3, 32        # conv1: 3->32,  maxpool2 -> 16x16
H2, W2, C2 = 16, 16, 64               # conv2: 32->64, maxpool2 -> 8x8
H3, W3, C3 = 8, 8, 128                # conv3: 64->128, avgpool2 -> 4x4
NUM_FEATS = C3 * 4 * 4                # 2048
HID = 512

B_IMGS = 8                            # images per feature-extractor grid step
CR1 = 8                               # conv1 output rows per chunk (4 chunks, M=256)
CR2 = 8                               # conv2 output rows per chunk (2 chunks, M=128)

# padded activation buffers: interior columns start at sublane offset 8 so the
# interior stores are aligned; the 1-pixel halo sits at columns 7 and 8+W.
PAD2_W = 8 + W2 + 1                   # 25
PAD3_W = 8 + W3 + 1                   # 17


# --------------------------------------------------------------------------- #
# Kernel A: conv feature extractor (B_IMGS images per grid step)              #
# --------------------------------------------------------------------------- #
def _feature_kernel(x1_ref,                      # (B, 1024, 27) bf16 layer-1 im2col
                    w1_ref, b1_ref,              # (27, 32)  bf16 / (1, 32)  f32
                    w2_ref, b2_ref,              # (288, 64) bf16 / (1, 64)  f32
                    w3_ref, b3_ref,              # (576,128) bf16 / (1, 128) f32
                    feat_ref,                    # (B, 4, 4, 128) bf16 pooled features
                    pad2_ref, pad3_ref,          # padded activations (f32)
                    hp1_ref, hp2_ref, hp3_ref):  # row-pair pooled strips (f32)
    f32 = jnp.float32
    bf16 = jnp.bfloat16

    # ---- halo-only zeroing (interior is fully rewritten for every image) ----
    pad2_ref[pl.ds(0, 1), :, :] = jnp.zeros((1, PAD2_W, C1), f32)
    pad2_ref[pl.ds(H2 + 1, 1), :, :] = jnp.zeros((1, PAD2_W, C1), f32)
    pad2_ref[pl.ds(1, H2), pl.ds(7, 1), :] = jnp.zeros((H2, 1, C1), f32)
    pad2_ref[pl.ds(1, H2), pl.ds(8 + W2, 1), :] = jnp.zeros((H2, 1, C1), f32)
    pad3_ref[pl.ds(0, 1), :, :] = jnp.zeros((1, PAD3_W, C2), f32)
    pad3_ref[pl.ds(H3 + 1, 1), :, :] = jnp.zeros((1, PAD3_W, C2), f32)
    pad3_ref[pl.ds(1, H3), pl.ds(7, 1), :] = jnp.zeros((H3, 1, C2), f32)
    pad3_ref[pl.ds(1, H3), pl.ds(8 + W3, 1), :] = jnp.zeros((H3, 1, C2), f32)

    # ---- hoisted weight / bias binds (outside every unrolled chunk loop) ----
    w1 = w1_ref[...]
    b1 = b1_ref[...]
    b2 = b2_ref[...]
    b3 = b3_ref[...]

    @pl.loop(0, B_IMGS)
    def _per_image(b):
        # ------- stage 1: conv3x3(3->32) + ReLU + 2x2 max pool (im2col matmul) -------
        for c in range(H1 // CR1):                                     # 4 chunks
            rows = CR1 * W1                                            # 256
            lhs = x1_ref[b, pl.ds(c * rows, rows), :]                  # (256, 27) bf16
            y = jnp.dot(lhs, w1, preferred_element_type=f32)
            y = jnp.maximum(y + b1, 0.0)                               # (256, 32)
            y = y.reshape(CR1 // 2, 2, W1, C1)
            hp1_ref[...] = jnp.maximum(y[:, 0], y[:, 1])               # pool row pairs
            pooled = jnp.maximum(hp1_ref[:, pl.ds(0, W1 // 2, 2), :],
                                 hp1_ref[:, pl.ds(1, W1 // 2, 2), :])  # (4, 16, 32)
            pad2_ref[pl.ds(1 + c * (CR1 // 2), CR1 // 2), pl.ds(8, W2), :] = pooled

        # ------- stage 2: conv3x3(32->64) + ReLU + 2x2 max pool -------
        for c in range(H2 // CR2):                                     # 2 chunks
            rows = CR2 * W2                                            # 128
            acc = jnp.zeros((rows, C2), f32)
            for dh in range(3):
                for dw in range(3):
                    k = dh * 3 + dw
                    piece = pad2_ref[pl.ds(c * CR2 + dh, CR2), pl.ds(7 + dw, W2), :]
                    piece = piece.reshape(rows, C1).astype(bf16)       # (128, 32)
                    acc = acc + jnp.dot(piece, w2_ref[pl.ds(k * C1, C1), :],
                                        preferred_element_type=f32)
            y = jnp.maximum(acc + b2, 0.0)                             # (128, 64)
            y = y.reshape(CR2 // 2, 2, W2, C2)
            hp2_ref[...] = jnp.maximum(y[:, 0], y[:, 1])               # (4, 16, 64)
            pooled = jnp.maximum(hp2_ref[:, pl.ds(0, W2 // 2, 2), :],
                                 hp2_ref[:, pl.ds(1, W2 // 2, 2), :])  # (4, 8, 64)
            pad3_ref[pl.ds(1 + c * (CR2 // 2), CR2 // 2), pl.ds(8, W3), :] = pooled

        # ------- stage 3: conv3x3(64->128) + ReLU + 2x2 avg pool + NHWC features -------
        rows3 = H3 * W3                                                # 64
        acc = jnp.zeros((rows3, C3), f32)
        for dh in range(3):
            for dw in range(3):
                k = dh * 3 + dw
                piece = pad3_ref[pl.ds(dh, H3), pl.ds(7 + dw, W3), :]
                piece = piece.reshape(rows3, C2).astype(bf16)          # (64, 64)
                acc = acc + jnp.dot(piece, w3_ref[pl.ds(k * C2, C2), :],
                                    preferred_element_type=f32)
        y = jnp.maximum(acc + b3, 0.0)                                 # (64, 128)
        y = y.reshape(H3 // 2, 2, W3, C3)
        hp3_ref[...] = y[:, 0] + y[:, 1]                               # (4, 8, 128) row-pair sums
        pooled = (hp3_ref[:, pl.ds(0, W3 // 2, 2), :] +
                  hp3_ref[:, pl.ds(1, W3 // 2, 2), :]) * 0.25          # (4, 4, 128)
        feat_ref[b] = pooled.astype(jnp.bfloat16)


# --------------------------------------------------------------------------- #
# Kernel B: batched classifier (Dropout layers are identity in eval mode)     #
# --------------------------------------------------------------------------- #
def _classifier_kernel(f_ref,                    # (TM, 2048) bf16 features
                       wf1_ref, bf1_ref,         # (2048, 512) bf16 / (1, 512) f32
                       wf2_ref, bf2_ref,         # (512, NCP)  bf16 / (1, NCP) f32
                       o_ref,                    # (TM, NCP)   f32
                       h_ref):                   # (TM, 512)   bf16 scratch (hidden)
    f32 = jnp.float32
    bf16 = jnp.bfloat16
    tm = f_ref.shape[0]
    TK, TN = 256, 128                            # canonical MXU-friendly tiles

    # fc1: (TM, 2048) x (2048, 512), tiled over N and K to bound live vregs
    for j in range(HID // TN):
        acc = jnp.zeros((tm, TN), f32)
        for k in range(NUM_FEATS // TK):
            acc = acc + jnp.dot(f_ref[:, pl.ds(k * TK, TK)],
                                wf1_ref[pl.ds(k * TK, TK), pl.ds(j * TN, TN)],
                                preferred_element_type=f32)
        hj = jnp.maximum(acc + bf1_ref[:, pl.ds(j * TN, TN)], 0.0)
        h_ref[:, pl.ds(j * TN, TN)] = hj.astype(bf16)

    # fc2: (TM, 512) x (512, NCP)
    o = jnp.dot(h_ref[...], wf2_ref[...], preferred_element_type=f32)
    o_ref[...] = o + bf2_ref[...]


# --------------------------------------------------------------------------- #
# Wrapper                                                                     #
# --------------------------------------------------------------------------- #
def _im2col_3x3(x_nhwc):
    """(N, H, W, C) -> (N, H*W, 9*C) patches, tap-major (dh, dw, c) order."""
    N, H, W, C = x_nhwc.shape
    xp = jnp.pad(x_nhwc, ((0, 0), (1, 1), (1, 1), (0, 0)))
    cols = [xp[:, dh:dh + H, dw:dw + W, :] for dh in range(3) for dw in range(3)]
    return jnp.concatenate(cols, axis=-1).reshape(N, H * W, 9 * C)


def _round_up(x, m):
    return (x + m - 1) // m * m


def simple_biometric_forward(x_nchw, params):
    """== SimpleBiometricModel.forward (eval mode) for 32x32 NCHW inputs.

    Expected param layout (a torch state_dict must be converted first):
      conv weights HWIO (3,3,Cin,Cout); linear weights (in,out); biases (1,C).
      wf1 must be transposed to (in,out) BEFORE the NCHW-flatten permutation
      applied below.  bf16 matmuls with f32 accumulation => ~1e-2 relative
      difference vs. PyTorch f32 is expected.
    """
    N = x_nchw.shape[0]
    num_classes = params["wf2"].shape[1]
    bf16 = jnp.bfloat16

    # NCHW -> NHWC + layer-1 im2col on the tiny 3-channel input (Cin=3 maps
    # terribly onto 128-lane vregs, so the wrapper builds the K=27 patches).
    x = jnp.transpose(x_nchw, (0, 2, 3, 1)).astype(jnp.float32)
    x1 = _im2col_3x3(x).astype(bf16)                                   # (N, 1024, 27)

    n_pad = _round_up(max(N, 1), B_IMGS)
    if n_pad != N:
        x1 = jnp.pad(x1, ((0, n_pad - N), (0, 0), (0, 0)))

    w1 = params["w1"].reshape(9 * C0, C1).astype(bf16)
    w2 = params["w2"].reshape(9 * C1, C2).astype(bf16)
    w3 = params["w3"].reshape(9 * C2, C3).astype(bf16)

    const2 = lambda n: (0, 0)

    # ---- Kernel A: features for B_IMGS images per grid step ----
    feats = pl.pallas_call(
        _feature_kernel,
        out_shape=jax.ShapeDtypeStruct((n_pad, 4, 4, C3), bf16),
        grid=(n_pad // B_IMGS,),
        in_specs=[
            pl.BlockSpec((B_IMGS, H1 * W1, 9 * C0), lambda n: (n, 0, 0)),
            pl.BlockSpec((9 * C0, C1), const2), pl.BlockSpec((1, C1), const2),
            pl.BlockSpec((9 * C1, C2), const2), pl.BlockSpec((1, C2), const2),
            pl.BlockSpec((9 * C2, C3), const2), pl.BlockSpec((1, C3), const2),
        ],
        out_specs=pl.BlockSpec((B_IMGS, 4, 4, C3), lambda n: (n, 0, 0, 0)),
        scratch_shapes=[
            pltpu.VMEM((H2 + 2, PAD2_W, C1), jnp.float32),   # pad2 (18, 25, 32)
            pltpu.VMEM((H3 + 2, PAD3_W, C2), jnp.float32),   # pad3 (10, 17, 64)
            pltpu.VMEM((CR1 // 2, W1, C1), jnp.float32),     # hp1  (4, 32, 32)
            pltpu.VMEM((CR2 // 2, W2, C2), jnp.float32),     # hp2  (4, 16, 64)
            pltpu.VMEM((H3 // 2, W3, C3), jnp.float32),      # hp3  (4, 8, 128)
        ],
        compiler_params=pltpu.CompilerParams(
            dimension_semantics=("parallel",),   # image blocks are independent
            vmem_limit_bytes=32 * 1024 * 1024,   # ~5-6 MB used
        ),
    )(x1, w1, params["b1"], w2, params["b2"], w3, params["b3"])

    feats = feats.reshape(n_pad, NUM_FEATS)      # NHWC-order flatten (contiguous, free)

    # ---- Kernel B: whole-batch classifier (row tiles of up to 128) ----
    tm = 128 if n_pad >= 128 else n_pad
    m_pad = _round_up(n_pad, tm)
    if m_pad != n_pad:
        feats = jnp.pad(feats, ((0, m_pad - n_pad), (0, 0)))

    # torch's x.view(N,-1) flattens NCHW (c*16 + h*4 + w); the kernel flattens
    # NHWC ((h*4+w)*128 + c).  Fold that permutation into wf1 once.
    idx = jnp.arange(NUM_FEATS)
    perm = (idx % C3) * 16 + idx // C3
    wf1 = params["wf1"][perm, :].astype(bf16)

    # pad the class dim to a lane-dense multiple of 128 (unmasked stores / dense DMA)
    ncp = _round_up(num_classes, 128)
    wf2 = jnp.pad(params["wf2"].astype(bf16), ((0, 0), (0, ncp - num_classes)))
    bf2 = jnp.pad(params["bf2"].astype(jnp.float32), ((0, 0), (0, ncp - num_classes)))

    logits = pl.pallas_call(
        _classifier_kernel,
        out_shape=jax.ShapeDtypeStruct((m_pad, ncp), jnp.float32),
        grid=(m_pad // tm,),
        in_specs=[
            pl.BlockSpec((tm, NUM_FEATS), lambda i: (i, 0)),
            pl.BlockSpec((NUM_FEATS, HID), const2), pl.BlockSpec((1, HID), const2),
            pl.BlockSpec((HID, ncp), const2), pl.BlockSpec((1, ncp), const2),
        ],
        out_specs=pl.BlockSpec((tm, ncp), lambda i: (i, 0)),
        scratch_shapes=[pltpu.VMEM((tm, HID), bf16)],
        compiler_params=pltpu.CompilerParams(
            dimension_semantics=("parallel",),
            vmem_limit_bytes=32 * 1024 * 1024,
        ),
    )(feats, wf1, params["bf1"], wf2, bf2)

    return logits[:N, :num_classes]


# --------------------------------------------------------------------------- #
# Reference + params + self-test                                              #
# --------------------------------------------------------------------------- #
def _reference_forward(x_nchw, params):
    """Pure-JAX f32 reference of SimpleBiometricModel.forward (eval mode)."""
    hi = lax.Precision.HIGHEST
    x = jnp.transpose(x_nchw, (0, 2, 3, 1)).astype(jnp.float32)
    dn = lax.conv_dimension_numbers(x.shape, params["w1"].shape, ("NHWC", "HWIO", "NHWC"))

    def conv_relu(h, w, b):
        y = lax.conv_general_dilated(h, w, (1, 1), "SAME",
                                     dimension_numbers=dn, precision=hi)
        return jnp.maximum(y + b.reshape(1, 1, 1, -1), 0.0)

    def pool(h, op, init):
        return lax.reduce_window(h, init, op, (1, 2, 2, 1), (1, 2, 2, 1), "VALID")

    h = pool(conv_relu(x, params["w1"], params["b1"]), lax.max, -jnp.inf)
    h = pool(conv_relu(h, params["w2"], params["b2"]), lax.max, -jnp.inf)
    h = pool(conv_relu(h, params["w3"], params["b3"]), lax.add, 0.0) * 0.25
    h = jnp.transpose(h, (0, 3, 1, 2)).reshape(x.shape[0], -1)   # torch NCHW flatten
    h = jnp.maximum(jnp.dot(h, params["wf1"], precision=hi) + params["bf1"], 0.0)
    return jnp.dot(h, params["wf2"], precision=hi) + params["bf2"]


def init_params(key, num_classes=100):
    """Random params.  Conv weights HWIO (3,3,Cin,Cout); Linear weights (in,out)
    with wf1 rows in torch's NCHW-flatten order; biases (1,C).  A torch
    state_dict would be converted by transposing Linear weights and reshaping
    the (C,) biases before calling the forward."""
    ks = jax.random.split(key, 10)

    def conv_w(k, cin, cout):
        return jax.random.normal(k, (3, 3, cin, cout), jnp.float32) / jnp.sqrt(9.0 * cin)

    def lin_w(k, fin, fout):
        return jax.random.normal(k, (fin, fout), jnp.float32) / jnp.sqrt(float(fin))

    return {
        "w1": conv_w(ks[0], C0, C1),  "b1": jax.random.normal(ks[1], (1, C1), jnp.float32) * 0.01,
        "w2": conv_w(ks[2], C1, C2),  "b2": jax.random.normal(ks[3], (1, C2), jnp.float32) * 0.01,
        "w3": conv_w(ks[4], C2, C3),  "b3": jax.random.normal(ks[5], (1, C3), jnp.float32) * 0.01,
        "wf1": lin_w(ks[6], NUM_FEATS, HID),
        "bf1": jax.random.normal(ks[7], (1, HID), jnp.float32) * 0.01,
        "wf2": lin_w(ks[8], HID, num_classes),
        "bf2": jax.random.normal(ks[9], (1, num_classes), jnp.float32) * 0.01,
    }


if __name__ == "__main__":
    key = jax.random.PRNGKey(0)
    k_x, k_p = jax.random.split(key)

    # PyTorch-convention NCHW input; 32x32 spatial so the feature extractor ends
    # at 8x8 before AdaptiveAvgPool2d((4,4)) (== the 2x2 average pool assumed).
    x = jax.random.normal(k_x, (2, 3, 32, 32), jnp.float32)
    params = init_params(k_p, num_classes=100)

    fwd = jax.jit(simple_biometric_forward)
    logits = fwd(x, params)
    jax.block_until_ready(logits)

    assert logits.shape == (2, 100) and logits.dtype == jnp.float32

    # bf16 matmuls vs f32 reference: loose tolerance, but a structural bug
    # (layout / halo / flatten-permutation) would blow far past it.
    ref = _reference_forward(x, params)
    max_err = float(jnp.max(jnp.abs(logits - ref)))
    assert max_err < 0.25, max_err

    print("KERNEL_OK")
</pallas_src>

<mosaic_0001>
module attributes {stable_mosaic.version = 11 : i64} {
  func.func @_feature_kernel(%arg0: i32, %arg1: memref<8x1024x27xbf16, #tpu.memory_space<vmem>>, %arg2: memref<27x32xbf16, #tpu.memory_space<vmem>>, %arg3: memref<1x32xf32, #tpu.memory_space<vmem>>, %arg4: memref<288x64xbf16, #tpu.memory_space<vmem>>, %arg5: memref<1x64xf32, #tpu.memory_space<vmem>>, %arg6: memref<576x128xbf16, #tpu.memory_space<vmem>>, %arg7: memref<1x128xf32, #tpu.memory_space<vmem>>, %arg8: memref<8x4x4x128xbf16, #tpu.memory_space<vmem>>, %arg9: memref<18x25x32xf32, #tpu.memory_space<vmem>>, %arg10: memref<10x17x64xf32, #tpu.memory_space<vmem>>, %arg11: memref<4x32x32xf32, #tpu.memory_space<vmem>>, %arg12: memref<4x16x64xf32, #tpu.memory_space<vmem>>, %arg13: memref<4x8x128xf32, #tpu.memory_space<vmem>>) attributes {dimension_semantics = [#tpu.dimension_semantics<parallel>], iteration_bounds = array<i64: 1>, scalar_prefetch = 0 : i64, scratch_operands = 5 : i64, tpu.core_type = #tpu.core_type<tc>, window_params = [{transform_indices = @transform_0, window_bounds = array<i64: 8, 1024, 27>}, {pipeline_mode = #tpu.pipeline_mode<synchronous>, transform_indices = @transform_1, window_bounds = array<i64: 27, 32>}, {pipeline_mode = #tpu.pipeline_mode<synchronous>, transform_indices = @transform_2, window_bounds = array<i64: 1, 32>}, {pipeline_mode = #tpu.pipeline_mode<synchronous>, transform_indices = @transform_3, window_bounds = array<i64: 288, 64>}, {pipeline_mode = #tpu.pipeline_mode<synchronous>, transform_indices = @transform_4, window_bounds = array<i64: 1, 64>}, {pipeline_mode = #tpu.pipeline_mode<synchronous>, transform_indices = @transform_5, window_bounds = array<i64: 576, 128>}, {pipeline_mode = #tpu.pipeline_mode<synchronous>, transform_indices = @transform_6, window_bounds = array<i64: 1, 128>}, {transform_indices = @transform_7, window_bounds = array<i64: 8, 4, 4, 128>}]} {
    %cst = arith.constant 0.000000e+00 : f32
    %0 = vector.broadcast %cst : f32 to vector<1x25x32xf32>
    %c0 = arith.constant 0 : index
    %c0_0 = arith.constant 0 : index
    %c0_1 = arith.constant 0 : index
    %1 = vector.load %arg9[%c0, %c0_0, %c0_1] : memref<18x25x32xf32, #tpu.memory_space<vmem>>, vector<1x25x32xf32>
    tpu.vector_store %arg9[%c0, %c0_0, %c0_1], %0 {strides = array<i32>} : memref<18x25x32xf32, #tpu.memory_space<vmem>>, vector<1x25x32xf32>,
    %cst_2 = arith.constant 0.000000e+00 : f32
    %2 = vector.broadcast %cst_2 : f32 to vector<1x25x32xf32>
    %c17 = arith.constant 17 : index
    %c0_3 = arith.constant 0 : index
    %c0_4 = arith.constant 0 : index
    %3 = vector.load %arg9[%c17, %c0_3, %c0_4] : memref<18x25x32xf32, #tpu.memory_space<vmem>>, vector<1x25x32xf32>
    tpu.vector_store %arg9[%c17, %c0_3, %c0_4], %2 {strides = array<i32>} : memref<18x25x32xf32, #tpu.memory_space<vmem>>, vector<1x25x32xf32>,
    %cst_5 = arith.constant 0.000000e+00 : f32
    %4 = vector.broadcast %cst_5 : f32 to vector<16x1x32xf32>
    %c1 = arith.constant 1 : index
    %c7 = arith.constant 7 : index
    %c0_6 = arith.constant 0 : index
    %5 = vector.load %arg9[%c1, %c7, %c0_6] : memref<18x25x32xf32, #tpu.memory_space<vmem>>, vector<16x1x32xf32>
    tpu.vector_store %arg9[%c1, %c7, %c0_6], %4 {strides = array<i32>} : memref<18x25x32xf32, #tpu.memory_space<vmem>>, vector<16x1x32xf32>,
    %cst_7 = arith.constant 0.000000e+00 : f32
    %6 = vector.broadcast %cst_7 : f32 to vector<16x1x32xf32>
    %c1_8 = arith.constant 1 : index
    %c24 = arith.constant 24 : index
    %c0_9 = arith.constant 0 : index
    %7 = vector.load %arg9[%c1_8, %c24, %c0_9] : memref<18x25x32xf32, #tpu.memory_space<vmem>>, vector<16x1x32xf32>
    tpu.vector_store %arg9[%c1_8, %c24, %c0_9], %6 {strides = array<i32>} : memref<18x25x32xf32, #tpu.memory_space<vmem>>, vector<16x1x32xf32>,
    %cst_10 = arith.constant 0.000000e+00 : f32
    %8 = vector.broadcast %cst_10 : f32 to vector<1x17x64xf32>
    %c0_11 = arith.constant 0 : index
    %c0_12 = arith.constant 0 : index
    %c0_13 = arith.constant 0 : index
    %9 = vector.load %arg10[%c0_11, %c0_12, %c0_13] : memref<10x17x64xf32, #tpu.memory_space<vmem>>, vector<1x17x64xf32>
    tpu.vector_store %arg10[%c0_11, %c0_12, %c0_13], %8 {strides = array<i32>} : memref<10x17x64xf32, #tpu.memory_space<vmem>>, vector<1x17x64xf32>,
    %cst_14 = arith.constant 0.000000e+00 : f32
    %10 = vector.broadcast %cst_14 : f32 to vector<1x17x64xf32>
    %c9 = arith.constant 9 : index
    %c0_15 = arith.constant 0 : index
    %c0_16 = arith.constant 0 : index
    %11 = vector.load %arg10[%c9, %c0_15, %c0_16] : memref<10x17x64xf32, #tpu.memory_space<vmem>>, vector<1x17x64xf32>
    tpu.vector_store %arg10[%c9, %c0_15, %c0_16], %10 {strides = array<i32>} : memref<10x17x64xf32, #tpu.memory_space<vmem>>, vector<1x17x64xf32>,
    %cst_17 = arith.constant 0.000000e+00 : f32
    %12 = vector.broadcast %cst_17 : f32 to vector<8x1x64xf32>
    %c1_18 = arith.constant 1 : index
    %c7_19 = arith.constant 7 : index
    %c0_20 = arith.constant 0 : index
    %13 = vector.load %arg10[%c1_18, %c7_19, %c0_20] : memref<10x17x64xf32, #tpu.memory_space<vmem>>, vector<8x1x64xf32>
    tpu.vector_store %arg10[%c1_18, %c7_19, %c0_20], %12 {strides = array<i32>} : memref<10x17x64xf32, #tpu.memory_space<vmem>>, vector<8x1x64xf32>,
    %cst_21 = arith.constant 0.000000e+00 : f32
    %14 = vector.broadcast %cst_21 : f32 to vector<8x1x64xf32>
    %c1_22 = arith.constant 1 : index
    %c16 = arith.constant 16 : index
    %c0_23 = arith.constant 0 : index
    %15 = vector.load %arg10[%c1_22, %c16, %c0_23] : memref<10x17x64xf32, #tpu.memory_space<vmem>>, vector<8x1x64xf32>
    tpu.vector_store %arg10[%c1_22, %c16, %c0_23], %14 {strides = array<i32>} : memref<10x17x64xf32, #tpu.memory_space<vmem>>, vector<8x1x64xf32>,
    %c0_24 = arith.constant 0 : index
    %c0_25 = arith.constant 0 : index
    %16 = vector.load %arg2[%c0_24, %c0_25] : memref<27x32xbf16, #tpu.memory_space<vmem>>, vector<27x32xbf16>
    %c0_26 = arith.constant 0 : index
    %c0_27 = arith.constant 0 : index
    %17 = vector.load %arg3[%c0_26, %c0_27] : memref<1x32xf32, #tpu.memory_space<vmem>>, vector<1x32xf32>
    %c0_28 = arith.constant 0 : index
    %c0_29 = arith.constant 0 : index
    %18 = vector.load %arg5[%c0_28, %c0_29] : memref<1x64xf32, #tpu.memory_space<vmem>>, vector<1x64xf32>
    %c0_30 = arith.constant 0 : index
    %c0_31 = arith.constant 0 : index
    %19 = vector.load %arg7[%c0_30, %c0_31] : memref<1x128xf32, #tpu.memory_space<vmem>>, vector<1x128xf32>
    %c0_i32 = arith.constant 0 : i32
    %c8_i32 = arith.constant 8 : i32
    %20 = arith.addi %c0_i32, %c8_i32 : i32
    %c1_i32 = arith.constant 1 : i32
    scf.for %arg14 = %c0_i32 to %20 step %c1_i32  : i32 {
      %c1_i32_33 = arith.constant 1 : i32
      %21 = arith.muli %arg14, %c1_i32_33 : i32
      %c0_i32_34 = arith.constant 0 : i32
      %22 = arith.addi %c0_i32_34, %21 : i32
      %23 = arith.index_cast %22 : i32 to index
      %c0_35 = arith.constant 0 : index
      %c0_36 = arith.constant 0 : index
      %24 = vector.load %arg1[%23, %c0_35, %c0_36] : memref<8x1024x27xbf16, #tpu.memory_space<vmem>>, vector<1x256x27xbf16>
      %25 = vector.shape_cast %24 : vector<1x256x27xbf16> to vector<256x27xbf16>
      %cst_37 = arith.constant dense<0.000000e+00> : vector<256x32xf32>
      %26 = tpu.matmul %25, %16, %cst_37 {dimension_numbers = #tpu.dot_dimension_numbers<[1], [0], [0], [1], [0, 0, 1, 1], [], []>} : vector<256x27xbf16>, vector<27x32xbf16>, vector<256x32xf32> -> vector<256x32xf32>
      %27 = vector.broadcast %17 : vector<1x32xf32> to vector<256x32xf32>
      %28 = arith.addf %26, %27 : vector<256x32xf32>
      %cst_38 = arith.constant 0.000000e+00 : f32
      %29 = vector.broadcast %cst_38 : f32 to vector<256x32xf32>
      %30 = arith.maximumf %28, %29 : vector<256x32xf32>
      %31 = vector.shape_cast %30 : vector<256x32xf32> to vector<4x2x32x32xf32>
      %32 = vector.extract_strided_slice %31 {offsets = [0, 0, 0, 0], sizes = [4, 1, 32, 32], strides = [1, 1, 1, 1]} : vector<4x2x32x32xf32> to vector<4x1x32x32xf32>
      %33 = vector.shape_cast %32 : vector<4x1x32x32xf32> to vector<4x32x32xf32>
      %34 = vector.extract_strided_slice %31 {offsets = [0, 1, 0, 0], sizes = [4, 1, 32, 32], strides = [1, 1, 1, 1]} : vector<4x2x32x32xf32> to vector<4x1x32x32xf32>
      %35 = vector.shape_cast %34 : vector<4x1x32x32xf32> to vector<4x32x32xf32>
      %36 = arith.maximumf %33, %35 : vector<4x32x32xf32>
      %c0_39 = arith.constant 0 : index
      %c0_40 = arith.constant 0 : index
      %c0_41 = arith.constant 0 : index
      %37 = vector.load %arg11[%c0_39, %c0_40, %c0_41] : memref<4x32x32xf32, #tpu.memory_space<vmem>>, vector<4x32x32xf32>
      tpu.vector_store %arg11[%c0_39, %c0_40, %c0_41], %36 {strides = array<i32>} : memref<4x32x32xf32, #tpu.memory_space<vmem>>, vector<4x32x32xf32>,
      %c0_42 = arith.constant 0 : index
      %c0_43 = arith.constant 0 : index
      %c0_44 = arith.constant 0 : index
      %38 = tpu.strided_load %arg11[%c0_42, %c0_43, %c0_44] {strides = array<i32: 1, 2, 1>} : memref<4x32x32xf32, #tpu.memory_space<vmem>>, vector<4x16x32xf32>
      %c0_45 = arith.constant 0 : index
      %c1_46 = arith.constant 1 : index
      %c0_47 = arith.constant 0 : index
      %39 = tpu.strided_load %arg11[%c0_45, %c1_46, %c0_47] {strides = array<i32: 1, 2, 1>} : memref<4x32x32xf32, #tpu.memory_space<vmem>>, vector<4x16x32xf32>
      %40 = arith.maximumf %38, %39 : vector<4x16x32xf32>
      %c1_48 = arith.constant 1 : index
      %c8 = arith.constant 8 : index
      %c0_49 = arith.constant 0 : index
      %41 = vector.load %arg9[%c1_48, %c8, %c0_49] : memref<18x25x32xf32, #tpu.memory_space<vmem>>, vector<4x16x32xf32>
      tpu.vector_store %arg9[%c1_48, %c8, %c0_49], %40 {strides = array<i32>} : memref<18x25x32xf32, #tpu.memory_space<vmem>>, vector<4x16x32xf32>,
      %42 = arith.index_cast %22 : i32 to index
      %c256 = arith.constant 256 : index
      %c0_50 = arith.constant 0 : index
      %43 = vector.load %arg1[%42, %c256, %c0_50] : memref<8x1024x27xbf16, #tpu.memory_space<vmem>>, vector<1x256x27xbf16>
      %44 = vector.shape_cast %43 : vector<1x256x27xbf16> to vector<256x27xbf16>
      %cst_51 = arith.constant dense<0.000000e+00> : vector<256x32xf32>
      %45 = tpu.matmul %44, %16, %cst_51 {dimension_numbers = #tpu.dot_dimension_numbers<[1], [0], [0], [1], [0, 0, 1, 1], [], []>} : vector<256x27xbf16>, vector<27x32xbf16>, vector<256x32xf32> -> vector<256x32xf32>
      %46 = vector.broadcast %17 : vector<1x32xf32> to vector<256x32xf32>
      %47 = arith.addf %45, %46 : vector<256x32xf32>
      %cst_52 = arith.constant 0.000000e+00 : f32
      %48 = vector.broadcast %cst_52 : f32 to vector<256x32xf32>
      %49 = arith.maximumf %47, %48 : vector<256x32xf32>
      %50 = vector.shape_cast %49 : vector<256x32xf32> to vector<4x2x32x32xf32>
      %51 = vector.extract_strided_slice %50 {offsets = [0, 0, 0, 0], sizes = [4, 1, 32, 32], strides = [1, 1, 1, 1]} : vector<4x2x32x32xf32> to vector<4x1x32x32xf32>
      %52 = vector.shape_cast %51 : vector<4x1x32x32xf32> to vector<4x32x32xf32>
      %53 = vector.extract_strided_slice %50 {offsets = [0, 1, 0, 0], sizes = [4, 1, 32, 32], strides = [1, 1, 1, 1]} : vector<4x2x32x32xf32> to vector<4x1x32x32xf32>
      %54 = vector.shape_cast %53 : vector<4x1x32x32xf32> to vector<4x32x32xf32>
      %55 = arith.maximumf %52, %54 : vector<4x32x32xf32>
      %c0_53 = arith.constant 0 : index
      %c0_54 = arith.constant 0 : index
      %c0_55 = arith.constant 0 : index
      %56 = vector.load %arg11[%c0_53, %c0_54, %c0_55] : memref<4x32x32xf32, #tpu.memory_space<vmem>>, vector<4x32x32xf32>
      tpu.vector_store %arg11[%c0_53, %c0_54, %c0_55], %55 {strides = array<i32>} : memref<4x32x32xf32, #tpu.memory_space<vmem>>, vector<4x32x32xf32>,
      %c0_56 = arith.constant 0 : index
      %c0_57 = arith.constant 0 : index
      %c0_58 = arith.constant 0 : index
      %57 = tpu.strided_load %arg11[%c0_56, %c0_57, %c0_58] {strides = array<i32: 1, 2, 1>} : memref<4x32x32xf32, #tpu.memory_space<vmem>>, vector<4x16x32xf32>
      %c0_59 = arith.constant 0 : index
      %c1_60 = arith.constant 1 : index
      %c0_61 = arith.constant 0 : index
      %58 = tpu.strided_load %arg11[%c0_59, %c1_60, %c0_61] {strides = array<i32: 1, 2, 1>} : memref<4x32x32xf32, #tpu.memory_space<vmem>>, vector<4x16x32xf32>
      %59 = arith.maximumf %57, %58 : vector<4x16x32xf32>
      %c5 = arith.constant 5 : index
      %c8_62 = arith.constant 8 : index
      %c0_63 = arith.constant 0 : index
      %60 = vector.load %arg9[%c5, %c8_62, %c0_63] : memref<18x25x32xf32, #tpu.memory_space<vmem>>, vector<4x16x32xf32>
      tpu.vector_store %arg9[%c5, %c8_62, %c0_63], %59 {strides = array<i32>} : memref<18x25x32xf32, #tpu.memory_space<vmem>>, vector<4x16x32xf32>,
      %61 = arith.index_cast %22 : i32 to index
      %c512 = arith.constant 512 : index
      %c0_64 = arith.constant 0 : index
      %62 = vector.load %arg1[%61, %c512, %c0_64] : memref<8x1024x27xbf16, #tpu.memory_space<vmem>>, vector<1x256x27xbf16>
      %63 = vector.shape_cast %62 : vector<1x256x27xbf16> to vector<256x27xbf16>
      %cst_65 = arith.constant dense<0.000000e+00> : vector<256x32xf32>
      %64 = tpu.matmul %63, %16, %cst_65 {dimension_numbers = #tpu.dot_dimension_numbers<[1], [0], [0], [1], [0, 0, 1, 1], [], []>} : vector<256x27xbf16>, vector<27x32xbf16>, vector<256x32xf32> -> vector<256x32xf32>
      %65 = vector.broadcast %17 : vector<1x32xf32> to vector<256x32xf32>
      %66 = arith.addf %64, %65 : vector<256x32xf32>
      %cst_66 = arith.constant 0.000000e+00 : f32
      %67 = vector.broadcast %cst_66 : f32 to vector<256x32xf32>
      %68 = arith.maximumf %66, %67 : vector<256x32xf32>
      %69 = vector.shape_cast %68 : vector<256x32xf32> to vector<4x2x32x32xf32>
      %70 = vector.extract_strided_slice %69 {offsets = [0, 0, 0, 0], sizes = [4, 1, 32, 32], strides = [1, 1, 1, 1]} : vector<4x2x32x32xf32> to vector<4x1x32x32xf32>
      %71 = vector.shape_cast %70 : vector<4x1x32x32xf32> to vector<4x32x32xf32>
      %72 = vector.extract_strided_slice %69 {offsets = [0, 1, 0, 0], sizes = [4, 1, 32, 32], strides = [1, 1, 1, 1]} : vector<4x2x32x32xf32> to vector<4x1x32x32xf32>
      %73 = vector.shape_cast %72 : vector<4x1x32x32xf32> to vector<4x32x32xf32>
      %74 = arith.maximumf %71, %73 : vector<4x32x32xf32>
      %c0_67 = arith.constant 0 : index
      %c0_68 = arith.constant 0 : index
      %c0_69 = arith.constant 0 : index
      %75 = vector.load %arg11[%c0_67, %c0_68, %c0_69] : memref<4x32x32xf32, #tpu.memory_space<vmem>>, vector<4x32x32xf32>
      tpu.vector_store %arg11[%c0_67, %c0_68, %c0_69], %74 {strides = array<i32>} : memref<4x32x32xf32, #tpu.memory_space<vmem>>, vector<4x32x32xf32>,
      %c0_70 = arith.constant 0 : index
      %c0_71 = arith.constant 0 : index
      %c0_72 = arith.constant 0 : index
      %76 = tpu.strided_load %arg11[%c0_70, %c0_71, %c0_72] {strides = array<i32: 1, 2, 1>} : memref<4x32x32xf32, #tpu.memory_space<vmem>>, vector<4x16x32xf32>
      %c0_73 = arith.constant 0 : index
      %c1_74 = arith.constant 1 : index
      %c0_75 = arith.constant 0 : index
      %77 = tpu.strided_load %arg11[%c0_73, %c1_74, %c0_75] {strides = array<i32: 1, 2, 1>} : memref<4x32x32xf32, #tpu.memory_space<vmem>>, vector<4x16x32xf32>
      %78 = arith.maximumf %76, %77 : vector<4x16x32xf32>
      %c9_76 = arith.constant 9 : index
      %c8_77 = arith.constant 8 : index
      %c0_78 = arith.constant 0 : index
      %79 = vector.load %arg9[%c9_76, %c8_77, %c0_78] : memref<18x25x32xf32, #tpu.memory_space<vmem>>, vector<4x16x32xf32>
      tpu.vector_store %arg9[%c9_76, %c8_77, %c0_78], %78 {strides = array<i32>} : memref<18x25x32xf32, #tpu.memory_space<vmem>>, vector<4x16x32xf32>,
      %80 = arith.index_cast %22 : i32 to index
      %c768 = arith.constant 768 : index
      %c0_79 = arith.constant 0 : index
      %81 = vector.load %arg1[%80, %c768, %c0_79] : memref<8x1024x27xbf16, #tpu.memory_space<vmem>>, vector<1x256x27xbf16>
      %82 = vector.shape_cast %81 : vector<1x256x27xbf16> to vector<256x27xbf16>
      %cst_80 = arith.constant dense<0.000000e+00> : vector<256x32xf32>
      %83 = tpu.matmul %82, %16, %cst_80 {dimension_numbers = #tpu.dot_dimension_numbers<[1], [0], [0], [1], [0, 0, 1, 1], [], []>} : vector<256x27xbf16>, vector<27x32xbf16>, vector<256x32xf32> -> vector<256x32xf32>
      %84 = vector.broadcast %17 : vector<1x32xf32> to vector<256x32xf32>
      %85 = arith.addf %83, %84 : vector<256x32xf32>
      %cst_81 = arith.constant 0.000000e+00 : f32
      %86 = vector.broadcast %cst_81 : f32 to vector<256x32xf32>
      %87 = arith.maximumf %85, %86 : vector<256x32xf32>
      %88 = vector.shape_cast %87 : vector<256x32xf32> to vector<4x2x32x32xf32>
      %89 = vector.extract_strided_slice %88 {offsets = [0, 0, 0, 0], sizes = [4, 1, 32, 32], strides = [1, 1, 1, 1]} : vector<4x2x32x32xf32> to vector<4x1x32x32xf32>
      %90 = vector.shape_cast %89 : vector<4x1x32x32xf32> to vector<4x32x32xf32>
      %91 = vector.extract_strided_slice %88 {offsets = [0, 1, 0, 0], sizes = [4, 1, 32, 32], strides = [1, 1, 1, 1]} : vector<4x2x32x32xf32> to vector<4x1x32x32xf32>
      %92 = vector.shape_cast %91 : vector<4x1x32x32xf32> to vector<4x32x32xf32>
      %93 = arith.maximumf %90, %92 : vector<4x32x32xf32>
      %c0_82 = arith.constant 0 : index
      %c0_83 = arith.constant 0 : index
      %c0_84 = arith.constant 0 : index
      %94 = vector.load %arg11[%c0_82, %c0_83, %c0_84] : memref<4x32x32xf32, #tpu.memory_space<vmem>>, vector<4x32x32xf32>
      tpu.vector_store %arg11[%c0_82, %c0_83, %c0_84], %93 {strides = array<i32>} : memref<4x32x32xf32, #tpu.memory_space<vmem>>, vector<4x32x32xf32>,
      %c0_85 = arith.constant 0 : index
      %c0_86 = arith.constant 0 : index
      %c0_87 = arith.constant 0 : index
      %95 = tpu.strided_load %arg11[%c0_85, %c0_86, %c0_87] {strides = array<i32: 1, 2, 1>} : memref<4x32x32xf32, #tpu.memory_space<vmem>>, vector<4x16x32xf32>
      %c0_88 = arith.constant 0 : index
      %c1_89 = arith.constant 1 : index
      %c0_90 = arith.constant 0 : index
      %96 = tpu.strided_load %arg11[%c0_88, %c1_89, %c0_90] {strides = array<i32: 1, 2, 1>} : memref<4x32x32xf32, #tpu.memory_space<vmem>>, vector<4x16x32xf32>
      %97 = arith.maximumf %95, %96 : vector<4x16x32xf32>
      %c13 = arith.constant 13 : index
      %c8_91 = arith.constant 8 : index
      %c0_92 = arith.constant 0 : index
      %98 = vector.load %arg9[%c13, %c8_91, %c0_92] : memref<18x25x32xf32, #tpu.memory_space<vmem>>, vector<4x16x32xf32>
      tpu.vector_store %arg9[%c13, %c8_91, %c0_92], %97 {strides = array<i32>} : memref<18x25x32xf32, #tpu.memory_space<vmem>>, vector<4x16x32xf32>,
      %cst_93 = arith.constant 0.000000e+00 : f32
      %99 = vector.broadcast %cst_93 : f32 to vector<128x64xf32>
      %c0_94 = arith.constant 0 : index
      %c7_95 = arith.constant 7 : index
      %c0_96 = arith.constant 0 : index
      %100 = vector.load %arg9[%c0_94, %c7_95, %c0_96] : memref<18x25x32xf32, #tpu.memory_space<vmem>>, vector<8x16x32xf32>
      %101 = vector.shape_cast %100 : vector<8x16x32xf32> to vector<128x32xf32>
      %102 = arith.truncf %101 : vector<128x32xf32> to vector<128x32xbf16>
      %c0_97 = arith.constant 0 : index
      %c0_98 = arith.constant 0 : index
      %103 = vector.load %arg4[%c0_97, %c0_98] : memref<288x64xbf16, #tpu.memory_space<vmem>>, vector<32x64xbf16>
      %cst_99 = arith.constant dense<0.000000e+00> : vector<128x64xf32>
      %104 = tpu.matmul %102, %103, %cst_99 {dimension_numbers = #tpu.dot_dimension_numbers<[1], [0], [0], [1], [0, 0, 1, 1], [], []>} : vector<128x32xbf16>, vector<32x64xbf16>, vector<128x64xf32> -> vector<128x64xf32>
      %105 = arith.addf %99, %104 : vector<128x64xf32>
      %c0_100 = arith.constant 0 : index
      %c8_101 = arith.constant 8 : index
      %c0_102 = arith.constant 0 : index
      %106 = vector.load %arg9[%c0_100, %c8_101, %c0_102] : memref<18x25x32xf32, #tpu.memory_space<vmem>>, vector<8x16x32xf32>
      %107 = vector.shape_cast %106 : vector<8x16x32xf32> to vector<128x32xf32>
      %108 = arith.truncf %107 : vector<128x32xf32> to vector<128x32xbf16>
      %c32 = arith.constant 32 : index
      %c0_103 = arith.constant 0 : index
      %109 = vector.load %arg4[%c32, %c0_103] : memref<288x64xbf16, #tpu.memory_space<vmem>>, vector<32x64xbf16>
      %cst_104 = arith.constant dense<0.000000e+00> : vector<128x64xf32>
      %110 = tpu.matmul %108, %109, %cst_104 {dimension_numbers = #tpu.dot_dimension_numbers<[1], [0], [0], [1], [0, 0, 1, 1], [], []>} : vector<128x32xbf16>, vector<32x64xbf16>, vector<128x64xf32> -> vector<128x64xf32>
      %111 = arith.addf %105, %110 : vector<128x64xf32>
      %c0_105 = arith.constant 0 : index
      %c9_106 = arith.constant 9 : index
      %c0_107 = arith.constant 0 : index
      %112 = vector.load %arg9[%c0_105, %c9_106, %c0_107] : memref<18x25x32xf32, #tpu.memory_space<vmem>>, vector<8x16x32xf32>
      %113 = vector.shape_cast %112 : vector<8x16x32xf32> to vector<128x32xf32>
      %114 = arith.truncf %113 : vector<128x32xf32> to vector<128x32xbf16>
      %c64 = arith.constant 64 : index
      %c0_108 = arith.constant 0 : index
      %115 = vector.load %arg4[%c64, %c0_108] : memref<288x64xbf16, #tpu.memory_space<vmem>>, vector<32x64xbf16>
      %cst_109 = arith.constant dense<0.000000e+00> : vector<128x64xf32>
      %116 = tpu.matmul %114, %115, %cst_109 {dimension_numbers = #tpu.dot_dimension_numbers<[1], [0], [0], [1], [0, 0, 1, 1], [], []>} : vector<128x32xbf16>, vector<32x64xbf16>, vector<128x64xf32> -> vector<128x64xf32>
      %117 = arith.addf %111, %116 : vector<128x64xf32>
      %c1_110 = arith.constant 1 : index
      %c7_111 = arith.constant 7 : index
      %c0_112 = arith.constant 0 : index
      %118 = vector.load %arg9[%c1_110, %c7_111, %c0_112] : memref<18x25x32xf32, #tpu.memory_space<vmem>>, vector<8x16x32xf32>
      %119 = vector.shape_cast %118 : vector<8x16x32xf32> to vector<128x32xf32>
      %120 = arith.truncf %119 : vector<128x32xf32> to vector<128x32xbf16>
      %c96 = arith.constant 96 : index
      %c0_113 = arith.constant 0 : index
      %121 = vector.load %arg4[%c96, %c0_113] : memref<288x64xbf16, #tpu.memory_space<vmem>>, vector<32x64xbf16>
      %cst_114 = arith.constant dense<0.000000e+00> : vector<128x64xf32>
      %122 = tpu.matmul %120, %121, %cst_114 {dimension_numbers = #tpu.dot_dimension_numbers<[1], [0], [0], [1], [0, 0, 1, 1], [], []>} : vector<128x32xbf16>, vector<32x64xbf16>, vector<128x64xf32> -> vector<128x64xf32>
      %123 = arith.addf %117, %122 : vector<128x64xf32>
      %c1_115 = arith.constant 1 : index
      %c8_116 = arith.constant 8 : index
      %c0_117 = arith.constant 0 : index
      %124 = vector.load %arg9[%c1_115, %c8_116, %c0_117] : memref<18x25x32xf32, #tpu.memory_space<vmem>>, vector<8x16x32xf32>
      %125 = vector.shape_cast %124 : vector<8x16x32xf32> to vector<128x32xf32>
      %126 = arith.truncf %125 : vector<128x32xf32> to vector<128x32xbf16>
      %c128 = arith.constant 128 : index
      %c0_118 = arith.constant 0 : index
      %127 = vector.load %arg4[%c128, %c0_118] : memref<288x64xbf16, #tpu.memory_space<vmem>>, vector<32x64xbf16>
      %cst_119 = arith.constant dense<0.000000e+00> : vector<128x64xf32>
      %128 = tpu.matmul %126, %127, %cst_119 {dimension_numbers = #tpu.dot_dimension_numbers<[1], [0], [0], [1], [0, 0, 1, 1], [], []>} : vector<128x32xbf16>, vector<32x64xbf16>, vector<128x64xf32> -> vector<128x64xf32>
      %129 = arith.addf %123, %128 : vector<128x64xf32>
      %c1_120 = arith.constant 1 : index
      %c9_121 = arith.constant 9 : index
      %c0_122 = arith.constant 0 : index
      %130 = vector.load %arg9[%c1_120, %c9_121, %c0_122] : memref<18x25x32xf32, #tpu.memory_space<vmem>>, vector<8x16x32xf32>
      %131 = vector.shape_cast %130 : vector<8x16x32xf32> to vector<128x32xf32>
      %132 = arith.truncf %131 : vector<128x32xf32> to vector<128x32xbf16>
      %c160 = arith.constant 160 : index
      %c0_123 = arith.constant 0 : index
      %133 = vector.load %arg4[%c160, %c0_123] : memref<288x64xbf16, #tpu.memory_space<vmem>>, vector<32x64xbf16>
      %cst_124 = arith.constant dense<0.000000e+00> : vector<128x64xf32>
      %134 = tpu.matmul %132, %133, %cst_124 {dimension_numbers = #tpu.dot_dimension_numbers<[1], [0], [0], [1], [0, 0, 1, 1], [], []>} : vector<128x32xbf16>, vector<32x64xbf16>, vector<128x64xf32> -> vector<128x64xf32>
      %135 = arith.addf %129, %134 : vector<128x64xf32>
      %c2 = arith.constant 2 : index
      %c7_125 = arith.constant 7 : index
      %c0_126 = arith.constant 0 : index
      %136 = vector.load %arg9[%c2, %c7_125, %c0_126] : memref<18x25x32xf32, #tpu.memory_space<vmem>>, vector<8x16x32xf32>
      %137 = vector.shape_cast %136 : vector<8x16x32xf32> to vector<128x32xf32>
      %138 = arith.truncf %137 : vector<128x32xf32> to vector<128x32xbf16>
      %c192 = arith.constant 192 : index
      %c0_127 = arith.constant 0 : index
      %139 = vector.load %arg4[%c192, %c0_127] : memref<288x64xbf16, #tpu.memory_space<vmem>>, vector<32x64xbf16>
      %cst_128 = arith.constant dense<0.000000e+00> : vector<128x64xf32>
      %140 = tpu.matmul %138, %139, %cst_128 {dimension_numbers = #tpu.dot_dimension_numbers<[1], [0], [0], [1], [0, 0, 1, 1], [], []>} : vector<128x32xbf16>, vector<32x64xbf16>, vector<128x64xf32> -> vector<128x64xf32>
      %141 = arith.addf %135, %140 : vector<128x64xf32>
      %c2_129 = arith.constant 2 : index
      %c8_130 = arith.constant 8 : index
      %c0_131 = arith.constant 0 : index
      %142 = vector.load %arg9[%c2_129, %c8_130, %c0_131] : memref<18x25x32xf32, #tpu.memory_space<vmem>>, vector<8x16x32xf32>
      %143 = vector.shape_cast %142 : vector<8x16x32xf32> to vector<128x32xf32>
      %144 = arith.truncf %143 : vector<128x32xf32> to vector<128x32xbf16>
      %c224 = arith.constant 224 : index
      %c0_132 = arith.constant 0 : index
      %145 = vector.load %arg4[%c224, %c0_132] : memref<288x64xbf16, #tpu.memory_space<vmem>>, vector<32x64xbf16>
      %cst_133 = arith.constant dense<0.000000e+00> : vector<128x64xf32>
      %146 = tpu.matmul %144, %145, %cst_133 {dimension_numbers = #tpu.dot_dimension_numbers<[1], [0], [0], [1], [0, 0, 1, 1], [], []>} : vector<128x32xbf16>, vector<32x64xbf16>, vector<128x64xf32> -> vector<128x64xf32>
      %147 = arith.addf %141, %146 : vector<128x64xf32>
      %c2_134 = arith.constant 2 : index
      %c9_135 = arith.constant 9 : index
      %c0_136 = arith.constant 0 : index
      %148 = vector.load %arg9[%c2_134, %c9_135, %c0_136] : memref<18x25x32xf32, #tpu.memory_space<vmem>>, vector<8x16x32xf32>
      %149 = vector.shape_cast %148 : vector<8x16x32xf32> to vector<128x32xf32>
      %150 = arith.truncf %149 : vector<128x32xf32> to vector<128x32xbf16>
      %c256_137 = arith.constant 256 : index
      %c0_138 = arith.constant 0 : index
      %151 = vector.load %arg4[%c256_137, %c0_138] : memref<288x64xbf16, #tpu.memory_space<vmem>>, vector<32x64xbf16>
      %cst_139 = arith.constant dense<0.000000e+00> : vector<128x64xf32>
      %152 = tpu.matmul %150, %151, %cst_139 {dimension_numbers = #tpu.dot_dimension_numbers<[1], [0], [0], [1], [0, 0, 1, 1], [], []>} : vector<128x32xbf16>, vector<32x64xbf16>, vector<128x64xf32> -> vector<128x64xf32>
      %153 = arith.addf %147, %152 : vector<128x64xf32>
      %154 = vector.broadcast %18 : vector<1x64xf32> to vector<128x64xf32>
      %155 = arith.addf %153, %154 : vector<128x64xf32>
      %cst_140 = arith.constant 0.000000e+00 : f32
      %156 = vector.broadcast %cst_140 : f32 to vector<128x64xf32>
      %157 = arith.maximumf %155, %156 : vector<128x64xf32>
      %158 = vector.shape_cast %157 : vector<128x64xf32> to vector<4x2x16x64xf32>
      %159 = vector.extract_strided_slice %158 {offsets = [0, 0, 0, 0], sizes = [4, 1, 16, 64], strides = [1, 1, 1, 1]} : vector<4x2x16x64xf32> to vector<4x1x16x64xf32>
      %160 = vector.shape_cast %159 : vector<4x1x16x64xf32> to vector<4x16x64xf32>
      %161 = vector.extract_strided_slice %158 {offsets = [0, 1, 0, 0], sizes = [4, 1, 16, 64], strides = [1, 1, 1, 1]} : vector<4x2x16x64xf32> to vector<4x1x16x64xf32>
      %162 = vector.shape_cast %161 : vector<4x1x16x64xf32> to vector<4x16x64xf32>
      %163 = arith.maximumf %160, %162 : vector<4x16x64xf32>
      %c0_141 = arith.constant 0 : index
      %c0_142 = arith.constant 0 : index
      %c0_143 = arith.constant 0 : index
      %164 = vector.load %arg12[%c0_141, %c0_142, %c0_143] : memref<4x16x64xf32, #tpu.memory_space<vmem>>, vector<4x16x64xf32>
      tpu.vector_store %arg12[%c0_141, %c0_142, %c0_143], %163 {strides = array<i32>} : memref<4x16x64xf32, #tpu.memory_space<vmem>>, vector<4x16x64xf32>,
      %c0_144 = arith.constant 0 : index
      %c0_145 = arith.constant 0 : index
      %c0_146 = arith.constant 0 : index
      %165 = tpu.strided_load %arg12[%c0_144, %c0_145, %c0_146] {strides = array<i32: 1, 2, 1>} : memref<4x16x64xf32, #tpu.memory_space<vmem>>, vector<4x8x64xf32>
      %c0_147 = arith.constant 0 : index
      %c1_148 = arith.constant 1 : index
      %c0_149 = arith.constant 0 : index
      %166 = tpu.strided_load %arg12[%c0_147, %c1_148, %c0_149] {strides = array<i32: 1, 2, 1>} : memref<4x16x64xf32, #tpu.memory_space<vmem>>, vector<4x8x64xf32>
      %167 = arith.maximumf %165, %166 : vector<4x8x64xf32>
      %c1_150 = arith.constant 1 : index
      %c8_151 = arith.constant 8 : index
      %c0_152 = arith.constant 0 : index
      %168 = vector.load %arg10[%c1_150, %c8_151, %c0_152] : memref<10x17x64xf32, #tpu.memory_space<vmem>>, vector<4x8x64xf32>
      tpu.vector_store %arg10[%c1_150, %c8_151, %c0_152], %167 {strides = array<i32>} : memref<10x17x64xf32, #tpu.memory_space<vmem>>, vector<4x8x64xf32>,
      %cst_153 = arith.constant 0.000000e+00 : f32
      %169 = vector.broadcast %cst_153 : f32 to vector<128x64xf32>
      %c8_154 = arith.constant 8 : index
      %c7_155 = arith.constant 7 : index
      %c0_156 = arith.constant 0 : index
      %170 = vector.load %arg9[%c8_154, %c7_155, %c0_156] : memref<18x25x32xf32, #tpu.memory_space<vmem>>, vector<8x16x32xf32>
      %171 = vector.shape_cast %170 : vector<8x16x32xf32> to vector<128x32xf32>
      %172 = arith.truncf %171 : vector<128x32xf32> to vector<128x32xbf16>
      %c0_157 = arith.constant 0 : index
      %c0_158 = arith.constant 0 : index
      %173 = vector.load %arg4[%c0_157, %c0_158] : memref<288x64xbf16, #tpu.memory_space<vmem>>, vector<32x64xbf16>
      %cst_159 = arith.constant dense<0.000000e+00> : vector<128x64xf32>
      %174 = tpu.matmul %172, %173, %cst_159 {dimension_numbers = #tpu.dot_dimension_numbers<[1], [0], [0], [1], [0, 0, 1, 1], [], []>} : vector<128x32xbf16>, vector<32x64xbf16>, vector<128x64xf32> -> vector<128x64xf32>
      %175 = arith.addf %169, %174 : vector<128x64xf32>
      %c8_160 = arith.constant 8 : index
      %c8_161 = arith.constant 8 : index
      %c0_162 = arith.constant 0 : index
      %176 = vector.load %arg9[%c8_160, %c8_161, %c0_162] : memref<18x25x32xf32, #tpu.memory_space<vmem>>, vector<8x16x32xf32>
      %177 = vector.shape_cast %176 : vector<8x16x32xf32> to vector<128x32xf32>
      %178 = arith.truncf %177 : vector<128x32xf32> to vector<128x32xbf16>
      %c32_163 = arith.constant 32 : index
      %c0_164 = arith.constant 0 : index
      %179 = vector.load %arg4[%c32_163, %c0_164] : memref<288x64xbf16, #tpu.memory_space<vmem>>, vector<32x64xbf16>
      %cst_165 = arith.constant dense<0.000000e+00> : vector<128x64xf32>
      %180 = tpu.matmul %178, %179, %cst_165 {dimension_numbers = #tpu.dot_dimension_numbers<[1], [0], [0], [1], [0, 0, 1, 1], [], []>} : vector<128x32xbf16>, vector<32x64xbf16>, vector<128x64xf32> -> vector<128x64xf32>
      %181 = arith.addf %175, %180 : vector<128x64xf32>
      %c8_166 = arith.constant 8 : index
      %c9_167 = arith.constant 9 : index
      %c0_168 = arith.constant 0 : index
      %182 = vector.load %arg9[%c8_166, %c9_167, %c0_168] : memref<18x25x32xf32, #tpu.memory_space<vmem>>, vector<8x16x32xf32>
      %183 = vector.shape_cast %182 : vector<8x16x32xf32> to vector<128x32xf32>
      %184 = arith.truncf %183 : vector<128x32xf32> to vector<128x32xbf16>
      %c64_169 = arith.constant 64 : index
      %c0_170 = arith.constant 0 : index
      %185 = vector.load %arg4[%c64_169, %c0_170] : memref<288x64xbf16, #tpu.memory_space<vmem>>, vector<32x64xbf16>
      %cst_171 = arith.constant dense<0.000000e+00> : vector<128x64xf32>
      %186 = tpu.matmul %184, %185, %cst_171 {dimension_numbers = #tpu.dot_dimension_numbers<[1], [0], [0], [1], [0, 0, 1, 1], [], []>} : vector<128x32xbf16>, vector<32x64xbf16>, vector<128x64xf32> -> vector<128x64xf32>
      %187 = arith.addf %181, %186 : vector<128x64xf32>
      %c9_172 = arith.constant 9 : index
      %c7_173 = arith.constant 7 : index
      %c0_174 = arith.constant 0 : index
      %188 = vector.load %arg9[%c9_172, %c7_173, %c0_174] : memref<18x25x32xf32, #tpu.memory_space<vmem>>, vector<8x16x32xf32>
      %189 = vector.shape_cast %188 : vector<8x16x32xf32> to vector<128x32xf32>
      %190 = arith.truncf %189 : vector<128x32xf32> to vector<128x32xbf16>
      %c96_175 = arith.constant 96 : index
      %c0_176 = arith.constant 0 : index
      %191 = vector.load %arg4[%c96_175, %c0_176] : memref<288x64xbf16, #tpu.memory_space<vmem>>, vector<32x64xbf16>
      %cst_177 = arith.constant dense<0.000000e+00> : vector<128x64xf32>
      %192 = tpu.matmul %190, %191, %cst_177 {dimension_numbers = #tpu.dot_dimension_numbers<[1], [0], [0], [1], [0, 0, 1, 1], [], []>} : vector<128x32xbf16>, vector<32x64xbf16>, vector<128x64xf32> -> vector<128x64xf32>
      %193 = arith.addf %187, %192 : vector<128x64xf32>
      %c9_178 = arith.constant 9 : index
      %c8_179 = arith.constant 8 : index
      %c0_180 = arith.constant 0 : index
      %194 = vector.load %arg9[%c9_178, %c8_179, %c0_180] : memref<18x25x32xf32, #tpu.memory_space<vmem>>, vector<8x16x32xf32>
      %195 = vector.shape_cast %194 : vector<8x16x32xf32> to vector<128x32xf32>
      %196 = arith.truncf %195 : vector<128x32xf32> to vector<128x32xbf16>
      %c128_181 = arith.constant 128 : index
      %c0_182 = arith.constant 0 : index
      %197 = vector.load %arg4[%c128_181, %c0_182] : memref<288x64xbf16, #tpu.memory_space<vmem>>, vector<32x64xbf16>
      %cst_183 = arith.constant dense<0.000000e+00> : vector<128x64xf32>
      %198 = tpu.matmul %196, %197, %cst_183 {dimension_numbers = #tpu.dot_dimension_numbers<[1], [0], [0], [1], [0, 0, 1, 1], [], []>} : vector<128x32xbf16>, vector<32x64xbf16>, vector<128x64xf32> -> vector<128x64xf32>
      %199 = arith.addf %193, %198 : vector<128x64xf32>
      %c9_184 = arith.constant 9 : index
      %c9_185 = arith.constant 9 : index
      %c0_186 = arith.constant 0 : index
      %200 = vector.load %arg9[%c9_184, %c9_185, %c0_186] : memref<18x25x32xf32, #tpu.memory_space<vmem>>, vector<8x16x32xf32>
      %201 = vector.shape_cast %200 : vector<8x16x32xf32> to vector<128x32xf32>
      %202 = arith.truncf %201 : vector<128x32xf32> to vector<128x32xbf16>
      %c160_187 = arith.constant 160 : index
      %c0_188 = arith.constant 0 : index
      %203 = vector.load %arg4[%c160_187, %c0_188] : memref<288x64xbf16, #tpu.memory_space<vmem>>, vector<32x64xbf16>
      %cst_189 = arith.constant dense<0.000000e+00> : vector<128x64xf32>
      %204 = tpu.matmul %202, %203, %cst_189 {dimension_numbers = #tpu.dot_dimension_numbers<[1], [0], [0], [1], [0, 0, 1, 1], [], []>} : vector<128x32xbf16>, vector<32x64xbf16>, vector<128x64xf32> -> vector<128x64xf32>
      %205 = arith.addf %199, %204 : vector<128x64xf32>
      %c10 = arith.constant 10 : index
      %c7_190 = arith.constant 7 : index
      %c0_191 = arith.constant 0 : index
      %206 = vector.load %arg9[%c10, %c7_190, %c0_191] : memref<18x25x32xf32, #tpu.memory_space<vmem>>, vector<8x16x32xf32>
      %207 = vector.shape_cast %206 : vector<8x16x32xf32> to vector<128x32xf32>
      %208 = arith.truncf %207 : vector<128x32xf32> to vector<128x32xbf16>
      %c192_192 = arith.constant 192 : index
      %c0_193 = arith.constant 0 : index
      %209 = vector.load %arg4[%c192_192, %c0_193] : memref<288x64xbf16, #tpu.memory_space<vmem>>, vector<32x64xbf16>
      %cst_194 = arith.constant dense<0.000000e+00> : vector<128x64xf32>
      %210 = tpu.matmul %208, %209, %cst_194 {dimension_numbers = #tpu.dot_dimension_numbers<[1], [0], [0], [1], [0, 0, 1, 1], [], []>} : vector<128x32xbf16>, vector<32x64xbf16>, vector<128x64xf32> -> vector<128x64xf32>
      %211 = arith.addf %205, %210 : vector<128x64xf32>
      %c10_195 = arith.constant 10 : index
      %c8_196 = arith.constant 8 : index
      %c0_197 = arith.constant 0 : index
      %212 = vector.load %arg9[%c10_195, %c8_196, %c0_197] : memref<18x25x32xf32, #tpu.memory_space<vmem>>, vector<8x16x32xf32>
      %213 = vector.shape_cast %212 : vector<8x16x32xf32> to vector<128x32xf32>
      %214 = arith.truncf %213 : vector<128x32xf32> to vector<128x32xbf16>
      %c224_198 = arith.constant 224 : index
      %c0_199 = arith.constant 0 : index
      %215 = vector.load %arg4[%c224_198, %c0_199] : memref<288x64xbf16, #tpu.memory_space<vmem>>, vector<32x64xbf16>
      %cst_200 = arith.constant dense<0.000000e+00> : vector<128x64xf32>
      %216 = tpu.matmul %214, %215, %cst_200 {dimension_numbers = #tpu.dot_dimension_numbers<[1], [0], [0], [1], [0, 0, 1, 1], [], []>} : vector<128x32xbf16>, vector<32x64xbf16>, vector<128x64xf32> -> vector<128x64xf32>
      %217 = arith.addf %211, %216 : vector<128x64xf32>
      %c10_201 = arith.constant 10 : index
      %c9_202 = arith.constant 9 : index
      %c0_203 = arith.constant 0 : index
      %218 = vector.load %arg9[%c10_201, %c9_202, %c0_203] : memref<18x25x32xf32, #tpu.memory_space<vmem>>, vector<8x16x32xf32>
      %219 = vector.shape_cast %218 : vector<8x16x32xf32> to vector<128x32xf32>
      %220 = arith.truncf %219 : vector<128x32xf32> to vector<128x32xbf16>
      %c256_204 = arith.constant 256 : index
      %c0_205 = arith.constant 0 : index
      %221 = vector.load %arg4[%c256_204, %c0_205] : memref<288x64xbf16, #tpu.memory_space<vmem>>, vector<32x64xbf16>
      %cst_206 = arith.constant dense<0.000000e+00> : vector<128x64xf32>
      %222 = tpu.matmul %220, %221, %cst_206 {dimension_numbers = #tpu.dot_dimension_numbers<[1], [0], [0], [1], [0, 0, 1, 1], [], []>} : vector<128x32xbf16>, vector<32x64xbf16>, vector<128x64xf32> -> vector<128x64xf32>
      %223 = arith.addf %217, %222 : vector<128x64xf32>
      %224 = vector.broadcast %18 : vector<1x64xf32> to vector<128x64xf32>
      %225 = arith.addf %223, %224 : vector<128x64xf32>
      %cst_207 = arith.constant 0.000000e+00 : f32
      %226 = vector.broadcast %cst_207 : f32 to vector<128x64xf32>
      %227 = arith.maximumf %225, %226 : vector<128x64xf32>
      %228 = vector.shape_cast %227 : vector<128x64xf32> to vector<4x2x16x64xf32>
      %229 = vector.extract_strided_slice %228 {offsets = [0, 0, 0, 0], sizes = [4, 1, 16, 64], strides = [1, 1, 1, 1]} : vector<4x2x16x64xf32> to vector<4x1x16x64xf32>
      %230 = vector.shape_cast %229 : vector<4x1x16x64xf32> to vector<4x16x64xf32>
      %231 = vector.extract_strided_slice %228 {offsets = [0, 1, 0, 0], sizes = [4, 1, 16, 64], strides = [1, 1, 1, 1]} : vector<4x2x16x64xf32> to vector<4x1x16x64xf32>
      %232 = vector.shape_cast %231 : vector<4x1x16x64xf32> to vector<4x16x64xf32>
      %233 = arith.maximumf %230, %232 : vector<4x16x64xf32>
      %c0_208 = arith.constant 0 : index
      %c0_209 = arith.constant 0 : index
      %c0_210 = arith.constant 0 : index
      %234 = vector.load %arg12[%c0_208, %c0_209, %c0_210] : memref<4x16x64xf32, #tpu.memory_space<vmem>>, vector<4x16x64xf32>
      tpu.vector_store %arg12[%c0_208, %c0_209, %c0_210], %233 {strides = array<i32>} : memref<4x16x64xf32, #tpu.memory_space<vmem>>, vector<4x16x64xf32>,
      %c0_211 = arith.constant 0 : index
      %c0_212 = arith.constant 0 : index
      %c0_213 = arith.constant 0 : index
      %235 = tpu.strided_load %arg12[%c0_211, %c0_212, %c0_213] {strides = array<i32: 1, 2, 1>} : memref<4x16x64xf32, #tpu.memory_space<vmem>>, vector<4x8x64xf32>
      %c0_214 = arith.constant 0 : index
      %c1_215 = arith.constant 1 : index
      %c0_216 = arith.constant 0 : index
      %236 = tpu.strided_load %arg12[%c0_214, %c1_215, %c0_216] {strides = array<i32: 1, 2, 1>} : memref<4x16x64xf32, #tpu.memory_space<vmem>>, vector<4x8x64xf32>
      %237 = arith.maximumf %235, %236 : vector<4x8x64xf32>
      %c5_217 = arith.constant 5 : index
      %c8_218 = arith.constant 8 : index
      %c0_219 = arith.constant 0 : index
      %238 = vector.load %arg10[%c5_217, %c8_218, %c0_219] : memref<10x17x64xf32, #tpu.memory_space<vmem>>, vector<4x8x64xf32>
      tpu.vector_store %arg10[%c5_217, %c8_218, %c0_219], %237 {strides = array<i32>} : memref<10x17x64xf32, #tpu.memory_space<vmem>>, vector<4x8x64xf32>,
      %cst_220 = arith.constant 0.000000e+00 : f32
      %239 = vector.broadcast %cst_220 : f32 to vector<64x128xf32>
      %c0_221 = arith.constant 0 : index
      %c7_222 = arith.constant 7 : index
      %c0_223 = arith.constant 0 : index
      %240 = vector.load %arg10[%c0_221, %c7_222, %c0_223] : memref<10x17x64xf32, #tpu.memory_space<vmem>>, vector<8x8x64xf32>
      %241 = vector.shape_cast %240 : vector<8x8x64xf32> to vector<64x64xf32>
      %242 = arith.truncf %241 : vector<64x64xf32> to vector<64x64xbf16>
      %c0_224 = arith.constant 0 : index
      %c0_225 = arith.constant 0 : index
      %243 = vector.load %arg6[%c0_224, %c0_225] : memref<576x128xbf16, #tpu.memory_space<vmem>>, vector<64x128xbf16>
      %cst_226 = arith.constant dense<0.000000e+00> : vector<64x128xf32>
      %244 = tpu.matmul %242, %243, %cst_226 {dimension_numbers = #tpu.dot_dimension_numbers<[1], [0], [0], [1], [0, 0, 1, 1], [], []>} : vector<64x64xbf16>, vector<64x128xbf16>, vector<64x128xf32> -> vector<64x128xf32>
      %245 = arith.addf %239, %244 : vector<64x128xf32>
      %c0_227 = arith.constant 0 : index
      %c8_228 = arith.constant 8 : index
      %c0_229 = arith.constant 0 : index
      %246 = vector.load %arg10[%c0_227, %c8_228, %c0_229] : memref<10x17x64xf32, #tpu.memory_space<vmem>>, vector<8x8x64xf32>
      %247 = vector.shape_cast %246 : vector<8x8x64xf32> to vector<64x64xf32>
      %248 = arith.truncf %247 : vector<64x64xf32> to vector<64x64xbf16>
      %c64_230 = arith.constant 64 : index
      %c0_231 = arith.constant 0 : index
      %249 = vector.load %arg6[%c64_230, %c0_231] : memref<576x128xbf16, #tpu.memory_space<vmem>>, vector<64x128xbf16>
      %cst_232 = arith.constant dense<0.000000e+00> : vector<64x128xf32>
      %250 = tpu.matmul %248, %249, %cst_232 {dimension_numbers = #tpu.dot_dimension_numbers<[1], [0], [0], [1], [0, 0, 1, 1], [], []>} : vector<64x64xbf16>, vector<64x128xbf16>, vector<64x128xf32> -> vector<64x128xf32>
      %251 = arith.addf %245, %250 : vector<64x128xf32>
      %c0_233 = arith.constant 0 : index
      %c9_234 = arith.constant 9 : index
      %c0_235 = arith.constant 0 : index
      %252 = vector.load %arg10[%c0_233, %c9_234, %c0_235] : memref<10x17x64xf32, #tpu.memory_space<vmem>>, vector<8x8x64xf32>
      %253 = vector.shape_cast %252 : vector<8x8x64xf32> to vector<64x64xf32>
      %254 = arith.truncf %253 : vector<64x64xf32> to vector<64x64xbf16>
      %c128_236 = arith.constant 128 : index
      %c0_237 = arith.constant 0 : index
      %255 = vector.load %arg6[%c128_236, %c0_237] : memref<576x128xbf16, #tpu.memory_space<vmem>>, vector<64x128xbf16>
      %cst_238 = arith.constant dense<0.000000e+00> : vector<64x128xf32>
      %256 = tpu.matmul %254, %255, %cst_238 {dimension_numbers = #tpu.dot_dimension_numbers<[1], [0], [0], [1], [0, 0, 1, 1], [], []>} : vector<64x64xbf16>, vector<64x128xbf16>, vector<64x128xf32> -> vector<64x128xf32>
      %257 = arith.addf %251, %256 : vector<64x128xf32>
      %c1_239 = arith.constant 1 : index
      %c7_240 = arith.constant 7 : index
      %c0_241 = arith.constant 0 : index
      %258 = vector.load %arg10[%c1_239, %c7_240, %c0_241] : memref<10x17x64xf32, #tpu.memory_space<vmem>>, vector<8x8x64xf32>
      %259 = vector.shape_cast %258 : vector<8x8x64xf32> to vector<64x64xf32>
      %260 = arith.truncf %259 : vector<64x64xf32> to vector<64x64xbf16>
      %c192_242 = arith.constant 192 : index
      %c0_243 = arith.constant 0 : index
      %261 = vector.load %arg6[%c192_242, %c0_243] : memref<576x128xbf16, #tpu.memory_space<vmem>>, vector<64x128xbf16>
      %cst_244 = arith.constant dense<0.000000e+00> : vector<64x128xf32>
      %262 = tpu.matmul %260, %261, %cst_244 {dimension_numbers = #tpu.dot_dimension_numbers<[1], [0], [0], [1], [0, 0, 1, 1], [], []>} : vector<64x64xbf16>, vector<64x128xbf16>, vector<64x128xf32> -> vector<64x128xf32>
      %263 = arith.addf %257, %262 : vector<64x128xf32>
      %c1_245 = arith.constant 1 : index
      %c8_246 = arith.constant 8 : index
      %c0_247 = arith.constant 0 : index
      %264 = vector.load %arg10[%c1_245, %c8_246, %c0_247] : memref<10x17x64xf32, #tpu.memory_space<vmem>>, vector<8x8x64xf32>
      %265 = vector.shape_cast %264 : vector<8x8x64xf32> to vector<64x64xf32>
      %266 = arith.truncf %265 : vector<64x64xf32> to vector<64x64xbf16>
      %c256_248 = arith.constant 256 : index
      %c0_249 = arith.constant 0 : index
      %267 = vector.load %arg6[%c256_248, %c0_249] : memref<576x128xbf16, #tpu.memory_space<vmem>>, vector<64x128xbf16>
      %cst_250 = arith.constant dense<0.000000e+00> : vector<64x128xf32>
      %268 = tpu.matmul %266, %267, %cst_250 {dimension_numbers = #tpu.dot_dimension_numbers<[1], [0], [0], [1], [0, 0, 1, 1], [], []>} : vector<64x64xbf16>, vector<64x128xbf16>, vector<64x128xf32> -> vector<64x128xf32>
      %269 = arith.addf %263, %268 : vector<64x128xf32>
      %c1_251 = arith.constant 1 : index
      %c9_252 = arith.constant 9 : index
      %c0_253 = arith.constant 0 : index
      %270 = vector.load %arg10[%c1_251, %c9_252, %c0_253] : memref<10x17x64xf32, #tpu.memory_space<vmem>>, vector<8x8x64xf32>
      %271 = vector.shape_cast %270 : vector<8x8x64xf32> to vector<64x64xf32>
      %272 = arith.truncf %271 : vector<64x64xf32> to vector<64x64xbf16>
      %c320 = arith.constant 320 : index
      %c0_254 = arith.constant 0 : index
      %273 = vector.load %arg6[%c320, %c0_254] : memref<576x128xbf16, #tpu.memory_space<vmem>>, vector<64x128xbf16>
      %cst_255 = arith.constant dense<0.000000e+00> : vector<64x128xf32>
      %274 = tpu.matmul %272, %273, %cst_255 {dimension_numbers = #tpu.dot_dimension_numbers<[1], [0], [0], [1], [0, 0, 1, 1], [], []>} : vector<64x64xbf16>, vector<64x128xbf16>, vector<64x128xf32> -> vector<64x128xf32>
      %275 = arith.addf %269, %274 : vector<64x128xf32>
      %c2_256 = arith.constant 2 : index
      %c7_257 = arith.constant 7 : index
      %c0_258 = arith.constant 0 : index
      %276 = vector.load %arg10[%c2_256, %c7_257, %c0_258] : memref<10x17x64xf32, #tpu.memory_space<vmem>>, vector<8x8x64xf32>
      %277 = vector.shape_cast %276 : vector<8x8x64xf32> to vector<64x64xf32>
      %278 = arith.truncf %277 : vector<64x64xf32> to vector<64x64xbf16>
      %c384 = arith.constant 384 : index
      %c0_259 = arith.constant 0 : index
      %279 = vector.load %arg6[%c384, %c0_259] : memref<576x128xbf16, #tpu.memory_space<vmem>>, vector<64x128xbf16>
      %cst_260 = arith.constant dense<0.000000e+00> : vector<64x128xf32>
      %280 = tpu.matmul %278, %279, %cst_260 {dimension_numbers = #tpu.dot_dimension_numbers<[1], [0], [0], [1], [0, 0, 1, 1], [], []>} : vector<64x64xbf16>, vector<64x128xbf16>, vector<64x128xf32> -> vector<64x128xf32>
      %281 = arith.addf %275, %280 : vector<64x128xf32>
      %c2_261 = arith.constant 2 : index
      %c8_262 = arith.constant 8 : index
      %c0_263 = arith.constant 0 : index
      %282 = vector.load %arg10[%c2_261, %c8_262, %c0_263] : memref<10x17x64xf32, #tpu.memory_space<vmem>>, vector<8x8x64xf32>
      %283 = vector.shape_cast %282 : vector<8x8x64xf32> to vector<64x64xf32>
      %284 = arith.truncf %283 : vector<64x64xf32> to vector<64x64xbf16>
      %c448 = arith.constant 448 : index
      %c0_264 = arith.constant 0 : index
      %285 = vector.load %arg6[%c448, %c0_264] : memref<576x128xbf16, #tpu.memory_space<vmem>>, vector<64x128xbf16>
      %cst_265 = arith.constant dense<0.000000e+00> : vector<64x128xf32>
      %286 = tpu.matmul %284, %285, %cst_265 {dimension_numbers = #tpu.dot_dimension_numbers<[1], [0], [0], [1], [0, 0, 1, 1], [], []>} : vector<64x64xbf16>, vector<64x128xbf16>, vector<64x128xf32> -> vector<64x128xf32>
      %287 = arith.addf %281, %286 : vector<64x128xf32>
      %c2_266 = arith.constant 2 : index
      %c9_267 = arith.constant 9 : index
      %c0_268 = arith.constant 0 : index
      %288 = vector.load %arg10[%c2_266, %c9_267, %c0_268] : memref<10x17x64xf32, #tpu.memory_space<vmem>>, vector<8x8x64xf32>
      %289 = vector.shape_cast %288 : vector<8x8x64xf32> to vector<64x64xf32>
      %290 = arith.truncf %289 : vector<64x64xf32> to vector<64x64xbf16>
      %c512_269 = arith.constant 512 : index
      %c0_270 = arith.constant 0 : index
      %291 = vector.load %arg6[%c512_269, %c0_270] : memref<576x128xbf16, #tpu.memory_space<vmem>>, vector<64x128xbf16>
      %cst_271 = arith.constant dense<0.000000e+00> : vector<64x128xf32>
      %292 = tpu.matmul %290, %291, %cst_271 {dimension_numbers = #tpu.dot_dimension_numbers<[1], [0], [0], [1], [0, 0, 1, 1], [], []>} : vector<64x64xbf16>, vector<64x128xbf16>, vector<64x128xf32> -> vector<64x128xf32>
      %293 = arith.addf %287, %292 : vector<64x128xf32>
      %294 = vector.broadcast %19 : vector<1x128xf32> to vector<64x128xf32>
      %295 = arith.addf %293, %294 : vector<64x128xf32>
      %cst_272 = arith.constant 0.000000e+00 : f32
      %296 = vector.broadcast %cst_272 : f32 to vector<64x128xf32>
      %297 = arith.maximumf %295, %296 : vector<64x128xf32>
      %298 = vector.shape_cast %297 : vector<64x128xf32> to vector<4x2x8x128xf32>
      %299 = vector.extract_strided_slice %298 {offsets = [0, 0, 0, 0], sizes = [4, 1, 8, 128], strides = [1, 1, 1, 1]} : vector<4x2x8x128xf32> to vector<4x1x8x128xf32>
      %300 = vector.shape_cast %299 : vector<4x1x8x128xf32> to vector<4x8x128xf32>
      %301 = vector.extract_strided_slice %298 {offsets = [0, 1, 0, 0], sizes = [4, 1, 8, 128], strides = [1, 1, 1, 1]} : vector<4x2x8x128xf32> to vector<4x1x8x128xf32>
      %302 = vector.shape_cast %301 : vector<4x1x8x128xf32> to vector<4x8x128xf32>
      %303 = arith.addf %300, %302 : vector<4x8x128xf32>
      %c0_273 = arith.constant 0 : index
      %c0_274 = arith.constant 0 : index
      %c0_275 = arith.constant 0 : index
      %304 = vector.load %arg13[%c0_273, %c0_274, %c0_275] : memref<4x8x128xf32, #tpu.memory_space<vmem>>, vector<4x8x128xf32>
      tpu.vector_store %arg13[%c0_273, %c0_274, %c0_275], %303 {strides = array<i32>} : memref<4x8x128xf32, #tpu.memory_space<vmem>>, vector<4x8x128xf32>,
      %c0_276 = arith.constant 0 : index
      %c0_277 = arith.constant 0 : index
      %c0_278 = arith.constant 0 : index
      %305 = tpu.strided_load %arg13[%c0_276, %c0_277, %c0_278] {strides = array<i32: 1, 2, 1>} : memref<4x8x128xf32, #tpu.memory_space<vmem>>, vector<4x4x128xf32>
      %c0_279 = arith.constant 0 : index
      %c1_280 = arith.constant 1 : index
      %c0_281 = arith.constant 0 : index
      %306 = tpu.strided_load %arg13[%c0_279, %c1_280, %c0_281] {strides = array<i32: 1, 2, 1>} : memref<4x8x128xf32, #tpu.memory_space<vmem>>, vector<4x4x128xf32>
      %307 = arith.addf %305, %306 : vector<4x4x128xf32>
      %cst_282 = arith.constant 2.500000e-01 : f32
      %308 = vector.broadcast %cst_282 : f32 to vector<4x4x128xf32>
      %309 = arith.mulf %307, %308 : vector<4x4x128xf32>
      %310 = arith.truncf %309 : vector<4x4x128xf32> to vector<4x4x128xbf16>
      %311 = arith.index_cast %22 : i32 to index
      %c0_283 = arith.constant 0 : index
      %c0_284 = arith.constant 0 : index
      %c0_285 = arith.constant 0 : index
      %312 = vector.load %arg8[%311, %c0_283, %c0_284, %c0_285] : memref<8x4x4x128xbf16, #tpu.memory_space<vmem>>, vector<1x4x4x128xbf16>
      %313 = vector.shape_cast %312 : vector<1x4x4x128xbf16> to vector<4x4x128xbf16>
      %314 = vector.shape_cast %310 : vector<4x4x128xbf16> to vector<1x4x4x128xbf16>
      tpu.vector_store %arg8[%311, %c0_283, %c0_284, %c0_285], %314 {strides = array<i32>} : memref<8x4x4x128xbf16, #tpu.memory_space<vmem>>, vector<1x4x4x128xbf16>,
    }
    %c8_i32_32 = arith.constant 8 : i32
    return
  }
  func.func @transform_0(%arg0: i32) -> (i32, i32, i32) {
    %c0_i32 = arith.constant 0 : i32
    %c0_i32_0 = arith.constant 0 : i32
    %c0_i32_1 = arith.constant 0 : i32
    return %arg0, %c0_i32, %c0_i32_0 : i32, i32, i32
  }
  func.func @transform_1(%arg0: i32) -> (i32, i32) {
    %c0_i32 = arith.constant 0 : i32
    %c0_i32_0 = arith.constant 0 : i32
    %c0_i32_1 = arith.constant 0 : i32
    return %c0_i32, %c0_i32_0 : i32, i32
  }
  func.func @transform_2(%arg0: i32) -> (i32, i32) {
    %c0_i32 = arith.constant 0 : i32
    %c0_i32_0 = arith.constant 0 : i32
    %c0_i32_1 = arith.constant 0 : i32
    return %c0_i32, %c0_i32_0 : i32, i32
  }
  func.func @transform_3(%arg0: i32) -> (i32, i32) {
    %c0_i32 = arith.constant 0 : i32
    %c0_i32_0 = arith.constant 0 : i32
    %c0_i32_1 = arith.constant 0 : i32
    return %c0_i32, %c0_i32_0 : i32, i32
  }
  func.func @transform_4(%arg0: i32) -> (i32, i32) {
    %c0_i32 = arith.constant 0 : i32
    %c0_i32_0 = arith.constant 0 : i32
    %c0_i32_1 = arith.constant 0 : i32
    return %c0_i32, %c0_i32_0 : i32, i32
  }
  func.func @transform_5(%arg0: i32) -> (i32, i32) {
    %c0_i32 = arith.constant 0 : i32
    %c0_i32_0 = arith.constant 0 : i32
    %c0_i32_1 = arith.constant 0 : i32
    return %c0_i32, %c0_i32_0 : i32, i32
  }
  func.func @transform_6(%arg0: i32) -> (i32, i32) {
    %c0_i32 = arith.constant 0 : i32
    %c0_i32_0 = arith.constant 0 : i32
    %c0_i32_1 = arith.constant 0 : i32
    return %c0_i32, %c0_i32_0 : i32, i32
  }
  func.func @transform_7(%arg0: i32) -> (i32, i32, i32, i32) {
    %c0_i32 = arith.constant 0 : i32
    %c0_i32_0 = arith.constant 0 : i32
    %c0_i32_1 = arith.constant 0 : i32
    %c0_i32_2 = arith.constant 0 : i32
    return %arg0, %c0_i32, %c0_i32_0, %c0_i32_1 : i32, i32, i32, i32
  }
}

module attributes {stable_mosaic.version = 11 : i64} {
  func.func @_classifier_kernel(%arg0: i32, %arg1: memref<8x2048xbf16, #tpu.memory_space<vmem>>, %arg2: memref<2048x512xbf16, #tpu.memory_space<vmem>>, %arg3: memref<1x512xf32, #tpu.memory_space<vmem>>, %arg4: memref<512x128xbf16, #tpu.memory_space<vmem>>, %arg5: memref<1x128xf32, #tpu.memory_space<vmem>>, %arg6: memref<8x128xf32, #tpu.memory_space<vmem>>, %arg7: memref<8x512xbf16, #tpu.memory_space<vmem>>) attributes {dimension_semantics = [#tpu.dimension_semantics<parallel>], iteration_bounds = array<i64: 1>, scalar_prefetch = 0 : i64, scratch_operands = 1 : i64, tpu.core_type = #tpu.core_type<tc>, window_params = [{transform_indices = @transform_0, window_bounds = array<i64: 8, 2048>}, {pipeline_mode = #tpu.pipeline_mode<synchronous>, transform_indices = @transform_1, window_bounds = array<i64: 2048, 512>}, {pipeline_mode = #tpu.pipeline_mode<synchronous>, transform_indices = @transform_2, window_bounds = array<i64: 1, 512>}, {pipeline_mode = #tpu.pipeline_mode<synchronous>, transform_indices = @transform_3, window_bounds = array<i64: 512, 128>}, {pipeline_mode = #tpu.pipeline_mode<synchronous>, transform_indices = @transform_4, window_bounds = array<i64: 1, 128>}, {transform_indices = @transform_5, window_bounds = array<i64: 8, 128>}]} {
    %cst = arith.constant 0.000000e+00 : f32
    %0 = vector.broadcast %cst : f32 to vector<8x128xf32>
    %c0 = arith.constant 0 : index
    %c0_0 = arith.constant 0 : index
    %1 = vector.load %arg1[%c0, %c0_0] : memref<8x2048xbf16, #tpu.memory_space<vmem>>, vector<8x256xbf16>
    %c0_1 = arith.constant 0 : index
    %c0_2 = arith.constant 0 : index
    %2 = vector.load %arg2[%c0_1, %c0_2] : memref<2048x512xbf16, #tpu.memory_space<vmem>>, vector<256x128xbf16>
    %cst_3 = arith.constant dense<0.000000e+00> : vector<8x128xf32>
    %3 = tpu.matmul %1, %2, %cst_3 {dimension_numbers = #tpu.dot_dimension_numbers<[1], [0], [0], [1], [0, 0, 1, 1], [], []>} : vector<8x256xbf16>, vector<256x128xbf16>, vector<8x128xf32> -> vector<8x128xf32>
    %4 = arith.addf %0, %3 : vector<8x128xf32>
    %c0_4 = arith.constant 0 : index
    %c256 = arith.constant 256 : index
    %5 = vector.load %arg1[%c0_4, %c256] : memref<8x2048xbf16, #tpu.memory_space<vmem>>, vector<8x256xbf16>
    %c256_5 = arith.constant 256 : index
    %c0_6 = arith.constant 0 : index
    %6 = vector.load %arg2[%c256_5, %c0_6] : memref<2048x512xbf16, #tpu.memory_space<vmem>>, vector<256x128xbf16>
    %cst_7 = arith.constant dense<0.000000e+00> : vector<8x128xf32>
    %7 = tpu.matmul %5, %6, %cst_7 {dimension_numbers = #tpu.dot_dimension_numbers<[1], [0], [0], [1], [0, 0, 1, 1], [], []>} : vector<8x256xbf16>, vector<256x128xbf16>, vector<8x128xf32> -> vector<8x128xf32>
    %8 = arith.addf %4, %7 : vector<8x128xf32>
    %c0_8 = arith.constant 0 : index
    %c512 = arith.constant 512 : index
    %9 = vector.load %arg1[%c0_8, %c512] : memref<8x2048xbf16, #tpu.memory_space<vmem>>, vector<8x256xbf16>
    %c512_9 = arith.constant 512 : index
    %c0_10 = arith.constant 0 : index
    %10 = vector.load %arg2[%c512_9, %c0_10] : memref<2048x512xbf16, #tpu.memory_space<vmem>>, vector<256x128xbf16>
    %cst_11 = arith.constant dense<0.000000e+00> : vector<8x128xf32>
    %11 = tpu.matmul %9, %10, %cst_11 {dimension_numbers = #tpu.dot_dimension_numbers<[1], [0], [0], [1], [0, 0, 1, 1], [], []>} : vector<8x256xbf16>, vector<256x128xbf16>, vector<8x128xf32> -> vector<8x128xf32>
    %12 = arith.addf %8, %11 : vector<8x128xf32>
    %c0_12 = arith.constant 0 : index
    %c768 = arith.constant 768 : index
    %13 = vector.load %arg1[%c0_12, %c768] : memref<8x2048xbf16, #tpu.memory_space<vmem>>, vector<8x256xbf16>
    %c768_13 = arith.constant 768 : index
    %c0_14 = arith.constant 0 : index
    %14 = vector.load %arg2[%c768_13, %c0_14] : memref<2048x512xbf16, #tpu.memory_space<vmem>>, vector<256x128xbf16>
    %cst_15 = arith.constant dense<0.000000e+00> : vector<8x128xf32>
    %15 = tpu.matmul %13, %14, %cst_15 {dimension_numbers = #tpu.dot_dimension_numbers<[1], [0], [0], [1], [0, 0, 1, 1], [], []>} : vector<8x256xbf16>, vector<256x128xbf16>, vector<8x128xf32> -> vector<8x128xf32>
    %16 = arith.addf %12, %15 : vector<8x128xf32>
    %c0_16 = arith.constant 0 : index
    %c1024 = arith.constant 1024 : index
    %17 = vector.load %arg1[%c0_16, %c1024] : memref<8x2048xbf16, #tpu.memory_space<vmem>>, vector<8x256xbf16>
    %c1024_17 = arith.constant 1024 : index
    %c0_18 = arith.constant 0 : index
    %18 = vector.load %arg2[%c1024_17, %c0_18] : memref<2048x512xbf16, #tpu.memory_space<vmem>>, vector<256x128xbf16>
    %cst_19 = arith.constant dense<0.000000e+00> : vector<8x128xf32>
    %19 = tpu.matmul %17, %18, %cst_19 {dimension_numbers = #tpu.dot_dimension_numbers<[1], [0], [0], [1], [0, 0, 1, 1], [], []>} : vector<8x256xbf16>, vector<256x128xbf16>, vector<8x128xf32> -> vector<8x128xf32>
    %20 = arith.addf %16, %19 : vector<8x128xf32>
    %c0_20 = arith.constant 0 : index
    %c1280 = arith.constant 1280 : index
    %21 = vector.load %arg1[%c0_20, %c1280] : memref<8x2048xbf16, #tpu.memory_space<vmem>>, vector<8x256xbf16>
    %c1280_21 = arith.constant 1280 : index
    %c0_22 = arith.constant 0 : index
    %22 = vector.load %arg2[%c1280_21, %c0_22] : memref<2048x512xbf16, #tpu.memory_space<vmem>>, vector<256x128xbf16>
    %cst_23 = arith.constant dense<0.000000e+00> : vector<8x128xf32>
    %23 = tpu.matmul %21, %22, %cst_23 {dimension_numbers = #tpu.dot_dimension_numbers<[1], [0], [0], [1], [0, 0, 1, 1], [], []>} : vector<8x256xbf16>, vector<256x128xbf16>, vector<8x128xf32> -> vector<8x128xf32>
    %24 = arith.addf %20, %23 : vector<8x128xf32>
    %c0_24 = arith.constant 0 : index
    %c1536 = arith.constant 1536 : index
    %25 = vector.load %arg1[%c0_24, %c1536] : memref<8x2048xbf16, #tpu.memory_space<vmem>>, vector<8x256xbf16>
    %c1536_25 = arith.constant 1536 : index
    %c0_26 = arith.constant 0 : index
    %26 = vector.load %arg2[%c1536_25, %c0_26] : memref<2048x512xbf16, #tpu.memory_space<vmem>>, vector<256x128xbf16>
    %cst_27 = arith.constant dense<0.000000e+00> : vector<8x128xf32>
    %27 = tpu.matmul %25, %26, %cst_27 {dimension_numbers = #tpu.dot_dimension_numbers<[1], [0], [0], [1], [0, 0, 1, 1], [], []>} : vector<8x256xbf16>, vector<256x128xbf16>, vector<8x128xf32> -> vector<8x128xf32>
    %28 = arith.addf %24, %27 : vector<8x128xf32>
    %c0_28 = arith.constant 0 : index
    %c1792 = arith.constant 1792 : index
    %29 = vector.load %arg1[%c0_28, %c1792] : memref<8x2048xbf16, #tpu.memory_space<vmem>>, vector<8x256xbf16>
    %c1792_29 = arith.constant 1792 : index
    %c0_30 = arith.constant 0 : index
    %30 = vector.load %arg2[%c1792_29, %c0_30] : memref<2048x512xbf16, #tpu.memory_space<vmem>>, vector<256x128xbf16>
    %cst_31 = arith.constant dense<0.000000e+00> : vector<8x128xf32>
    %31 = tpu.matmul %29, %30, %cst_31 {dimension_numbers = #tpu.dot_dimension_numbers<[1], [0], [0], [1], [0, 0, 1, 1], [], []>} : vector<8x256xbf16>, vector<256x128xbf16>, vector<8x128xf32> -> vector<8x128xf32>
    %32 = arith.addf %28, %31 : vector<8x128xf32>
    %c0_32 = arith.constant 0 : index
    %c0_33 = arith.constant 0 : index
    %33 = vector.load %arg3[%c0_32, %c0_33] : memref<1x512xf32, #tpu.memory_space<vmem>>, vector<1x128xf32>
    %34 = vector.broadcast %33 : vector<1x128xf32> to vector<8x128xf32>
    %35 = arith.addf %32, %34 : vector<8x128xf32>
    %cst_34 = arith.constant 0.000000e+00 : f32
    %36 = vector.broadcast %cst_34 : f32 to vector<8x128xf32>
    %37 = arith.maximumf %35, %36 : vector<8x128xf32>
    %38 = arith.truncf %37 : vector<8x128xf32> to vector<8x128xbf16>
    %c0_35 = arith.constant 0 : index
    %c0_36 = arith.constant 0 : index
    %39 = vector.load %arg7[%c0_35, %c0_36] : memref<8x512xbf16, #tpu.memory_space<vmem>>, vector<8x128xbf16>
    tpu.vector_store %arg7[%c0_35, %c0_36], %38 {strides = array<i32>} : memref<8x512xbf16, #tpu.memory_space<vmem>>, vector<8x128xbf16>,
    %cst_37 = arith.constant 0.000000e+00 : f32
    %40 = vector.broadcast %cst_37 : f32 to vector<8x128xf32>
    %c0_38 = arith.constant 0 : index
    %c0_39 = arith.constant 0 : index
    %41 = vector.load %arg1[%c0_38, %c0_39] : memref<8x2048xbf16, #tpu.memory_space<vmem>>, vector<8x256xbf16>
    %c0_40 = arith.constant 0 : index
    %c128 = arith.constant 128 : index
    %42 = vector.load %arg2[%c0_40, %c128] : memref<2048x512xbf16, #tpu.memory_space<vmem>>, vector<256x128xbf16>
    %cst_41 = arith.constant dense<0.000000e+00> : vector<8x128xf32>
    %43 = tpu.matmul %41, %42, %cst_41 {dimension_numbers = #tpu.dot_dimension_numbers<[1], [0], [0], [1], [0, 0, 1, 1], [], []>} : vector<8x256xbf16>, vector<256x128xbf16>, vector<8x128xf32> -> vector<8x128xf32>
    %44 = arith.addf %40, %43 : vector<8x128xf32>
    %c0_42 = arith.constant 0 : index
    %c256_43 = arith.constant 256 : index
    %45 = vector.load %arg1[%c0_42, %c256_43] : memref<8x2048xbf16, #tpu.memory_space<vmem>>, vector<8x256xbf16>
    %c256_44 = arith.constant 256 : index
    %c128_45 = arith.constant 128 : index
    %46 = vector.load %arg2[%c256_44, %c128_45] : memref<2048x512xbf16, #tpu.memory_space<vmem>>, vector<256x128xbf16>
    %cst_46 = arith.constant dense<0.000000e+00> : vector<8x128xf32>
    %47 = tpu.matmul %45, %46, %cst_46 {dimension_numbers = #tpu.dot_dimension_numbers<[1], [0], [0], [1], [0, 0, 1, 1], [], []>} : vector<8x256xbf16>, vector<256x128xbf16>, vector<8x128xf32> -> vector<8x128xf32>
    %48 = arith.addf %44, %47 : vector<8x128xf32>
    %c0_47 = arith.constant 0 : index
    %c512_48 = arith.constant 512 : index
    %49 = vector.load %arg1[%c0_47, %c512_48] : memref<8x2048xbf16, #tpu.memory_space<vmem>>, vector<8x256xbf16>
    %c512_49 = arith.constant 512 : index
    %c128_50 = arith.constant 128 : index
    %50 = vector.load %arg2[%c512_49, %c128_50] : memref<2048x512xbf16, #tpu.memory_space<vmem>>, vector<256x128xbf16>
    %cst_51 = arith.constant dense<0.000000e+00> : vector<8x128xf32>
    %51 = tpu.matmul %49, %50, %cst_51 {dimension_numbers = #tpu.dot_dimension_numbers<[1], [0], [0], [1], [0, 0, 1, 1], [], []>} : vector<8x256xbf16>, vector<256x128xbf16>, vector<8x128xf32> -> vector<8x128xf32>
    %52 = arith.addf %48, %51 : vector<8x128xf32>
    %c0_52 = arith.constant 0 : index
    %c768_53 = arith.constant 768 : index
    %53 = vector.load %arg1[%c0_52, %c768_53] : memref<8x2048xbf16, #tpu.memory_space<vmem>>, vector<8x256xbf16>
    %c768_54 = arith.constant 768 : index
    %c128_55 = arith.constant 128 : index
    %54 = vector.load %arg2[%c768_54, %c128_55] : memref<2048x512xbf16, #tpu.memory_space<vmem>>, vector<256x128xbf16>
    %cst_56 = arith.constant dense<0.000000e+00> : vector<8x128xf32>
    %55 = tpu.matmul %53, %54, %cst_56 {dimension_numbers = #tpu.dot_dimension_numbers<[1], [0], [0], [1], [0, 0, 1, 1], [], []>} : vector<8x256xbf16>, vector<256x128xbf16>, vector<8x128xf32> -> vector<8x128xf32>
    %56 = arith.addf %52, %55 : vector<8x128xf32>
    %c0_57 = arith.constant 0 : index
    %c1024_58 = arith.constant 1024 : index
    %57 = vector.load %arg1[%c0_57, %c1024_58] : memref<8x2048xbf16, #tpu.memory_space<vmem>>, vector<8x256xbf16>
    %c1024_59 = arith.constant 1024 : index
    %c128_60 = arith.constant 128 : index
    %58 = vector.load %arg2[%c1024_59, %c128_60] : memref<2048x512xbf16, #tpu.memory_space<vmem>>, vector<256x128xbf16>
    %cst_61 = arith.constant dense<0.000000e+00> : vector<8x128xf32>
    %59 = tpu.matmul %57, %58, %cst_61 {dimension_numbers = #tpu.dot_dimension_numbers<[1], [0], [0], [1], [0, 0, 1, 1], [], []>} : vector<8x256xbf16>, vector<256x128xbf16>, vector<8x128xf32> -> vector<8x128xf32>
    %60 = arith.addf %56, %59 : vector<8x128xf32>
    %c0_62 = arith.constant 0 : index
    %c1280_63 = arith.constant 1280 : index
    %61 = vector.load %arg1[%c0_62, %c1280_63] : memref<8x2048xbf16, #tpu.memory_space<vmem>>, vector<8x256xbf16>
    %c1280_64 = arith.constant 1280 : index
    %c128_65 = arith.constant 128 : index
    %62 = vector.load %arg2[%c1280_64, %c128_65] : memref<2048x512xbf16, #tpu.memory_space<vmem>>, vector<256x128xbf16>
    %cst_66 = arith.constant dense<0.000000e+00> : vector<8x128xf32>
    %63 = tpu.matmul %61, %62, %cst_66 {dimension_numbers = #tpu.dot_dimension_numbers<[1], [0], [0], [1], [0, 0, 1, 1], [], []>} : vector<8x256xbf16>, vector<256x128xbf16>, vector<8x128xf32> -> vector<8x128xf32>
    %64 = arith.addf %60, %63 : vector<8x128xf32>
    %c0_67 = arith.constant 0 : index
    %c1536_68 = arith.constant 1536 : index
    %65 = vector.load %arg1[%c0_67, %c1536_68] : memref<8x2048xbf16, #tpu.memory_space<vmem>>, vector<8x256xbf16>
    %c1536_69 = arith.constant 1536 : index
    %c128_70 = arith.constant 128 : index
    %66 = vector.load %arg2[%c1536_69, %c128_70] : memref<2048x512xbf16, #tpu.memory_space<vmem>>, vector<256x128xbf16>
    %cst_71 = arith.constant dense<0.000000e+00> : vector<8x128xf32>
    %67 = tpu.matmul %65, %66, %cst_71 {dimension_numbers = #tpu.dot_dimension_numbers<[1], [0], [0], [1], [0, 0, 1, 1], [], []>} : vector<8x256xbf16>, vector<256x128xbf16>, vector<8x128xf32> -> vector<8x128xf32>
    %68 = arith.addf %64, %67 : vector<8x128xf32>
    %c0_72 = arith.constant 0 : index
    %c1792_73 = arith.constant 1792 : index
    %69 = vector.load %arg1[%c0_72, %c1792_73] : memref<8x2048xbf16, #tpu.memory_space<vmem>>, vector<8x256xbf16>
    %c1792_74 = arith.constant 1792 : index
    %c128_75 = arith.constant 128 : index
    %70 = vector.load %arg2[%c1792_74, %c128_75] : memref<2048x512xbf16, #tpu.memory_space<vmem>>, vector<256x128xbf16>
    %cst_76 = arith.constant dense<0.000000e+00> : vector<8x128xf32>
    %71 = tpu.matmul %69, %70, %cst_76 {dimension_numbers = #tpu.dot_dimension_numbers<[1], [0], [0], [1], [0, 0, 1, 1], [], []>} : vector<8x256xbf16>, vector<256x128xbf16>, vector<8x128xf32> -> vector<8x128xf32>
    %72 = arith.addf %68, %71 : vector<8x128xf32>
    %c0_77 = arith.constant 0 : index
    %c128_78 = arith.constant 128 : index
    %73 = vector.load %arg3[%c0_77, %c128_78] : memref<1x512xf32, #tpu.memory_space<vmem>>, vector<1x128xf32>
    %74 = vector.broadcast %73 : vector<1x128xf32> to vector<8x128xf32>
    %75 = arith.addf %72, %74 : vector<8x128xf32>
    %cst_79 = arith.constant 0.000000e+00 : f32
    %76 = vector.broadcast %cst_79 : f32 to vector<8x128xf32>
    %77 = arith.maximumf %75, %76 : vector<8x128xf32>
    %78 = arith.truncf %77 : vector<8x128xf32> to vector<8x128xbf16>
    %c0_80 = arith.constant 0 : index
    %c128_81 = arith.constant 128 : index
    %79 = vector.load %arg7[%c0_80, %c128_81] : memref<8x512xbf16, #tpu.memory_space<vmem>>, vector<8x128xbf16>
    tpu.vector_store %arg7[%c0_80, %c128_81], %78 {strides = array<i32>} : memref<8x512xbf16, #tpu.memory_space<vmem>>, vector<8x128xbf16>,
    %cst_82 = arith.constant 0.000000e+00 : f32
    %80 = vector.broadcast %cst_82 : f32 to vector<8x128xf32>
    %c0_83 = arith.constant 0 : index
    %c0_84 = arith.constant 0 : index
    %81 = vector.load %arg1[%c0_83, %c0_84] : memref<8x2048xbf16, #tpu.memory_space<vmem>>, vector<8x256xbf16>
    %c0_85 = arith.constant 0 : index
    %c256_86 = arith.constant 256 : index
    %82 = vector.load %arg2[%c0_85, %c256_86] : memref<2048x512xbf16, #tpu.memory_space<vmem>>, vector<256x128xbf16>
    %cst_87 = arith.constant dense<0.000000e+00> : vector<8x128xf32>
    %83 = tpu.matmul %81, %82, %cst_87 {dimension_numbers = #tpu.dot_dimension_numbers<[1], [0], [0], [1], [0, 0, 1, 1], [], []>} : vector<8x256xbf16>, vector<256x128xbf16>, vector<8x128xf32> -> vector<8x128xf32>
    %84 = arith.addf %80, %83 : vector<8x128xf32>
    %c0_88 = arith.constant 0 : index
    %c256_89 = arith.constant 256 : index
    %85 = vector.load %arg1[%c0_88, %c256_89] : memref<8x2048xbf16, #tpu.memory_space<vmem>>, vector<8x256xbf16>
    %c256_90 = arith.constant 256 : index
    %c256_91 = arith.constant 256 : index
    %86 = vector.load %arg2[%c256_90, %c256_91] : memref<2048x512xbf16, #tpu.memory_space<vmem>>, vector<256x128xbf16>
    %cst_92 = arith.constant dense<0.000000e+00> : vector<8x128xf32>
    %87 = tpu.matmul %85, %86, %cst_92 {dimension_numbers = #tpu.dot_dimension_numbers<[1], [0], [0], [1], [0, 0, 1, 1], [], []>} : vector<8x256xbf16>, vector<256x128xbf16>, vector<8x128xf32> -> vector<8x128xf32>
    %88 = arith.addf %84, %87 : vector<8x128xf32>
    %c0_93 = arith.constant 0 : index
    %c512_94 = arith.constant 512 : index
    %89 = vector.load %arg1[%c0_93, %c512_94] : memref<8x2048xbf16, #tpu.memory_space<vmem>>, vector<8x256xbf16>
    %c512_95 = arith.constant 512 : index
    %c256_96 = arith.constant 256 : index
    %90 = vector.load %arg2[%c512_95, %c256_96] : memref<2048x512xbf16, #tpu.memory_space<vmem>>, vector<256x128xbf16>
    %cst_97 = arith.constant dense<0.000000e+00> : vector<8x128xf32>
    %91 = tpu.matmul %89, %90, %cst_97 {dimension_numbers = #tpu.dot_dimension_numbers<[1], [0], [0], [1], [0, 0, 1, 1], [], []>} : vector<8x256xbf16>, vector<256x128xbf16>, vector<8x128xf32> -> vector<8x128xf32>
    %92 = arith.addf %88, %91 : vector<8x128xf32>
    %c0_98 = arith.constant 0 : index
    %c768_99 = arith.constant 768 : index
    %93 = vector.load %arg1[%c0_98, %c768_99] : memref<8x2048xbf16, #tpu.memory_space<vmem>>, vector<8x256xbf16>
    %c768_100 = arith.constant 768 : index
    %c256_101 = arith.constant 256 : index
    %94 = vector.load %arg2[%c768_100, %c256_101] : memref<2048x512xbf16, #tpu.memory_space<vmem>>, vector<256x128xbf16>
    %cst_102 = arith.constant dense<0.000000e+00> : vector<8x128xf32>
    %95 = tpu.matmul %93, %94, %cst_102 {dimension_numbers = #tpu.dot_dimension_numbers<[1], [0], [0], [1], [0, 0, 1, 1], [], []>} : vector<8x256xbf16>, vector<256x128xbf16>, vector<8x128xf32> -> vector<8x128xf32>
    %96 = arith.addf %92, %95 : vector<8x128xf32>
    %c0_103 = arith.constant 0 : index
    %c1024_104 = arith.constant 1024 : index
    %97 = vector.load %arg1[%c0_103, %c1024_104] : memref<8x2048xbf16, #tpu.memory_space<vmem>>, vector<8x256xbf16>
    %c1024_105 = arith.constant 1024 : index
    %c256_106 = arith.constant 256 : index
    %98 = vector.load %arg2[%c1024_105, %c256_106] : memref<2048x512xbf16, #tpu.memory_space<vmem>>, vector<256x128xbf16>
    %cst_107 = arith.constant dense<0.000000e+00> : vector<8x128xf32>
    %99 = tpu.matmul %97, %98, %cst_107 {dimension_numbers = #tpu.dot_dimension_numbers<[1], [0], [0], [1], [0, 0, 1, 1], [], []>} : vector<8x256xbf16>, vector<256x128xbf16>, vector<8x128xf32> -> vector<8x128xf32>
    %100 = arith.addf %96, %99 : vector<8x128xf32>
    %c0_108 = arith.constant 0 : index
    %c1280_109 = arith.constant 1280 : index
    %101 = vector.load %arg1[%c0_108, %c1280_109] : memref<8x2048xbf16, #tpu.memory_space<vmem>>, vector<8x256xbf16>
    %c1280_110 = arith.constant 1280 : index
    %c256_111 = arith.constant 256 : index
    %102 = vector.load %arg2[%c1280_110, %c256_111] : memref<2048x512xbf16, #tpu.memory_space<vmem>>, vector<256x128xbf16>
    %cst_112 = arith.constant dense<0.000000e+00> : vector<8x128xf32>
    %103 = tpu.matmul %101, %102, %cst_112 {dimension_numbers = #tpu.dot_dimension_numbers<[1], [0], [0], [1], [0, 0, 1, 1], [], []>} : vector<8x256xbf16>, vector<256x128xbf16>, vector<8x128xf32> -> vector<8x128xf32>
    %104 = arith.addf %100, %103 : vector<8x128xf32>
    %c0_113 = arith.constant 0 : index
    %c1536_114 = arith.constant 1536 : index
    %105 = vector.load %arg1[%c0_113, %c1536_114] : memref<8x2048xbf16, #tpu.memory_space<vmem>>, vector<8x256xbf16>
    %c1536_115 = arith.constant 1536 : index
    %c256_116 = arith.constant 256 : index
    %106 = vector.load %arg2[%c1536_115, %c256_116] : memref<2048x512xbf16, #tpu.memory_space<vmem>>, vector<256x128xbf16>
    %cst_117 = arith.constant dense<0.000000e+00> : vector<8x128xf32>
    %107 = tpu.matmul %105, %106, %cst_117 {dimension_numbers = #tpu.dot_dimension_numbers<[1], [0], [0], [1], [0, 0, 1, 1], [], []>} : vector<8x256xbf16>, vector<256x128xbf16>, vector<8x128xf32> -> vector<8x128xf32>
    %108 = arith.addf %104, %107 : vector<8x128xf32>
    %c0_118 = arith.constant 0 : index
    %c1792_119 = arith.constant 1792 : index
    %109 = vector.load %arg1[%c0_118, %c1792_119] : memref<8x2048xbf16, #tpu.memory_space<vmem>>, vector<8x256xbf16>
    %c1792_120 = arith.constant 1792 : index
    %c256_121 = arith.constant 256 : index
    %110 = vector.load %arg2[%c1792_120, %c256_121] : memref<2048x512xbf16, #tpu.memory_space<vmem>>, vector<256x128xbf16>
    %cst_122 = arith.constant dense<0.000000e+00> : vector<8x128xf32>
    %111 = tpu.matmul %109, %110, %cst_122 {dimension_numbers = #tpu.dot_dimension_numbers<[1], [0], [0], [1], [0, 0, 1, 1], [], []>} : vector<8x256xbf16>, vector<256x128xbf16>, vector<8x128xf32> -> vector<8x128xf32>
    %112 = arith.addf %108, %111 : vector<8x128xf32>
    %c0_123 = arith.constant 0 : index
    %c256_124 = arith.constant 256 : index
    %113 = vector.load %arg3[%c0_123, %c256_124] : memref<1x512xf32, #tpu.memory_space<vmem>>, vector<1x128xf32>
    %114 = vector.broadcast %113 : vector<1x128xf32> to vector<8x128xf32>
    %115 = arith.addf %112, %114 : vector<8x128xf32>
    %cst_125 = arith.constant 0.000000e+00 : f32
    %116 = vector.broadcast %cst_125 : f32 to vector<8x128xf32>
    %117 = arith.maximumf %115, %116 : vector<8x128xf32>
    %118 = arith.truncf %117 : vector<8x128xf32> to vector<8x128xbf16>
    %c0_126 = arith.constant 0 : index
    %c256_127 = arith.constant 256 : index
    %119 = vector.load %arg7[%c0_126, %c256_127] : memref<8x512xbf16, #tpu.memory_space<vmem>>, vector<8x128xbf16>
    tpu.vector_store %arg7[%c0_126, %c256_127], %118 {strides = array<i32>} : memref<8x512xbf16, #tpu.memory_space<vmem>>, vector<8x128xbf16>,
    %cst_128 = arith.constant 0.000000e+00 : f32
    %120 = vector.broadcast %cst_128 : f32 to vector<8x128xf32>
    %c0_129 = arith.constant 0 : index
    %c0_130 = arith.constant 0 : index
    %121 = vector.load %arg1[%c0_129, %c0_130] : memref<8x2048xbf16, #tpu.memory_space<vmem>>, vector<8x256xbf16>
    %c0_131 = arith.constant 0 : index
    %c384 = arith.constant 384 : index
    %122 = vector.load %arg2[%c0_131, %c384] : memref<2048x512xbf16, #tpu.memory_space<vmem>>, vector<256x128xbf16>
    %cst_132 = arith.constant dense<0.000000e+00> : vector<8x128xf32>
    %123 = tpu.matmul %121, %122, %cst_132 {dimension_numbers = #tpu.dot_dimension_numbers<[1], [0], [0], [1], [0, 0, 1, 1], [], []>} : vector<8x256xbf16>, vector<256x128xbf16>, vector<8x128xf32> -> vector<8x128xf32>
    %124 = arith.addf %120, %123 : vector<8x128xf32>
    %c0_133 = arith.constant 0 : index
    %c256_134 = arith.constant 256 : index
    %125 = vector.load %arg1[%c0_133, %c256_134] : memref<8x2048xbf16, #tpu.memory_space<vmem>>, vector<8x256xbf16>
    %c256_135 = arith.constant 256 : index
    %c384_136 = arith.constant 384 : index
    %126 = vector.load %arg2[%c256_135, %c384_136] : memref<2048x512xbf16, #tpu.memory_space<vmem>>, vector<256x128xbf16>
    %cst_137 = arith.constant dense<0.000000e+00> : vector<8x128xf32>
    %127 = tpu.matmul %125, %126, %cst_137 {dimension_numbers = #tpu.dot_dimension_numbers<[1], [0], [0], [1], [0, 0, 1, 1], [], []>} : vector<8x256xbf16>, vector<256x128xbf16>, vector<8x128xf32> -> vector<8x128xf32>
    %128 = arith.addf %124, %127 : vector<8x128xf32>
    %c0_138 = arith.constant 0 : index
    %c512_139 = arith.constant 512 : index
    %129 = vector.load %arg1[%c0_138, %c512_139] : memref<8x2048xbf16, #tpu.memory_space<vmem>>, vector<8x256xbf16>
    %c512_140 = arith.constant 512 : index
    %c384_141 = arith.constant 384 : index
    %130 = vector.load %arg2[%c512_140, %c384_141] : memref<2048x512xbf16, #tpu.memory_space<vmem>>, vector<256x128xbf16>
    %cst_142 = arith.constant dense<0.000000e+00> : vector<8x128xf32>
    %131 = tpu.matmul %129, %130, %cst_142 {dimension_numbers = #tpu.dot_dimension_numbers<[1], [0], [0], [1], [0, 0, 1, 1], [], []>} : vector<8x256xbf16>, vector<256x128xbf16>, vector<8x128xf32> -> vector<8x128xf32>
    %132 = arith.addf %128, %131 : vector<8x128xf32>
    %c0_143 = arith.constant 0 : index
    %c768_144 = arith.constant 768 : index
    %133 = vector.load %arg1[%c0_143, %c768_144] : memref<8x2048xbf16, #tpu.memory_space<vmem>>, vector<8x256xbf16>
    %c768_145 = arith.constant 768 : index
    %c384_146 = arith.constant 384 : index
    %134 = vector.load %arg2[%c768_145, %c384_146] : memref<2048x512xbf16, #tpu.memory_space<vmem>>, vector<256x128xbf16>
    %cst_147 = arith.constant dense<0.000000e+00> : vector<8x128xf32>
    %135 = tpu.matmul %133, %134, %cst_147 {dimension_numbers = #tpu.dot_dimension_numbers<[1], [0], [0], [1], [0, 0, 1, 1], [], []>} : vector<8x256xbf16>, vector<256x128xbf16>, vector<8x128xf32> -> vector<8x128xf32>
    %136 = arith.addf %132, %135 : vector<8x128xf32>
    %c0_148 = arith.constant 0 : index
    %c1024_149 = arith.constant 1024 : index
    %137 = vector.load %arg1[%c0_148, %c1024_149] : memref<8x2048xbf16, #tpu.memory_space<vmem>>, vector<8x256xbf16>
    %c1024_150 = arith.constant 1024 : index
    %c384_151 = arith.constant 384 : index
    %138 = vector.load %arg2[%c1024_150, %c384_151] : memref<2048x512xbf16, #tpu.memory_space<vmem>>, vector<256x128xbf16>
    %cst_152 = arith.constant dense<0.000000e+00> : vector<8x128xf32>
    %139 = tpu.matmul %137, %138, %cst_152 {dimension_numbers = #tpu.dot_dimension_numbers<[1], [0], [0], [1], [0, 0, 1, 1], [], []>} : vector<8x256xbf16>, vector<256x128xbf16>, vector<8x128xf32> -> vector<8x128xf32>
    %140 = arith.addf %136, %139 : vector<8x128xf32>
    %c0_153 = arith.constant 0 : index
    %c1280_154 = arith.constant 1280 : index
    %141 = vector.load %arg1[%c0_153, %c1280_154] : memref<8x2048xbf16, #tpu.memory_space<vmem>>, vector<8x256xbf16>
    %c1280_155 = arith.constant 1280 : index
    %c384_156 = arith.constant 384 : index
    %142 = vector.load %arg2[%c1280_155, %c384_156] : memref<2048x512xbf16, #tpu.memory_space<vmem>>, vector<256x128xbf16>
    %cst_157 = arith.constant dense<0.000000e+00> : vector<8x128xf32>
    %143 = tpu.matmul %141, %142, %cst_157 {dimension_numbers = #tpu.dot_dimension_numbers<[1], [0], [0], [1], [0, 0, 1, 1], [], []>} : vector<8x256xbf16>, vector<256x128xbf16>, vector<8x128xf32> -> vector<8x128xf32>
    %144 = arith.addf %140, %143 : vector<8x128xf32>
    %c0_158 = arith.constant 0 : index
    %c1536_159 = arith.constant 1536 : index
    %145 = vector.load %arg1[%c0_158, %c1536_159] : memref<8x2048xbf16, #tpu.memory_space<vmem>>, vector<8x256xbf16>
    %c1536_160 = arith.constant 1536 : index
    %c384_161 = arith.constant 384 : index
    %146 = vector.load %arg2[%c1536_160, %c384_161] : memref<2048x512xbf16, #tpu.memory_space<vmem>>, vector<256x128xbf16>
    %cst_162 = arith.constant dense<0.000000e+00> : vector<8x128xf32>
    %147 = tpu.matmul %145, %146, %cst_162 {dimension_numbers = #tpu.dot_dimension_numbers<[1], [0], [0], [1], [0, 0, 1, 1], [], []>} : vector<8x256xbf16>, vector<256x128xbf16>, vector<8x128xf32> -> vector<8x128xf32>
    %148 = arith.addf %144, %147 : vector<8x128xf32>
    %c0_163 = arith.constant 0 : index
    %c1792_164 = arith.constant 1792 : index
    %149 = vector.load %arg1[%c0_163, %c1792_164] : memref<8x2048xbf16, #tpu.memory_space<vmem>>, vector<8x256xbf16>
    %c1792_165 = arith.constant 1792 : index
    %c384_166 = arith.constant 384 : index
    %150 = vector.load %arg2[%c1792_165, %c384_166] : memref<2048x512xbf16, #tpu.memory_space<vmem>>, vector<256x128xbf16>
    %cst_167 = arith.constant dense<0.000000e+00> : vector<8x128xf32>
    %151 = tpu.matmul %149, %150, %cst_167 {dimension_numbers = #tpu.dot_dimension_numbers<[1], [0], [0], [1], [0, 0, 1, 1], [], []>} : vector<8x256xbf16>, vector<256x128xbf16>, vector<8x128xf32> -> vector<8x128xf32>
    %152 = arith.addf %148, %151 : vector<8x128xf32>
    %c0_168 = arith.constant 0 : index
    %c384_169 = arith.constant 384 : index
    %153 = vector.load %arg3[%c0_168, %c384_169] : memref<1x512xf32, #tpu.memory_space<vmem>>, vector<1x128xf32>
    %154 = vector.broadcast %153 : vector<1x128xf32> to vector<8x128xf32>
    %155 = arith.addf %152, %154 : vector<8x128xf32>
    %cst_170 = arith.constant 0.000000e+00 : f32
    %156 = vector.broadcast %cst_170 : f32 to vector<8x128xf32>
    %157 = arith.maximumf %155, %156 : vector<8x128xf32>
    %158 = arith.truncf %157 : vector<8x128xf32> to vector<8x128xbf16>
    %c0_171 = arith.constant 0 : index
    %c384_172 = arith.constant 384 : index
    %159 = vector.load %arg7[%c0_171, %c384_172] : memref<8x512xbf16, #tpu.memory_space<vmem>>, vector<8x128xbf16>
    tpu.vector_store %arg7[%c0_171, %c384_172], %158 {strides = array<i32>} : memref<8x512xbf16, #tpu.memory_space<vmem>>, vector<8x128xbf16>,
    %c0_173 = arith.constant 0 : index
    %c0_174 = arith.constant 0 : index
    %160 = vector.load %arg7[%c0_173, %c0_174] : memref<8x512xbf16, #tpu.memory_space<vmem>>, vector<8x512xbf16>
    %c0_175 = arith.constant 0 : index
    %c0_176 = arith.constant 0 : index
    %161 = vector.load %arg4[%c0_175, %c0_176] : memref<512x128xbf16, #tpu.memory_space<vmem>>, vector<512x128xbf16>
    %cst_177 = arith.constant dense<0.000000e+00> : vector<8x128xf32>
    %162 = tpu.matmul %160, %161, %cst_177 {dimension_numbers = #tpu.dot_dimension_numbers<[1], [0], [0], [1], [0, 0, 1, 1], [], []>} : vector<8x512xbf16>, vector<512x128xbf16>, vector<8x128xf32> -> vector<8x128xf32>
    %c0_178 = arith.constant 0 : index
    %c0_179 = arith.constant 0 : index
    %163 = vector.load %arg5[%c0_178, %c0_179] : memref<1x128xf32, #tpu.memory_space<vmem>>, vector<1x128xf32>
    %164 = vector.broadcast %163 : vector<1x128xf32> to vector<8x128xf32>
    %165 = arith.addf %162, %164 : vector<8x128xf32>
    %c0_180 = arith.constant 0 : index
    %c0_181 = arith.constant 0 : index
    %166 = vector.load %arg6[%c0_180, %c0_181] : memref<8x128xf32, #tpu.memory_space<vmem>>, vector<8x128xf32>
    tpu.vector_store %arg6[%c0_180, %c0_181], %165 {strides = array<i32>} : memref<8x128xf32, #tpu.memory_space<vmem>>, vector<8x128xf32>,
    return
  }
  func.func @transform_0(%arg0: i32) -> (i32, i32) {
    %c0_i32 = arith.constant 0 : i32
    %c0_i32_0 = arith.constant 0 : i32
    return %arg0, %c0_i32 : i32, i32
  }
  func.func @transform_1(%arg0: i32) -> (i32, i32) {
    %c0_i32 = arith.constant 0 : i32
    %c0_i32_0 = arith.constant 0 : i32
    %c0_i32_1 = arith.constant 0 : i32
    return %c0_i32, %c0_i32_0 : i32, i32
  }
  func.func @transform_2(%arg0: i32) -> (i32, i32) {
    %c0_i32 = arith.constant 0 : i32
    %c0_i32_0 = arith.constant 0 : i32
    %c0_i32_1 = arith.constant 0 : i32
    return %c0_i32, %c0_i32_0 : i32, i32
  }
  func.func @transform_3(%arg0: i32) -> (i32, i32) {
    %c0_i32 = arith.constant 0 : i32
    %c0_i32_0 = arith.constant 0 : i32
    %c0_i32_1 = arith.constant 0 : i32
    return %c0_i32, %c0_i32_0 : i32, i32
  }
  func.func @transform_4(%arg0: i32) -> (i32, i32) {
    %c0_i32 = arith.constant 0 : i32
    %c0_i32_0 = arith.constant 0 : i32
    %c0_i32_1 = arith.constant 0 : i32
    return %c0_i32, %c0_i32_0 : i32, i32
  }
  func.func @transform_5(%arg0: i32) -> (i32, i32) {
    %c0_i32 = arith.constant 0 : i32
    %c0_i32_0 = arith.constant 0 : i32
    return %arg0, %c0_i32 : i32, i32
  }
}

</mosaic_0001>

<bundles_post_ra>
// kernel: simple_biometric_forward.2
= control target key start
LH: loop header
LB: loop body
LE: loop exit
PB: predicated region body
PF: predicated region fallthrough
CT: control target
= control target key end

     0   :  { %vm27_vm0 = vcmask 261120   ;;  %vm31_vm1 = vcmask 253952   ;;  %vm71_vm2 = vcmask 523264   ;;  %v8155_v0 = vmov 0.0   ;;  %s9607_s0 = inlined_call_operand.vmem [shape: bf16[8,1024,27], index: 0, kind: input, shape index: {}]   ;;  %s9608_s1 = inlined_call_operand.vmem [shape: bf16[27,32], index: 1, kind: input, shape index: {}]   ;;  %s9609_s2 = inlined_call_operand.vmem [shape: f32[1,32], index: 2, kind: input, shape index: {}]   ;;  %s9610_s3 = inlined_call_operand.vmem [shape: bf16[288,64], index: 3, kind: input, shape index: {}]   ;;  %s9611_s4 = inlined_call_operand.vmem [shape: f32[1,64], index: 4, kind: input, shape index: {}]   ;;  %s9612_s5 = inlined_call_operand.vmem [shape: bf16[576,128], index: 5, kind: input, shape index: {}]   ;;  %s9613_s6 = inlined_call_operand.vmem [shape: f32[1,128], index: 6, kind: input, shape index: {}]   ;;  %s9614_s7 = inlined_call_operand.vmem [shape: bf16[8,4,4,128], index: 7, kind: output, shape index: {}]  }
   0x1   :  { %28 = vst.msk [vmem:[#allocation2] sm:$0xff] %vm27_vm0, %v8155_v0  ;;  %29 = vst.msk [vmem:[#allocation2 + $0x8] sm:$0xff] %vm27_vm0, %v8155_v0  ;;  %v8212_v1 = vld [vmem:[%s9608_s1] sm:$0xf]  ;;  %v8217_v2 = vld [vmem:[%s9608_s1 + $0x4] sm:$0xf] }
   0x2   :  { %30 = vst.msk [vmem:[#allocation2 + $0x10] sm:$0xff] %vm27_vm0, %v8155_v0  ;;  %34 = vst.msk [vmem:[#allocation2 + $0x220] sm:$0xff] %vm27_vm0, %v8155_v0  ;;  %v8222_v3 = vld [vmem:[%s9608_s1 + $0x8] sm:$0xf]  ;;  %v8303_v4 = vld [vmem:[%s9608_s1 + $0xc] sm:$0x3] }
   0x3   :  { %35 = vst.msk [vmem:[#allocation2 + $0x228] sm:$0xff] %vm27_vm0, %v8155_v0  ;;  %36 = vst.msk [vmem:[#allocation2 + $0x230] sm:$0xff] %vm27_vm0, %v8155_v0  ;;  %v8308_v5 = vld [vmem:[%s9609_s2] ss:$0 sm:$0xff]  ;;  %vm74_vm3 = vcmask 516096   ;;  %s8356_s1 = smov 0  }
   0x4   :  { %32 = vst.msk [vmem:[#allocation2 + $0x18] sm:$0x1] %vm31_vm1, %v8155_v0  ;;  %37 = vst.msk [vmem:[#allocation2 + $0x238] sm:$0x1] %vm31_vm1, %v8155_v0  ;;  %v8313_v6 = vld [vmem:[%s9611_s4] ss:$0 sm:$0xff] }
   0x5   :  { %39 = vst.msk [vmem:[#allocation2 + $0x27] sm:$0x1] %vm31_vm1, %v8155_v0  ;;  %40 = vst.msk [vmem:[#allocation2 + $0x47] sm:$0x1] %vm31_vm1, %v8155_v0  ;;  %v8318_v7 = vld [vmem:[%s9613_s6] ss:$0 sm:$0xff] }
   0x6   :  { %41 = vst.msk [vmem:[#allocation2 + $0x67] sm:$0x1] %vm31_vm1, %v8155_v0  ;;  %42 = vst.msk [vmem:[#allocation2 + $0x87] sm:$0x1] %vm31_vm1, %v8155_v0 }
   0x7   :  { %43 = vst.msk [vmem:[#allocation2 + $0xa7] sm:$0x1] %vm31_vm1, %v8155_v0  ;;  %44 = vst.msk [vmem:[#allocation2 + $0xc7] sm:$0x1] %vm31_vm1, %v8155_v0 }
   0x8   :  { %45 = vst.msk [vmem:[#allocation2 + $0xe7] sm:$0x1] %vm31_vm1, %v8155_v0  ;;  %46 = vst.msk [vmem:[#allocation2 + $0x107] sm:$0x1] %vm31_vm1, %v8155_v0 }
   0x9   :  { %47 = vst.msk [vmem:[#allocation2 + $0x127] sm:$0x1] %vm31_vm1, %v8155_v0  ;;  %48 = vst.msk [vmem:[#allocation2 + $0x147] sm:$0x1] %vm31_vm1, %v8155_v0 }
   0xa   :  { %49 = vst.msk [vmem:[#allocation2 + $0x167] sm:$0x1] %vm31_vm1, %v8155_v0  ;;  %50 = vst.msk [vmem:[#allocation2 + $0x187] sm:$0x1] %vm31_vm1, %v8155_v0 }
   0xb   :  { %51 = vst.msk [vmem:[#allocation2 + $0x1a7] sm:$0x1] %vm31_vm1, %v8155_v0  ;;  %52 = vst.msk [vmem:[#allocation2 + $0x1c7] sm:$0x1] %vm31_vm1, %v8155_v0 }
   0xc   :  { %53 = vst.msk [vmem:[#allocation2 + $0x1e7] sm:$0x1] %vm31_vm1, %v8155_v0  ;;  %54 = vst.msk [vmem:[#allocation2 + $0x207] sm:$0x1] %vm31_vm1, %v8155_v0 }
   0xd   :  { %55 = vst.msk [vmem:[#allocation2 + $0x38] sm:$0x1] %vm31_vm1, %v8155_v0  ;;  %56 = vst.msk [vmem:[#allocation2 + $0x58] sm:$0x1] %vm31_vm1, %v8155_v0 }
   0xe   :  { %57 = vst.msk [vmem:[#allocation2 + $0x78] sm:$0x1] %vm31_vm1, %v8155_v0  ;;  %58 = vst.msk [vmem:[#allocation2 + $0x98] sm:$0x1] %vm31_vm1, %v8155_v0 }
   0xf   :  { %59 = vst.msk [vmem:[#allocation2 + $0xb8] sm:$0x1] %vm31_vm1, %v8155_v0  ;;  %60 = vst.msk [vmem:[#allocation2 + $0xd8] sm:$0x1] %vm31_vm1, %v8155_v0 }
  0x10   :  { %61 = vst.msk [vmem:[#allocation2 + $0xf8] sm:$0x1] %vm31_vm1, %v8155_v0  ;;  %62 = vst.msk [vmem:[#allocation2 + $0x118] sm:$0x1] %vm31_vm1, %v8155_v0 }
  0x11   :  { %63 = vst.msk [vmem:[#allocation2 + $0x138] sm:$0x1] %vm31_vm1, %v8155_v0  ;;  %64 = vst.msk [vmem:[#allocation2 + $0x158] sm:$0x1] %vm31_vm1, %v8155_v0 }
  0x12   :  { %65 = vst.msk [vmem:[#allocation2 + $0x178] sm:$0x1] %vm31_vm1, %v8155_v0  ;;  %66 = vst.msk [vmem:[#allocation2 + $0x198] sm:$0x1] %vm31_vm1, %v8155_v0 }
  0x13   :  { %67 = vst.msk [vmem:[#allocation2 + $0x1b8] sm:$0x1] %vm31_vm1, %v8155_v0  ;;  %68 = vst.msk [vmem:[#allocation2 + $0x1d8] sm:$0x1] %vm31_vm1, %v8155_v0 }
  0x14   :  { %69 = vst.msk [vmem:[#allocation2 + $0x1f8] sm:$0x1] %vm31_vm1, %v8155_v0  ;;  %70 = vst.msk [vmem:[#allocation2 + $0x218] sm:$0x1] %vm31_vm1, %v8155_v0 }
  0x15   :  { %72 = vst.msk [vmem:[#allocation3] sm:$0xff] %vm71_vm2, %v8155_v0  ;;  %73 = vst.msk [vmem:[#allocation3 + $0x8] sm:$0xff] %vm71_vm2, %v8155_v0 }
  0x16   :  { %77 = vst.msk [vmem:[#allocation3 + $0xd8] sm:$0xff] %vm71_vm2, %v8155_v0  ;;  %78 = vst.msk [vmem:[#allocation3 + $0xe0] sm:$0xff] %vm71_vm2, %v8155_v0 }
  0x17   :  { %75 = vst.msk [vmem:[#allocation3 + $0x10] sm:$0x1] %vm74_vm3, %v8155_v0  ;;  %79 = vst.msk [vmem:[#allocation3 + $0xe8] sm:$0x1] %vm74_vm3, %v8155_v0 }
  0x18   :  { %81 = vst.msk [vmem:[#allocation3 + $0x1f] sm:$0x1] %vm74_vm3, %v8155_v0  ;;  %82 = vst.msk [vmem:[#allocation3 + $0x37] sm:$0x1] %vm74_vm3, %v8155_v0 }
  0x19   :  { %83 = vst.msk [vmem:[#allocation3 + $0x4f] sm:$0x1] %vm74_vm3, %v8155_v0  ;;  %84 = vst.msk [vmem:[#allocation3 + $0x67] sm:$0x1] %vm74_vm3, %v8155_v0 }
  0x1a   :  { %85 = vst.msk [vmem:[#allocation3 + $0x7f] sm:$0x1] %vm74_vm3, %v8155_v0  ;;  %86 = vst.msk [vmem:[#allocation3 + $0x97] sm:$0x1] %vm74_vm3, %v8155_v0 }
  0x1b   :  { %87 = vst.msk [vmem:[#allocation3 + $0xaf] sm:$0x1] %vm74_vm3, %v8155_v0  ;;  %88 = vst.msk [vmem:[#allocation3 + $0xc7] sm:$0x1] %vm74_vm3, %v8155_v0 }
  0x1c   :  { %89 = vst.msk [vmem:[#allocation3 + $0x28] sm:$0x1] %vm74_vm3, %v8155_v0  ;;  %90 = vst.msk [vmem:[#allocation3 + $0x40] sm:$0x1] %vm74_vm3, %v8155_v0 }
  0x1d   :  { %91 = vst.msk [vmem:[#allocation3 + $0x58] sm:$0x1] %vm74_vm3, %v8155_v0  ;;  %92 = vst.msk [vmem:[#allocation3 + $0x70] sm:$0x1] %vm74_vm3, %v8155_v0 }
  0x1e   :  { %93 = vst.msk [vmem:[#allocation3 + $0x88] sm:$0x1] %vm74_vm3, %v8155_v0  ;;  %94 = vst.msk [vmem:[#allocation3 + $0xa0] sm:$0x1] %vm74_vm3, %v8155_v0 }
  0x1f   :  { %95 = vst.msk [vmem:[#allocation3 + $0xb8] sm:$0x1] %vm74_vm3, %v8155_v0  ;;  %96 = vst.msk [vmem:[#allocation3 + $0xd0] sm:$0x1] %vm74_vm3, %v8155_v0 }
  0x20 LB: > { %v8363_v8 = vcombine.low %v8212_v1, %v8217_v2  ;;  %v6334_v9 = vcombine.low %v8222_v3, %v8303_v4  ;;  %vm291_vm4 = vcmask 1044480   ;;  %vm292_vm5 = vcmask 1045504   ;;  %s6703_s2 = sshll.u32 %s8153_s1, 9  ;;  %v8071_v59 = vld [vmem:[%s9610_s3 + $0x10] sm:$0xff]   ;;  %v8072_v60 = vld [vmem:[%s9610_s3 + $0x18] sm:$0xff]   ;;  %v1852_v63 = vld [vmem:[#allocation2 + $0x8] sm:$0xff]  ;;  %s8153_s1 = sphi %s8356_s1, %s109_s1  }
  0x21   : > { %v8156_v10 = vmov 65535   ;;  %s8374_s15 = scalar_lea.vmem %s9607_s0, %s6703_s2  ;;  %vm242_vm6 = vcmask 220160   ;;  %v1853_v0 = vld [vmem:[#allocation2 + $0x10] sm:$0xff]  ;;  %s6704_s30 = sshll.u32 %s8153_s1, 3 }
  0x22   : > { %7029 = vmatprep.subr.bf16.mxu1 %v8363_v8  ;;  %v293_v11 = vsel %vm291_vm4, 4294967295, %v8156_v10  ;;  %7101 = vmatprep.subr.bf16.mxu0 %v8363_v8  ;;  %v8011_v14 = vld [vmem:[%s8374_s15] sm:$0xff]   ;;  %v8012_v15 = vld [vmem:[%s8374_s15 + $0x8] sm:$0xff]   ;;  %v8013_v16 = vld [vmem:[%s8374_s15 + $0x10] sm:$0xff]   ;;  %s6296_s10 = scalar_lea.vmem %s9614_s7, %s6704_s30  ;;  %s109_s1 = sadd.s32 1, %s8153_s1  }
  0x23   : > { %7030 = vmatpush3.bf16.msra.mxu1 %v8363_v8  ;;  %v294_v12 = vsel %vm292_vm5, %v293_v11, 0  ;;  %7102 = vmatpush3.bf16.msra.mxu0 %v8363_v8  ;;  %v8014_v17 = vld [vmem:[%s8374_s15 + $0x18] sm:$0xff]   ;;  %v8015_v18 = vld [vmem:[%s8374_s15 + $0x20] sm:$0xff]   ;;  %v8016_v19 = vld [vmem:[%s8374_s15 + $0x28] sm:$0xff]   ;;  %p106_p0 = scmp.ge.s32.totalorder %s109_s1, 8  }
  0x24   : > { %v8377_v13 = vand.u32 %v6334_v9, %v294_v12  ;;  %7033 = vmatprep.mubr.msk.bf16.mxu1 %vm242_vm6, %v8011_v14  ;;  %v8017_v20 = vld [vmem:[%s8374_s15 + $0x30] sm:$0xff]   ;;  %v8032_v21 = vld [vmem:[%s8374_s15 + $0x100] sm:$0xff]   ;;  %v8034_v22 = vld [vmem:[%s8374_s15 + $0x108] sm:$0xff]   ;;  %v1868_v9 = vpack.c.bf16 %v1853_v0, %v1852_v63 }
  0x25   : > { %7105 = vmatprep.mubr.msk.bf16.mxu0 %vm242_vm6, %v8032_v21  ;;  %v8036_v23 = vld [vmem:[%s8374_s15 + $0x110] sm:$0xff]   ;;  %v8018_v24 = vld [vmem:[%s8374_s15 + $0x38] sm:$0xff]   ;;  %v8019_v25 = vld [vmem:[%s8374_s15 + $0x40] sm:$0xff]  }
  0x26   : > { %7031 = vmatprep.subr.bf16.mxu1 %v8377_v13  ;;  %7103 = vmatprep.subr.bf16.mxu0 %v8377_v13  ;;  %v8038_v26 = vld [vmem:[%s8374_s15 + $0x118] sm:$0xff]   ;;  %v8040_v27 = vld [vmem:[%s8374_s15 + $0x120] sm:$0xff]   ;;  %v8020_v28 = vld [vmem:[%s8374_s15 + $0x48] sm:$0xff]  }
  0x27   : > { %7032 = vmatpush3.bf16.msra.mxu1 %v8377_v13  ;;  %7104 = vmatpush3.bf16.msra.mxu0 %v8377_v13  ;;  %v8021_v29 = vld [vmem:[%s8374_s15 + $0x50] sm:$0xff]   ;;  %v8042_v30 = vld [vmem:[%s8374_s15 + $0x128] sm:$0xff]   ;;  %v8022_v32 = vld [vmem:[%s8374_s15 + $0x58] sm:$0xff]  }
  0x28   : > { %7065 = vmatprep.subr.bf16.mxu1 %v8363_v8  ;;  %v8044_v31 = vld [vmem:[%s8374_s15 + $0x130] sm:$0xff]   ;;  %v8023_v33 = vld [vmem:[%s8374_s15 + $0x60] sm:$0xff]   ;;  %v8046_v34 = vld [vmem:[%s8374_s15 + $0x138] sm:$0xff]   ;;  %7173 = vmatprep.subr.bf16.mxu0 %v8071_v59 }
  0x29   : > { %v8048_v35 = vld [vmem:[%s8374_s15 + $0x140] sm:$0xff]   ;;  %v8024_v36 = vld [vmem:[%s8374_s15 + $0x68] sm:$0xff]   ;;  %v8025_v37 = vld [vmem:[%s8374_s15 + $0x70] sm:$0xff]  }
  0x2a   : > { %7034 = vmatmul.mubr.msk.bf16.vlgmr.msra.gmra.mrb[0].mxu1 %vm242_vm6, %v8012_v15  ;;  %7106 = vmatmul.mubr.msk.bf16.vlgmr.msra.gmra.mrb[0].mxu0 %vm242_vm6, %v8034_v22  ;;  %v8050_v38 = vld [vmem:[%s8374_s15 + $0x148] sm:$0xff]   ;;  %v8052_v39 = vld [vmem:[%s8374_s15 + $0x150] sm:$0xff]   ;;  %v8026_v40 = vld [vmem:[%s8374_s15 + $0x78] sm:$0xff]  }
  0x2b   : > { %7066 = vmatpush3.bf16.msra.mxu1 %v8363_v8  ;;  %7037 = vmatprep.mubr.msk.bf16.mxu1 %vm242_vm6, %v8013_v16  ;;  %v8027_v41 = vld [vmem:[%s8374_s15 + $0x80] sm:$0xff]   ;;  %v8054_v42 = vld [vmem:[%s8374_s15 + $0x158] sm:$0xff]   ;;  %v8028_v44 = vld [vmem:[%s8374_s15 + $0x88] sm:$0xff]  }
  0x2c   : > { %7067 = vmatprep.subr.bf16.mxu1 %v8377_v13  ;;  %7109 = vmatprep.mubr.msk.bf16.mxu0 %vm242_vm6, %v8036_v23  ;;  %v8055_v43 = vld [vmem:[%s8374_s15 + $0x160] sm:$0xff]   ;;  %v8029_v45 = vld [vmem:[%s8374_s15 + $0x90] sm:$0xff]   ;;  %v8057_v46 = vld [vmem:[%s8374_s15 + $0x168] sm:$0xff]  }
  0x2d   : > { %v8030_v47 = vld [vmem:[%s8374_s15 + $0x98] sm:$0xff]   ;;  %v8031_v48 = vld [vmem:[%s8374_s15 + $0xa0] sm:$0xff]   ;;  %v8033_v49 = vld [vmem:[%s8374_s15 + $0xa8] sm:$0xff]   ;;  %7174 = vmatpush3.bf16.msra.mxu0 %v8071_v59 }
  0x2e   : > { %v8035_v50 = vld [vmem:[%s8374_s15 + $0xb0] sm:$0xff]   ;;  %v8037_v51 = vld [vmem:[%s8374_s15 + $0xb8] sm:$0xff]   ;;  %v8039_v52 = vld [vmem:[%s8374_s15 + $0xc0] sm:$0xff]   ;;  %7175 = vmatprep.subr.bf16.mxu0 %v8072_v60 }
  0x2f   : > { %7068 = vmatpush3.bf16.msra.mxu1 %v8377_v13  ;;  %v8041_v53 = vld [vmem:[%s8374_s15 + $0xc8] sm:$0xff]   ;;  %v8043_v54 = vld [vmem:[%s8374_s15 + $0xd0] sm:$0xff]   ;;  %v8045_v55 = vld [vmem:[%s8374_s15 + $0xd8] sm:$0xff]  }
  0x30   : > { %7677 = vmatprep.subr.bf16.mxu1 %v8363_v8  ;;  %v8047_v56 = vld [vmem:[%s8374_s15 + $0xe0] sm:$0xff]   ;;  %v8049_v57 = vld [vmem:[%s8374_s15 + $0xe8] sm:$0xff]   ;;  %v8051_v58 = vld [vmem:[%s8374_s15 + $0xf0] sm:$0xff]  }
  0x31   : > { %v8053_v61 = vld [vmem:[%s8374_s15 + $0xf8] sm:$0xff]   ;;  %v8056_v62 = vld [vmem:[%s8374_s15 + $0x170] sm:$0xff]   ;;  %7176 = vmatpush3.bf16.msra.mxu0 %v8072_v60  ;;  %v8059_v11 = vld [vmem:[%s8374_s15 + $0x180] sm:$0xff]  }
  0x32   : > { %7038 = vmatmul.mubr.msk.bf16.gmra.mrb[4].mxu1 %vm242_vm6, %v8014_v17  ;;  %7110 = vmatmul.mubr.msk.bf16.gmra.mrb[4].mxu0 %vm242_vm6, %v8038_v26  ;;  %v8058_v10 = vld [vmem:[%s8374_s15 + $0x178] sm:$0xff]   ;;  %v8060_v12 = vld [vmem:[%s8374_s15 + $0x188] sm:$0xff]   ;;  %v8061_v14 = vld [vmem:[%s8374_s15 + $0x190] sm:$0xff]  }
  0x33   : > { %7041 = vmatprep.mubr.msk.bf16.mxu1 %vm242_vm6, %v8015_v18  ;;  %7113 = vmatprep.mubr.msk.bf16.mxu0 %vm242_vm6, %v8040_v27  ;;  %v8062_v15 = vld [vmem:[%s8374_s15 + $0x198] sm:$0xff]   ;;  %v8063_v16 = vld [vmem:[%s8374_s15 + $0x1a0] sm:$0xff]   ;;  %v8065_v17 = vld [vmem:[%s8374_s15 + $0x1b0] sm:$0xff]  }
  0x34   : > { %v8067_v18 = vld [vmem:[%s8374_s15 + $0x1c0] sm:$0xff]   ;;  %v8070_v21 = vld [vmem:[%s8374_s15 + $0x1d8] sm:$0xff]   ;;  %v8074_v23 = vld [vmem:[%s8374_s15 + $0x1e8] sm:$0xff]  }
  0x35   : > { %v8073_v22 = vld [vmem:[%s8374_s15 + $0x1e0] sm:$0xff]   ;;  %v8077_v26 = vld [vmem:[%s9610_s3 + $0x10] sm:$0xff]   ;;  %v8080_v59 = vld [vmem:[%s9610_s3 + $0x18] sm:$0xff]  }
  0x3a   : > { %7042 = vmatmul.mubr.msk.bf16.gmra.mrb[8].mxu1 %vm242_vm6, %v8016_v19  ;;  %7114 = vmatmul.mubr.msk.bf16.gmra.mrb[8].mxu0 %vm242_vm6, %v8042_v30  ;;  %v8068_v19 = vld [vmem:[%s8374_s15 + $0x1c8] sm:$0xff]  }
  0x3b   : > { %7045 = vmatprep.mubr.msk.bf16.mxu1 %vm242_vm6, %v8017_v20  ;;  %7117 = vmatprep.mubr.msk.bf16.mxu0 %vm242_vm6, %v8044_v31  ;;  %v8069_v20 = vld [vmem:[%s8374_s15 + $0x1d0] sm:$0xff]   ;;  %v8536_v31 = vld [vmem:[%s9610_s3] sm:$0xff]  }
  0x3c   : > { %7193 = vmatprep.subr.bf16.mxu0 %v8536_v31 }
  0x42   : > { %7046 = vmatmul.mubr.msk.bf16.gmra.mrb[12].mxu1 %vm242_vm6, %v8018_v24  ;;  %7118 = vmatmul.mubr.msk.bf16.gmra.mrb[12].mxu0 %vm242_vm6, %v8046_v34  ;;  %v8075_v24 = vld [vmem:[%s8374_s15 + $0x1f0] sm:$0xff]  }
  0x43   : > { %7049 = vmatprep.mubr.msk.bf16.mxu1 %vm242_vm6, %v8019_v25  ;;  %7121 = vmatprep.mubr.msk.bf16.mxu0 %vm242_vm6, %v8048_v35  ;;  %v8076_v25 = vld [vmem:[%s8374_s15 + $0x1f8] sm:$0xff]  }
  0x4a   : > { %7050 = vmatmul.mubr.msk.bf16.gmra.mrb[16].mxu1 %vm242_vm6, %v8020_v28  ;;  %7122 = vmatmul.mubr.msk.bf16.gmra.mrb[16].mxu0 %vm242_vm6, %v8050_v38 }
  0x4b   : > { %7053 = vmatprep.mubr.msk.bf16.mxu1 %vm242_vm6, %v8021_v29  ;;  %7125 = vmatprep.mubr.msk.bf16.mxu0 %vm242_vm6, %v8052_v39 }
  0x52   : > { %7054 = vmatmul.mubr.msk.bf16.gmra.mrb[20].mxu1 %vm242_vm6, %v8022_v32  ;;  %7126 = vmatmul.mubr.msk.bf16.gmra.mrb[20].mxu0 %vm242_vm6, %v8054_v42 }
  0x53   : > { %7057 = vmatprep.mubr.msk.bf16.mxu1 %vm242_vm6, %v8023_v33  ;;  %7129 = vmatprep.mubr.msk.bf16.mxu0 %vm242_vm6, %v8055_v43 }
  0x5a   : > { %7058 = vmatmul.mubr.msk.bf16.gmra.mrb[24].mxu1 %vm242_vm6, %v8024_v36  ;;  %7130 = vmatmul.mubr.msk.bf16.gmra.mrb[24].mxu0 %vm242_vm6, %v8057_v46 }
  0x5b   : > { %7061 = vmatprep.mubr.msk.bf16.mxu1 %vm242_vm6, %v8025_v37  ;;  %7177 = vmatprep.mubr.msk.bf16.mxu0 %vm27_vm0, %v1868_v9 }
  0x62   : > { %7062 = vmatmul.mubr.msk.bf16.gmra.mrb[28].mxu1 %vm242_vm6, %v8026_v40 }
  0x63   : > { %7069 = vmatprep.mubr.msk.bf16.mxu1 %vm242_vm6, %v8027_v41 }
  0x6a   : > { %7070 = vmatmul.mubr.msk.bf16.vlgmr.msra.gmra.mrb[32].mxu1 %vm242_vm6, %v8028_v44 }
  0x6b   : > { %7679 = vmatpush3.bf16.msra.mxu1 %v8363_v8  ;;  %7073 = vmatprep.mubr.msk.bf16.mxu1 %vm242_vm6, %v8029_v45 }
  0x6c   : > { %7678 = vmatprep.subr.bf16.mxu1 %v8377_v13 }
  0x6f   : > { %7680 = vmatpush3.bf16.msra.mxu1 %v8377_v13 }
  0x70   : > { %7137 = vmatprep.subr.bf16.mxu1 %v8363_v8 }
  0x72   : > { %7074 = vmatmul.mubr.msk.bf16.gmra.mrb[36].mxu1 %vm242_vm6, %v8030_v47 }
  0x73   : > { %7077 = vmatprep.mubr.msk.bf16.mxu1 %vm242_vm6, %v8031_v48 }
  0x7a   : > { %7078 = vmatmul.mubr.msk.bf16.gmra.mrb[40].mxu1 %vm242_vm6, %v8033_v49 }
  0x7b   : > { %7081 = vmatprep.mubr.msk.bf16.mxu1 %vm242_vm6, %v8035_v50 }
  0x82   : > { %7082 = vmatmul.mubr.msk.bf16.gmra.mrb[44].mxu1 %vm242_vm6, %v8037_v51 }
  0x83   : > { %7085 = vmatprep.mubr.msk.bf16.mxu1 %vm242_vm6, %v8039_v52 }
  0x8a   : > { %7086 = vmatmul.mubr.msk.bf16.gmra.mrb[48].mxu1 %vm242_vm6, %v8041_v53 }
  0x8b   : > { %7089 = vmatprep.mubr.msk.bf16.mxu1 %vm242_vm6, %v8043_v54 }
  0x92   : > { %7090 = vmatmul.mubr.msk.bf16.gmra.mrb[52].mxu1 %vm242_vm6, %v8045_v55 }
  0x93   : > { %7093 = vmatprep.mubr.msk.bf16.mxu1 %vm242_vm6, %v8047_v56 }
  0x9a   : > { %7094 = vmatmul.mubr.msk.bf16.gmra.mrb[56].mxu1 %vm242_vm6, %v8049_v57 }
  0x9b   : > { %7097 = vmatprep.mubr.msk.bf16.mxu1 %vm242_vm6, %v8051_v58 }
  0xa2   : > { %7098 = vmatmul.mubr.msk.bf16.gmra.mrb[60].mxu1 %vm242_vm6, %v8053_v61 }
  0xa3   : > { %7133 = vmatprep.mubr.msk.bf16.mxu1 %vm242_vm6, %v8056_v62 }
  0xaa   : > { %7134 = vmatmul.mubr.msk.bf16.vlgmr.msra.gmra.mrb[64].mxu1 %vm242_vm6, %v8058_v10 }
  0xab   : > { %7138 = vmatpush3.bf16.msra.mxu1 %v8363_v8  ;;  %7141 = vmatprep.mubr.msk.bf16.mxu1 %vm242_vm6, %v8059_v11  ;;  %v8064_v8 = vld [vmem:[%s8374_s15 + $0x1a8] sm:$0xff]  }
  0xac   : > { %7139 = vmatprep.subr.bf16.mxu1 %v8377_v13 }
  0xaf   : > { %7140 = vmatpush3.bf16.msra.mxu1 %v8377_v13  ;;  %v8066_v13 = vld [vmem:[%s8374_s15 + $0x1b8] sm:$0xff]  }
  0xb0   : > { %7353 = vmatprep.subr.bf16.mxu1 %v8077_v26 }
  0xb2   : > { %7142 = vmatmul.mubr.msk.bf16.vlgmr.msra.gmra.mrb[68].mxu1 %vm242_vm6, %v8060_v12 }
  0xb3   : > { %7145 = vmatprep.mubr.msk.bf16.mxu1 %vm242_vm6, %v8061_v14  ;;  %7354 = vmatpush3.bf16.msra.mxu1 %v8077_v26 }
  0xb4   : > { %7355 = vmatprep.subr.bf16.mxu1 %v8080_v59 }
  0xb7   : > { %7356 = vmatpush3.bf16.msra.mxu1 %v8080_v59 }
  0xba   : > { %7146 = vmatmul.mubr.msk.bf16.gmra.mrb[72].mxu1 %vm242_vm6, %v8062_v15 }
  0xbb   : > { %7149 = vmatprep.mubr.msk.bf16.mxu1 %vm242_vm6, %v8063_v16 }
  0xc2   : > { %7150 = vmatmul.mubr.msk.bf16.gmra.mrb[76].mxu1 %vm242_vm6, %v8064_v8 }
  0xc3   : > { %7153 = vmatprep.mubr.msk.bf16.mxu1 %vm242_vm6, %v8065_v17 }
  0xca   : > { %7154 = vmatmul.mubr.msk.bf16.gmra.mrb[80].mxu1 %vm242_vm6, %v8066_v13 }
  0xcb   : > { %7157 = vmatprep.mubr.msk.bf16.mxu1 %vm242_vm6, %v8067_v18 }
  0xd2   : > { %7158 = vmatmul.mubr.msk.bf16.gmra.mrb[84].mxu1 %vm242_vm6, %v8068_v19 }
  0xd3   : > { %7161 = vmatprep.mubr.msk.bf16.mxu1 %vm242_vm6, %v8069_v20 }
  0xda   : > { %7162 = vmatmul.mubr.msk.bf16.gmra.mrb[88].mxu1 %vm242_vm6, %v8070_v21 }
  0xdb   : > { %7165 = vmatprep.mubr.msk.bf16.mxu1 %vm242_vm6, %v8073_v22 }
  0xe2   : > { %7166 = vmatmul.mubr.msk.bf16.gmra.mrb[92].mxu1 %vm242_vm6, %v8074_v23 }
  0xe3   : > { %7169 = vmatprep.mubr.msk.bf16.mxu1 %vm242_vm6, %v8075_v24 }
  0xea   : > { %7170 = vmatmul.mubr.msk.bf16.gmra.mrb[96].mxu1 %vm242_vm6, %v8076_v25 }
  0xfd   : > { %v7035_v27 = vpop.f32.mrb[0].mxu1  ;;  %v7107_v61 = vpop.f32.mrb[0].mxu0 }
  0xfe   : > { %v332_v28 = vpop.f32.mrb[1].mxu1  ;;  %v341_v32 = vadd.f32 %v7035_v27, %v8308_v5  ;;  %v1182_v63 = vpop.f32.mrb[1].mxu0  ;;  %v1191_v14 = vadd.f32 %v7107_v61, %v8308_v5 }
  0xff   : > { %v7036_v29 = vpop.f32.mrb[2].mxu1  ;;  %v333_v33 = vadd.f32 %v8308_v5, %v332_v28  ;;  %v7108_v9 = vpop.f32.mrb[2].mxu0  ;;  %v1183_v13 = vadd.f32 %v8308_v5, %v1182_v63 }
 0x100   : > { %v335_v30 = vpop.f32.mrb[3].mxu1  ;;  %v344_v35 = vadd.f32 %v7036_v29, %v8308_v5  ;;  %v461_v41 = vmax.f32 %v341_v32, 0.0  ;;  %v1185_v12 = vpop.f32.mrb[3].mxu0  ;;  %v1194_v24 = vadd.f32 %v7108_v9, %v8308_v5 }
 0x101   : > { %v336_v38 = vadd.f32 %v8308_v5, %v335_v30  ;;  %v459_v45 = vmax.f32 %v333_v33, 0.0 }
 0x102   : > { %v462_v48 = vmax.f32 %v344_v35, 0.0  ;;  %v1186_v35 = vadd.f32 %v8308_v5, %v1185_v12 }
 0x103   : > { %v460_v51 = vmax.f32 %v336_v38, 0.0 }
 0x105   : > { %v7039_v34 = vpop.f32.mrb[4].mxu1 }
 0x106   : > { %v357_v36 = vadd.f32 %v7039_v34, %v8308_v5  ;;  %v348_v37 = vpop.f32.mrb[5].mxu1  ;;  %v1311_v34 = vmax.f32 %v1191_v14, 0.0 }
 0x107   : > { %v349_v39 = vadd.f32 %v8308_v5, %v348_v37  ;;  %v7040_v40 = vpop.f32.mrb[6].mxu1 }
 0x108   : > { %v465_v42 = vmax.f32 %v357_v36, 0.0  ;;  %v360_v43 = vadd.f32 %v7040_v40, %v8308_v5  ;;  %v351_v44 = vpop.f32.mrb[7].mxu1  ;;  %v7111_v36 = vpop.f32.mrb[4].mxu0 }
 0x109   : > { %v463_v46 = vmax.f32 %v349_v39, 0.0  ;;  %v352_v47 = vadd.f32 %v8308_v5, %v351_v44  ;;  %v1309_v39 = vmax.f32 %v1183_v13, 0.0  ;;  %v1207_v40 = vadd.f32 %v7111_v36, %v8308_v5 }
 0x10a   : > { %v493_v49 = vmax.f32 %v461_v41, %v465_v42  ;;  %v466_v50 = vmax.f32 %v360_v43, 0.0  ;;  %v1198_v41 = vpop.f32.mrb[5].mxu0  ;;  %v1312_v44 = vmax.f32 %v1194_v24, 0.0 }
 0x10b   : > { %v491_v52 = vmax.f32 %v459_v45, %v463_v46  ;;  %v464_v53 = vmax.f32 %v352_v47, 0.0  ;;  %v1199_v45 = vadd.f32 %v8308_v5, %v1198_v41  ;;  %v7112_v46 = vpop.f32.mrb[6].mxu0 }
 0x10c   : > { %509 = vst.msk [vmem:[#allocation4 + $0x10] sm:$0xff] %vm27_vm0, %v493_v49  ;;  %v494_v54 = vmax.f32 %v462_v48, %v466_v50  ;;  %v1315_v49 = vmax.f32 %v1207_v40, 0.0  ;;  %v1210_v50 = vadd.f32 %v7112_v46, %v8308_v5 }
 0x10d   : > { %507 = vst.msk [vmem:[#allocation4] sm:$0xff] %vm27_vm0, %v491_v52  ;;  %v492_v55 = vmax.f32 %v460_v51, %v464_v53  ;;  %v7043_v56 = vpop.f32.mrb[8].mxu1  ;;  %v1201_v51 = vpop.f32.mrb[7].mxu0  ;;  %v1310_v53 = vmax.f32 %v1186_v35, 0.0 }
 0x10e   : > { %510 = vst.msk [vmem:[#allocation4 + $0x18] sm:$0xff] %vm27_vm0, %v494_v54  ;;  %v364_v57 = vpop.f32.mrb[9].mxu1  ;;  %v373_v62 = vadd.f32 %v7043_v56, %v8308_v5  ;;  %v1313_v54 = vmax.f32 %v1199_v45, 0.0  ;;  %v1316_v59 = vmax.f32 %v1210_v50, 0.0 }
 0x10f   : > { %508 = vst.msk [vmem:[#allocation4 + $0x8] sm:$0xff] %vm27_vm0, %v492_v55  ;;  %v7044_v58 = vpop.f32.mrb[10].mxu1  ;;  %v365_v0 = vadd.f32 %v8308_v5, %v364_v57  ;;  %v1202_v55 = vadd.f32 %v8308_v5, %v1201_v51 }
 0x110   : > { %v367_v60 = vpop.f32.mrb[11].mxu1  ;;  %v376_v10 = vadd.f32 %v7044_v58, %v8308_v5  ;;  %v469_v8 = vmax.f32 %v373_v62, 0.0  ;;  %v8574_v58 = vmax.f32 %v1311_v34, %v1315_v49  ;;  %v8577_v61 = vmax.f32 %v1309_v39, %v1313_v54 }
 0x111   : > { %v368_v11 = vadd.f32 %v8308_v5, %v367_v60  ;;  %v467_v20 = vmax.f32 %v365_v0, 0.0  ;;  %v1314_v62 = vmax.f32 %v1202_v55, 0.0  ;;  %v8580_v9 = vmax.f32 %v1312_v44, %v1316_v59 }
 0x112   : > { %v470_v25 = vmax.f32 %v376_v10, 0.0 }
 0x113   : > { %v468_v26 = vmax.f32 %v368_v11, 0.0  ;;  %v8583_v14 = vmax.f32 %v1310_v53, %v1314_v62 }
 0x115   : > { %v525_v15 = vld [vmem:[#allocation4 + $0x10] ss:$2 sm:$0xff]  ;;  %v541_v16 = vld [vmem:[#allocation4 + $0x11] ss:$2 sm:$0xff]  ;;  %v7047_v17 = vpop.f32.mrb[12].mxu1 }
 0x116   : > { %v523_v18 = vld [vmem:[#allocation4] ss:$2 sm:$0xff]  ;;  %v539_v19 = vld [vmem:[#allocation4 + $0x1] ss:$2 sm:$0xff]  ;;  %v389_v21 = vadd.f32 %v7047_v17, %v8308_v5  ;;  %v380_v22 = vpop.f32.mrb[13].mxu1  ;;  %v555_v23 = vmax.f32 %v525_v15, %v541_v16  ;;  %v7115_v15 = vpop.f32.mrb[8].mxu0 }
 0x117   : > { %v381_v27 = vadd.f32 %v8308_v5, %v380_v22  ;;  %v7048_v28 = vpop.f32.mrb[14].mxu1  ;;  %v554_v29 = vmax.f32 %v523_v18, %v539_v19  ;;  %v8079_v17 = vld [vmem:[%s9610_s3 + $0x8] sm:$0xff]  }
 0x118   : > { %v473_v30 = vmax.f32 %v389_v21, 0.0  ;;  %v392_v32 = vadd.f32 %v7048_v28, %v8308_v5  ;;  %v383_v33 = vpop.f32.mrb[15].mxu1  ;;  %563 = vst.msk [vmem:[#allocation2 + $0x30] sm:$0xff] %vm27_vm0, %v555_v23  ;;  %v1223_v23 = vadd.f32 %v7115_v15, %v8308_v5  ;;  %v8598_v28 = vld [vmem:[%s9610_s3 + $0x20] sm:$0xff]  }
 0x119   : > { %v471_v37 = vmax.f32 %v381_v27, 0.0  ;;  %v384_v38 = vadd.f32 %v8308_v5, %v383_v33  ;;  %562 = vst.msk [vmem:[#allocation2 + $0x28] sm:$0xff] %vm27_vm0, %v554_v29 }
 0x11a   : > { %v497_v42 = vmax.f32 %v469_v8, %v473_v30  ;;  %v474_v43 = vmax.f32 %v392_v32, 0.0  ;;  %v1214_v8 = vpop.f32.mrb[9].mxu0  ;;  %v1319_v44 = vmax.f32 %v1223_v23, 0.0 }
 0x11b   : > { %v495_v47 = vmax.f32 %v467_v20, %v471_v37  ;;  %v472_v48 = vmax.f32 %v384_v38, 0.0  ;;  %v7116_v18 = vpop.f32.mrb[10].mxu0  ;;  %v1215_v27 = vadd.f32 %v8308_v5, %v1214_v8 }
 0x11c   : > { %513 = vst.msk [vmem:[#allocation4 + $0x30] sm:$0xff] %vm27_vm0, %v497_v42  ;;  %v498_v52 = vmax.f32 %v470_v25, %v474_v43  ;;  %v1217_v21 = vpop.f32.mrb[11].mxu0 }
 0x11d   : > { %511 = vst.msk [vmem:[#allocation4 + $0x20] sm:$0xff] %vm27_vm0, %v495_v47  ;;  %v496_v56 = vmax.f32 %v468_v26, %v472_v48  ;;  %v7051_v57 = vpop.f32.mrb[16].mxu1  ;;  %v1218_v45 = vadd.f32 %v8308_v5, %v1217_v21  ;;  %v7119_v46 = vpop.f32.mrb[12].mxu0  ;;  %v1317_v49 = vmax.f32 %v1215_v27, 0.0 }
 0x11e   : > { %514 = vst.msk [vmem:[#allocation4 + $0x38] sm:$0xff] %vm27_vm0, %v498_v52  ;;  %v396_v60 = vpop.f32.mrb[17].mxu1  ;;  %v405_v10 = vadd.f32 %v7051_v57, %v8308_v5  ;;  %v1239_v50 = vadd.f32 %v7119_v46, %v8308_v5  ;;  %v1230_v51 = vpop.f32.mrb[13].mxu0 }
 0x11f   : > { %512 = vst.msk [vmem:[#allocation4 + $0x28] sm:$0xff] %vm27_vm0, %v496_v56  ;;  %v7052_v63 = vpop.f32.mrb[18].mxu1  ;;  %v1855_v0 = vld [vmem:[#allocation2 + $0x30] sm:$0xff]  ;;  %v397_v13 = vadd.f32 %v8308_v5, %v396_v60  ;;  %v1231_v55 = vadd.f32 %v8308_v5, %v1230_v51  ;;  %v7120_v56 = vpop.f32.mrb[14].mxu0 }
 0x120   : > { %v399_v11 = vpop.f32.mrb[19].mxu1  ;;  %v1854_v12 = vld [vmem:[#allocation2 + $0x28] sm:$0xff]  ;;  %v408_v19 = vadd.f32 %v7052_v63, %v8308_v5  ;;  %v477_v22 = vmax.f32 %v405_v10, 0.0  ;;  %v1323_v60 = vmax.f32 %v1239_v50, 0.0  ;;  %v1242_v62 = vadd.f32 %v7120_v56, %v8308_v5  ;;  %v1233_v63 = vpop.f32.mrb[15].mxu0 }
 0x121   : > { %v1869_v16 = vpack.c.bf16 %v1855_v0, %v1854_v12  ;;  %v400_v20 = vadd.f32 %v8308_v5, %v399_v11  ;;  %v475_v32 = vmax.f32 %v397_v13, 0.0  ;;  %v1318_v10 = vmax.f32 %v1218_v45, 0.0 }
 0x122   : > { %v478_v36 = vmax.f32 %v408_v19, 0.0  ;;  %v1321_v11 = vmax.f32 %v1231_v55, 0.0  ;;  %v1234_v12 = vadd.f32 %v8308_v5, %v1233_v63  ;;  %v8615_v8 = vmax.f32 %v1319_v44, %v1323_v60 }
 0x123   : > { %7178 = vmatmul.mubr.msk.bf16.vlgmr.msra.gmra.mrb[28].mxu0 %vm27_vm0, %v1869_v16  ;;  %v476_v37 = vmax.f32 %v400_v20, 0.0 }
 0x124   : > { %7194 = vmatpush3.bf16.msra.mxu0 %v8536_v31  ;;  %v1226_v31 = vadd.f32 %v7116_v18, %v8308_v5  ;;  %v8618_v18 = vmax.f32 %v1317_v49, %v1321_v11  ;;  %v1322_v19 = vmax.f32 %v1234_v12, 0.0 }
 0x125   : > { %v529_v24 = vld [vmem:[#allocation4 + $0x30] ss:$2 sm:$0xff]  ;;  %v545_v25 = vld [vmem:[#allocation4 + $0x31] ss:$2 sm:$0xff]  ;;  %v7055_v26 = vpop.f32.mrb[20].mxu1  ;;  %7195 = vmatprep.subr.bf16.mxu0 %v8079_v17 }
 0x126   : > { %v527_v29 = vld [vmem:[#allocation4 + $0x20] ss:$2 sm:$0xff]  ;;  %v543_v30 = vld [vmem:[#allocation4 + $0x21] ss:$2 sm:$0xff]  ;;  %v421_v33 = vadd.f32 %v7055_v26, %v8308_v5  ;;  %v412_v34 = vpop.f32.mrb[21].mxu1  ;;  %v557_v35 = vmax.f32 %v529_v24, %v545_v25  ;;  %v1320_v54 = vmax.f32 %v1226_v31, 0.0  ;;  %v8623_v25 = vmax.f32 %v1318_v10, %v1322_v19 }
 0x127   : > { %v413_v38 = vadd.f32 %v8308_v5, %v412_v34  ;;  %v7056_v39 = vpop.f32.mrb[22].mxu1  ;;  %v556_v40 = vmax.f32 %v527_v29, %v543_v30  ;;  %v7123_v26 = vpop.f32.mrb[16].mxu0 }
 0x128   : > { %v481_v41 = vmax.f32 %v421_v33, 0.0  ;;  %v424_v42 = vadd.f32 %v7056_v39, %v8308_v5  ;;  %v415_v43 = vpop.f32.mrb[23].mxu1  ;;  %565 = vst.msk [vmem:[#allocation2 + $0x50] sm:$0xff] %vm27_vm0, %v557_v35  ;;  %7196 = vmatpush3.bf16.msra.mxu0 %v8079_v17  ;;  %v1324_v17 = vmax.f32 %v1242_v62, 0.0  ;;  %v1246_v30 = vpop.f32.mrb[17].mxu0 }
 0x129   : > { %v479_v47 = vmax.f32 %v413_v38, 0.0  ;;  %v416_v48 = vadd.f32 %v8308_v5, %v415_v43  ;;  %564 = vst.msk [vmem:[#allocation2 + $0x48] sm:$0xff] %vm27_vm0, %v556_v40  ;;  %7213 = vmatprep.subr.bf16.mxu0 %v8598_v28  ;;  %v7124_v33 = vpop.f32.mrb[18].mxu0 }
 0x12a   : > { %v501_v52 = vmax.f32 %v477_v22, %v481_v41  ;;  %v482_v53 = vmax.f32 %v424_v42, 0.0  ;;  %v8621_v22 = vmax.f32 %v1320_v54, %v1324_v17  ;;  %v1249_v31 = vpop.f32.mrb[19].mxu0  ;;  %v1247_v41 = vadd.f32 %v8308_v5, %v1246_v30  ;;  %v8638_v54 = vld [vmem:[%s9610_s3] sm:$0xff]  }
 0x12b   : > { %v499_v57 = vmax.f32 %v475_v32, %v479_v47  ;;  %v480_v59 = vmax.f32 %v416_v48, 0.0  ;;  %v1258_v48 = vadd.f32 %v7124_v33, %v8308_v5  ;;  %v1250_v60 = vadd.f32 %v8308_v5, %v1249_v31  ;;  %v7127_v62 = vpop.f32.mrb[20].mxu0  ;;  %7373 = vmatprep.subr.bf16.mxu1 %v8638_v54 }
 0x12c   : > { %517 = vst.msk [vmem:[#allocation4 + $0x50] sm:$0xff] %vm27_vm0, %v501_v52  ;;  %v502_v0 = vmax.f32 %v478_v36, %v482_v53  ;;  %v1255_v36 = vadd.f32 %v7123_v26, %v8308_v5  ;;  %v1325_v10 = vmax.f32 %v1247_v41, 0.0  ;;  %v1271_v11 = vadd.f32 %v7127_v62, %v8308_v5  ;;  %v1262_v12 = vpop.f32.mrb[21].mxu0 }
 0x12d   : > { %515 = vst.msk [vmem:[#allocation4 + $0x40] sm:$0xff] %vm27_vm0, %v499_v57  ;;  %v500_v15 = vmax.f32 %v476_v37, %v480_v59  ;;  %v7059_v16 = vpop.f32.mrb[24].mxu1  ;;  %v1328_v17 = vmax.f32 %v1258_v48, 0.0  ;;  %v7128_v19 = vpop.f32.mrb[22].mxu0 }
 0x12e   : > { %518 = vst.msk [vmem:[#allocation4 + $0x58] sm:$0xff] %vm27_vm0, %v502_v0  ;;  %v428_v13 = vpop.f32.mrb[25].mxu1  ;;  %v437_v27 = vadd.f32 %v7059_v16, %v8308_v5  ;;  %v1327_v59 = vmax.f32 %v1255_v36, 0.0  ;;  %v1265_v26 = vpop.f32.mrb[23].mxu0 }
 0x12f   : > { %516 = vst.msk [vmem:[#allocation4 + $0x48] sm:$0xff] %vm27_vm0, %v500_v15  ;;  %v7060_v20 = vpop.f32.mrb[26].mxu1  ;;  %v1857_v21 = vld [vmem:[#allocation2 + $0x50] sm:$0xff]  ;;  %v429_v32 = vadd.f32 %v8308_v5, %v428_v13  ;;  %v1263_v13 = vadd.f32 %v8308_v5, %v1262_v12 }
 0x130   : > { %v431_v23 = vpop.f32.mrb[27].mxu1  ;;  %v1856_v24 = vld [vmem:[#allocation2 + $0x48] sm:$0xff]  ;;  %v440_v34 = vadd.f32 %v7060_v20, %v8308_v5  ;;  %v485_v39 = vmax.f32 %v437_v27, 0.0 }
 0x131   : > { %v1870_v29 = vpack.c.bf16 %v1857_v21, %v1856_v24  ;;  %v432_v35 = vadd.f32 %v8308_v5, %v431_v23  ;;  %v483_v44 = vmax.f32 %v429_v32, 0.0  ;;  %v1331_v23 = vmax.f32 %v1271_v11, 0.0 }
 0x132   : > { %v486_v49 = vmax.f32 %v440_v34, 0.0  ;;  %v1274_v24 = vadd.f32 %v7128_v19, %v8308_v5  ;;  %v1329_v30 = vmax.f32 %v1263_v13, 0.0  ;;  %v1266_v32 = vadd.f32 %v8308_v5, %v1265_v26 }
 0x133   : > { %7181 = vmatprep.mubr.msk.bf16.mxu0 %vm27_vm0, %v1870_v29  ;;  %v484_v50 = vmax.f32 %v432_v35, 0.0  ;;  %v1326_v29 = vmax.f32 %v1250_v60, 0.0  ;;  %v8652_v35 = vmax.f32 %v1327_v59, %v1331_v23 }
 0x134   : > { %v1332_v31 = vmax.f32 %v1274_v24, 0.0 }
 0x135   : > { %v533_v37 = vld [vmem:[#allocation4 + $0x50] ss:$2 sm:$0xff]  ;;  %v549_v38 = vld [vmem:[#allocation4 + $0x51] ss:$2 sm:$0xff]  ;;  %v7063_v40 = vpop.f32.mrb[28].mxu1 }
 0x136   : > { %v531_v42 = vld [vmem:[#allocation4 + $0x40] ss:$2 sm:$0xff]  ;;  %v547_v43 = vld [vmem:[#allocation4 + $0x41] ss:$2 sm:$0xff]  ;;  %v453_v45 = vadd.f32 %v7063_v40, %v8308_v5  ;;  %v444_v46 = vpop.f32.mrb[29].mxu1  ;;  %v559_v47 = vmax.f32 %v533_v37, %v549_v38  ;;  %v8655_v37 = vmax.f32 %v1325_v10, %v1329_v30  ;;  %v1330_v38 = vmax.f32 %v1266_v32, 0.0 }
 0x137   : > { %v445_v51 = vadd.f32 %v8308_v5, %v444_v46  ;;  %v7064_v52 = vpop.f32.mrb[30].mxu1  ;;  %v558_v53 = vmax.f32 %v531_v42, %v547_v43  ;;  %v8658_v41 = vmax.f32 %v1328_v17, %v1332_v31 }
 0x138   : > { %v489_v55 = vmax.f32 %v453_v45, 0.0  ;;  %v456_v56 = vadd.f32 %v7064_v52, %v8308_v5  ;;  %v447_v57 = vpop.f32.mrb[31].mxu1  ;;  %567 = vst.msk [vmem:[#allocation2 + $0x70] sm:$0xff] %vm27_vm0, %v559_v47  ;;  %v8662_v45 = vpop.f32.mrb[24].mxu0 }
 0x139   : > { %v487_v63 = vmax.f32 %v445_v51, 0.0  ;;  %v448_v0 = vadd.f32 %v8308_v5, %v447_v57  ;;  %566 = vst.msk [vmem:[#allocation2 + $0x68] sm:$0xff] %vm27_vm0, %v558_v53  ;;  %v8664_v47 = vpop.f32.mrb[25].mxu0 }
 0x13a   : > { %v505_v15 = vmax.f32 %v485_v39, %v489_v55  ;;  %v490_v16 = vmax.f32 %v456_v56, 0.0  ;;  %v8666_v48 = vpop.f32.mrb[26].mxu0 }
 0x13b   : > { %v503_v20 = vmax.f32 %v483_v44, %v487_v63  ;;  %v488_v21 = vmax.f32 %v448_v0, 0.0  ;;  %v8660_v44 = vmax.f32 %v1326_v29, %v1330_v38 }
 0x13c   : > { %521 = vst.msk [vmem:[#allocation4 + $0x70] sm:$0xff] %vm27_vm0, %v505_v15  ;;  %v506_v27 = vmax.f32 %v486_v49, %v490_v16  ;;  %v8669_v49 = vpop.f32.mrb[27].mxu0 }
 0x13d   : > { %519 = vst.msk [vmem:[#allocation4 + $0x60] sm:$0xff] %vm27_vm0, %v503_v20  ;;  %v504_v33 = vmax.f32 %v484_v50, %v488_v21  ;;  %v7071_v34 = vpop.f32.mrb[32].mxu1 }
 0x13e   : > { %522 = vst.msk [vmem:[#allocation4 + $0x78] sm:$0xff] %vm27_vm0, %v506_v27  ;;  %v764_v36 = vpop.f32.mrb[33].mxu1  ;;  %v773_v50 = vadd.f32 %v7071_v34, %v8308_v5 }
 0x13f   : > { %520 = vst.msk [vmem:[#allocation4 + $0x68] sm:$0xff] %vm27_vm0, %v504_v33  ;;  %v7072_v39 = vpop.f32.mrb[34].mxu1  ;;  %v1859_v40 = vld [vmem:[#allocation2 + $0x70] sm:$0xff]  ;;  %v765_v53 = vadd.f32 %v8308_v5, %v764_v36 }
 0x140   : > { %v767_v42 = vpop.f32.mrb[35].mxu1  ;;  %v1858_v43 = vld [vmem:[#allocation2 + $0x68] sm:$0xff]  ;;  %v776_v59 = vadd.f32 %v7072_v39, %v8308_v5  ;;  %v893_v15 = vmax.f32 %v773_v50, 0.0 }
 0x141   : > { %v1871_v46 = vpack.c.bf16 %v1859_v40, %v1858_v43  ;;  %v768_v0 = vadd.f32 %v8308_v5, %v767_v42  ;;  %v891_v19 = vmax.f32 %v765_v53, 0.0 }
 0x142   : > { %v894_v23 = vmax.f32 %v776_v59, 0.0 }
 0x143   : > { %7182 = vmatmul.mubr.msk.bf16.gmra.mrb[32].mxu0 %vm27_vm0, %v1871_v46  ;;  %v892_v27 = vmax.f32 %v768_v0, 0.0 }
 0x145   : > { %v537_v51 = vld [vmem:[#allocation4 + $0x70] ss:$2 sm:$0xff]  ;;  %v553_v52 = vld [vmem:[#allocation4 + $0x71] ss:$2 sm:$0xff]  ;;  %v7075_v55 = vpop.f32.mrb[36].mxu1 }
 0x146   : > { %v535_v56 = vld [vmem:[#allocation4 + $0x60] ss:$2 sm:$0xff]  ;;  %v551_v57 = vld [vmem:[#allocation4 + $0x61] ss:$2 sm:$0xff]  ;;  %v789_v60 = vadd.f32 %v7075_v55, %v8308_v5  ;;  %v780_v62 = vpop.f32.mrb[37].mxu1  ;;  %v561_v63 = vmax.f32 %v537_v51, %v553_v52 }
 0x147   : > { %v781_v10 = vadd.f32 %v8308_v5, %v780_v62  ;;  %v7076_v11 = vpop.f32.mrb[38].mxu1  ;;  %v560_v12 = vmax.f32 %v535_v56, %v551_v57 }
 0x148   : > { %v897_v16 = vmax.f32 %v789_v60, 0.0  ;;  %v792_v17 = vadd.f32 %v7076_v11, %v8308_v5  ;;  %v783_v13 = vpop.f32.mrb[39].mxu1  ;;  %569 = vst.msk [vmem:[#allocation2 + $0x90] sm:$0xff] %vm27_vm0, %v561_v63 }
 0x149   : > { %v895_v20 = vmax.f32 %v781_v10, 0.0  ;;  %v784_v21 = vadd.f32 %v8308_v5, %v783_v13  ;;  %568 = vst.msk [vmem:[#allocation2 + $0x88] sm:$0xff] %vm27_vm0, %v560_v12 }
 0x14a   : > { %v925_v24 = vmax.f32 %v893_v15, %v897_v16  ;;  %v898_v26 = vmax.f32 %v792_v17, 0.0 }
 0x14b   : > { %v923_v29 = vmax.f32 %v891_v19, %v895_v20  ;;  %v896_v30 = vmax.f32 %v784_v21, 0.0 }
 0x14c   : > { %941 = vst.msk [vmem:[#allocation4 + $0x10] sm:$0xff] %vm27_vm0, %v925_v24  ;;  %v926_v32 = vmax.f32 %v894_v23, %v898_v26 }
 0x14d   : > { %939 = vst.msk [vmem:[#allocation4] sm:$0xff] %vm27_vm0, %v923_v29  ;;  %v924_v33 = vmax.f32 %v892_v27, %v896_v30  ;;  %v7079_v34 = vpop.f32.mrb[40].mxu1 }
 0x14e   : > { %942 = vst.msk [vmem:[#allocation4 + $0x18] sm:$0xff] %vm27_vm0, %v926_v32  ;;  %v796_v31 = vpop.f32.mrb[41].mxu1  ;;  %v805_v43 = vadd.f32 %v7079_v34, %v8308_v5 }
 0x14f   : > { %940 = vst.msk [vmem:[#allocation4 + $0x8] sm:$0xff] %vm27_vm0, %v924_v33  ;;  %v7080_v36 = vpop.f32.mrb[42].mxu1  ;;  %v1861_v38 = vld [vmem:[#allocation2 + $0x90] sm:$0xff]  ;;  %v797_v51 = vadd.f32 %v8308_v5, %v796_v31 }
 0x150   : > { %v799_v39 = vpop.f32.mrb[43].mxu1  ;;  %v1860_v40 = vld [vmem:[#allocation2 + $0x88] sm:$0xff]  ;;  %v808_v56 = vadd.f32 %v7080_v36, %v8308_v5  ;;  %v901_v11 = vmax.f32 %v805_v43, 0.0 }
 0x151   : > { %v1872_v42 = vpack.c.bf16 %v1861_v38, %v1860_v40  ;;  %v800_v62 = vadd.f32 %v8308_v5, %v799_v39 }
 0x152   : > { %v902_v13 = vmax.f32 %v808_v56, 0.0 }
 0x153   : > { %7185 = vmatprep.mubr.msk.bf16.mxu0 %vm27_vm0, %v1872_v42 }
 0x155   : > { %v956_v46 = vld [vmem:[#allocation4 + $0x10] ss:$2 sm:$0xff]  ;;  %v964_v50 = vld [vmem:[#allocation4 + $0x11] ss:$2 sm:$0xff]  ;;  %v7083_v52 = vpop.f32.mrb[44].mxu1 }
 0x156   : > { %v955_v53 = vld [vmem:[#allocation4] ss:$2 sm:$0xff]  ;;  %v963_v55 = vld [vmem:[#allocation4 + $0x1] ss:$2 sm:$0xff]  ;;  %v821_v57 = vadd.f32 %v7083_v52, %v8308_v5  ;;  %v812_v59 = vpop.f32.mrb[45].mxu1  ;;  %v972_v60 = vmax.f32 %v956_v46, %v964_v50  ;;  %1359 = vst.msk [vmem:[#allocation4 + $0x10] sm:$0xff] %vm27_vm0, %v8574_v58 }
 0x157   : > { %1360 = vst.msk [vmem:[#allocation4 + $0x18] sm:$0xff] %vm27_vm0, %v8580_v9  ;;  %v813_v63 = vadd.f32 %v8308_v5, %v812_v59  ;;  %v7084_v0 = vpop.f32.mrb[46].mxu1  ;;  %v971_v10 = vmax.f32 %v955_v53, %v963_v55  ;;  %1357 = vst.msk [vmem:[#allocation4] sm:$0xff] %vm27_vm0, %v8577_v61  ;;  %v899_v9 = vmax.f32 %v797_v51, 0.0  ;;  %v900_v61 = vmax.f32 %v800_v62, 0.0 }
 0x158   : > { %1358 = vst.msk [vmem:[#allocation4 + $0x8] sm:$0xff] %vm27_vm0, %v8583_v14  ;;  %v905_v12 = vmax.f32 %v821_v57, 0.0  ;;  %v824_v15 = vadd.f32 %v7084_v0, %v8308_v5  ;;  %v815_v58 = vpop.f32.mrb[47].mxu1  ;;  %981 = vst.msk [vmem:[#allocation2 + $0xb0] sm:$0xff] %vm27_vm0, %v972_v60 }
 0x159   : > { %v903_v16 = vmax.f32 %v813_v63, 0.0  ;;  %v816_v17 = vadd.f32 %v8308_v5, %v815_v58  ;;  %980 = vst.msk [vmem:[#allocation2 + $0xa8] sm:$0xff] %vm27_vm0, %v971_v10 }
 0x15a   : > { %v929_v19 = vmax.f32 %v901_v11, %v905_v12  ;;  %v906_v20 = vmax.f32 %v824_v15, 0.0 }
 0x15b   : > { %v927_v21 = vmax.f32 %v899_v9, %v903_v16  ;;  %v904_v23 = vmax.f32 %v816_v17, 0.0 }
 0x15c   : > { %945 = vst.msk [vmem:[#allocation4 + $0x30] sm:$0xff] %vm27_vm0, %v929_v19  ;;  %v930_v14 = vmax.f32 %v902_v13, %v906_v20 }
 0x15d   : > { %943 = vst.msk [vmem:[#allocation4 + $0x20] sm:$0xff] %vm27_vm0, %v927_v21  ;;  %v928_v24 = vmax.f32 %v900_v61, %v904_v23  ;;  %v7087_v26 = vpop.f32.mrb[48].mxu1 }
 0x15e   : > { %v1374_v27 = vld [vmem:[#allocation4 + $0x10] ss:$2 sm:$0xff]  ;;  %v1382_v29 = vld [vmem:[#allocation4 + $0x11] ss:$2 sm:$0xff]  ;;  %946 = vst.msk [vmem:[#allocation4 + $0x38] sm:$0xff] %vm27_vm0, %v930_v14  ;;  %v828_v30 = vpop.f32.mrb[49].mxu1  ;;  %v837_v43 = vadd.f32 %v7087_v26, %v8308_v5 }
 0x15f   : > { %v1373_v32 = vld [vmem:[#allocation4] ss:$2 sm:$0xff]  ;;  %v1381_v33 = vld [vmem:[#allocation4 + $0x1] ss:$2 sm:$0xff]  ;;  %v1390_v34 = vmax.f32 %v1374_v27, %v1382_v29  ;;  %944 = vst.msk [vmem:[#allocation4 + $0x28] sm:$0xff] %vm27_vm0, %v928_v24  ;;  %v7088_v31 = vpop.f32.mrb[50].mxu1  ;;  %v829_v46 = vadd.f32 %v8308_v5, %v828_v30 }
 0x160   : > { %v1863_v36 = vld [vmem:[#allocation2 + $0xb0] sm:$0xff]  ;;  %v1389_v38 = vmax.f32 %v1373_v32, %v1381_v33  ;;  %v831_v39 = vpop.f32.mrb[51].mxu1  ;;  %v1862_v40 = vld [vmem:[#allocation2 + $0xa8] sm:$0xff]  ;;  %v840_v53 = vadd.f32 %v7088_v31, %v8308_v5  ;;  %v909_v11 = vmax.f32 %v837_v43, 0.0 }
 0x161   : > { %1399 = vst.msk [vmem:[#allocation2 + $0x130] sm:$0xff] %vm27_vm0, %v1390_v34  ;;  %v1873_v42 = vpack.c.bf16 %v1863_v36, %v1862_v40  ;;  %v832_v62 = vadd.f32 %v8308_v5, %v831_v39 }
 0x162   : > { %1398 = vst.msk [vmem:[#allocation2 + $0x128] sm:$0xff] %vm27_vm0, %v1389_v38  ;;  %v910_v16 = vmax.f32 %v840_v53, 0.0 }
 0x163   : > { %7186 = vmatmul.mubr.msk.bf16.gmra.mrb[36].mxu0 %vm27_vm0, %v1873_v42 }
 0x165   : > { %v7091_v50 = vpop.f32.mrb[52].mxu1  ;;  %v958_v51 = vld [vmem:[#allocation4 + $0x30] ss:$2 sm:$0xff]  ;;  %v966_v52 = vld [vmem:[#allocation4 + $0x31] ss:$2 sm:$0xff] }
 0x166   : > { %v853_v55 = vadd.f32 %v7091_v50, %v8308_v5  ;;  %v844_v56 = vpop.f32.mrb[53].mxu1  ;;  %v974_v57 = vmax.f32 %v958_v51, %v966_v52  ;;  %1363 = vst.msk [vmem:[#allocation4 + $0x30] sm:$0xff] %vm27_vm0, %v8615_v8  ;;  %v957_v59 = vld [vmem:[#allocation4 + $0x20] ss:$2 sm:$0xff]  ;;  %v965_v60 = vld [vmem:[#allocation4 + $0x21] ss:$2 sm:$0xff] }
 0x167   : > { %1364 = vst.msk [vmem:[#allocation4 + $0x38] sm:$0xff] %vm27_vm0, %v8621_v22  ;;  %v845_v63 = vadd.f32 %v8308_v5, %v844_v56  ;;  %v7092_v0 = vpop.f32.mrb[54].mxu1  ;;  %v973_v10 = vmax.f32 %v957_v59, %v965_v60  ;;  %1361 = vst.msk [vmem:[#allocation4 + $0x20] sm:$0xff] %vm27_vm0, %v8618_v18  ;;  %v907_v22 = vmax.f32 %v829_v46, 0.0  ;;  %v908_v18 = vmax.f32 %v832_v62, 0.0 }
 0x168   : > { %1362 = vst.msk [vmem:[#allocation4 + $0x28] sm:$0xff] %vm27_vm0, %v8623_v25  ;;  %v913_v12 = vmax.f32 %v853_v55, 0.0  ;;  %v856_v8 = vadd.f32 %v7092_v0, %v8308_v5  ;;  %v847_v15 = vpop.f32.mrb[55].mxu1  ;;  %983 = vst.msk [vmem:[#allocation2 + $0xd0] sm:$0xff] %vm27_vm0, %v974_v57 }
 0x169   : > { %v911_v58 = vmax.f32 %v845_v63, 0.0  ;;  %v848_v9 = vadd.f32 %v8308_v5, %v847_v15  ;;  %982 = vst.msk [vmem:[#allocation2 + $0xc8] sm:$0xff] %vm27_vm0, %v973_v10 }
 0x16a   : > { %v933_v17 = vmax.f32 %v909_v11, %v913_v12  ;;  %v914_v13 = vmax.f32 %v856_v8, 0.0 }
 0x16b   : > { %v931_v19 = vmax.f32 %v907_v22, %v911_v58  ;;  %v912_v20 = vmax.f32 %v848_v9, 0.0  ;;  %v1279_v9 = vadd.f32 %v8308_v5, %v8664_v47 }
 0x16c   : > { %949 = vst.msk [vmem:[#allocation4 + $0x50] sm:$0xff] %vm27_vm0, %v933_v17  ;;  %v934_v25 = vmax.f32 %v910_v16, %v914_v13  ;;  %v1290_v17 = vadd.f32 %v8666_v48, %v8308_v5  ;;  %v1824_v13 = vld [vmem:[#allocation2 + $0x7] sm:$0xff] }
 0x16d   : > { %947 = vst.msk [vmem:[#allocation4 + $0x40] sm:$0xff] %vm27_vm0, %v931_v19  ;;  %v932_v61 = vmax.f32 %v908_v18, %v912_v20  ;;  %v7095_v21 = vpop.f32.mrb[56].mxu1  ;;  %v1825_v20 = vld [vmem:[#allocation2 + $0xf] sm:$0xff] }
 0x16e   : > { %v1376_v23 = vld [vmem:[#allocation4 + $0x30] ss:$2 sm:$0xff]  ;;  %v1384_v14 = vld [vmem:[#allocation4 + $0x31] ss:$2 sm:$0xff]  ;;  %950 = vst.msk [vmem:[#allocation4 + $0x58] sm:$0xff] %vm27_vm0, %v934_v25  ;;  %v860_v24 = vpop.f32.mrb[57].mxu1  ;;  %v869_v38 = vadd.f32 %v7095_v21, %v8308_v5 }
 0x16f   : > { %v1375_v26 = vld [vmem:[#allocation4 + $0x20] ss:$2 sm:$0xff]  ;;  %v1383_v27 = vld [vmem:[#allocation4 + $0x21] ss:$2 sm:$0xff]  ;;  %v1392_v29 = vmax.f32 %v1376_v23, %v1384_v14  ;;  %948 = vst.msk [vmem:[#allocation4 + $0x48] sm:$0xff] %vm27_vm0, %v932_v61  ;;  %v7096_v30 = vpop.f32.mrb[58].mxu1  ;;  %v861_v39 = vadd.f32 %v8308_v5, %v860_v24 }
 0x170   : > { %v1865_v32 = vld [vmem:[#allocation2 + $0xd0] sm:$0xff]  ;;  %v1391_v33 = vmax.f32 %v1375_v26, %v1383_v27  ;;  %v863_v34 = vpop.f32.mrb[59].mxu1  ;;  %v1864_v31 = vld [vmem:[#allocation2 + $0xc8] sm:$0xff]  ;;  %v872_v46 = vadd.f32 %v7096_v30, %v8308_v5  ;;  %v917_v62 = vmax.f32 %v869_v38, 0.0  ;;  %v1333_v26 = vmax.f32 %v1279_v9, 0.0 }
 0x171   : > { %1401 = vst.msk [vmem:[#allocation2 + $0x150] sm:$0xff] %vm27_vm0, %v1392_v29  ;;  %v1874_v36 = vpack.c.bf16 %v1865_v32, %v1864_v31  ;;  %v864_v56 = vadd.f32 %v8308_v5, %v863_v34  ;;  %v1840_v38 = vpack.c.bf16 %v1825_v20, %v1824_v13  ;;  %v1831_v9 = vld [vmem:[#allocation2 + $0x6f] sm:$0xff]  ;;  %v1832_v13 = vld [vmem:[#allocation2 + $0x87] sm:$0xff] }
 0x172   : > { %1400 = vst.msk [vmem:[#allocation2 + $0x148] sm:$0xff] %vm27_vm0, %v1391_v33  ;;  %v918_v12 = vmax.f32 %v872_v46, 0.0  ;;  %v1336_v33 = vmax.f32 %v1290_v17, 0.0 }
 0x173   : > { %7189 = vmatprep.mubr.msk.bf16.mxu0 %vm27_vm0, %v1874_v36 }
 0x175   : > { %v7099_v40 = vpop.f32.mrb[60].mxu1  ;;  %v960_v42 = vld [vmem:[#allocation4 + $0x50] ss:$2 sm:$0xff]  ;;  %v968_v43 = vld [vmem:[#allocation4 + $0x51] ss:$2 sm:$0xff] }
 0x176   : > { %v885_v50 = vadd.f32 %v7099_v40, %v8308_v5  ;;  %v876_v51 = vpop.f32.mrb[61].mxu1  ;;  %v976_v52 = vmax.f32 %v960_v42, %v968_v43  ;;  %1367 = vst.msk [vmem:[#allocation4 + $0x50] sm:$0xff] %vm27_vm0, %v8652_v35  ;;  %v959_v53 = vld [vmem:[#allocation4 + $0x40] ss:$2 sm:$0xff]  ;;  %v967_v55 = vld [vmem:[#allocation4 + $0x41] ss:$2 sm:$0xff] }
 0x177   : > { %1368 = vst.msk [vmem:[#allocation4 + $0x58] sm:$0xff] %vm27_vm0, %v8658_v41  ;;  %v877_v57 = vadd.f32 %v8308_v5, %v876_v51  ;;  %v7100_v59 = vpop.f32.mrb[62].mxu1  ;;  %v975_v60 = vmax.f32 %v959_v53, %v967_v55  ;;  %1365 = vst.msk [vmem:[#allocation4 + $0x40] sm:$0xff] %vm27_vm0, %v8655_v37  ;;  %v915_v41 = vmax.f32 %v861_v39, 0.0  ;;  %v1287_v37 = vadd.f32 %v8662_v45, %v8308_v5 }
 0x178   : > { %1366 = vst.msk [vmem:[#allocation4 + $0x48] sm:$0xff] %vm27_vm0, %v8660_v44  ;;  %v921_v63 = vmax.f32 %v885_v50, 0.0  ;;  %v888_v35 = vadd.f32 %v7100_v59, %v8308_v5  ;;  %v879_v0 = vpop.f32.mrb[63].mxu1  ;;  %985 = vst.msk [vmem:[#allocation2 + $0xf0] sm:$0xff] %vm27_vm0, %v976_v52  ;;  %v916_v44 = vmax.f32 %v864_v56, 0.0  ;;  %v1282_v45 = vadd.f32 %v8308_v5, %v8669_v49 }
 0x179   : > { %v919_v10 = vmax.f32 %v877_v57, 0.0  ;;  %v880_v11 = vadd.f32 %v8308_v5, %v879_v0  ;;  %984 = vst.msk [vmem:[#allocation2 + $0xe8] sm:$0xff] %vm27_vm0, %v975_v60  ;;  %v1335_v47 = vmax.f32 %v1287_v37, 0.0  ;;  %v1826_v60 = vld [vmem:[#allocation2 + $0x27] sm:$0xff] }
 0x17a   : > { %v937_v8 = vmax.f32 %v917_v62, %v921_v63  ;;  %v922_v15 = vmax.f32 %v888_v35, 0.0  ;;  %v1334_v40 = vmax.f32 %v1282_v45, 0.0 }
 0x17b   : > { %v935_v22 = vmax.f32 %v915_v41, %v919_v10  ;;  %v920_v58 = vmax.f32 %v880_v11, 0.0  ;;  %v1827_v41 = vld [vmem:[#allocation2 + $0x2f] sm:$0xff] }
 0x17c   : > { %953 = vst.msk [vmem:[#allocation4 + $0x70] sm:$0xff] %vm27_vm0, %v937_v8  ;;  %v938_v16 = vmax.f32 %v918_v12, %v922_v15  ;;  %v1828_v12 = vld [vmem:[#allocation2 + $0x47] sm:$0xff]  ;;  %v1829_v8 = vld [vmem:[#allocation2 + $0x4f] sm:$0xff]  ;;  %v8783_v37 = vpack.c.bf16 %v1827_v41, %v1826_v60 }
 0x17d   : > { %951 = vst.msk [vmem:[#allocation4 + $0x60] sm:$0xff] %vm27_vm0, %v935_v22  ;;  %v936_v18 = vmax.f32 %v916_v44, %v920_v58  ;;  %v7135_v19 = vpop.f32.mrb[64].mxu1  ;;  %v8082_v44 = vld [vmem:[%s9610_s3 + $0x28] sm:$0xff]   ;;  %v8788_v22 = vpack.c.bf16 %v1829_v8, %v1828_v12 }
 0x17e   : > { %v1378_v25 = vld [vmem:[#allocation4 + $0x50] ss:$2 sm:$0xff]  ;;  %v1386_v61 = vld [vmem:[#allocation4 + $0x51] ss:$2 sm:$0xff]  ;;  %954 = vst.msk [vmem:[#allocation4 + $0x78] sm:$0xff] %vm27_vm0, %v938_v16  ;;  %v1303_v21 = vadd.f32 %v7135_v19, %v8308_v5  ;;  %v1294_v23 = vpop.f32.mrb[65].mxu1 }
 0x17f   : > { %v1377_v14 = vld [vmem:[#allocation4 + $0x40] ss:$2 sm:$0xff]  ;;  %v1385_v24 = vld [vmem:[#allocation4 + $0x41] ss:$2 sm:$0xff]  ;;  %v1394_v48 = vmax.f32 %v1378_v25, %v1386_v61  ;;  %952 = vst.msk [vmem:[#allocation4 + $0x68] sm:$0xff] %vm27_vm0, %v936_v18  ;;  %v1295_v27 = vadd.f32 %v8308_v5, %v1294_v23  ;;  %v7136_v29 = vpop.f32.mrb[66].mxu1 }
 0x180   : > { %v1867_v30 = vld [vmem:[#allocation2 + $0xf0] sm:$0xff]  ;;  %v1393_v49 = vmax.f32 %v1377_v14, %v1385_v24  ;;  %v1339_v32 = vmax.f32 %v1303_v21, 0.0  ;;  %v1306_v34 = vadd.f32 %v7136_v29, %v8308_v5  ;;  %v1297_v31 = vpop.f32.mrb[67].mxu1  ;;  %v1866_v36 = vld [vmem:[#allocation2 + $0xe8] sm:$0xff] }
 0x181   : > { %1403 = vst.msk [vmem:[#allocation2 + $0x170] sm:$0xff] %vm27_vm0, %v1394_v48  ;;  %v1337_v39 = vmax.f32 %v1295_v27, 0.0  ;;  %v1298_v42 = vadd.f32 %v8308_v5, %v1297_v31  ;;  %v8771_v43 = vpack.c.bf16 %v1867_v30, %v1866_v36  ;;  %v1830_v58 = vld [vmem:[#allocation2 + $0x67] sm:$0xff]  ;;  %v8795_v16 = vld [vmem:[%s9610_s3 + $0x30] sm:$0xff]  }
 0x182   : > { %1402 = vst.msk [vmem:[#allocation2 + $0x168] sm:$0xff] %vm27_vm0, %v1393_v49  ;;  %v1355_v46 = vmax.f32 %v1335_v47, %v1339_v32  ;;  %v1340_v50 = vmax.f32 %v1306_v34, 0.0  ;;  %v1833_v18 = vld [vmem:[#allocation2 + $0x8f] sm:$0xff]  ;;  %v8804_v24 = vpack.c.bf16 %v1831_v9, %v1830_v58  ;;  %v8838_v58 = vld [vmem:[%s9610_s3 + $0x20] sm:$0xff]  }
 0x183   : > { %v1353_v51 = vmax.f32 %v1333_v26, %v1337_v39  ;;  %v1338_v52 = vmax.f32 %v1298_v42, 0.0  ;;  %7190 = vmatmul.mubr.msk.bf16.gmra.mrb[40].mxu0 %vm27_vm0, %v8771_v43  ;;  %v3497_v19 = vld [vmem:[#allocation2 + $0x150] sm:$0xff]  ;;  %v3496_v25 = vld [vmem:[#allocation2 + $0x148] sm:$0xff]  ;;  %v8808_v32 = vpack.c.bf16 %v1833_v18, %v1832_v13 }
 0x184   : > { %v1356_v53 = vmax.f32 %v1336_v33, %v1340_v50  ;;  %7197 = vmatprep.mubr.msk.bf16.mxu0 %vm27_vm0, %v1840_v38  ;;  %v3494_v33 = vld [vmem:[#allocation2 + $0x128] sm:$0xff]  ;;  %v3495_v34 = vld [vmem:[#allocation2 + $0x130] sm:$0xff] }
 0x185   : > { %v962_v55 = vld [vmem:[#allocation4 + $0x70] ss:$2 sm:$0xff]  ;;  %v970_v56 = vld [vmem:[#allocation4 + $0x71] ss:$2 sm:$0xff]  ;;  %v1354_v57 = vmax.f32 %v1334_v40, %v1338_v52  ;;  %v7143_v59 = vpop.f32.mrb[68].mxu1 }
 0x186   : > { %v978_v62 = vmax.f32 %v962_v55, %v970_v56  ;;  %1371 = vst.msk [vmem:[#allocation4 + $0x70] sm:$0xff] %vm27_vm0, %v1355_v46  ;;  %v961_v63 = vld [vmem:[#allocation4 + $0x60] ss:$2 sm:$0xff]  ;;  %v969_v35 = vld [vmem:[#allocation4 + $0x61] ss:$2 sm:$0xff]  ;;  %1372 = vst.msk [vmem:[#allocation4 + $0x78] sm:$0xff] %vm27_vm0, %v1356_v53  ;;  %v1609_v17 = vadd.f32 %v7143_v59, %v8308_v5  ;;  %v8811_v46 = vpack.c.bf16 %v3497_v19, %v3496_v25 }
 0x187   : > { %v1600_v0 = vpop.f32.mrb[69].mxu1  ;;  %v977_v10 = vmax.f32 %v961_v63, %v969_v35  ;;  %1369 = vst.msk [vmem:[#allocation4 + $0x60] sm:$0xff] %vm27_vm0, %v1353_v51  ;;  %1370 = vst.msk [vmem:[#allocation4 + $0x68] sm:$0xff] %vm27_vm0, %v1354_v57  ;;  %v3509_v59 = vpack.c.bf16 %v3495_v34, %v3494_v33  ;;  %v8085_v60 = vld [vmem:[%s9610_s3 + $0x8] sm:$0xff]  }
 0x188   : > { %v7144_v11 = vpop.f32.mrb[70].mxu1  ;;  %987 = vst.msk [vmem:[#allocation2 + $0x110] sm:$0xff] %vm27_vm0, %v978_v62  ;;  %v1601_v45 = vadd.f32 %v8308_v5, %v1600_v0  ;;  %v1729_v36 = vmax.f32 %v1609_v17, 0.0  ;;  %v3499_v12 = vld [vmem:[#allocation2 + $0x170] sm:$0xff]  ;;  %v1836_v17 = vld [vmem:[#allocation2 + $0xc7] sm:$0xff] }
 0x189   : > { %v1603_v15 = vpop.f32.mrb[71].mxu1  ;;  %986 = vst.msk [vmem:[#allocation2 + $0x108] sm:$0xff] %vm27_vm0, %v977_v10  ;;  %v1612_v21 = vadd.f32 %v7144_v11, %v8308_v5  ;;  %v3498_v11 = vld [vmem:[#allocation2 + $0x168] sm:$0xff] }
 0x18a   : > { %v1604_v29 = vadd.f32 %v8308_v5, %v1603_v15  ;;  %v1727_v50 = vmax.f32 %v1601_v45, 0.0  ;;  %v1834_v15 = vld [vmem:[#allocation2 + $0xa7] sm:$0xff]  ;;  %v1837_v13 = vld [vmem:[#allocation2 + $0xcf] sm:$0xff]  ;;  %v8841_v19 = vpack.c.bf16 %v3499_v12, %v3498_v11 }
 0x18b   : > { %7198 = vmatmul.mubr.msk.bf16.vlgmr.msra.gmra.mrb[28].mxu0 %vm27_vm0, %v8783_v37  ;;  %v1730_v55 = vmax.f32 %v1612_v21, 0.0  ;;  %v8845_v25 = vpack.c.bf16 %v1837_v13, %v1836_v17  ;;  %v2146_v21 = vld [vmem:[#allocation2 + $0x9] sm:$0xff]  ;;  %v2149_v17 = vld [vmem:[#allocation2 + $0x31] sm:$0xff] }
 0x18c   : > { %7201 = vmatprep.mubr.msk.bf16.mxu0 %vm27_vm0, %v8788_v22  ;;  %7214 = vmatpush3.bf16.msra.mxu0 %v8598_v28  ;;  %v1728_v62 = vmax.f32 %v1604_v29, 0.0  ;;  %v1839_v33 = vld [vmem:[#allocation2 + $0xef] sm:$0xff] }
 0x18d   : > { %v7147_v20 = vpop.f32.mrb[72].mxu1  ;;  %v1380_v61 = vld [vmem:[#allocation4 + $0x70] ss:$2 sm:$0xff]  ;;  %v1388_v47 = vld [vmem:[#allocation4 + $0x71] ss:$2 sm:$0xff]  ;;  %7215 = vmatprep.subr.bf16.mxu0 %v8082_v44 }
 0x18e   : > { %v1625_v23 = vadd.f32 %v7147_v20, %v8308_v5  ;;  %v1616_v14 = vpop.f32.mrb[73].mxu1  ;;  %v1379_v48 = vld [vmem:[#allocation4 + $0x60] ss:$2 sm:$0xff]  ;;  %v1387_v26 = vld [vmem:[#allocation4 + $0x61] ss:$2 sm:$0xff]  ;;  %v1396_v27 = vmax.f32 %v1380_v61, %v1388_v47 }
 0x18f   : > { %v1617_v28 = vadd.f32 %v8308_v5, %v1616_v14  ;;  %v7148_v30 = vpop.f32.mrb[74].mxu1  ;;  %v3493_v49 = vld [vmem:[#allocation2 + $0x110] sm:$0xff]  ;;  %v1395_v31 = vmax.f32 %v1379_v48, %v1387_v26  ;;  %v1838_v26 = vld [vmem:[#allocation2 + $0xe7] sm:$0xff] }
 0x190   : > { %v1733_v38 = vmax.f32 %v1625_v23, 0.0  ;;  %v1628_v39 = vadd.f32 %v7148_v30, %v8308_v5  ;;  %v1619_v40 = vpop.f32.mrb[75].mxu1  ;;  %v3492_v42 = vld [vmem:[#allocation2 + $0x108] sm:$0xff]  ;;  %1405 = vst.msk [vmem:[#allocation2 + $0x190] sm:$0xff] %vm27_vm0, %v1396_v27  ;;  %7216 = vmatpush3.bf16.msra.mxu0 %v8082_v44  ;;  %v2147_v23 = vld [vmem:[#allocation2 + $0x11] sm:$0xff] }
 0x191   : > { %v1731_v51 = vmax.f32 %v1617_v28, 0.0  ;;  %v1620_v52 = vadd.f32 %v8308_v5, %v1619_v40  ;;  %v8815_v53 = vpack.c.bf16 %v3493_v49, %v3492_v42  ;;  %1404 = vst.msk [vmem:[#allocation2 + $0x188] sm:$0xff] %vm27_vm0, %v1395_v31  ;;  %7233 = vmatprep.subr.bf16.mxu0 %v8795_v16  ;;  %v1835_v44 = vld [vmem:[#allocation2 + $0xaf] sm:$0xff] }
 0x192   : > { %v1761_v56 = vmax.f32 %v1729_v36, %v1733_v38  ;;  %v1734_v57 = vmax.f32 %v1628_v39, 0.0  ;;  %v8843_v20 = vpack.c.bf16 %v1835_v44, %v1834_v15 }
 0x193   : > { %v1759_v63 = vmax.f32 %v1727_v50, %v1731_v51  ;;  %v1732_v35 = vmax.f32 %v1620_v52, 0.0  ;;  %7202 = vmatmul.mubr.msk.bf16.gmra.mrb[32].mxu0 %vm27_vm0, %v8804_v24  ;;  %7357 = vmatprep.mubr.msk.bf16.mxu1 %vm27_vm0, %v8815_v53 }
 0x194   : > { %1777 = vst.msk [vmem:[#allocation4 + $0x10] sm:$0xff] %vm27_vm0, %v1761_v56  ;;  %v1762_v0 = vmax.f32 %v1730_v55, %v1734_v57  ;;  %7205 = vmatprep.mubr.msk.bf16.mxu0 %vm27_vm0, %v8808_v32  ;;  %7358 = vmatmul.mubr.msk.bf16.vlgmr.msra.gmra.mrb[100].mxu1 %vm27_vm0, %v3509_v59  ;;  %v2162_v56 = vpack.c.bf16 %v2147_v23, %v2146_v21 }
 0x195   : > { %1775 = vst.msk [vmem:[#allocation4] sm:$0xff] %vm27_vm0, %v1759_v63  ;;  %v1760_v41 = vmax.f32 %v1728_v62, %v1732_v35  ;;  %v7151_v10 = vpop.f32.mrb[76].mxu1  ;;  %7361 = vmatprep.mubr.msk.bf16.mxu1 %vm27_vm0, %v8811_v46  ;;  %7374 = vmatpush3.bf16.msra.mxu1 %v8638_v54  ;;  %v8867_v62 = vpack.c.bf16 %v1839_v33, %v1838_v26 }
 0x196   : > { %1778 = vst.msk [vmem:[#allocation4 + $0x18] sm:$0xff] %vm27_vm0, %v1762_v0  ;;  %v1632_v8 = vpop.f32.mrb[77].mxu1  ;;  %7375 = vmatprep.subr.bf16.mxu1 %v8085_v60  ;;  %v1641_v47 = vadd.f32 %v7151_v10, %v8308_v5 }
 0x197   : > { %1776 = vst.msk [vmem:[#allocation4 + $0x8] sm:$0xff] %vm27_vm0, %v1760_v41  ;;  %v7152_v9 = vpop.f32.mrb[78].mxu1  ;;  %v3501_v45 = vld [vmem:[#allocation2 + $0x190] sm:$0xff]  ;;  %v1633_v14 = vadd.f32 %v8308_v5, %v1632_v8 }
 0x198   : > { %v1635_v18 = vpop.f32.mrb[79].mxu1  ;;  %v3500_v54 = vld [vmem:[#allocation2 + $0x188] sm:$0xff]  ;;  %v1644_v28 = vadd.f32 %v7152_v9, %v8308_v5  ;;  %v1737_v50 = vmax.f32 %v1641_v47, 0.0 }
 0x199   : > { %7376 = vmatpush3.bf16.msra.mxu1 %v8085_v60  ;;  %v8850_v61 = vpack.c.bf16 %v3501_v45, %v3500_v54  ;;  %v1636_v38 = vadd.f32 %v8308_v5, %v1635_v18  ;;  %v1735_v57 = vmax.f32 %v1633_v14, 0.0  ;;  %v2148_v9 = vld [vmem:[#allocation2 + $0x29] sm:$0xff]  ;;  %v2151_v45 = vld [vmem:[#allocation2 + $0x51] sm:$0xff] }
 0x19a   : > { %7393 = vmatprep.subr.bf16.mxu1 %v8838_v58  ;;  %v1738_v63 = vmax.f32 %v1644_v28, 0.0  ;;  %v2150_v54 = vld [vmem:[#allocation2 + $0x49] sm:$0xff]  ;;  %v8877_v23 = vpack.c.bf16 %v2149_v17, %v2148_v9 }
 0x19b   : > { %7206 = vmatmul.mubr.msk.bf16.gmra.mrb[36].mxu0 %vm27_vm0, %v8843_v20  ;;  %v1736_v41 = vmax.f32 %v1636_v38, 0.0  ;;  %v8884_v26 = vpack.c.bf16 %v2151_v45, %v2150_v54 }
 0x19c   : > { %7209 = vmatprep.mubr.msk.bf16.mxu0 %vm27_vm0, %v8845_v25  ;;  %7362 = vmatmul.mubr.msk.bf16.gmra.mrb[104].mxu1 %vm27_vm0, %v8841_v19 }
 0x19d   : > { %v7155_v48 = vpop.f32.mrb[80].mxu1  ;;  %7365 = vmatprep.mubr.msk.bf16.mxu1 %vm27_vm0, %v8850_v61  ;;  %v1792_v27 = vld [vmem:[#allocation4 + $0x10] ss:$2 sm:$0xff]  ;;  %v1800_v29 = vld [vmem:[#allocation4 + $0x11] ss:$2 sm:$0xff] }
 0x19e   : > { %v1657_v30 = vadd.f32 %v7155_v48, %v8308_v5  ;;  %v1648_v49 = vpop.f32.mrb[81].mxu1  ;;  %v1791_v34 = vld [vmem:[#allocation4] ss:$2 sm:$0xff]  ;;  %v1799_v31 = vld [vmem:[#allocation4 + $0x1] ss:$2 sm:$0xff]  ;;  %v1808_v36 = vmax.f32 %v1792_v27, %v1800_v29 }
 0x19f   : > { %v1649_v39 = vadd.f32 %v8308_v5, %v1648_v49  ;;  %v7156_v40 = vpop.f32.mrb[82].mxu1  ;;  %v1807_v42 = vmax.f32 %v1791_v34, %v1799_v31  ;;  %v8086_v48 = vld [vmem:[%s9610_s3 + $0x38] sm:$0xff]   ;;  %v8898_v34 = vld [vmem:[%s9610_s3 + $0x40] sm:$0xff]  }
 0x1a0   : > { %v1741_v51 = vmax.f32 %v1657_v30, 0.0  ;;  %v1660_v52 = vadd.f32 %v7156_v40, %v8308_v5  ;;  %v1651_v55 = vpop.f32.mrb[83].mxu1  ;;  %1817 = vst.msk [vmem:[#allocation2 + $0x1b0] sm:$0xff] %vm27_vm0, %v1808_v36  ;;  %v2153_v29 = vld [vmem:[#allocation2 + $0x71] sm:$0xff] }
 0x1a1   : > { %v1739_v59 = vmax.f32 %v1649_v39, 0.0  ;;  %v1652_v60 = vadd.f32 %v8308_v5, %v1651_v55  ;;  %1816 = vst.msk [vmem:[#allocation2 + $0x1a8] sm:$0xff] %vm27_vm0, %v1807_v42  ;;  %v2152_v39 = vld [vmem:[#allocation2 + $0x69] sm:$0xff] }
 0x1a2   : > { %v1765_v35 = vmax.f32 %v1737_v50, %v1741_v51  ;;  %v1742_v0 = vmax.f32 %v1660_v52, 0.0  ;;  %v2154_v55 = vld [vmem:[#allocation2 + $0x89] sm:$0xff] }
 0x1a3   : > { %v1763_v10 = vmax.f32 %v1735_v57, %v1739_v59  ;;  %v1740_v11 = vmax.f32 %v1652_v60, 0.0  ;;  %7210 = vmatmul.mubr.msk.bf16.gmra.mrb[40].mxu0 %vm27_vm0, %v8867_v62 }
 0x1a4   : > { %1781 = vst.msk [vmem:[#allocation4 + $0x30] sm:$0xff] %vm27_vm0, %v1765_v35  ;;  %v1766_v12 = vmax.f32 %v1738_v63, %v1742_v0  ;;  %7217 = vmatprep.mubr.msk.bf16.mxu0 %vm27_vm0, %v2162_v56  ;;  %v2155_v56 = vld [vmem:[#allocation2 + $0x91] sm:$0xff] }
 0x1a5   : > { %1779 = vst.msk [vmem:[#allocation4 + $0x20] sm:$0xff] %vm27_vm0, %v1763_v10  ;;  %v1764_v8 = vmax.f32 %v1736_v41, %v1740_v11  ;;  %v7159_v15 = vpop.f32.mrb[84].mxu1  ;;  %v8907_v11 = vpack.c.bf16 %v2153_v29, %v2152_v39  ;;  %v2158_v29 = vld [vmem:[#allocation2 + $0xc9] sm:$0xff] }
 0x1a6   : > { %1782 = vst.msk [vmem:[#allocation4 + $0x38] sm:$0xff] %vm27_vm0, %v1766_v12  ;;  %v1664_v44 = vpop.f32.mrb[85].mxu1  ;;  %v1673_v27 = vadd.f32 %v7159_v15, %v8308_v5 }
 0x1a7   : > { %1780 = vst.msk [vmem:[#allocation4 + $0x28] sm:$0xff] %vm27_vm0, %v1764_v8  ;;  %v7160_v13 = vpop.f32.mrb[86].mxu1  ;;  %v3503_v18 = vld [vmem:[#allocation2 + $0x1b0] sm:$0xff]  ;;  %v1665_v28 = vadd.f32 %v8308_v5, %v1664_v44  ;;  %v8911_v44 = vpack.c.bf16 %v2155_v56, %v2154_v55 }
 0x1a8   : > { %v1667_v47 = vpop.f32.mrb[87].mxu1  ;;  %v3502_v21 = vld [vmem:[#allocation2 + $0x1a8] sm:$0xff]  ;;  %v1676_v31 = vadd.f32 %v7160_v13, %v8308_v5  ;;  %v1745_v59 = vmax.f32 %v1673_v27, 0.0 }
 0x1a9   : > { %v8879_v14 = vpack.c.bf16 %v3503_v18, %v3502_v21  ;;  %v1668_v50 = vadd.f32 %v8308_v5, %v1667_v47  ;;  %v1743_v0 = vmax.f32 %v1665_v28, 0.0  ;;  %v2156_v47 = vld [vmem:[#allocation2 + $0xa9] sm:$0xff]  ;;  %v2157_v21 = vld [vmem:[#allocation2 + $0xb1] sm:$0xff] }
 0x1aa   : > { %v1746_v12 = vmax.f32 %v1676_v31, 0.0  ;;  %v2159_v28 = vld [vmem:[#allocation2 + $0xd1] sm:$0xff]  ;;  %v8921_v31 = vpack.c.bf16 %v2157_v21, %v2156_v47 }
 0x1ab   : > { %7218 = vmatmul.mubr.msk.bf16.vlgmr.msra.gmra.mrb[28].mxu0 %vm27_vm0, %v8877_v23  ;;  %7366 = vmatmul.mubr.msk.bf16.gmra.mrb[108].mxu1 %vm27_vm0, %v8879_v14  ;;  %v1744_v9 = vmax.f32 %v1668_v50, 0.0  ;;  %v2160_v50 = vld [vmem:[#allocation2 + $0xe9] sm:$0xff] }
 0x1ac   : > { %7221 = vmatprep.mubr.msk.bf16.mxu0 %vm27_vm0, %v8884_v26  ;;  %7234 = vmatpush3.bf16.msra.mxu0 %v8795_v16 }
 0x1ad   : > { %v7163_v30 = vpop.f32.mrb[88].mxu1  ;;  %v1794_v49 = vld [vmem:[#allocation4 + $0x30] ss:$2 sm:$0xff]  ;;  %v1802_v33 = vld [vmem:[#allocation4 + $0x31] ss:$2 sm:$0xff]  ;;  %7235 = vmatprep.subr.bf16.mxu0 %v8086_v48 }
 0x1ae   : > { %v1689_v36 = vadd.f32 %v7163_v30, %v8308_v5  ;;  %v1680_v38 = vpop.f32.mrb[89].mxu1  ;;  %v1793_v40 = vld [vmem:[#allocation4 + $0x20] ss:$2 sm:$0xff]  ;;  %v1801_v42 = vld [vmem:[#allocation4 + $0x21] ss:$2 sm:$0xff]  ;;  %v1810_v16 = vmax.f32 %v1794_v49, %v1802_v33 }
 0x1af   : > { %v1681_v51 = vadd.f32 %v8308_v5, %v1680_v38  ;;  %v7164_v52 = vpop.f32.mrb[90].mxu1  ;;  %v1809_v57 = vmax.f32 %v1793_v40, %v1801_v42  ;;  %v8925_v38 = vpack.c.bf16 %v2159_v28, %v2158_v29  ;;  %v2161_v42 = vld [vmem:[#allocation2 + $0xf1] sm:$0xff] }
 0x1b0   : > { %v1749_v60 = vmax.f32 %v1689_v36, 0.0  ;;  %v1692_v63 = vadd.f32 %v7164_v52, %v8308_v5  ;;  %v1683_v35 = vpop.f32.mrb[91].mxu1  ;;  %1819 = vst.msk [vmem:[#allocation2 + $0x1d0] sm:$0xff] %vm27_vm0, %v1810_v16  ;;  %7236 = vmatpush3.bf16.msra.mxu0 %v8086_v48 }
 0x1b1   : > { %v1747_v41 = vmax.f32 %v1681_v51, 0.0  ;;  %v1684_v10 = vadd.f32 %v8308_v5, %v1683_v35  ;;  %1818 = vst.msk [vmem:[#allocation2 + $0x1c8] sm:$0xff] %vm27_vm0, %v1809_v57  ;;  %7253 = vmatprep.subr.bf16.mxu0 %v8898_v34 }
 0x1b2   : > { %v1769_v8 = vmax.f32 %v1745_v59, %v1749_v60  ;;  %v1750_v15 = vmax.f32 %v1692_v63, 0.0 }
 0x1b3   : > { %v1767_v17 = vmax.f32 %v1743_v0, %v1747_v41  ;;  %v1748_v13 = vmax.f32 %v1684_v10, 0.0  ;;  %7222 = vmatmul.mubr.msk.bf16.gmra.mrb[32].mxu0 %vm27_vm0, %v8907_v11 }
 0x1b4   : > { %1785 = vst.msk [vmem:[#allocation4 + $0x50] sm:$0xff] %vm27_vm0, %v1769_v8  ;;  %v1770_v18 = vmax.f32 %v1746_v12, %v1750_v15  ;;  %7225 = vmatprep.mubr.msk.bf16.mxu0 %vm27_vm0, %v8911_v44 }
 0x1b5   : > { %1783 = vst.msk [vmem:[#allocation4 + $0x40] sm:$0xff] %vm27_vm0, %v1767_v17  ;;  %v1768_v54 = vmax.f32 %v1744_v9, %v1748_v13  ;;  %v7167_v45 = vpop.f32.mrb[92].mxu1 }
 0x1b6   : > { %1786 = vst.msk [vmem:[#allocation4 + $0x58] sm:$0xff] %vm27_vm0, %v1770_v18  ;;  %v1696_v48 = vpop.f32.mrb[93].mxu1  ;;  %v1705_v39 = vadd.f32 %v7167_v45, %v8308_v5  ;;  %v8941_v18 = vpack.c.bf16 %v2161_v42, %v2160_v50  ;;  %v3466_v50 = vld [vmem:[#allocation2 + $0x127] sm:$0xff] }
 0x1b7   : > { %1784 = vst.msk [vmem:[#allocation4 + $0x48] sm:$0xff] %vm27_vm0, %v1768_v54  ;;  %v3505_v27 = vld [vmem:[#allocation2 + $0x1d0] sm:$0xff]  ;;  %v7168_v30 = vpop.f32.mrb[94].mxu1  ;;  %v1697_v40 = vadd.f32 %v8308_v5, %v1696_v48 }
 0x1b8   : > { %v3504_v49 = vld [vmem:[#allocation2 + $0x1c8] sm:$0xff]  ;;  %v1699_v33 = vpop.f32.mrb[95].mxu1  ;;  %v1708_v16 = vadd.f32 %v7168_v30, %v8308_v5  ;;  %v1753_v63 = vmax.f32 %v1705_v39, 0.0 }
 0x1b9   : > { %v8923_v36 = vpack.c.bf16 %v3505_v27, %v3504_v49  ;;  %v1700_v55 = vadd.f32 %v8308_v5, %v1699_v33  ;;  %v1751_v10 = vmax.f32 %v1697_v40, 0.0  ;;  %v3464_v33 = vld [vmem:[#allocation2 + $0x107] sm:$0xff]  ;;  %v3465_v39 = vld [vmem:[#allocation2 + $0x10f] sm:$0xff] }
 0x1ba   : > { %v1754_v15 = vmax.f32 %v1708_v16, 0.0  ;;  %v8955_v16 = vpack.c.bf16 %v3465_v39, %v3464_v33  ;;  %v2505_v33 = vld [vmem:[#allocation2 + $0x70] sm:$0xff]  ;;  %v2504_v39 = vld [vmem:[#allocation2 + $0x68] sm:$0xff] }
 0x1bb   : > { %7226 = vmatmul.mubr.msk.bf16.gmra.mrb[36].mxu0 %vm27_vm0, %v8921_v31  ;;  %7369 = vmatprep.mubr.msk.bf16.mxu1 %vm27_vm0, %v8923_v36  ;;  %v1752_v54 = vmax.f32 %v1700_v55, 0.0 }
 0x1bc   : > { %7229 = vmatprep.mubr.msk.bf16.mxu0 %vm27_vm0, %v8925_v38 }
 0x1bd   : > { %v1796_v51 = vld [vmem:[#allocation4 + $0x50] ss:$2 sm:$0xff]  ;;  %v1804_v52 = vld [vmem:[#allocation4 + $0x51] ss:$2 sm:$0xff]  ;;  %v7171_v56 = vpop.f32.mrb[96].mxu1 }
 0x1be   : > { %v1795_v57 = vld [vmem:[#allocation4 + $0x40] ss:$2 sm:$0xff]  ;;  %v1803_v59 = vld [vmem:[#allocation4 + $0x41] ss:$2 sm:$0xff]  ;;  %v1812_v60 = vmax.f32 %v1796_v51, %v1804_v52  ;;  %v1721_v35 = vadd.f32 %v7171_v56, %v8308_v5  ;;  %v1712_v0 = vpop.f32.mrb[97].mxu1 }
 0x1bf   : > { %v1811_v41 = vmax.f32 %v1795_v57, %v1803_v59  ;;  %v1713_v12 = vadd.f32 %v8308_v5, %v1712_v0  ;;  %v7172_v8 = vpop.f32.mrb[98].mxu1  ;;  %v3467_v51 = vld [vmem:[#allocation2 + $0x12f] sm:$0xff] }
 0x1c0   : > { %1821 = vst.msk [vmem:[#allocation2 + $0x1f0] sm:$0xff] %vm27_vm0, %v1812_v60  ;;  %v1757_v9 = vmax.f32 %v1721_v35, 0.0  ;;  %v1724_v17 = vadd.f32 %v7172_v8, %v8308_v5  ;;  %v1715_v13 = vpop.f32.mrb[99].mxu1  ;;  %v3468_v60 = vld [vmem:[#allocation2 + $0x147] sm:$0xff]  ;;  %v8975_v35 = vpack.c.bf16 %v3467_v51, %v3466_v50  ;;  %v3473_v8 = vld [vmem:[#allocation2 + $0x18f] sm:$0xff] }
 0x1c1   : > { %1820 = vst.msk [vmem:[#allocation2 + $0x1e8] sm:$0xff] %vm27_vm0, %v1811_v41  ;;  %v1755_v45 = vmax.f32 %v1713_v12, 0.0  ;;  %v1716_v47 = vadd.f32 %v8308_v5, %v1715_v13  ;;  %v8089_v0 = vld [vmem:[%s9610_s3 + $0x28] sm:$0xff]   ;;  %v8996_v12 = vld [vmem:[%s9610_s3 + $0x30] sm:$0xff]  }
 0x1c2   : > { %v1773_v21 = vmax.f32 %v1753_v63, %v1757_v9  ;;  %v1758_v48 = vmax.f32 %v1724_v17, 0.0  ;;  %v3470_v41 = vld [vmem:[#allocation2 + $0x167] sm:$0xff]  ;;  %v3475_v17 = vld [vmem:[#allocation2 + $0x1af] sm:$0xff] }
 0x1c3   : > { %7230 = vmatmul.mubr.msk.bf16.gmra.mrb[40].mxu0 %vm27_vm0, %v8941_v18  ;;  %v1771_v27 = vmax.f32 %v1751_v10, %v1755_v45  ;;  %v1756_v29 = vmax.f32 %v1716_v47, 0.0  ;;  %v3471_v10 = vld [vmem:[#allocation2 + $0x16f] sm:$0xff]  ;;  %v3476_v45 = vld [vmem:[#allocation2 + $0x1c7] sm:$0xff] }
 0x1c4   : > { %7237 = vmatprep.mubr.msk.bf16.mxu0 %vm27_vm0, %v8783_v37  ;;  %1789 = vst.msk [vmem:[#allocation4 + $0x70] sm:$0xff] %vm27_vm0, %v1773_v21  ;;  %v1774_v28 = vmax.f32 %v1754_v15, %v1758_v48  ;;  %v8090_v37 = vld [vmem:[%s9610_s3 + $0x48] sm:$0xff]   ;;  %v8998_v15 = vpack.c.bf16 %v3471_v10, %v3470_v41  ;;  %v2501_v13 = vld [vmem:[#allocation2 + $0x30] sm:$0xff] }
 0x1c5   : > { %1787 = vst.msk [vmem:[#allocation4 + $0x60] sm:$0xff] %vm27_vm0, %v1771_v27  ;;  %v1772_v30 = vmax.f32 %v1752_v54, %v1756_v29  ;;  %v2500_v54 = vld [vmem:[#allocation2 + $0x28] sm:$0xff] }
 0x1c6   : > { %1790 = vst.msk [vmem:[#allocation4 + $0x78] sm:$0xff] %vm27_vm0, %v1774_v28  ;;  %v3477_v47 = vld [vmem:[#allocation2 + $0x1cf] sm:$0xff]  ;;  %v2516_v48 = vpack.c.bf16 %v2501_v13, %v2500_v54 }
 0x1c7   : > { %v3507_v49 = vld [vmem:[#allocation2 + $0x1f0] sm:$0xff]  ;;  %1788 = vst.msk [vmem:[#allocation4 + $0x68] sm:$0xff] %vm27_vm0, %v1772_v30  ;;  %v9013_v27 = vpack.c.bf16 %v3477_v47, %v3476_v45  ;;  %v2502_v29 = vld [vmem:[#allocation2 + $0x48] sm:$0xff] }
 0x1c8   : > { %v3506_v40 = vld [vmem:[#allocation2 + $0x1e8] sm:$0xff]  ;;  %v2503_v28 = vld [vmem:[#allocation2 + $0x50] sm:$0xff] }
 0x1c9   : > { %v8953_v42 = vpack.c.bf16 %v3507_v49, %v3506_v40  ;;  %v3478_v30 = vld [vmem:[#allocation2 + $0x1e7] sm:$0xff]  ;;  %v3479_v49 = vld [vmem:[#allocation2 + $0x1ef] sm:$0xff]  ;;  %v9022_v50 = vpack.c.bf16 %v2503_v28, %v2502_v29 }
 0x1ca   : > { %v3786_v40 = vld [vmem:[#allocation2 + $0x109] sm:$0xff]  ;;  %v9024_v51 = vpack.c.bf16 %v3479_v49, %v3478_v30  ;;  %v8095_v29 = vld [vmem:[%s9610_s3 + $0x40] sm:$0xff]   ;;  %v3795_v30 = vld [vmem:[#allocation2 + $0x191] sm:$0xff] }
 0x1cb   : > { %7238 = vmatmul.mubr.msk.bf16.vlgmr.msra.gmra.mrb[28].mxu0 %vm27_vm0, %v8788_v22  ;;  %7370 = vmatmul.mubr.msk.bf16.gmra.mrb[112].mxu1 %vm27_vm0, %v8953_v42  ;;  %v8972_v22 = vld [vmem:[%s9610_s3 + $0x50] sm:$0xff]   ;;  %v2508_v41 = vld [vmem:[#allocation2 + $0xa8] sm:$0xff] }
 0x1cc   : > { %7241 = vmatprep.mubr.msk.bf16.mxu0 %vm27_vm0, %v8804_v24  ;;  %7377 = vmatprep.mubr.msk.bf16.mxu1 %vm27_vm0, %v8955_v16  ;;  %v3469_v24 = vld [vmem:[#allocation2 + $0x14f] sm:$0xff] }
 0x1cd   : > { %7254 = vmatpush3.bf16.msra.mxu0 %v8898_v34  ;;  %v1798_v52 = vld [vmem:[#allocation4 + $0x70] ss:$2 sm:$0xff]  ;;  %v1806_v55 = vld [vmem:[#allocation4 + $0x71] ss:$2 sm:$0xff]  ;;  %v8978_v34 = vpack.c.bf16 %v3469_v24, %v3468_v60  ;;  %v2509_v60 = vld [vmem:[#allocation2 + $0xb0] sm:$0xff] }
 0x1ce   : > { %7255 = vmatprep.subr.bf16.mxu0 %v8090_v37  ;;  %v1797_v56 = vld [vmem:[#allocation4 + $0x60] ss:$2 sm:$0xff]  ;;  %v1805_v57 = vld [vmem:[#allocation4 + $0x61] ss:$2 sm:$0xff]  ;;  %v1814_v59 = vmax.f32 %v1798_v52, %v1806_v55  ;;  %v9026_v52 = vpack.c.bf16 %v2505_v33, %v2504_v39  ;;  %v2510_v54 = vld [vmem:[#allocation2 + $0xc8] sm:$0xff] }
 0x1cf   : > { %v1813_v63 = vmax.f32 %v1797_v56, %v1805_v57  ;;  %v8094_v56 = vld [vmem:[%s9610_s3 + $0x58] sm:$0xff]   ;;  %v2506_v57 = vld [vmem:[#allocation2 + $0x88] sm:$0xff]  ;;  %v2511_v45 = vld [vmem:[#allocation2 + $0xd0] sm:$0xff] }
 0x1d0   : > { %1823 = vst.msk [vmem:[#allocation2 + $0x210] sm:$0xff] %vm27_vm0, %v1814_v59  ;;  %v2507_v59 = vld [vmem:[#allocation2 + $0x90] sm:$0xff]  ;;  %v9068_v49 = vpack.c.bf16 %v2511_v45, %v2510_v54 }
 0x1d1   : > { %7256 = vmatpush3.bf16.msra.mxu0 %v8090_v37  ;;  %1822 = vst.msk [vmem:[#allocation2 + $0x208] sm:$0xff] %vm27_vm0, %v1813_v63  ;;  %v3787_v37 = vld [vmem:[#allocation2 + $0x111] sm:$0xff]  ;;  %v3788_v24 = vld [vmem:[#allocation2 + $0x129] sm:$0xff] }
 0x1d2   : > { %7273 = vmatprep.subr.bf16.mxu0 %v8972_v22  ;;  %v9028_v55 = vpack.c.bf16 %v3787_v37, %v3786_v40  ;;  %v3789_v63 = vld [vmem:[#allocation2 + $0x131] sm:$0xff]  ;;  %v3790_v10 = vld [vmem:[#allocation2 + $0x149] sm:$0xff] }
 0x1d3   : > { %7242 = vmatmul.mubr.msk.bf16.gmra.mrb[32].mxu0 %vm27_vm0, %v8808_v32  ;;  %7378 = vmatmul.mubr.msk.bf16.vlgmr.msra.gmra.mrb[100].mxu1 %vm27_vm0, %v8975_v35  ;;  %v3472_v32 = vld [vmem:[#allocation2 + $0x187] sm:$0xff]  ;;  %v3797_v40 = vld [vmem:[#allocation2 + $0x1b1] sm:$0xff] }
 0x1d4   : > { %7245 = vmatprep.mubr.msk.bf16.mxu0 %vm27_vm0, %v8843_v20  ;;  %7381 = vmatprep.mubr.msk.bf16.mxu1 %vm27_vm0, %v8978_v34  ;;  %v9000_v9 = vpack.c.bf16 %v3473_v8, %v3472_v32  ;;  %v3791_v32 = vld [vmem:[#allocation2 + $0x151] sm:$0xff]  ;;  %v9045_v8 = vpack.c.bf16 %v2507_v59, %v2506_v57  ;;  %v3792_v47 = vld [vmem:[#allocation2 + $0x169] sm:$0xff] }
 0x1d5   : > { %7394 = vmatpush3.bf16.msra.mxu1 %v8838_v58  ;;  %v3474_v58 = vld [vmem:[#allocation2 + $0x1a7] sm:$0xff]  ;;  %v9051_v13 = vpack.c.bf16 %v3791_v32, %v3790_v10  ;;  %v2860_v32 = vld [vmem:[#allocation2 + $0x8f] sm:$0xff] }
 0x1d6   : > { %7395 = vmatprep.subr.bf16.mxu1 %v8089_v0  ;;  %v9011_v21 = vpack.c.bf16 %v3475_v17, %v3474_v58  ;;  %v9047_v58 = vpack.c.bf16 %v3789_v63, %v3788_v24  ;;  %v9049_v17 = vpack.c.bf16 %v2509_v60, %v2508_v41  ;;  %v3794_v28 = vld [vmem:[#allocation2 + $0x189] sm:$0xff]  ;;  %v3801_v60 = vld [vmem:[#allocation2 + $0x1f1] sm:$0xff] }
 0x1d7   : > { %v9072_v39 = vpack.c.bf16 %v3795_v30, %v3794_v28  ;;  %v3798_v37 = vld [vmem:[#allocation2 + $0x1c9] sm:$0xff]  ;;  %v8102_v28 = vld [vmem:[%s9610_s3 + $0x78] sm:$0xff]   ;;  %v8104_v30 = vld [vmem:[%s9610_s3 + $0x80] sm:$0xff]  }
 0x1d8   : > { %v8098_v63 = vld [vmem:[%s9610_s3 + $0x68] sm:$0xff]   ;;  %v4141_v54 = vld [vmem:[#allocation2 + $0x130] sm:$0xff] }
 0x1d9   : > { %7396 = vmatpush3.bf16.msra.mxu1 %v8089_v0  ;;  %v8096_v0 = vld [vmem:[%s9610_s3 + $0x60] sm:$0xff]   ;;  %v3978_v41 = vld [vmem:[#allocation2 + $0x20f] sm:$0xff] }
 0x1da   : > { %7413 = vmatprep.subr.bf16.mxu1 %v8996_v12  ;;  %v2859_v10 = vld [vmem:[#allocation2 + $0x87] sm:$0xff] }
 0x1db   : > { %7246 = vmatmul.mubr.msk.bf16.gmra.mrb[36].mxu0 %vm27_vm0, %v8845_v25  ;;  %7382 = vmatmul.mubr.msk.bf16.gmra.mrb[104].mxu1 %vm27_vm0, %v8998_v15 }
 0x1dc   : > { %7249 = vmatprep.mubr.msk.bf16.mxu0 %vm27_vm0, %v8867_v62  ;;  %7385 = vmatprep.mubr.msk.bf16.mxu1 %vm27_vm0, %v9000_v9 }
 0x1e3   : > { %7250 = vmatmul.mubr.msk.bf16.gmra.mrb[40].mxu0 %vm27_vm0, %v8955_v16  ;;  %7386 = vmatmul.mubr.msk.bf16.gmra.mrb[108].mxu1 %vm27_vm0, %v9011_v21 }
 0x1e4   : > { %7257 = vmatprep.mubr.msk.bf16.mxu0 %vm27_vm0, %v2516_v48  ;;  %7389 = vmatprep.mubr.msk.bf16.mxu1 %vm27_vm0, %v9013_v27  ;;  %v3793_v48 = vld [vmem:[#allocation2 + $0x171] sm:$0xff] }
 0x1e5   : > { %v9070_v33 = vpack.c.bf16 %v3793_v48, %v3792_v47  ;;  %v2873_v48 = vpack.c.bf16 %v2860_v32, %v2859_v10  ;;  %v3220_v10 = vld [vmem:[#allocation2 + $0xf1] sm:$0xff]  ;;  %v8109_v32 = vld [vmem:[%s9610_s3 + $0x80] sm:$0xff]  }
 0x1eb   : > { %7258 = vmatmul.mubr.msk.bf16.vlgmr.msra.gmra.mrb[28].mxu0 %vm27_vm0, %v9022_v50  ;;  %7390 = vmatmul.mubr.msk.bf16.gmra.mrb[112].mxu1 %vm27_vm0, %v9024_v51 }
 0x1ec   : > { %7261 = vmatprep.mubr.msk.bf16.mxu0 %vm27_vm0, %v9026_v52  ;;  %7397 = vmatprep.mubr.msk.bf16.mxu1 %vm27_vm0, %v9028_v55 }
 0x1ed   : > { %7274 = vmatpush3.bf16.msra.mxu0 %v8972_v22  ;;  %v8093_v22 = vld [vmem:[%s9610_s3 + $0x38] sm:$0xff]  }
 0x1ee   : > { %7275 = vmatprep.subr.bf16.mxu0 %v8094_v56 }
 0x1f1   : > { %7276 = vmatpush3.bf16.msra.mxu0 %v8094_v56  ;;  %v3799_v56 = vld [vmem:[#allocation2 + $0x1d1] sm:$0xff] }
 0x1f2   : > { %7293 = vmatprep.subr.bf16.mxu0 %v8096_v0  ;;  %v9084_v59 = vpack.c.bf16 %v3799_v56, %v3798_v37  ;;  %v3212_v37 = vld [vmem:[#allocation2 + $0x71] sm:$0xff]  ;;  %v4331_v56 = vld [vmem:[#allocation2 + $0x209] sm:$0xff] }
 0x1f3   : > { %7262 = vmatmul.mubr.msk.bf16.gmra.mrb[32].mxu0 %vm27_vm0, %v9045_v8  ;;  %7398 = vmatmul.mubr.msk.bf16.vlgmr.msra.gmra.mrb[100].mxu1 %vm27_vm0, %v9047_v58 }
 0x1f4   : > { %7265 = vmatprep.mubr.msk.bf16.mxu0 %vm27_vm0, %v9049_v17  ;;  %7401 = vmatprep.mubr.msk.bf16.mxu1 %vm27_vm0, %v9051_v13 }
 0x1f5   : > { %7414 = vmatpush3.bf16.msra.mxu1 %v8996_v12  ;;  %v3796_v12 = vld [vmem:[#allocation2 + $0x1a9] sm:$0xff] }
 0x1f6   : > { %7415 = vmatprep.subr.bf16.mxu1 %v8093_v22  ;;  %v9082_v57 = vpack.c.bf16 %v3797_v40, %v3796_v12  ;;  %v8101_v12 = vld [vmem:[%s9610_s3 + $0x58] sm:$0xff]   ;;  %v8103_v40 = vld [vmem:[%s9610_s3 + $0x60] sm:$0xff]  }
 0x1f9   : > { %7416 = vmatpush3.bf16.msra.mxu1 %v8093_v22  ;;  %v4140_v22 = vld [vmem:[#allocation2 + $0x128] sm:$0xff] }
 0x1fa   : > { %7433 = vmatprep.subr.bf16.mxu1 %v8095_v29 }
 0x1fb   : > { %7266 = vmatmul.mubr.msk.bf16.gmra.mrb[36].mxu0 %vm27_vm0, %v9068_v49  ;;  %7402 = vmatmul.mubr.msk.bf16.gmra.mrb[104].mxu1 %vm27_vm0, %v9070_v33 }
 0x1fc   : > { %7269 = vmatprep.mubr.msk.bf16.mxu0 %vm27_vm0, %v8771_v43  ;;  %7405 = vmatprep.mubr.msk.bf16.mxu1 %vm27_vm0, %v9072_v39  ;;  %v3800_v43 = vld [vmem:[#allocation2 + $0x1e9] sm:$0xff] }
 0x1fd   : > { %v9094_v24 = vpack.c.bf16 %v3801_v60, %v3800_v43  ;;  %v4332_v43 = vld [vmem:[#allocation2 + $0x211] sm:$0xff]  ;;  %v3213_v60 = vld [vmem:[#allocation2 + $0x89] sm:$0xff] }
 0x203   : > { %7270 = vmatmul.mubr.msk.bf16.gmra.mrb[40].mxu0 %vm27_vm0, %v8815_v53  ;;  %7406 = vmatmul.mubr.msk.bf16.gmra.mrb[108].mxu1 %vm27_vm0, %v9082_v57  ;;  %v8100_v53 = vld [vmem:[%s9610_s3 + $0x70] sm:$0xff]  }
 0x204   : > { %7277 = vmatprep.mubr.msk.bf16.mxu0 %vm27_vm0, %v8877_v23  ;;  %7409 = vmatprep.mubr.msk.bf16.mxu1 %vm27_vm0, %v9084_v59  ;;  %v8097_v23 = vld [vmem:[%s9610_s3 + $0x48] sm:$0xff]  }
 0x20b   : > { %7278 = vmatmul.mubr.msk.bf16.vlgmr.msra.gmra.mrb[28].mxu0 %vm27_vm0, %v8884_v26  ;;  %7410 = vmatmul.mubr.msk.bf16.gmra.mrb[112].mxu1 %vm27_vm0, %v9094_v24  ;;  %v8099_v26 = vld [vmem:[%s9610_s3 + $0x50] sm:$0xff]  }
 0x20c   : > { %7281 = vmatprep.mubr.msk.bf16.mxu0 %vm27_vm0, %v8907_v11  ;;  %7417 = vmatprep.mubr.msk.bf16.mxu1 %vm27_vm0, %v8975_v35  ;;  %v2855_v11 = vld [vmem:[#allocation2 + $0x47] sm:$0xff] }
 0x20d   : > { %7294 = vmatpush3.bf16.msra.mxu0 %v8096_v0  ;;  %v2858_v0 = vld [vmem:[#allocation2 + $0x6f] sm:$0xff] }
 0x20e   : > { %7295 = vmatprep.subr.bf16.mxu0 %v8098_v63 }
 0x211   : > { %7296 = vmatpush3.bf16.msra.mxu0 %v8098_v63  ;;  %v3214_v63 = vld [vmem:[#allocation2 + $0x91] sm:$0xff] }
 0x212   : > { %7313 = vmatprep.subr.bf16.mxu0 %v8100_v53 }
 0x213   : > { %7282 = vmatmul.mubr.msk.bf16.gmra.mrb[32].mxu0 %vm27_vm0, %v8911_v44  ;;  %7418 = vmatmul.mubr.msk.bf16.vlgmr.msra.gmra.mrb[100].mxu1 %vm27_vm0, %v8978_v34  ;;  %v2856_v44 = vld [vmem:[#allocation2 + $0x4f] sm:$0xff] }
 0x214   : > { %7285 = vmatprep.mubr.msk.bf16.mxu0 %vm27_vm0, %v8921_v31  ;;  %7421 = vmatprep.mubr.msk.bf16.mxu1 %vm27_vm0, %v8998_v15  ;;  %v2871_v31 = vpack.c.bf16 %v2856_v44, %v2855_v11  ;;  %v3215_v11 = vld [vmem:[#allocation2 + $0xa9] sm:$0xff]  ;;  %v3216_v44 = vld [vmem:[#allocation2 + $0xb1] sm:$0xff] }
 0x215   : > { %7434 = vmatpush3.bf16.msra.mxu1 %v8095_v29  ;;  %v9141_v29 = vpack.c.bf16 %v4141_v54, %v4140_v22 }
 0x216   : > { %7435 = vmatprep.subr.bf16.mxu1 %v8097_v23 }
 0x219   : > { %7436 = vmatpush3.bf16.msra.mxu1 %v8097_v23  ;;  %v9225_v23 = vpack.c.bf16 %v4332_v43, %v4331_v56 }
 0x21a   : > { %7453 = vmatprep.subr.bf16.mxu1 %v8099_v26 }
 0x21b   : > { %7286 = vmatmul.mubr.msk.bf16.gmra.mrb[36].mxu0 %vm27_vm0, %v8925_v38  ;;  %7422 = vmatmul.mubr.msk.bf16.gmra.mrb[104].mxu1 %vm27_vm0, %v9000_v9  ;;  %v2857_v38 = vld [vmem:[#allocation2 + $0x67] sm:$0xff] }
 0x21c   : > { %7289 = vmatprep.mubr.msk.bf16.mxu0 %vm27_vm0, %v8941_v18  ;;  %7425 = vmatprep.mubr.msk.bf16.mxu1 %vm27_vm0, %v9011_v21  ;;  %v3977_v18 = vld [vmem:[#allocation2 + $0x207] sm:$0xff]  ;;  %v2872_v45 = vpack.c.bf16 %v2858_v0, %v2857_v38  ;;  %v3218_v38 = vld [vmem:[#allocation2 + $0xd1] sm:$0xff]  ;;  %v3228_v0 = vpack.c.bf16 %v3216_v44, %v3215_v11 }
 0x21d   : > { %v9139_v47 = vpack.c.bf16 %v3978_v41, %v3977_v18  ;;  %v8108_v41 = vld [vmem:[%s9610_s3 + $0x78] sm:$0xff]  }
 0x223   : > { %7290 = vmatmul.mubr.msk.bf16.gmra.mrb[40].mxu0 %vm27_vm0, %v9028_v55  ;;  %7426 = vmatmul.mubr.msk.bf16.gmra.mrb[108].mxu1 %vm27_vm0, %v9013_v27 }
 0x224   : > { %7297 = vmatprep.mubr.msk.bf16.mxu0 %vm27_vm0, %v2871_v31  ;;  %7429 = vmatprep.mubr.msk.bf16.mxu1 %vm27_vm0, %v9024_v51  ;;  %v3217_v31 = vld [vmem:[#allocation2 + $0xc9] sm:$0xff] }
 0x225   : > { %v3229_v18 = vpack.c.bf16 %v3218_v38, %v3217_v31 }
 0x22b   : > { %7298 = vmatmul.mubr.msk.bf16.vlgmr.msra.gmra.mrb[28].mxu0 %vm27_vm0, %v2872_v45  ;;  %7430 = vmatmul.mubr.msk.bf16.gmra.mrb[112].mxu1 %vm27_vm0, %v9139_v47  ;;  %v4672_v45 = vld [vmem:[#allocation2 + $0x148] sm:$0xff] }
 0x22c   : > { %7301 = vmatprep.mubr.msk.bf16.mxu0 %vm27_vm0, %v2873_v48  ;;  %7437 = vmatprep.mubr.msk.bf16.mxu1 %vm27_vm0, %v9141_v29 }
 0x22d   : > { %7314 = vmatpush3.bf16.msra.mxu0 %v8100_v53 }
 0x22e   : > { %7315 = vmatprep.subr.bf16.mxu0 %v8102_v28 }
 0x231   : > { %7316 = vmatpush3.bf16.msra.mxu0 %v8102_v28 }
 0x232   : > { %7333 = vmatprep.subr.bf16.mxu0 %v8104_v30 }
 0x233   : > { %7302 = vmatmul.mubr.msk.bf16.gmra.mrb[32].mxu0 %vm27_vm0, %v8843_v20  ;;  %7438 = vmatmul.mubr.msk.bf16.vlgmr.msra.gmra.mrb[100].mxu1 %vm27_vm0, %v8811_v46  ;;  %v4154_v46 = vld [vmem:[#allocation2 + $0x208] sm:$0xff] }
 0x234   : > { %7305 = vmatprep.mubr.msk.bf16.mxu0 %vm27_vm0, %v8845_v25  ;;  %7441 = vmatprep.mubr.msk.bf16.mxu1 %vm27_vm0, %v8841_v19  ;;  %v4155_v19 = vld [vmem:[#allocation2 + $0x210] sm:$0xff]  ;;  %v8106_v25 = vld [vmem:[%s9610_s3 + $0x88] sm:$0xff]  }
 0x235   : > { %7454 = vmatpush3.bf16.msra.mxu1 %v8099_v26  ;;  %v9185_v20 = vpack.c.bf16 %v4155_v19, %v4154_v46  ;;  %v3227_v26 = vpack.c.bf16 %v3214_v63, %v3213_v60  ;;  %v4681_v46 = vld [vmem:[#allocation2 + $0x1d0] sm:$0xff] }
 0x236   : > { %7455 = vmatprep.subr.bf16.mxu1 %v8101_v12 }
 0x239   : > { %7456 = vmatpush3.bf16.msra.mxu1 %v8101_v12  ;;  %v4679_v12 = vld [vmem:[#allocation2 + $0x1b0] sm:$0xff] }
 0x23a   : > { %7473 = vmatprep.subr.bf16.mxu1 %v8103_v40 }
 0x23b   : > { %7306 = vmatmul.mubr.msk.bf16.gmra.mrb[36].mxu0 %vm27_vm0, %v8867_v62  ;;  %7442 = vmatmul.mubr.msk.bf16.gmra.mrb[104].mxu1 %vm27_vm0, %v8850_v61  ;;  %v8105_v61 = vld [vmem:[%s9610_s3 + $0x68] sm:$0xff]  }
 0x23c   : > { %7309 = vmatprep.mubr.msk.bf16.mxu0 %vm27_vm0, %v8955_v16  ;;  %7445 = vmatprep.mubr.msk.bf16.mxu1 %vm27_vm0, %v8879_v14  ;;  %v3042_v62 = vld [vmem:[#allocation2 + $0xe8] sm:$0xff]  ;;  %v3043_v14 = vld [vmem:[#allocation2 + $0xf0] sm:$0xff] }
 0x23d   : > { %v3045_v16 = vld [vmem:[#allocation2 + $0x110] sm:$0xff] }
 0x243   : > { %7310 = vmatmul.mubr.msk.bf16.gmra.mrb[40].mxu0 %vm27_vm0, %v8975_v35  ;;  %7446 = vmatmul.mubr.msk.bf16.gmra.mrb[108].mxu1 %vm27_vm0, %v8923_v36  ;;  %v8107_v36 = vld [vmem:[%s9610_s3 + $0x70] sm:$0xff]   ;;  %v3053_v35 = vpack.c.bf16 %v3043_v14, %v3042_v62 }
 0x244   : > { %7317 = vmatprep.mubr.msk.bf16.mxu0 %vm27_vm0, %v9022_v50  ;;  %7449 = vmatprep.mubr.msk.bf16.mxu1 %vm27_vm0, %v8953_v42  ;;  %v3044_v42 = vld [vmem:[#allocation2 + $0x108] sm:$0xff]  ;;  %v4683_v62 = vld [vmem:[#allocation2 + $0x1f0] sm:$0xff] }
 0x245   : > { %v3054_v50 = vpack.c.bf16 %v3045_v16, %v3044_v42  ;;  %v4687_v42 = vld [vmem:[#allocation2 + $0x230] sm:$0xff] }
 0x24b   : > { %7318 = vmatmul.mubr.msk.bf16.vlgmr.msra.gmra.mrb[28].mxu0 %vm27_vm0, %v9026_v52  ;;  %7450 = vmatmul.mubr.msk.bf16.gmra.mrb[112].mxu1 %vm27_vm0, %v9185_v20  ;;  %v3209_v52 = vld [vmem:[#allocation2 + $0x49] sm:$0xff] }
 0x24c   : > { %7321 = vmatprep.mubr.msk.bf16.mxu0 %vm27_vm0, %v9045_v8  ;;  %7457 = vmatprep.mubr.msk.bf16.mxu1 %vm27_vm0, %v9047_v58  ;;  %v3210_v8 = vld [vmem:[#allocation2 + $0x51] sm:$0xff] }
 0x24d   : > { %7334 = vmatpush3.bf16.msra.mxu0 %v8104_v30  ;;  %v4678_v30 = vld [vmem:[#allocation2 + $0x1a8] sm:$0xff] }
 0x24e   : > { %7335 = vmatprep.subr.bf16.mxu0 %v8106_v25  ;;  %v4691_v19 = vpack.c.bf16 %v4679_v12, %v4678_v30 }
 0x251   : > { %7336 = vmatpush3.bf16.msra.mxu0 %v8106_v25 }
 0x253   : > { %7322 = vmatmul.mubr.msk.bf16.gmra.mrb[32].mxu0 %vm27_vm0, %v9049_v17  ;;  %7458 = vmatmul.mubr.msk.bf16.vlgmr.msra.gmra.mrb[100].mxu1 %vm27_vm0, %v9051_v13  ;;  %v3225_v17 = vpack.c.bf16 %v3210_v8, %v3209_v52 }
 0x254   : > { %7325 = vmatprep.mubr.msk.bf16.mxu0 %vm27_vm0, %v9068_v49  ;;  %7461 = vmatprep.mubr.msk.bf16.mxu1 %vm27_vm0, %v9070_v33  ;;  %v3211_v49 = vld [vmem:[#allocation2 + $0x69] sm:$0xff] }
 0x255   : > { %7474 = vmatpush3.bf16.msra.mxu1 %v8103_v40  ;;  %v3226_v53 = vpack.c.bf16 %v3212_v37, %v3211_v49  ;;  %v4680_v40 = vld [vmem:[#allocation2 + $0x1c8] sm:$0xff] }
 0x256   : > { %7475 = vmatprep.subr.bf16.mxu1 %v8105_v61  ;;  %v4692_v25 = vpack.c.bf16 %v4681_v46, %v4680_v40 }
 0x259   : > { %7476 = vmatpush3.bf16.msra.mxu1 %v8105_v61  ;;  %v4682_v61 = vld [vmem:[#allocation2 + $0x1e8] sm:$0xff] }
 0x25a   : > { %7493 = vmatprep.subr.bf16.mxu1 %v8107_v36  ;;  %v4693_v14 = vpack.c.bf16 %v4683_v62, %v4682_v61 }
 0x25b   : > { %7326 = vmatmul.mubr.msk.bf16.gmra.mrb[36].mxu0 %vm27_vm0, %v3053_v35  ;;  %7462 = vmatmul.mubr.msk.bf16.gmra.mrb[104].mxu1 %vm27_vm0, %v9072_v39 }
 0x25c   : > { %7329 = vmatprep.mubr.msk.bf16.mxu0 %vm27_vm0, %v3054_v50  ;;  %7465 = vmatprep.mubr.msk.bf16.mxu1 %vm27_vm0, %v9082_v57 }
 0x263   : > { %7330 = vmatmul.mubr.msk.bf16.gmra.mrb[40].mxu0 %vm27_vm0, %v9141_v29  ;;  %7466 = vmatmul.mubr.msk.bf16.gmra.mrb[108].mxu1 %vm27_vm0, %v9084_v59  ;;  %v4676_v29 = vld [vmem:[#allocation2 + $0x188] sm:$0xff] }
 0x264   : > { %7337 = vmatprep.mubr.msk.bf16.mxu0 %vm27_vm0, %v3225_v17  ;;  %7469 = vmatprep.mubr.msk.bf16.mxu1 %vm27_vm0, %v9094_v24 }
 0x26b   : > { %7338 = vmatmul.mubr.msk.bf16.vlgmr.msra.gmra.mrb[28].mxu0 %vm27_vm0, %v3226_v53  ;;  %7470 = vmatmul.mubr.msk.bf16.gmra.mrb[112].mxu1 %vm27_vm0, %v9225_v23 }
 0x26c   : > { %7341 = vmatprep.mubr.msk.bf16.mxu0 %vm27_vm0, %v3227_v26  ;;  %7477 = vmatprep.mubr.msk.bf16.mxu1 %vm27_vm0, %v8978_v34  ;;  %v3219_v34 = vld [vmem:[#allocation2 + $0xe9] sm:$0xff] }
 0x26d   : > { %v3230_v22 = vpack.c.bf16 %v3220_v10, %v3219_v34 }
 0x273   : > { %7342 = vmatmul.mubr.msk.bf16.gmra.mrb[32].mxu0 %vm27_vm0, %v3228_v0  ;;  %7478 = vmatmul.mubr.msk.bf16.vlgmr.msra.gmra.mrb[100].mxu1 %vm27_vm0, %v8998_v15  ;;  %v4509_v15 = vld [vmem:[#allocation2 + $0x227] sm:$0xff] }
 0x274   : > { %7345 = vmatprep.mubr.msk.bf16.mxu0 %vm27_vm0, %v3229_v18  ;;  %7481 = vmatprep.mubr.msk.bf16.mxu1 %vm27_vm0, %v9000_v9  ;;  %v4510_v9 = vld [vmem:[#allocation2 + $0x22f] sm:$0xff] }
 0x275   : > { %7494 = vmatpush3.bf16.msra.mxu1 %v8107_v36  ;;  %v4518_v54 = vpack.c.bf16 %v4510_v9, %v4509_v15  ;;  %v4686_v36 = vld [vmem:[#allocation2 + $0x228] sm:$0xff] }
 0x276   : > { %7495 = vmatprep.subr.bf16.mxu1 %v8108_v41  ;;  %v4695_v16 = vpack.c.bf16 %v4687_v42, %v4686_v36 }
 0x279   : > { %7496 = vmatpush3.bf16.msra.mxu1 %v8108_v41 }
 0x27a   : > { %7513 = vmatprep.subr.bf16.mxu1 %v8109_v32 }
 0x27b   : > { %7346 = vmatmul.mubr.msk.bf16.gmra.mrb[36].mxu0 %vm27_vm0, %v3230_v22  ;;  %7482 = vmatmul.mubr.msk.bf16.gmra.mrb[104].mxu1 %vm27_vm0, %v9011_v21  ;;  %v4673_v21 = vld [vmem:[#allocation2 + $0x150] sm:$0xff] }
 0x27c   : > { %7349 = vmatprep.mubr.msk.bf16.mxu0 %vm27_vm0, %v9028_v55  ;;  %7485 = vmatprep.mubr.msk.bf16.mxu1 %vm27_vm0, %v9013_v27  ;;  %v4688_v48 = vpack.c.bf16 %v4673_v21, %v4672_v45  ;;  %v4674_v27 = vld [vmem:[#allocation2 + $0x168] sm:$0xff]  ;;  %v4675_v55 = vld [vmem:[#allocation2 + $0x170] sm:$0xff] }
 0x27d   : > { %v4689_v28 = vpack.c.bf16 %v4675_v55, %v4674_v27 }
 0x283   : > { %7350 = vmatmul.mubr.msk.bf16.gmra.mrb[40].mxu0 %vm27_vm0, %v9047_v58  ;;  %7486 = vmatmul.mubr.msk.bf16.gmra.mrb[108].mxu1 %vm27_vm0, %v9024_v51  ;;  %v4677_v58 = vld [vmem:[#allocation2 + $0x190] sm:$0xff]  ;;  %v8110_v51 = vld [vmem:[%s9610_s3 + $0x88] sm:$0xff]  }
 0x284   : > { %7489 = vmatprep.mubr.msk.bf16.mxu1 %vm27_vm0, %v9139_v47  ;;  %v4690_v47 = vpack.c.bf16 %v4677_v58, %v4676_v29 }
 0x28b   : > { %7490 = vmatmul.mubr.msk.bf16.gmra.mrb[112].mxu1 %vm27_vm0, %v4518_v54 }
 0x28c   : > { %7497 = vmatprep.mubr.msk.bf16.mxu1 %vm27_vm0, %v4688_v48 }
 0x293   : > { %7498 = vmatmul.mubr.msk.bf16.vlgmr.msra.gmra.mrb[100].mxu1 %vm27_vm0, %v4689_v28 }
 0x294   : > { %7501 = vmatprep.mubr.msk.bf16.mxu1 %vm27_vm0, %v4690_v47  ;;  %7514 = vmatpush3.bf16.msra.mxu1 %v8109_v32 }
 0x295   : > { %7515 = vmatprep.subr.bf16.mxu1 %v8110_v51 }
 0x298   : > { %7516 = vmatpush3.bf16.msra.mxu1 %v8110_v51 }
 0x29b   : > { %7502 = vmatmul.mubr.msk.bf16.gmra.mrb[104].mxu1 %vm27_vm0, %v4691_v19 }
 0x29c   : > { %7505 = vmatprep.mubr.msk.bf16.mxu1 %vm27_vm0, %v4692_v25 }
 0x2a3   : > { %7506 = vmatmul.mubr.msk.bf16.gmra.mrb[108].mxu1 %vm27_vm0, %v4693_v14 }
 0x2a4   : > { %7509 = vmatprep.mubr.msk.bf16.mxu1 %vm27_vm0, %v9185_v20  ;;  %v4863_v20 = vld [vmem:[#allocation2 + $0x229] sm:$0xff] }
 0x2ab   : > { %7510 = vmatmul.mubr.msk.bf16.gmra.mrb[112].mxu1 %vm27_vm0, %v4695_v16 }
 0x2ac   : > { %7517 = vmatprep.mubr.msk.bf16.mxu1 %vm27_vm0, %v9051_v13  ;;  %v4864_v13 = vld [vmem:[#allocation2 + $0x231] sm:$0xff] }
 0x2ad   : > { %v4872_v35 = vpack.c.bf16 %v4864_v13, %v4863_v20  ;;  %v5111_v13 = vld [vmem:[#allocation3 + $0x8] sm:$0xff] }
 0x2b3   : > { %7518 = vmatmul.mubr.msk.bf16.vlgmr.msra.gmra.mrb[100].mxu1 %vm27_vm0, %v9070_v33  ;;  %v8111_v33 = vld [vmem:[%s9612_s5 + $0x20] sm:$0xff]  }
 0x2b4   : > { %7521 = vmatprep.mubr.msk.bf16.mxu1 %vm27_vm0, %v9072_v39  ;;  %7533 = vmatprep.subr.bf16.mxu0 %v8111_v33  ;;  %v8112_v39 = vld [vmem:[%s9612_s5 + $0x28] sm:$0xff]  }
 0x2b5   : > { %7534 = vmatpush3.bf16.msra.mxu0 %v8111_v33 }
 0x2b6   : > { %7535 = vmatprep.subr.bf16.mxu0 %v8112_v39 }
 0x2b9   : > { %7536 = vmatpush3.bf16.msra.mxu0 %v8112_v39 }
 0x2bb   : > { %7522 = vmatmul.mubr.msk.bf16.gmra.mrb[104].mxu1 %vm27_vm0, %v9082_v57  ;;  %v8113_v57 = vld [vmem:[%s9612_s5 + $0x30] sm:$0xff]  }
 0x2bc   : > { %7525 = vmatprep.mubr.msk.bf16.mxu1 %vm27_vm0, %v9084_v59  ;;  %7537 = vmatprep.subr.bf16.mxu0 %v8113_v57  ;;  %v8114_v59 = vld [vmem:[%s9612_s5 + $0x38] sm:$0xff]  }
 0x2bd   : > { %7538 = vmatpush3.bf16.msra.mxu0 %v8113_v57 }
 0x2be   : > { %7539 = vmatprep.subr.bf16.mxu0 %v8114_v59 }
 0x2c1   : > { %7540 = vmatpush3.bf16.msra.mxu0 %v8114_v59 }
 0x2c3   : > { %7526 = vmatmul.mubr.msk.bf16.gmra.mrb[108].mxu1 %vm27_vm0, %v9094_v24  ;;  %v9301_v24 = vld [vmem:[%s9612_s5] sm:$0xff]  }
 0x2c4   : > { %7529 = vmatprep.mubr.msk.bf16.mxu1 %vm27_vm0, %v9225_v23  ;;  %7549 = vmatprep.subr.bf16.mxu0 %v9301_v24 }
 0x2cb   : > { %7530 = vmatmul.mubr.msk.bf16.gmra.mrb[112].mxu1 %vm27_vm0, %v4872_v35 }
 0x33e   : > { %v7339_v50 = vpop.f32.mrb[28].mxu0 }
 0x33f   : > { %v3394_v52 = vadd.f32 %v7339_v50, %v8313_v6  ;;  %v3307_v8 = vpop.f32.mrb[29].mxu0 }
 0x340   : > { %v3392_v17 = vadd.f32 %v8313_v6, %v3307_v8  ;;  %v7340_v49 = vpop.f32.mrb[30].mxu0 }
 0x341   : > { %v3410_v37 = vmax.f32 %v3394_v52, 0.0  ;;  %v3395_v56 = vadd.f32 %v7340_v49, %v8313_v6  ;;  %v3310_v43 = vpop.f32.mrb[31].mxu0 }
 0x342   : > { %v3408_v60 = vmax.f32 %v3392_v17, 0.0  ;;  %v3393_v63 = vadd.f32 %v8313_v6, %v3310_v43 }
 0x343   : > { %v3411_v53 = vmax.f32 %v3395_v56, 0.0 }
 0x344   : > { %v3424_v23 = vmax.f32 %v3408_v60, %v3410_v37  ;;  %v3409_v26 = vmax.f32 %v3393_v63, 0.0 }
 0x346   : > { %3432 = vst.msk [vmem:[#allocation5] sm:$0xff] %vm71_vm2, %v3424_v23  ;;  %v3425_v11 = vmax.f32 %v3409_v26, %v3411_v53  ;;  %v7343_v44 = vpop.f32.mrb[32].mxu0 }
 0x347   : > { %v3398_v31 = vadd.f32 %v7343_v44, %v8313_v6  ;;  %v3323_v38 = vpop.f32.mrb[33].mxu0 }
 0x348   : > { %3433 = vst.msk [vmem:[#allocation5 + $0x8] sm:$0xff] %vm71_vm2, %v3425_v11  ;;  %v3396_v0 = vadd.f32 %v8313_v6, %v3323_v38  ;;  %v7344_v18 = vpop.f32.mrb[34].mxu0 }
 0x349   : > { %v3414_v41 = vmax.f32 %v3398_v31, 0.0  ;;  %v3399_v34 = vadd.f32 %v7344_v18, %v8313_v6  ;;  %v3326_v10 = vpop.f32.mrb[35].mxu0 }
 0x34a   : > { %v3412_v32 = vmax.f32 %v3396_v0, 0.0  ;;  %v3397_v22 = vadd.f32 %v8313_v6, %v3326_v10 }
 0x34b   : > { %v3415_v15 = vmax.f32 %v3399_v34, 0.0  ;;  %v8117_v34 = vld [vmem:[%s9612_s5 + $0x10] sm:$0xff]  }
 0x34c   : > { %v3426_v9 = vmax.f32 %v3412_v32, %v3414_v41  ;;  %v3413_v54 = vmax.f32 %v3397_v22, 0.0  ;;  %v8116_v41 = vld [vmem:[%s9612_s5 + $0x8] sm:$0xff]   ;;  %v8118_v32 = vld [vmem:[%s9612_s5 + $0x18] sm:$0xff]  }
 0x34e   : > { %3434 = vst.msk [vmem:[#allocation5 + $0x10] sm:$0xff] %vm71_vm2, %v3426_v9  ;;  %v3427_v45 = vmax.f32 %v3413_v54, %v3415_v15  ;;  %v7347_v21 = vpop.f32.mrb[36].mxu0 }
 0x34f   : > { %v3440_v48 = vld [vmem:[#allocation5] ss:$2 sm:$0xff]  ;;  %v3448_v27 = vld [vmem:[#allocation5 + $0x1] ss:$2 sm:$0xff]  ;;  %v3402_v55 = vadd.f32 %v7347_v21, %v8313_v6  ;;  %v3339_v29 = vpop.f32.mrb[37].mxu0 }
 0x350   : > { %3435 = vst.msk [vmem:[#allocation5 + $0x18] sm:$0xff] %vm71_vm2, %v3427_v45  ;;  %v3400_v58 = vadd.f32 %v8313_v6, %v3339_v29  ;;  %v7348_v28 = vpop.f32.mrb[38].mxu0  ;;  %v3455_v51 = vmax.f32 %v3440_v48, %v3448_v27 }
 0x351   : > { %v3418_v47 = vmax.f32 %v3402_v55, 0.0  ;;  %v3403_v30 = vadd.f32 %v7348_v28, %v8313_v6  ;;  %v3342_v12 = vpop.f32.mrb[39].mxu0 }
 0x352   : > { %v3416_v40 = vmax.f32 %v3400_v58, 0.0  ;;  %v3401_v46 = vadd.f32 %v8313_v6, %v3342_v12  ;;  %3459 = vst.msk [vmem:[#allocation3 + $0x20] sm:$0xff] %vm71_vm2, %v3455_v51 }
 0x353   : > { %v3419_v19 = vmax.f32 %v3403_v30, 0.0 }
 0x354   : > { %v3428_v25 = vmax.f32 %v3416_v40, %v3418_v47  ;;  %v3417_v61 = vmax.f32 %v3401_v46, 0.0 }
 0x356   : > { %3436 = vst.msk [vmem:[#allocation5 + $0x20] sm:$0xff] %vm71_vm2, %v3428_v25  ;;  %v3429_v62 = vmax.f32 %v3417_v61, %v3419_v19  ;;  %v7351_v14 = vpop.f32.mrb[40].mxu0 }
 0x357   : > { %v3442_v36 = vld [vmem:[#allocation5 + $0x10] ss:$2 sm:$0xff]  ;;  %v3450_v42 = vld [vmem:[#allocation5 + $0x11] ss:$2 sm:$0xff]  ;;  %v3406_v16 = vadd.f32 %v7351_v14, %v8313_v6  ;;  %v3355_v20 = vpop.f32.mrb[41].mxu0 }
 0x358   : > { %v3456_v35 = vmax.f32 %v3442_v36, %v3450_v42  ;;  %3437 = vst.msk [vmem:[#allocation5 + $0x28] sm:$0xff] %vm71_vm2, %v3429_v62  ;;  %v3404_v33 = vadd.f32 %v8313_v6, %v3355_v20  ;;  %v7352_v39 = vpop.f32.mrb[42].mxu0 }
 0x359   : > { %v3422_v57 = vmax.f32 %v3406_v16, 0.0  ;;  %v3407_v59 = vadd.f32 %v7352_v39, %v8313_v6  ;;  %v3358_v50 = vpop.f32.mrb[43].mxu0  ;;  %v9326_v52 = vld [vmem:[#allocation3 + $0x20] sm:$0xff] }
 0x35a   : > { %3460 = vst.msk [vmem:[#allocation3 + $0x38] sm:$0xff] %vm71_vm2, %v3456_v35  ;;  %v3420_v8 = vmax.f32 %v3404_v33, 0.0  ;;  %v3405_v17 = vadd.f32 %v8313_v6, %v3358_v50  ;;  %v5119_v49 = vpack.c.bf16 %v9326_v52, %v5111_v13 }
 0x35b   : > { %v3423_v37 = vmax.f32 %v3407_v59, 0.0 }
 0x35c   : > { %v3430_v56 = vmax.f32 %v3420_v8, %v3422_v57  ;;  %v3421_v43 = vmax.f32 %v3405_v17, 0.0  ;;  %7541 = vmatprep.mubr.msk.bf16.mxu0 %vm71_vm2, %v5119_v49 }
 0x35e   : > { %3438 = vst.msk [vmem:[#allocation5 + $0x30] sm:$0xff] %vm71_vm2, %v3430_v56  ;;  %v3431_v60 = vmax.f32 %v3421_v43, %v3423_v37 }
 0x35f   : > { %v3444_v63 = vld [vmem:[#allocation5 + $0x20] ss:$2 sm:$0xff]  ;;  %v3452_v53 = vld [vmem:[#allocation5 + $0x21] ss:$2 sm:$0xff] }
 0x360   : > { %v3457_v23 = vmax.f32 %v3444_v63, %v3452_v53  ;;  %3439 = vst.msk [vmem:[#allocation5 + $0x38] sm:$0xff] %vm71_vm2, %v3431_v60 }
 0x361   : > { %v9334_v26 = vld [vmem:[#allocation3 + $0x38] sm:$0xff] }
 0x362   : > { %3461 = vst.msk [vmem:[#allocation3 + $0x50] sm:$0xff] %vm71_vm2, %v3457_v23  ;;  %v5599_v11 = vpack.c.bf16 %v9334_v26, %v9326_v52  ;;  %v8133_v52 = vld [vmem:[%s9612_s5 + $0xb0] sm:$0xff]  }
 0x367   : > { %v3446_v44 = vld [vmem:[#allocation5 + $0x30] ss:$2 sm:$0xff]  ;;  %v3454_v31 = vld [vmem:[#allocation5 + $0x31] ss:$2 sm:$0xff] }
 0x368   : > { %v3458_v38 = vmax.f32 %v3446_v44, %v3454_v31 }
 0x369   : > { %v9339_v0 = vld [vmem:[#allocation3 + $0x50] sm:$0xff] }
 0x36a   : > { %v9343_v18 = vpack.c.bf16 %v9339_v0, %v9334_v26  ;;  %3462 = vst.msk [vmem:[#allocation3 + $0x68] sm:$0xff] %vm71_vm2, %v3458_v38 }
 0x36c   : > { %7542 = vmatmul.mubr.msk.bf16.vlgmr.msra.gmra.mrb[44].mxu0 %vm71_vm2, %v9343_v18 }
 0x36d   : > { %7550 = vmatpush3.bf16.msra.mxu0 %v9301_v24  ;;  %v9365_v24 = vld [vmem:[%s9612_s5 + $0x40] sm:$0xff]  }
 0x36e   : > { %7551 = vmatprep.subr.bf16.mxu0 %v8116_v41 }
 0x371   : > { %v9355_v10 = vld [vmem:[#allocation3 + $0x68] sm:$0xff]  ;;  %7552 = vmatpush3.bf16.msra.mxu0 %v8116_v41 }
 0x372   : > { %7553 = vmatprep.subr.bf16.mxu0 %v8117_v34  ;;  %v5600_v22 = vpack.c.bf16 %v9355_v10, %v9339_v0  ;;  %v8134_v0 = vld [vmem:[%s9612_s5 + $0xb8] sm:$0xff]  }
 0x375   : > { %7554 = vmatpush3.bf16.msra.mxu0 %v8117_v34 }
 0x376   : > { %7555 = vmatprep.subr.bf16.mxu0 %v8118_v32 }
 0x379   : > { %7556 = vmatpush3.bf16.msra.mxu0 %v8118_v32 }
 0x37a   : > { %7565 = vmatprep.subr.bf16.mxu0 %v9365_v24 }
 0x386   : > { %v7519_v15 = vpop.f32.mrb[100].mxu1 }
 0x387   : > { %v5028_v9 = vadd.f32 %v7519_v15, %v8313_v6  ;;  %v4947_v54 = vpop.f32.mrb[101].mxu1 }
 0x388   : > { %v5026_v45 = vadd.f32 %v8313_v6, %v4947_v54  ;;  %v7520_v21 = vpop.f32.mrb[102].mxu1 }
 0x389   : > { %v5044_v48 = vmax.f32 %v5028_v9, 0.0  ;;  %v5029_v27 = vadd.f32 %v7520_v21, %v8313_v6  ;;  %v4950_v55 = vpop.f32.mrb[103].mxu1 }
 0x38a   : > { %v5042_v29 = vmax.f32 %v5026_v45, 0.0  ;;  %v5027_v58 = vadd.f32 %v8313_v6, %v4950_v55 }
 0x38b   : > { %v5045_v28 = vmax.f32 %v5029_v27, 0.0 }
 0x38c   : > { %v5058_v51 = vmax.f32 %v5042_v29, %v5044_v48  ;;  %v5043_v47 = vmax.f32 %v5027_v58, 0.0 }
 0x38e   : > { %5066 = vst.msk [vmem:[#allocation5] sm:$0xff] %vm71_vm2, %v5058_v51  ;;  %v5059_v30 = vmax.f32 %v5043_v47, %v5045_v28  ;;  %v7523_v12 = vpop.f32.mrb[104].mxu1 }
 0x38f   : > { %v5032_v40 = vadd.f32 %v7523_v12, %v8313_v6  ;;  %v4963_v46 = vpop.f32.mrb[105].mxu1 }
 0x390   : > { %5067 = vst.msk [vmem:[#allocation5 + $0x8] sm:$0xff] %vm71_vm2, %v5059_v30  ;;  %v5030_v19 = vadd.f32 %v8313_v6, %v4963_v46  ;;  %v7524_v25 = vpop.f32.mrb[106].mxu1 }
 0x391   : > { %v5048_v61 = vmax.f32 %v5032_v40, 0.0  ;;  %v5033_v62 = vadd.f32 %v7524_v25, %v8313_v6  ;;  %v4966_v14 = vpop.f32.mrb[107].mxu1 }
 0x392   : > { %v5046_v36 = vmax.f32 %v5030_v19, 0.0  ;;  %v5031_v42 = vadd.f32 %v8313_v6, %v4966_v14  ;;  %v5092_v14 = vld [vmem:[#allocation3 + $0x1f] sm:$0xff] }
 0x393   : > { %v5049_v16 = vmax.f32 %v5033_v62, 0.0  ;;  %v5091_v62 = vld [vmem:[#allocation3 + $0x7] sm:$0xff] }
 0x394   : > { %v5060_v20 = vmax.f32 %v5046_v36, %v5048_v61  ;;  %v5047_v13 = vmax.f32 %v5031_v42, 0.0 }
 0x396   : > { %5068 = vst.msk [vmem:[#allocation5 + $0x10] sm:$0xff] %vm71_vm2, %v5060_v20  ;;  %v5061_v35 = vmax.f32 %v5047_v13, %v5049_v16  ;;  %v7527_v33 = vpop.f32.mrb[108].mxu1  ;;  %v5099_v13 = vpack.c.bf16 %v5092_v14, %v5091_v62 }
 0x397   : > { %v5036_v39 = vadd.f32 %v7527_v33, %v8313_v6  ;;  %v4979_v57 = vpop.f32.mrb[109].mxu1  ;;  %v5074_v59 = vld [vmem:[#allocation5] ss:$2 sm:$0xff]  ;;  %v5078_v50 = vld [vmem:[#allocation5 + $0x1] ss:$2 sm:$0xff] }
 0x398   : > { %5069 = vst.msk [vmem:[#allocation5 + $0x18] sm:$0xff] %vm71_vm2, %v5061_v35  ;;  %v5034_v8 = vadd.f32 %v8313_v6, %v4979_v57  ;;  %v7528_v17 = vpop.f32.mrb[110].mxu1  ;;  %v5082_v49 = vmax.f32 %v5074_v59, %v5078_v50  ;;  %v5094_v35 = vld [vmem:[#allocation3 + $0x4f] sm:$0xff]  ;;  %v5095_v59 = vld [vmem:[#allocation3 + $0x67] sm:$0xff] }
 0x399   : > { %v5052_v37 = vmax.f32 %v5036_v39, 0.0  ;;  %v5037_v56 = vadd.f32 %v7528_v17, %v8313_v6  ;;  %v4982_v43 = vpop.f32.mrb[111].mxu1  ;;  %v5093_v39 = vld [vmem:[#allocation3 + $0x37] sm:$0xff]  ;;  %v8120_v50 = vld [vmem:[%s9612_s5 + $0x48] sm:$0xff]  }
 0x39a   : > { %v5050_v60 = vmax.f32 %v5034_v8, 0.0  ;;  %v5035_v63 = vadd.f32 %v8313_v6, %v4982_v43  ;;  %5087 = vst.msk [vmem:[#allocation3 + $0x80] sm:$0xff] %vm71_vm2, %v5082_v49  ;;  %v9415_v57 = vpack.c.bf16 %v5094_v35, %v5093_v39  ;;  %v8121_v17 = vld [vmem:[%s9612_s5 + $0x50] sm:$0xff]  }
 0x39b   : > { %v5053_v53 = vmax.f32 %v5037_v56, 0.0  ;;  %v9430_v56 = vld [vmem:[#allocation3 + $0x21] sm:$0xff] }
 0x39c   : > { %v5062_v23 = vmax.f32 %v5050_v60, %v5052_v37  ;;  %v5051_v44 = vmax.f32 %v5035_v63, 0.0  ;;  %v5333_v37 = vld [vmem:[#allocation3 + $0x9] sm:$0xff]  ;;  %v8122_v63 = vld [vmem:[%s9612_s5 + $0x58] sm:$0xff]  }
 0x39e   : > { %5070 = vst.msk [vmem:[#allocation5 + $0x20] sm:$0xff] %vm71_vm2, %v5062_v23  ;;  %v5063_v31 = vmax.f32 %v5051_v44, %v5053_v53  ;;  %v7531_v38 = vpop.f32.mrb[112].mxu1  ;;  %v8123_v53 = vld [vmem:[%s9612_s5 + $0x60] sm:$0xff]   ;;  %v9444_v23 = vld [vmem:[#allocation3 + $0x51] sm:$0xff] }
 0x39f   : > { %v5040_v41 = vadd.f32 %v7531_v38, %v8313_v6  ;;  %v4995_v34 = vpop.f32.mrb[113].mxu1  ;;  %v5075_v32 = vld [vmem:[#allocation5 + $0x10] ss:$2 sm:$0xff]  ;;  %v5079_v15 = vld [vmem:[#allocation5 + $0x11] ss:$2 sm:$0xff] }
 0x3a0   : > { %5071 = vst.msk [vmem:[#allocation5 + $0x28] sm:$0xff] %vm71_vm2, %v5063_v31  ;;  %v5038_v9 = vadd.f32 %v8313_v6, %v4995_v34  ;;  %v7532_v54 = vpop.f32.mrb[114].mxu1  ;;  %v5083_v45 = vmax.f32 %v5075_v32, %v5079_v15  ;;  %v5335_v31 = vld [vmem:[#allocation3 + $0x39] sm:$0xff]  ;;  %v8124_v34 = vld [vmem:[%s9612_s5 + $0x68] sm:$0xff]   ;;  %v8125_v15 = vld [vmem:[%s9612_s5 + $0x70] sm:$0xff]  }
 0x3a1   : > { %v5056_v21 = vmax.f32 %v5040_v41, 0.0  ;;  %v5041_v48 = vadd.f32 %v7532_v54, %v8313_v6  ;;  %v4998_v27 = vpop.f32.mrb[115].mxu1  ;;  %v9390_v55 = vld [vmem:[#allocation3 + $0x80] sm:$0xff]  ;;  %v9449_v38 = vpack.c.bf16 %v9444_v23, %v5335_v31  ;;  %v9451_v41 = vld [vmem:[#allocation3 + $0x69] sm:$0xff] }
 0x3a2   : > { %v5054_v29 = vmax.f32 %v5038_v9, 0.0  ;;  %v5039_v58 = vadd.f32 %v8313_v6, %v4998_v27  ;;  %v9395_v28 = vpack.c.bf16 %v9390_v55, %v9355_v10  ;;  %5088 = vst.msk [vmem:[#allocation3 + $0x98] sm:$0xff] %vm71_vm2, %v5083_v45  ;;  %v5096_v33 = vld [vmem:[#allocation3 + $0x7f] sm:$0xff]  ;;  %v5728_v10 = vpack.c.bf16 %v5335_v31, %v9430_v56 }
 0x3a3   : > { %v5057_v51 = vmax.f32 %v5041_v48, 0.0  ;;  %v9420_v8 = vpack.c.bf16 %v5096_v33, %v5095_v59  ;;  %v9446_v44 = vld [vmem:[#allocation3 + $0x81] sm:$0xff]  ;;  %v5470_v48 = vpack.c.bf16 %v5093_v39, %v5092_v14  ;;  %v8137_v14 = vld [vmem:[%s9612_s5 + $0xd0] sm:$0xff]  }
 0x3a4   : > { %v5064_v47 = vmax.f32 %v5054_v29, %v5056_v21  ;;  %v5055_v30 = vmax.f32 %v5039_v58, 0.0  ;;  %7545 = vmatprep.mubr.msk.bf16.mxu0 %vm71_vm2, %v9395_v28  ;;  %v9458_v32 = vpack.c.bf16 %v9446_v44, %v9451_v41  ;;  %v8126_v21 = vld [vmem:[%s9612_s5 + $0x78] sm:$0xff]   ;;  %v8127_v27 = vld [vmem:[%s9612_s5 + $0x80] sm:$0xff]   ;;  %v5471_v29 = vpack.c.bf16 %v5095_v59, %v5094_v35  ;;  %v8128_v58 = vld [vmem:[%s9612_s5 + $0x88] sm:$0xff]  }
 0x3a5   : > { %v8140_v35 = vld [vmem:[%s9612_s5 + $0xe8] sm:$0xff]   ;;  %v5857_v39 = vld [vmem:[#allocation3 + $0xdf] sm:$0xff] }
 0x3a6   : > { %5072 = vst.msk [vmem:[#allocation5 + $0x30] sm:$0xff] %vm71_vm2, %v5064_v47  ;;  %v5065_v12 = vmax.f32 %v5055_v30, %v5057_v51  ;;  %v8129_v47 = vld [vmem:[%s9612_s5 + $0x90] sm:$0xff]   ;;  %v8142_v59 = vld [vmem:[%s9612_s5 + $0xf8] sm:$0xff]  }
 0x3a7   : > { %v5076_v40 = vld [vmem:[#allocation5 + $0x20] ss:$2 sm:$0xff]  ;;  %v5080_v46 = vld [vmem:[#allocation5 + $0x21] ss:$2 sm:$0xff] }
 0x3a8   : > { %5073 = vst.msk [vmem:[#allocation5 + $0x38] sm:$0xff] %vm71_vm2, %v5065_v12  ;;  %v5084_v19 = vmax.f32 %v5076_v40, %v5080_v46  ;;  %v8130_v40 = vld [vmem:[%s9612_s5 + $0x98] sm:$0xff]   ;;  %v8131_v46 = vld [vmem:[%s9612_s5 + $0xa0] sm:$0xff]  }
 0x3a9   : > { %v9403_v42 = vld [vmem:[#allocation3 + $0x98] sm:$0xff] }
 0x3aa   : > { %5089 = vst.msk [vmem:[#allocation3 + $0xb0] sm:$0xff] %vm71_vm2, %v5084_v19  ;;  %v5097_v43 = vld [vmem:[#allocation3 + $0x97] sm:$0xff]  ;;  %v8132_v19 = vld [vmem:[%s9612_s5 + $0xa8] sm:$0xff]  }
 0x3ab   : > { %v5339_v54 = vld [vmem:[#allocation3 + $0x99] sm:$0xff]  ;;  %v5472_v51 = vpack.c.bf16 %v5097_v43, %v5096_v33  ;;  %v8141_v33 = vld [vmem:[%s9612_s5 + $0xf0] sm:$0xff]  }
 0x3ac   : > { %v5730_v62 = vpack.c.bf16 %v5339_v54, %v9446_v44 }
 0x3af   : > { %v5077_v25 = vld [vmem:[#allocation5 + $0x30] ss:$2 sm:$0xff]  ;;  %v5081_v61 = vld [vmem:[#allocation5 + $0x31] ss:$2 sm:$0xff] }
 0x3b0   : > { %v5085_v36 = vmax.f32 %v5077_v25, %v5081_v61  ;;  %v5601_v25 = vpack.c.bf16 %v9403_v42, %v9390_v55  ;;  %v5729_v55 = vpack.c.bf16 %v9451_v41, %v9444_v23  ;;  %v8136_v61 = vld [vmem:[%s9612_s5 + $0xc8] sm:$0xff]  }
 0x3b1   : > { %v9405_v16 = vld [vmem:[#allocation3 + $0xb0] sm:$0xff] }
 0x3b2   : > { %v9409_v20 = vpack.c.bf16 %v9405_v16, %v9403_v42  ;;  %5090 = vst.msk [vmem:[#allocation3 + $0xc8] sm:$0xff] %vm71_vm2, %v5085_v36  ;;  %v5098_v49 = vld [vmem:[#allocation3 + $0xaf] sm:$0xff] }
 0x3b3   : > { %v9432_v60 = vpack.c.bf16 %v5098_v49, %v5097_v43  ;;  %v9467_v9 = vld [vmem:[#allocation3 + $0xb1] sm:$0xff] }
 0x3b4   : > { %7546 = vmatmul.mubr.msk.bf16.gmra.mrb[48].mxu0 %vm71_vm2, %v9409_v20  ;;  %v9470_v45 = vpack.c.bf16 %v9467_v9, %v5339_v54 }
 0x3b5   : > { %7557 = vmatprep.mubr.msk.bf16.mxu0 %vm71_vm2, %v5099_v13  ;;  %v8139_v13 = vld [vmem:[%s9612_s5 + $0xe0] sm:$0xff]  }
 0x3b9   : > { %v9489_v30 = vld [vmem:[#allocation3 + $0xc7] sm:$0xff] }
 0x3ba   : > { %v5473_v12 = vpack.c.bf16 %v9489_v30, %v5098_v49  ;;  %v9516_v26 = vld [vmem:[#allocation3 + $0xc8] sm:$0xff] }
 0x3bb   : > { %v5727_v36 = vld [vmem:[#allocation3 + $0xc9] sm:$0xff] }
 0x3bc   : > { %7558 = vmatmul.mubr.msk.bf16.vlgmr.msra.gmra.mrb[44].mxu0 %vm71_vm2, %v9415_v57  ;;  %v5731_v42 = vpack.c.bf16 %v5727_v36, %v9467_v9 }
 0x3bd   : > { %7561 = vmatprep.mubr.msk.bf16.mxu0 %vm71_vm2, %v9420_v8  ;;  %7566 = vmatpush3.bf16.msra.mxu0 %v9365_v24  ;;  %v5341_v24 = vpack.c.bf16 %v9430_v56, %v5333_v37  ;;  %v8146_v37 = vld [vmem:[%s9612_s5 + $0x118] sm:$0xff]  }
 0x3be   : > { %7567 = vmatprep.subr.bf16.mxu0 %v8120_v50 }
 0x3c1   : > { %7568 = vmatpush3.bf16.msra.mxu0 %v8120_v50  ;;  %v8143_v50 = vld [vmem:[%s9612_s5 + $0x100] sm:$0xff]  }
 0x3c2   : > { %7569 = vmatprep.subr.bf16.mxu0 %v8121_v17 }
 0x3c4   : > { %7562 = vmatmul.mubr.msk.bf16.gmra.mrb[48].mxu0 %vm71_vm2, %v9432_v60 }
 0x3c5   : > { %7570 = vmatpush3.bf16.msra.mxu0 %v8121_v17  ;;  %7573 = vmatprep.mubr.msk.bf16.mxu0 %vm71_vm2, %v5341_v24  ;;  %v5986_v17 = vld [vmem:[#allocation3 + $0xe0] sm:$0xff] }
 0x3c6   : > { %7571 = vmatprep.subr.bf16.mxu0 %v8122_v63  ;;  %v5990_v49 = vpack.c.bf16 %v5986_v17, %v9516_v26 }
 0x3c9   : > { %7572 = vmatpush3.bf16.msra.mxu0 %v8122_v63 }
 0x3ca   : > { %7581 = vmatprep.subr.bf16.mxu0 %v8123_v53 }
 0x3cc   : > { %7574 = vmatmul.mubr.msk.bf16.vlgmr.msra.gmra.mrb[44].mxu0 %vm71_vm2, %v9449_v38 }
 0x3cd   : > { %7577 = vmatprep.mubr.msk.bf16.mxu0 %vm71_vm2, %v9458_v32  ;;  %7582 = vmatpush3.bf16.msra.mxu0 %v8123_v53 }
 0x3ce   : > { %7583 = vmatprep.subr.bf16.mxu0 %v8124_v34 }
 0x3d1   : > { %7584 = vmatpush3.bf16.msra.mxu0 %v8124_v34 }
 0x3d2   : > { %7585 = vmatprep.subr.bf16.mxu0 %v8125_v15 }
 0x3d4   : > { %7578 = vmatmul.mubr.msk.bf16.gmra.mrb[48].mxu0 %vm71_vm2, %v9470_v45 }
 0x3d5   : > { %7586 = vmatpush3.bf16.msra.mxu0 %v8125_v15  ;;  %7589 = vmatprep.mubr.msk.bf16.mxu0 %vm71_vm2, %v5470_v48 }
 0x3d6   : > { %7587 = vmatprep.subr.bf16.mxu0 %v8126_v21 }
 0x3d9   : > { %7588 = vmatpush3.bf16.msra.mxu0 %v8126_v21 }
 0x3da   : > { %7597 = vmatprep.subr.bf16.mxu0 %v8127_v27 }
 0x3dc   : > { %7590 = vmatmul.mubr.msk.bf16.vlgmr.msra.gmra.mrb[44].mxu0 %vm71_vm2, %v5471_v29 }
 0x3dd   : > { %7593 = vmatprep.mubr.msk.bf16.mxu0 %vm71_vm2, %v5472_v51  ;;  %7598 = vmatpush3.bf16.msra.mxu0 %v8127_v27 }
 0x3de   : > { %7599 = vmatprep.subr.bf16.mxu0 %v8128_v58 }
 0x3e1   : > { %7600 = vmatpush3.bf16.msra.mxu0 %v8128_v58 }
 0x3e2   : > { %7601 = vmatprep.subr.bf16.mxu0 %v8129_v47 }
 0x3e4   : > { %7594 = vmatmul.mubr.msk.bf16.gmra.mrb[48].mxu0 %vm71_vm2, %v5473_v12 }
 0x3e5   : > { %7602 = vmatpush3.bf16.msra.mxu0 %v8129_v47  ;;  %7605 = vmatprep.mubr.msk.bf16.mxu0 %vm71_vm2, %v5599_v11  ;;  %v5602_v11 = vpack.c.bf16 %v9516_v26, %v9405_v16  ;;  %v8138_v16 = vld [vmem:[%s9612_s5 + $0xd8] sm:$0xff]  }
 0x3e6   : > { %7603 = vmatprep.subr.bf16.mxu0 %v8130_v40 }
 0x3e9   : > { %7604 = vmatpush3.bf16.msra.mxu0 %v8130_v40 }
 0x3ea   : > { %7613 = vmatprep.subr.bf16.mxu0 %v8131_v46 }
 0x3ec   : > { %7606 = vmatmul.mubr.msk.bf16.vlgmr.msra.gmra.mrb[44].mxu0 %vm71_vm2, %v5600_v22  ;;  %v8135_v22 = vld [vmem:[%s9612_s5 + $0xc0] sm:$0xff]  }
 0x3ed   : > { %7609 = vmatprep.mubr.msk.bf16.mxu0 %vm71_vm2, %v5601_v25  ;;  %7614 = vmatpush3.bf16.msra.mxu0 %v8131_v46 }
 0x3ee   : > { %7615 = vmatprep.subr.bf16.mxu0 %v8132_v19 }
 0x3f1   : > { %7616 = vmatpush3.bf16.msra.mxu0 %v8132_v19 }
 0x3f2   : > { %7617 = vmatprep.subr.bf16.mxu0 %v8133_v52 }
 0x3f4   : > { %7610 = vmatmul.mubr.msk.bf16.gmra.mrb[48].mxu0 %vm71_vm2, %v5602_v11 }
 0x3f5   : > { %7618 = vmatpush3.bf16.msra.mxu0 %v8133_v52  ;;  %7621 = vmatprep.mubr.msk.bf16.mxu0 %vm71_vm2, %v5728_v10 }
 0x3f6   : > { %7619 = vmatprep.subr.bf16.mxu0 %v8134_v0 }
 0x3f9   : > { %7620 = vmatpush3.bf16.msra.mxu0 %v8134_v0 }
 0x3fa   : > { %7629 = vmatprep.subr.bf16.mxu0 %v8135_v22 }
 0x3fc   : > { %7622 = vmatmul.mubr.msk.bf16.vlgmr.msra.gmra.mrb[44].mxu0 %vm71_vm2, %v5729_v55 }
 0x3fd   : > { %7625 = vmatprep.mubr.msk.bf16.mxu0 %vm71_vm2, %v5730_v62  ;;  %7630 = vmatpush3.bf16.msra.mxu0 %v8135_v22 }
 0x3fe   : > { %7631 = vmatprep.subr.bf16.mxu0 %v8136_v61 }
 0x401   : > { %7632 = vmatpush3.bf16.msra.mxu0 %v8136_v61 }
 0x402   : > { %7633 = vmatprep.subr.bf16.mxu0 %v8137_v14 }
 0x404   : > { %7626 = vmatmul.mubr.msk.bf16.gmra.mrb[48].mxu0 %vm71_vm2, %v5731_v42 }
 0x405   : > { %7634 = vmatpush3.bf16.msra.mxu0 %v8137_v14  ;;  %7637 = vmatprep.mubr.msk.bf16.mxu0 %vm71_vm2, %v9415_v57  ;;  %v5861_v57 = vpack.c.bf16 %v5857_v39, %v9489_v30 }
 0x406   : > { %7635 = vmatprep.subr.bf16.mxu0 %v8138_v16 }
 0x409   : > { %7636 = vmatpush3.bf16.msra.mxu0 %v8138_v16 }
 0x40a   : > { %7645 = vmatprep.subr.bf16.mxu0 %v8139_v13 }
 0x40c   : > { %7638 = vmatmul.mubr.msk.bf16.vlgmr.msra.gmra.mrb[44].mxu0 %vm71_vm2, %v9420_v8  ;;  %v8144_v8 = vld [vmem:[%s9612_s5 + $0x108] sm:$0xff]  }
 0x40d   : > { %7641 = vmatprep.mubr.msk.bf16.mxu0 %vm71_vm2, %v9432_v60  ;;  %7646 = vmatpush3.bf16.msra.mxu0 %v8139_v13 }
 0x40e   : > { %7647 = vmatprep.subr.bf16.mxu0 %v8140_v35 }
 0x411   : > { %7648 = vmatpush3.bf16.msra.mxu0 %v8140_v35 }
 0x412   : > { %7649 = vmatprep.subr.bf16.mxu0 %v8141_v33 }
 0x414   : > { %7642 = vmatmul.mubr.msk.bf16.gmra.mrb[48].mxu0 %vm71_vm2, %v5861_v57 }
 0x415   : > { %7650 = vmatpush3.bf16.msra.mxu0 %v8141_v33  ;;  %7653 = vmatprep.mubr.msk.bf16.mxu0 %vm71_vm2, %v9343_v18  ;;  %v8145_v18 = vld [vmem:[%s9612_s5 + $0x110] sm:$0xff]  }
 0x416   : > { %7651 = vmatprep.subr.bf16.mxu0 %v8142_v59 }
 0x419   : > { %7652 = vmatpush3.bf16.msra.mxu0 %v8142_v59 }
 0x41a   : > { %7661 = vmatprep.subr.bf16.mxu0 %v8143_v50 }
 0x41c   : > { %7654 = vmatmul.mubr.msk.bf16.vlgmr.msra.gmra.mrb[44].mxu0 %vm71_vm2, %v9395_v28  ;;  %v6115_v28 = vld [vmem:[#allocation3 + $0xe1] sm:$0xff] }
 0x41d   : > { %7657 = vmatprep.mubr.msk.bf16.mxu0 %vm71_vm2, %v9409_v20  ;;  %7662 = vmatpush3.bf16.msra.mxu0 %v8143_v50  ;;  %v6119_v20 = vpack.c.bf16 %v6115_v28, %v5727_v36 }
 0x41e   : > { %7663 = vmatprep.subr.bf16.mxu0 %v8144_v8 }
 0x421   : > { %7664 = vmatpush3.bf16.msra.mxu0 %v8144_v8 }
 0x422   : > { %7665 = vmatprep.subr.bf16.mxu0 %v8145_v18 }
 0x424   : > { %7658 = vmatmul.mubr.msk.bf16.gmra.mrb[48].mxu0 %vm71_vm2, %v5990_v49 }
 0x425   : > { %7666 = vmatpush3.bf16.msra.mxu0 %v8145_v18  ;;  %7669 = vmatprep.mubr.msk.bf16.mxu0 %vm71_vm2, %v9449_v38 }
 0x426   : > { %7667 = vmatprep.subr.bf16.mxu0 %v8146_v37 }
 0x429   : > { %7668 = vmatpush3.bf16.msra.mxu0 %v8146_v37 }
 0x42c   : > { %7670 = vmatmul.mubr.msk.bf16.vlgmr.msra.gmra.mrb[44].mxu0 %vm71_vm2, %v9458_v32 }
 0x42d   : > { %7673 = vmatprep.mubr.msk.bf16.mxu0 %vm71_vm2, %v9470_v45 }
 0x434   : > { %7674 = vmatmul.mubr.msk.bf16.gmra.mrb[48].mxu0 %vm71_vm2, %v6119_v20 }
 0x4ff   : > { %v7671_v56 = vpop.f32.mrb[44].mxu0 }
 0x500   : > { %v6245_v43 = vadd.f32 %v7671_v56, %v8318_v7  ;;  %v6198_v60 = vpop.f32.mrb[45].mxu0 }
 0x501   : > { %v6243_v63 = vadd.f32 %v8318_v7, %v6198_v60  ;;  %v7672_v24 = vpop.f32.mrb[46].mxu0 }
 0x502   : > { %v6246_v53 = vadd.f32 %v7672_v24, %v8318_v7  ;;  %v6201_v23 = vpop.f32.mrb[47].mxu0  ;;  %v6253_v31 = vmax.f32 %v6245_v43, 0.0 }
 0x503   : > { %v6244_v44 = vadd.f32 %v8318_v7, %v6201_v23  ;;  %v6251_v41 = vmax.f32 %v6243_v63, 0.0 }
 0x504   : > { %v6254_v38 = vmax.f32 %v6246_v53, 0.0 }
 0x505   : > { %v6252_v34 = vmax.f32 %v6244_v44, 0.0 }
 0x506   : > { %v6260_v32 = vadd.f32 %v6254_v38, %v6253_v31 }
 0x507   : > { %v6259_v15 = vadd.f32 %v6252_v34, %v6251_v41  ;;  %v7675_v9 = vpop.f32.mrb[48].mxu0 }
 0x508   : > { %6264 = vst [vmem:[#allocation6 + $0x8] sm:$0xff] %v6260_v32  ;;  %v6249_v54 = vadd.f32 %v7675_v9, %v8318_v7  ;;  %v6214_v45 = vpop.f32.mrb[49].mxu0 }
 0x509   : > { %6263 = vst [vmem:[#allocation6] sm:$0xff] %v6259_v15  ;;  %v6247_v21 = vadd.f32 %v8318_v7, %v6214_v45  ;;  %v7676_v48 = vpop.f32.mrb[50].mxu0 }
 0x50a   : > { %v6250_v27 = vadd.f32 %v7676_v48, %v8318_v7  ;;  %v6217_v29 = vpop.f32.mrb[51].mxu0  ;;  %v6257_v51 = vmax.f32 %v6249_v54, 0.0 }
 0x50b   : > { %v6248_v58 = vadd.f32 %v8318_v7, %v6217_v29  ;;  %v6255_v30 = vmax.f32 %v6247_v21, 0.0 }
 0x50c   : > { %v6258_v47 = vmax.f32 %v6250_v27, 0.0 }
 0x50d   : > { %v6256_v12 = vmax.f32 %v6248_v58, 0.0 }
 0x50e   : > { %v6262_v40 = vadd.f32 %v6258_v47, %v6257_v51 }
 0x50f   : > { %v6269_v46 = vld [vmem:[#allocation6 + $0x8] ss:$2 sm:$0xf]  ;;  %v6277_v19 = vld [vmem:[#allocation6 + $0x9] ss:$2 sm:$0xf]  ;;  %v6261_v25 = vadd.f32 %v6256_v12, %v6255_v30 }
 0x510   : > { %v6283_v52 = vadd.f32 %v6277_v19, %v6269_v46  ;;  %v6267_v26 = vld [vmem:[#allocation6] ss:$2 sm:$0xf]  ;;  %v6275_v11 = vld [vmem:[#allocation6 + $0x1] ss:$2 sm:$0xf] }
 0x511   : > { %6266 = vst [vmem:[#allocation6 + $0x18] sm:$0xff] %v6262_v40  ;;  %v6282_v0 = vadd.f32 %v6275_v11, %v6267_v26  ;;  %6265 = vst [vmem:[#allocation6 + $0x10] sm:$0xff] %v6261_v25 }
 0x512   : > { %v6287_v10 = vmul.f32 0.25, %v6283_v52 }
 0x513   : > { %v6286_v22 = vmul.f32 0.25, %v6282_v0 }
 0x514   : > { %v6291_v55 = vpack.c.bf16 %v6287_v10, %v6287_v10 }
 0x515   : > { %v6290_v61 = vpack.c.bf16 %v6286_v22, %v6286_v22 }
 0x516   : > { %6298 = vst [vmem:[%s6296_s10 + $0x2] sm:$0x3] %v6291_v55 }
 0x517   : > { %6297 = vst [vmem:[%s6296_s10] sm:$0x3] %v6290_v61 }
 0x518   : > { %v6273_v62 = vld [vmem:[#allocation6 + $0x18] ss:$2 sm:$0xf]  ;;  %v6281_v14 = vld [vmem:[#allocation6 + $0x19] ss:$2 sm:$0xf] }
 0x519   : > { %v6285_v36 = vadd.f32 %v6281_v14, %v6273_v62  ;;  %v6271_v42 = vld [vmem:[#allocation6 + $0x10] ss:$2 sm:$0xf]  ;;  %v6279_v16 = vld [vmem:[#allocation6 + $0x11] ss:$2 sm:$0xf] }
 0x51a   : > { %v6284_v13 = vadd.f32 %v6279_v16, %v6271_v42  ;;  %108 = sbr.rel (!%p106_p0) target bundleno = 32 (0x20), region = 98 }
 0x51b   : > { %v6289_v35 = vmul.f32 0.25, %v6285_v36 }
 0x51c   : > { %v6288_v33 = vmul.f32 0.25, %v6284_v13 }
 0x51d   : > { %v6293_v39 = vpack.c.bf16 %v6289_v35, %v6289_v35 }
 0x51e   : > { %v6292_v57 = vpack.c.bf16 %v6288_v33, %v6288_v33 }
 0x51f   : > { %6300 = vst [vmem:[%s6296_s10 + $0x6] sm:$0x3] %v6293_v39 }
 0x520   : > { %6299 = vst [vmem:[%s6296_s10 + $0x4] sm:$0x3] %v6292_v57 }

// kernel: simple_biometric_forward.3
= control target key start
LH: loop header
LB: loop body
LE: loop exit
PB: predicated region body
PF: predicated region fallthrough
CT: control target
= control target key end

     0   :  { %s9859_s1 = inlined_call_operand.vmem [shape: bf16[2048,512], index: 1, kind: input, shape index: {}]   ;;  %s9860_s0 = inlined_call_operand.vmem [shape: bf16[8,2048], index: 0, kind: input, shape index: {}]   ;;  %s9861_s2 = inlined_call_operand.vmem [shape: f32[1,512], index: 2, kind: input, shape index: {}]   ;;  %s9862_s3 = inlined_call_operand.vmem [shape: bf16[512,128], index: 3, kind: input, shape index: {}]   ;;  %s9863_s4 = inlined_call_operand.vmem [shape: f32[1,128], index: 4, kind: input, shape index: {}]   ;;  %s9864_s5 = inlined_call_operand.vmem [shape: f32[8,128], index: 5, kind: output, shape index: {}]  }
   0x1   :  { %v7450_v0 = vld [vmem:[%s9859_s1 + $0x300] ss:$16 sps:$4 sm:$0xff]   ;;  %v54_v32 = vld [vmem:[%s9860_s0 + $0x8] sm:$0xff] }
   0x2   :  { %v7451_v1 = vld [vmem:[%s9859_s1 + $0x100] ss:$16 sps:$4 sm:$0xff]   ;;  %6702 = vmatprep.subr.bf16.mxu0 %v7450_v0  ;;  %v6085_v34 = vcombine.low %v54_v32, %v54_v32  ;;  %v6086_v35 = vcombine.high %v54_v32, %v54_v32 }
   0x3   :  { %v7452_v2 = vld [vmem:[%s9859_s1 + $0x200] ss:$16 sps:$4 sm:$0xff]   ;;  %6724 = vmatprep.subr.bf16.mxu1 %v7451_v1 }
   0x4   :  { %v7453_v3 = vld [vmem:[%s9859_s1] ss:$16 sps:$4 sm:$0xff]   ;;  %6703 = vmatpush3.bf16.msra.mxu0 %v7452_v2  ;;  %222 = vmatprep.mubr.bf16.mxu0 %v6086_v35 }
   0x5   :  { %v7454_v4 = vld [vmem:[%s9859_s1 + $0x320] ss:$16 sps:$4 sm:$0xff]   ;;  %6725 = vmatpush3.bf16.msra.mxu1 %v7453_v3 }
   0x6   :  { %v7455_v5 = vld [vmem:[%s9859_s1 + $0x120] ss:$16 sps:$4 sm:$0xff]   ;;  %6704 = vmatprep.subr.bf16.mxu0 %v7454_v4 }
   0x7   :  { %v7456_v6 = vld [vmem:[%s9859_s1 + $0x220] ss:$16 sps:$4 sm:$0xff]   ;;  %6726 = vmatprep.subr.bf16.mxu1 %v7455_v5 }
   0x8   :  { %v7457_v7 = vld [vmem:[%s9859_s1 + $0x20] ss:$16 sps:$4 sm:$0xff]   ;;  %6705 = vmatpush3.bf16.msra.mxu0 %v7456_v6 }
   0x9   :  { %v7458_v8 = vld [vmem:[%s9859_s1 + $0x340] ss:$16 sps:$4 sm:$0xff]   ;;  %6727 = vmatpush3.bf16.msra.mxu1 %v7457_v7 }
   0xa   :  { %v7459_v9 = vld [vmem:[%s9859_s1 + $0x140] ss:$16 sps:$4 sm:$0xff]   ;;  %6706 = vmatprep.subr.bf16.mxu0 %v7458_v8 }
   0xb   :  { %v7460_v10 = vld [vmem:[%s9859_s1 + $0x240] ss:$16 sps:$4 sm:$0xff]   ;;  %6728 = vmatprep.subr.bf16.mxu1 %v7459_v9  ;;  %v550_v9 = vld [vmem:[%s9860_s0 + $0x18] sm:$0xff] }
   0xc   :  { %v7461_v11 = vld [vmem:[%s9859_s1 + $0x40] ss:$16 sps:$4 sm:$0xff]   ;;  %6707 = vmatpush3.bf16.msra.mxu0 %v7460_v10  ;;  %v6139_v10 = vcombine.low %v550_v9, %v550_v9 }
   0xd   :  { %v7462_v12 = vld [vmem:[%s9859_s1 + $0x360] ss:$16 sps:$4 sm:$0xff]   ;;  %6729 = vmatpush3.bf16.msra.mxu1 %v7461_v11  ;;  %v6140_v11 = vcombine.high %v550_v9, %v550_v9 }
   0xe   :  { %v7463_v13 = vld [vmem:[%s9859_s1 + $0x160] ss:$16 sps:$4 sm:$0xff]   ;;  %6708 = vmatprep.subr.bf16.mxu0 %v7462_v12 }
   0xf   :  { %v7464_v14 = vld [vmem:[%s9859_s1 + $0x260] ss:$16 sps:$4 sm:$0xff]   ;;  %6730 = vmatprep.subr.bf16.mxu1 %v7463_v13 }
  0x10   :  { %v7465_v15 = vld [vmem:[%s9859_s1 + $0x60] ss:$16 sps:$4 sm:$0xff]   ;;  %6709 = vmatpush3.bf16.msra.mxu0 %v7464_v14 }
  0x11   :  { %v7466_v16 = vld [vmem:[%s9859_s1 + $0x380] ss:$16 sps:$4 sm:$0xff]   ;;  %6731 = vmatpush3.bf16.msra.mxu1 %v7465_v15 }
  0x12   :  { %v7467_v17 = vld [vmem:[%s9859_s1 + $0x180] ss:$16 sps:$4 sm:$0xff]   ;;  %6710 = vmatprep.subr.bf16.mxu0 %v7466_v16 }
  0x13   :  { %v7468_v18 = vld [vmem:[%s9859_s1 + $0x280] ss:$16 sps:$4 sm:$0xff]   ;;  %6732 = vmatprep.subr.bf16.mxu1 %v7467_v17 }
  0x14   :  { %v7469_v19 = vld [vmem:[%s9859_s1 + $0x80] ss:$16 sps:$4 sm:$0xff]   ;;  %6711 = vmatpush3.bf16.msra.mxu0 %v7468_v18 }
  0x15   :  { %v7470_v20 = vld [vmem:[%s9859_s1 + $0x3a0] ss:$16 sps:$4 sm:$0xff]   ;;  %6733 = vmatpush3.bf16.msra.mxu1 %v7469_v19 }
  0x16   :  { %v7471_v21 = vld [vmem:[%s9859_s1 + $0x1a0] ss:$16 sps:$4 sm:$0xff]   ;;  %6712 = vmatprep.subr.bf16.mxu0 %v7470_v20 }
  0x17   :  { %v7472_v22 = vld [vmem:[%s9859_s1 + $0x2a0] ss:$16 sps:$4 sm:$0xff]   ;;  %6734 = vmatprep.subr.bf16.mxu1 %v7471_v21 }
  0x18   :  { %v7473_v23 = vld [vmem:[%s9859_s1 + $0xa0] ss:$16 sps:$4 sm:$0xff]   ;;  %6713 = vmatpush3.bf16.msra.mxu0 %v7472_v22 }
  0x19   :  { %v7474_v24 = vld [vmem:[%s9859_s1 + $0x3c0] ss:$16 sps:$4 sm:$0xff]   ;;  %6735 = vmatpush3.bf16.msra.mxu1 %v7473_v23 }
  0x1a   :  { %v7475_v25 = vld [vmem:[%s9859_s1 + $0x1c0] ss:$16 sps:$4 sm:$0xff]   ;;  %6714 = vmatprep.subr.bf16.mxu0 %v7474_v24 }
  0x1b   :  { %v7476_v26 = vld [vmem:[%s9859_s1 + $0x2c0] ss:$16 sps:$4 sm:$0xff]   ;;  %6736 = vmatprep.subr.bf16.mxu1 %v7475_v25 }
  0x1c   :  { %v7477_v27 = vld [vmem:[%s9859_s1 + $0xc0] ss:$16 sps:$4 sm:$0xff]   ;;  %6715 = vmatpush3.bf16.msra.mxu0 %v7476_v26 }
  0x1d   :  { %v7478_v28 = vld [vmem:[%s9859_s1 + $0x3e0] ss:$16 sps:$4 sm:$0xff]   ;;  %6737 = vmatpush3.bf16.msra.mxu1 %v7477_v27 }
  0x1e   :  { %v7479_v29 = vld [vmem:[%s9859_s1 + $0x1e0] ss:$16 sps:$4 sm:$0xff]   ;;  %6716 = vmatprep.subr.bf16.mxu0 %v7478_v28 }
  0x1f   :  { %v7480_v30 = vld [vmem:[%s9859_s1 + $0x2e0] ss:$16 sps:$4 sm:$0xff]   ;;  %6738 = vmatprep.subr.bf16.mxu1 %v7479_v29 }
  0x20   :  { %v7481_v31 = vld [vmem:[%s9859_s1 + $0xe0] ss:$16 sps:$4 sm:$0xff]   ;;  %6717 = vmatpush3.bf16.msra.mxu0 %v7480_v30 }
  0x21   :  { %v21_v33 = vld [vmem:[%s9860_s0] sm:$0xff]  ;;  %6739 = vmatpush3.bf16.msra.mxu1 %v7481_v31  ;;  %v373_v6 = vld [vmem:[%s9860_s0 + $0x10] sm:$0xff] }
  0x22   :  { %v6103_v36 = vcombine.low %v21_v33, %v21_v33  ;;  %v6104_v37 = vcombine.high %v21_v33, %v21_v33  ;;  %v7486_v38 = vld [vmem:[%s9859_s1 + $0x500] ss:$16 sps:$4 sm:$0xff]   ;;  %v6121_v7 = vcombine.low %v373_v6, %v373_v6  ;;  %v6122_v8 = vcombine.high %v373_v6, %v373_v6 }
  0x23   :  { %v7487_v39 = vld [vmem:[%s9859_s1 + $0x700] ss:$16 sps:$4 sm:$0xff]   ;;  %223 = vmatmul.mubr.bf16.vlgmr.msra.gmra.mrb[0].mxu0 %v6085_v34  ;;  %6746 = vmatprep.subr.bf16.mxu0 %v7486_v38 }
  0x24   :  { %365 = vmatprep.mubr.bf16.mxu1 %v6104_v37  ;;  %v7488_v40 = vld [vmem:[%s9859_s1 + $0x400] ss:$16 sps:$4 sm:$0xff]   ;;  %6768 = vmatprep.subr.bf16.mxu1 %v7487_v39 }
  0x25   :  { %366 = vmatmul.mubr.bf16.vlgmr.msra.gmra.mrb[0].mxu1 %v6103_v36  ;;  %v7489_v41 = vld [vmem:[%s9859_s1 + $0x600] ss:$16 sps:$4 sm:$0xff]   ;;  %6747 = vmatpush3.bf16.msra.mxu0 %v7488_v40 }
  0x26   :  { %v7490_v42 = vld [vmem:[%s9859_s1 + $0x520] ss:$16 sps:$4 sm:$0xff]   ;;  %6769 = vmatpush3.bf16.msra.mxu1 %v7489_v41  ;;  %541 = vmatprep.mubr.bf16.mxu0 %v6122_v8 }
  0x27   :  { %v7491_v43 = vld [vmem:[%s9859_s1 + $0x720] ss:$16 sps:$4 sm:$0xff]   ;;  %6748 = vmatprep.subr.bf16.mxu0 %v7490_v42  ;;  %718 = vmatprep.mubr.bf16.mxu1 %v6140_v11 }
  0x28   :  { %v7492_v44 = vld [vmem:[%s9859_s1 + $0x420] ss:$16 sps:$4 sm:$0xff]   ;;  %6770 = vmatprep.subr.bf16.mxu1 %v7491_v43 }
  0x29   :  { %v7493_v45 = vld [vmem:[%s9859_s1 + $0x620] ss:$16 sps:$4 sm:$0xff]   ;;  %6749 = vmatpush3.bf16.msra.mxu0 %v7492_v44 }
  0x2a   :  { %v7494_v46 = vld [vmem:[%s9859_s1 + $0x540] ss:$16 sps:$4 sm:$0xff]   ;;  %6771 = vmatpush3.bf16.msra.mxu1 %v7493_v45  ;;  %v904_v45 = vld [vmem:[%s9860_s0 + $0x28] sm:$0xff] }
  0x2b   :  { %v7495_v47 = vld [vmem:[%s9859_s1 + $0x740] ss:$16 sps:$4 sm:$0xff]   ;;  %6750 = vmatprep.subr.bf16.mxu0 %v7494_v46 }
  0x2c   :  { %v7496_v48 = vld [vmem:[%s9859_s1 + $0x440] ss:$16 sps:$4 sm:$0xff]   ;;  %6772 = vmatprep.subr.bf16.mxu1 %v7495_v47 }
  0x2d   :  { %v7497_v49 = vld [vmem:[%s9859_s1 + $0x640] ss:$16 sps:$4 sm:$0xff]   ;;  %6751 = vmatpush3.bf16.msra.mxu0 %v7496_v48  ;;  %v6175_v48 = vcombine.low %v904_v45, %v904_v45 }
  0x2e   :  { %v7498_v50 = vld [vmem:[%s9859_s1 + $0x560] ss:$16 sps:$4 sm:$0xff]   ;;  %6773 = vmatpush3.bf16.msra.mxu1 %v7497_v49  ;;  %v6176_v49 = vcombine.high %v904_v45, %v904_v45  ;;  %v7615_v45 = vld [vmem:[%s9859_s1 + $0x1a4] ss:$16 sps:$4 sm:$0xff]  }
  0x2f   :  { %v7499_v51 = vld [vmem:[%s9859_s1 + $0x760] ss:$16 sps:$4 sm:$0xff]   ;;  %6752 = vmatprep.subr.bf16.mxu0 %v7498_v50 }
  0x30   :  { %v7500_v52 = vld [vmem:[%s9859_s1 + $0x460] ss:$16 sps:$4 sm:$0xff]   ;;  %6774 = vmatprep.subr.bf16.mxu1 %v7499_v51 }
  0x31   :  { %v7501_v53 = vld [vmem:[%s9859_s1 + $0x660] ss:$16 sps:$4 sm:$0xff]   ;;  %6753 = vmatpush3.bf16.msra.mxu0 %v7500_v52 }
  0x32   :  { %v7502_v54 = vld [vmem:[%s9859_s1 + $0x580] ss:$16 sps:$4 sm:$0xff]   ;;  %6775 = vmatpush3.bf16.msra.mxu1 %v7501_v53 }
  0x33   :  { %v7503_v55 = vld [vmem:[%s9859_s1 + $0x780] ss:$16 sps:$4 sm:$0xff]   ;;  %6754 = vmatprep.subr.bf16.mxu0 %v7502_v54 }
  0x34   :  { %v7504_v56 = vld [vmem:[%s9859_s1 + $0x480] ss:$16 sps:$4 sm:$0xff]   ;;  %6776 = vmatprep.subr.bf16.mxu1 %v7503_v55 }
  0x35   :  { %v7505_v57 = vld [vmem:[%s9859_s1 + $0x680] ss:$16 sps:$4 sm:$0xff]   ;;  %6755 = vmatpush3.bf16.msra.mxu0 %v7504_v56 }
  0x36   :  { %v7506_v58 = vld [vmem:[%s9859_s1 + $0x5a0] ss:$16 sps:$4 sm:$0xff]   ;;  %6777 = vmatpush3.bf16.msra.mxu1 %v7505_v57 }
  0x37   :  { %v7507_v59 = vld [vmem:[%s9859_s1 + $0x7a0] ss:$16 sps:$4 sm:$0xff]   ;;  %6756 = vmatprep.subr.bf16.mxu0 %v7506_v58 }
  0x38   :  { %v7508_v60 = vld [vmem:[%s9859_s1 + $0x4a0] ss:$16 sps:$4 sm:$0xff]   ;;  %6778 = vmatprep.subr.bf16.mxu1 %v7507_v59 }
  0x39   :  { %v7509_v61 = vld [vmem:[%s9859_s1 + $0x6a0] ss:$16 sps:$4 sm:$0xff]   ;;  %6757 = vmatpush3.bf16.msra.mxu0 %v7508_v60 }
  0x3a   :  { %v7510_v62 = vld [vmem:[%s9859_s1 + $0x5c0] ss:$16 sps:$4 sm:$0xff]   ;;  %6779 = vmatpush3.bf16.msra.mxu1 %v7509_v61 }
  0x3b   :  { %v7511_v63 = vld [vmem:[%s9859_s1 + $0x7c0] ss:$16 sps:$4 sm:$0xff]   ;;  %6758 = vmatprep.subr.bf16.mxu0 %v7510_v62 }
  0x3c   :  { %v7512_v0 = vld [vmem:[%s9859_s1 + $0x4c0] ss:$16 sps:$4 sm:$0xff]   ;;  %6780 = vmatprep.subr.bf16.mxu1 %v7511_v63 }
  0x3d   :  { %v7513_v1 = vld [vmem:[%s9859_s1 + $0x6c0] ss:$16 sps:$4 sm:$0xff]   ;;  %6759 = vmatpush3.bf16.msra.mxu0 %v7512_v0 }
  0x3e   :  { %v7514_v2 = vld [vmem:[%s9859_s1 + $0x5e0] ss:$16 sps:$4 sm:$0xff]   ;;  %6781 = vmatpush3.bf16.msra.mxu1 %v7513_v1 }
  0x3f   :  { %v7515_v3 = vld [vmem:[%s9859_s1 + $0x7e0] ss:$16 sps:$4 sm:$0xff]   ;;  %6760 = vmatprep.subr.bf16.mxu0 %v7514_v2 }
  0x40   :  { %v7516_v4 = vld [vmem:[%s9859_s1 + $0x4e0] ss:$16 sps:$4 sm:$0xff]   ;;  %6782 = vmatprep.subr.bf16.mxu1 %v7515_v3 }
  0x41   :  { %v7517_v5 = vld [vmem:[%s9859_s1 + $0x6e0] ss:$16 sps:$4 sm:$0xff]   ;;  %6761 = vmatpush3.bf16.msra.mxu0 %v7516_v4 }
  0x42   :  { %6783 = vmatpush3.bf16.msra.mxu1 %v7517_v5  ;;  %v7522_v12 = vld [vmem:[%s9859_s1 + $0x900] ss:$16 sps:$4 sm:$0xff]  }
  0x43   :  { %v7523_v13 = vld [vmem:[%s9859_s1 + $0xb00] ss:$16 sps:$4 sm:$0xff]   ;;  %6790 = vmatprep.subr.bf16.mxu0 %v7522_v12 }
  0x44   :  { %v7524_v14 = vld [vmem:[%s9859_s1 + $0x800] ss:$16 sps:$4 sm:$0xff]   ;;  %542 = vmatmul.mubr.bf16.vlgmr.msra.gmra.mrb[4].mxu0 %v6121_v7  ;;  %6812 = vmatprep.subr.bf16.mxu1 %v7523_v13 }
  0x45   :  { %719 = vmatmul.mubr.bf16.vlgmr.msra.gmra.mrb[4].mxu1 %v6139_v10  ;;  %v7525_v15 = vld [vmem:[%s9859_s1 + $0xa00] ss:$16 sps:$4 sm:$0xff]   ;;  %6791 = vmatpush3.bf16.msra.mxu0 %v7524_v14 }
  0x46   :  { %v7526_v16 = vld [vmem:[%s9859_s1 + $0x920] ss:$16 sps:$4 sm:$0xff]   ;;  %6813 = vmatpush3.bf16.msra.mxu1 %v7525_v15  ;;  %1072 = vmatprep.mubr.bf16.mxu1 %v6176_v49  ;;  %v7619_v49 = vld [vmem:[%s9859_s1 + $0x1c4] ss:$16 sps:$4 sm:$0xff]  }
  0x47   :  { %v7527_v17 = vld [vmem:[%s9859_s1 + $0xb20] ss:$16 sps:$4 sm:$0xff]   ;;  %6792 = vmatprep.subr.bf16.mxu0 %v7526_v16 }
  0x48   :  { %v7528_v18 = vld [vmem:[%s9859_s1 + $0x820] ss:$16 sps:$4 sm:$0xff]   ;;  %6814 = vmatprep.subr.bf16.mxu1 %v7527_v17 }
  0x49   :  { %v7529_v19 = vld [vmem:[%s9859_s1 + $0xa20] ss:$16 sps:$4 sm:$0xff]   ;;  %6793 = vmatpush3.bf16.msra.mxu0 %v7528_v18 }
  0x4a   :  { %v7530_v20 = vld [vmem:[%s9859_s1 + $0x940] ss:$16 sps:$4 sm:$0xff]   ;;  %6815 = vmatpush3.bf16.msra.mxu1 %v7529_v19  ;;  %v1258_v19 = vld [vmem:[%s9860_s0 + $0x38] sm:$0xff] }
  0x4b   :  { %v7531_v21 = vld [vmem:[%s9859_s1 + $0xb40] ss:$16 sps:$4 sm:$0xff]   ;;  %6794 = vmatprep.subr.bf16.mxu0 %v7530_v20 }
  0x4c   :  { %v7532_v22 = vld [vmem:[%s9859_s1 + $0x840] ss:$16 sps:$4 sm:$0xff]   ;;  %6816 = vmatprep.subr.bf16.mxu1 %v7531_v21 }
  0x4d   :  { %v7533_v23 = vld [vmem:[%s9859_s1 + $0xa40] ss:$16 sps:$4 sm:$0xff]   ;;  %6795 = vmatpush3.bf16.msra.mxu0 %v7532_v22  ;;  %v6211_v22 = vcombine.low %v1258_v19, %v1258_v19 }
  0x4e   :  { %v7534_v24 = vld [vmem:[%s9859_s1 + $0x960] ss:$16 sps:$4 sm:$0xff]   ;;  %6817 = vmatpush3.bf16.msra.mxu1 %v7533_v23  ;;  %v7594_v23 = vld [vmem:[%s9859_s1 + $0x304] ss:$16 sps:$4 sm:$0xff]  }
  0x4f   :  { %v7535_v25 = vld [vmem:[%s9859_s1 + $0xb60] ss:$16 sps:$4 sm:$0xff]   ;;  %6796 = vmatprep.subr.bf16.mxu0 %v7534_v24  ;;  %v6212_v24 = vcombine.high %v1258_v19, %v1258_v19  ;;  %v7651_v19 = vld [vmem:[%s9859_s1 + $0x7a4] ss:$16 sps:$4 sm:$0xff]  }
  0x50   :  { %v7536_v26 = vld [vmem:[%s9859_s1 + $0x860] ss:$16 sps:$4 sm:$0xff]   ;;  %6818 = vmatprep.subr.bf16.mxu1 %v7535_v25  ;;  %v7595_v25 = vld [vmem:[%s9859_s1 + $0x104] ss:$16 sps:$4 sm:$0xff]  }
  0x51   :  { %v7537_v27 = vld [vmem:[%s9859_s1 + $0xa60] ss:$16 sps:$4 sm:$0xff]   ;;  %6797 = vmatpush3.bf16.msra.mxu0 %v7536_v26  ;;  %v7596_v26 = vld [vmem:[%s9859_s1 + $0x204] ss:$16 sps:$4 sm:$0xff]  }
  0x52   :  { %v7538_v28 = vld [vmem:[%s9859_s1 + $0x980] ss:$16 sps:$4 sm:$0xff]   ;;  %6819 = vmatpush3.bf16.msra.mxu1 %v7537_v27  ;;  %v7597_v27 = vld [vmem:[%s9859_s1 + $0x4] ss:$16 sps:$4 sm:$0xff]  }
  0x53   :  { %v7539_v29 = vld [vmem:[%s9859_s1 + $0xb80] ss:$16 sps:$4 sm:$0xff]   ;;  %6798 = vmatprep.subr.bf16.mxu0 %v7538_v28  ;;  %v7598_v28 = vld [vmem:[%s9859_s1 + $0x324] ss:$16 sps:$4 sm:$0xff]  }
  0x54   :  { %v7540_v30 = vld [vmem:[%s9859_s1 + $0x880] ss:$16 sps:$4 sm:$0xff]   ;;  %6820 = vmatprep.subr.bf16.mxu1 %v7539_v29  ;;  %v7599_v29 = vld [vmem:[%s9859_s1 + $0x124] ss:$16 sps:$4 sm:$0xff]  }
  0x55   :  { %v7541_v31 = vld [vmem:[%s9859_s1 + $0xa80] ss:$16 sps:$4 sm:$0xff]   ;;  %6799 = vmatpush3.bf16.msra.mxu0 %v7540_v30  ;;  %v7600_v30 = vld [vmem:[%s9859_s1 + $0x224] ss:$16 sps:$4 sm:$0xff]  }
  0x56   :  { %v7542_v32 = vld [vmem:[%s9859_s1 + $0x9a0] ss:$16 sps:$4 sm:$0xff]   ;;  %6821 = vmatpush3.bf16.msra.mxu1 %v7541_v31  ;;  %v7601_v31 = vld [vmem:[%s9859_s1 + $0x24] ss:$16 sps:$4 sm:$0xff]  }
  0x57   :  { %v7543_v33 = vld [vmem:[%s9859_s1 + $0xba0] ss:$16 sps:$4 sm:$0xff]   ;;  %6800 = vmatprep.subr.bf16.mxu0 %v7542_v32  ;;  %v7602_v32 = vld [vmem:[%s9859_s1 + $0x344] ss:$16 sps:$4 sm:$0xff]  }
  0x58   :  { %v7544_v34 = vld [vmem:[%s9859_s1 + $0x8a0] ss:$16 sps:$4 sm:$0xff]   ;;  %6822 = vmatprep.subr.bf16.mxu1 %v7543_v33  ;;  %v7603_v33 = vld [vmem:[%s9859_s1 + $0x144] ss:$16 sps:$4 sm:$0xff]  }
  0x59   :  { %v7545_v35 = vld [vmem:[%s9859_s1 + $0xaa0] ss:$16 sps:$4 sm:$0xff]   ;;  %6801 = vmatpush3.bf16.msra.mxu0 %v7544_v34  ;;  %v7604_v34 = vld [vmem:[%s9859_s1 + $0x244] ss:$16 sps:$4 sm:$0xff]  }
  0x5a   :  { %v7546_v36 = vld [vmem:[%s9859_s1 + $0x9c0] ss:$16 sps:$4 sm:$0xff]   ;;  %6823 = vmatpush3.bf16.msra.mxu1 %v7545_v35  ;;  %v7605_v35 = vld [vmem:[%s9859_s1 + $0x44] ss:$16 sps:$4 sm:$0xff]  }
  0x5b   :  { %v7547_v37 = vld [vmem:[%s9859_s1 + $0xbc0] ss:$16 sps:$4 sm:$0xff]   ;;  %6802 = vmatprep.subr.bf16.mxu0 %v7546_v36  ;;  %v7606_v36 = vld [vmem:[%s9859_s1 + $0x364] ss:$16 sps:$4 sm:$0xff]  }
  0x5c   :  { %v7548_v38 = vld [vmem:[%s9859_s1 + $0x8c0] ss:$16 sps:$4 sm:$0xff]   ;;  %6824 = vmatprep.subr.bf16.mxu1 %v7547_v37  ;;  %v7607_v37 = vld [vmem:[%s9859_s1 + $0x164] ss:$16 sps:$4 sm:$0xff]  }
  0x5d   :  { %v7549_v39 = vld [vmem:[%s9859_s1 + $0xac0] ss:$16 sps:$4 sm:$0xff]   ;;  %6803 = vmatpush3.bf16.msra.mxu0 %v7548_v38  ;;  %v7608_v38 = vld [vmem:[%s9859_s1 + $0x264] ss:$16 sps:$4 sm:$0xff]  }
  0x5e   :  { %v7550_v40 = vld [vmem:[%s9859_s1 + $0x9e0] ss:$16 sps:$4 sm:$0xff]   ;;  %6825 = vmatpush3.bf16.msra.mxu1 %v7549_v39  ;;  %v7609_v39 = vld [vmem:[%s9859_s1 + $0x64] ss:$16 sps:$4 sm:$0xff]  }
  0x5f   :  { %v7551_v41 = vld [vmem:[%s9859_s1 + $0xbe0] ss:$16 sps:$4 sm:$0xff]   ;;  %6804 = vmatprep.subr.bf16.mxu0 %v7550_v40  ;;  %v7610_v40 = vld [vmem:[%s9859_s1 + $0x384] ss:$16 sps:$4 sm:$0xff]  }
  0x60   :  { %v7552_v42 = vld [vmem:[%s9859_s1 + $0x8e0] ss:$16 sps:$4 sm:$0xff]   ;;  %6826 = vmatprep.subr.bf16.mxu1 %v7551_v41  ;;  %v7611_v41 = vld [vmem:[%s9859_s1 + $0x184] ss:$16 sps:$4 sm:$0xff]  }
  0x61   :  { %v7553_v43 = vld [vmem:[%s9859_s1 + $0xae0] ss:$16 sps:$4 sm:$0xff]   ;;  %6805 = vmatpush3.bf16.msra.mxu0 %v7552_v42  ;;  %v7612_v42 = vld [vmem:[%s9859_s1 + $0x284] ss:$16 sps:$4 sm:$0xff]  }
  0x62   :  { %v727_v44 = vld [vmem:[%s9860_s0 + $0x20] sm:$0xff]  ;;  %6827 = vmatpush3.bf16.msra.mxu1 %v7553_v43  ;;  %v1081_v18 = vld [vmem:[%s9860_s0 + $0x30] sm:$0xff] }
  0x63   :  { %v6157_v46 = vcombine.low %v727_v44, %v727_v44  ;;  %v6158_v47 = vcombine.high %v727_v44, %v727_v44  ;;  %v7558_v50 = vld [vmem:[%s9859_s1 + $0xd00] ss:$16 sps:$4 sm:$0xff]   ;;  %v6193_v20 = vcombine.low %v1081_v18, %v1081_v18  ;;  %v6194_v21 = vcombine.high %v1081_v18, %v1081_v18  ;;  %v7613_v43 = vld [vmem:[%s9859_s1 + $0x84] ss:$16 sps:$4 sm:$0xff]  }
  0x64   :  { %v7559_v51 = vld [vmem:[%s9859_s1 + $0xf00] ss:$16 sps:$4 sm:$0xff]   ;;  %6834 = vmatprep.subr.bf16.mxu0 %v7558_v50  ;;  %v7614_v44 = vld [vmem:[%s9859_s1 + $0x3a4] ss:$16 sps:$4 sm:$0xff]  }
  0x65   :  { %895 = vmatprep.mubr.bf16.mxu0 %v6158_v47  ;;  %v7560_v52 = vld [vmem:[%s9859_s1 + $0xc00] ss:$16 sps:$4 sm:$0xff]   ;;  %1073 = vmatmul.mubr.bf16.vlgmr.msra.gmra.mrb[8].mxu1 %v6175_v48  ;;  %v7617_v47 = vld [vmem:[%s9859_s1 + $0xa4] ss:$16 sps:$4 sm:$0xff]  }
  0x66   :  { %896 = vmatmul.mubr.bf16.vlgmr.msra.gmra.mrb[8].mxu0 %v6157_v46  ;;  %v7561_v53 = vld [vmem:[%s9859_s1 + $0xe00] ss:$16 sps:$4 sm:$0xff]   ;;  %6856 = vmatprep.subr.bf16.mxu1 %v7559_v51  ;;  %v7616_v46 = vld [vmem:[%s9859_s1 + $0x2a4] ss:$16 sps:$4 sm:$0xff]  }
  0x67   :  { %v7562_v54 = vld [vmem:[%s9859_s1 + $0xd20] ss:$16 sps:$4 sm:$0xff]   ;;  %6835 = vmatpush3.bf16.msra.mxu0 %v7560_v52  ;;  %6857 = vmatpush3.bf16.msra.mxu1 %v7561_v53  ;;  %v7618_v48 = vld [vmem:[%s9859_s1 + $0x3c4] ss:$16 sps:$4 sm:$0xff]  }
  0x68   :  { %v7563_v55 = vld [vmem:[%s9859_s1 + $0xf20] ss:$16 sps:$4 sm:$0xff]   ;;  %6836 = vmatprep.subr.bf16.mxu0 %v7562_v54  ;;  %1249 = vmatprep.mubr.bf16.mxu0 %v6194_v21  ;;  %v7620_v50 = vld [vmem:[%s9859_s1 + $0x2c4] ss:$16 sps:$4 sm:$0xff]  }
  0x69   :  { %v7564_v56 = vld [vmem:[%s9859_s1 + $0xc20] ss:$16 sps:$4 sm:$0xff]   ;;  %6858 = vmatprep.subr.bf16.mxu1 %v7563_v55  ;;  %1426 = vmatprep.mubr.bf16.mxu1 %v6212_v24  ;;  %v7621_v51 = vld [vmem:[%s9859_s1 + $0xc4] ss:$16 sps:$4 sm:$0xff]  }
  0x6a   :  { %v7565_v57 = vld [vmem:[%s9859_s1 + $0xe20] ss:$16 sps:$4 sm:$0xff]   ;;  %v7622_v52 = vld [vmem:[%s9859_s1 + $0x3e4] ss:$16 sps:$4 sm:$0xff]  }
  0x6b   :  { %v7566_v58 = vld [vmem:[%s9859_s1 + $0xd40] ss:$16 sps:$4 sm:$0xff]   ;;  %6837 = vmatpush3.bf16.msra.mxu0 %v7564_v56  ;;  %6859 = vmatpush3.bf16.msra.mxu1 %v7565_v57  ;;  %v7623_v53 = vld [vmem:[%s9859_s1 + $0x1e4] ss:$16 sps:$4 sm:$0xff]   ;;  %v1479_v56 = vld [vmem:[%s9860_s0 + $0x8] sm:$0xff] }
  0x6c   :  { %v7567_v59 = vld [vmem:[%s9859_s1 + $0xf40] ss:$16 sps:$4 sm:$0xff]   ;;  %6838 = vmatprep.subr.bf16.mxu0 %v7566_v58  ;;  %v7624_v54 = vld [vmem:[%s9859_s1 + $0x2e4] ss:$16 sps:$4 sm:$0xff]   ;;  %v6230_v57 = vcombine.low %v1479_v56, %v1479_v56  ;;  %v6231_v58 = vcombine.high %v1479_v56, %v1479_v56 }
  0x6d   :  { %v7568_v60 = vld [vmem:[%s9859_s1 + $0xc40] ss:$16 sps:$4 sm:$0xff]   ;;  %6860 = vmatprep.subr.bf16.mxu1 %v7567_v59  ;;  %v7625_v55 = vld [vmem:[%s9859_s1 + $0xe4] ss:$16 sps:$4 sm:$0xff]  }
  0x6e   :  { %v7569_v61 = vld [vmem:[%s9859_s1 + $0xe40] ss:$16 sps:$4 sm:$0xff]   ;;  %v7650_v18 = vld [vmem:[%s9859_s1 + $0x5a4] ss:$16 sps:$4 sm:$0xff]  }
  0x6f   :  { %v7570_v62 = vld [vmem:[%s9859_s1 + $0xd60] ss:$16 sps:$4 sm:$0xff]   ;;  %6839 = vmatpush3.bf16.msra.mxu0 %v7568_v60  ;;  %6861 = vmatpush3.bf16.msra.mxu1 %v7569_v61  ;;  %v7653_v21 = vld [vmem:[%s9859_s1 + $0x6a4] ss:$16 sps:$4 sm:$0xff]  }
  0x70   :  { %v7571_v63 = vld [vmem:[%s9859_s1 + $0xf60] ss:$16 sps:$4 sm:$0xff]   ;;  %6840 = vmatprep.subr.bf16.mxu0 %v7570_v62  ;;  %v7630_v62 = vld [vmem:[%s9859_s1 + $0x504] ss:$16 sps:$4 sm:$0xff]  }
  0x71   :  { %v7572_v0 = vld [vmem:[%s9859_s1 + $0xc60] ss:$16 sps:$4 sm:$0xff]   ;;  %6862 = vmatprep.subr.bf16.mxu1 %v7571_v63  ;;  %v7631_v63 = vld [vmem:[%s9859_s1 + $0x704] ss:$16 sps:$4 sm:$0xff]  }
  0x72   :  { %v7573_v1 = vld [vmem:[%s9859_s1 + $0xe60] ss:$16 sps:$4 sm:$0xff]   ;;  %v7656_v24 = vld [vmem:[%s9859_s1 + $0x4c4] ss:$16 sps:$4 sm:$0xff]  }
  0x73   :  { %v7574_v2 = vld [vmem:[%s9859_s1 + $0xd80] ss:$16 sps:$4 sm:$0xff]   ;;  %6841 = vmatpush3.bf16.msra.mxu0 %v7572_v0  ;;  %6863 = vmatpush3.bf16.msra.mxu1 %v7573_v1  ;;  %v7632_v0 = vld [vmem:[%s9859_s1 + $0x404] ss:$16 sps:$4 sm:$0xff]  }
  0x74   :  { %v7575_v3 = vld [vmem:[%s9859_s1 + $0xf80] ss:$16 sps:$4 sm:$0xff]   ;;  %6842 = vmatprep.subr.bf16.mxu0 %v7574_v2  ;;  %v7633_v1 = vld [vmem:[%s9859_s1 + $0x604] ss:$16 sps:$4 sm:$0xff]  }
  0x75   :  { %v7576_v4 = vld [vmem:[%s9859_s1 + $0xc80] ss:$16 sps:$4 sm:$0xff]   ;;  %6864 = vmatprep.subr.bf16.mxu1 %v7575_v3  ;;  %v7634_v2 = vld [vmem:[%s9859_s1 + $0x524] ss:$16 sps:$4 sm:$0xff]  }
  0x76   :  { %v7577_v5 = vld [vmem:[%s9859_s1 + $0xe80] ss:$16 sps:$4 sm:$0xff]   ;;  %v7635_v3 = vld [vmem:[%s9859_s1 + $0x724] ss:$16 sps:$4 sm:$0xff]  }
  0x77   :  { %v7578_v6 = vld [vmem:[%s9859_s1 + $0xda0] ss:$16 sps:$4 sm:$0xff]   ;;  %6843 = vmatpush3.bf16.msra.mxu0 %v7576_v4  ;;  %6865 = vmatpush3.bf16.msra.mxu1 %v7577_v5  ;;  %v7636_v4 = vld [vmem:[%s9859_s1 + $0x424] ss:$16 sps:$4 sm:$0xff]  }
  0x78   :  { %v7579_v7 = vld [vmem:[%s9859_s1 + $0xfa0] ss:$16 sps:$4 sm:$0xff]   ;;  %6844 = vmatprep.subr.bf16.mxu0 %v7578_v6  ;;  %v7637_v5 = vld [vmem:[%s9859_s1 + $0x624] ss:$16 sps:$4 sm:$0xff]  }
  0x79   :  { %v7580_v8 = vld [vmem:[%s9859_s1 + $0xca0] ss:$16 sps:$4 sm:$0xff]   ;;  %6866 = vmatprep.subr.bf16.mxu1 %v7579_v7  ;;  %v7638_v6 = vld [vmem:[%s9859_s1 + $0x544] ss:$16 sps:$4 sm:$0xff]  }
  0x7a   :  { %v7581_v9 = vld [vmem:[%s9859_s1 + $0xea0] ss:$16 sps:$4 sm:$0xff]   ;;  %v7639_v7 = vld [vmem:[%s9859_s1 + $0x744] ss:$16 sps:$4 sm:$0xff]  }
  0x7b   :  { %v7582_v10 = vld [vmem:[%s9859_s1 + $0xdc0] ss:$16 sps:$4 sm:$0xff]   ;;  %6845 = vmatpush3.bf16.msra.mxu0 %v7580_v8  ;;  %6867 = vmatpush3.bf16.msra.mxu1 %v7581_v9  ;;  %v7640_v8 = vld [vmem:[%s9859_s1 + $0x444] ss:$16 sps:$4 sm:$0xff]  }
  0x7c   :  { %v7583_v11 = vld [vmem:[%s9859_s1 + $0xfc0] ss:$16 sps:$4 sm:$0xff]   ;;  %6846 = vmatprep.subr.bf16.mxu0 %v7582_v10  ;;  %v7641_v9 = vld [vmem:[%s9859_s1 + $0x644] ss:$16 sps:$4 sm:$0xff]  }
  0x7d   :  { %v7584_v12 = vld [vmem:[%s9859_s1 + $0xcc0] ss:$16 sps:$4 sm:$0xff]   ;;  %6868 = vmatprep.subr.bf16.mxu1 %v7583_v11  ;;  %v7642_v10 = vld [vmem:[%s9859_s1 + $0x564] ss:$16 sps:$4 sm:$0xff]  }
  0x7e   :  { %v7585_v13 = vld [vmem:[%s9859_s1 + $0xec0] ss:$16 sps:$4 sm:$0xff]   ;;  %v7643_v11 = vld [vmem:[%s9859_s1 + $0x764] ss:$16 sps:$4 sm:$0xff]  }
  0x7f   :  { %v7586_v14 = vld [vmem:[%s9859_s1 + $0xde0] ss:$16 sps:$4 sm:$0xff]   ;;  %6847 = vmatpush3.bf16.msra.mxu0 %v7584_v12  ;;  %6869 = vmatpush3.bf16.msra.mxu1 %v7585_v13  ;;  %v7644_v12 = vld [vmem:[%s9859_s1 + $0x464] ss:$16 sps:$4 sm:$0xff]  }
  0x80   :  { %v7587_v15 = vld [vmem:[%s9859_s1 + $0xfe0] ss:$16 sps:$4 sm:$0xff]   ;;  %6848 = vmatprep.subr.bf16.mxu0 %v7586_v14  ;;  %v7645_v13 = vld [vmem:[%s9859_s1 + $0x664] ss:$16 sps:$4 sm:$0xff]  }
  0x81   :  { %v7588_v16 = vld [vmem:[%s9859_s1 + $0xce0] ss:$16 sps:$4 sm:$0xff]   ;;  %6870 = vmatprep.subr.bf16.mxu1 %v7587_v15  ;;  %v7646_v14 = vld [vmem:[%s9859_s1 + $0x584] ss:$16 sps:$4 sm:$0xff]  }
  0x82   :  { %v7589_v17 = vld [vmem:[%s9859_s1 + $0xee0] ss:$16 sps:$4 sm:$0xff]   ;;  %v7647_v15 = vld [vmem:[%s9859_s1 + $0x784] ss:$16 sps:$4 sm:$0xff]  }
  0x83   :  { %6849 = vmatpush3.bf16.msra.mxu0 %v7588_v16  ;;  %6871 = vmatpush3.bf16.msra.mxu1 %v7589_v17  ;;  %v1446_v59 = vld [vmem:[%s9860_s0] sm:$0xff] }
  0x84   :  { %6878 = vmatprep.subr.bf16.mxu0 %v7594_v23  ;;  %6900 = vmatprep.subr.bf16.mxu1 %v7595_v25  ;;  %v6248_v60 = vcombine.low %v1446_v59, %v1446_v59  ;;  %v6249_v61 = vcombine.high %v1446_v59, %v1446_v59  ;;  %v7648_v16 = vld [vmem:[%s9859_s1 + $0x484] ss:$16 sps:$4 sm:$0xff]  }
  0x85   :  { %v7649_v17 = vld [vmem:[%s9859_s1 + $0x684] ss:$16 sps:$4 sm:$0xff]  }
  0x86   :  { %1250 = vmatmul.mubr.bf16.vlgmr.msra.gmra.mrb[12].mxu0 %v6193_v20  ;;  %1427 = vmatmul.mubr.bf16.vlgmr.msra.gmra.mrb[12].mxu1 %v6211_v22  ;;  %v7652_v20 = vld [vmem:[%s9859_s1 + $0x4a4] ss:$16 sps:$4 sm:$0xff]  }
  0x87   :  { %6879 = vmatpush3.bf16.msra.mxu0 %v7596_v26  ;;  %6901 = vmatpush3.bf16.msra.mxu1 %v7597_v27  ;;  %v7654_v22 = vld [vmem:[%s9859_s1 + $0x5c4] ss:$16 sps:$4 sm:$0xff]  }
  0x88   :  { %6880 = vmatprep.subr.bf16.mxu0 %v7598_v28  ;;  %6902 = vmatprep.subr.bf16.mxu1 %v7599_v29  ;;  %v7655_v23 = vld [vmem:[%s9859_s1 + $0x7c4] ss:$16 sps:$4 sm:$0xff]  }
  0x89   :  { %1647 = vmatprep.mubr.bf16.mxu0 %v6231_v58  ;;  %1790 = vmatprep.mubr.bf16.mxu1 %v6249_v61  ;;  %v7657_v25 = vld [vmem:[%s9859_s1 + $0x6c4] ss:$16 sps:$4 sm:$0xff]  }
  0x8a   :  { %v7658_v26 = vld [vmem:[%s9859_s1 + $0x5e4] ss:$16 sps:$4 sm:$0xff]  }
  0x8b   :  { %6881 = vmatpush3.bf16.msra.mxu0 %v7600_v30  ;;  %6903 = vmatpush3.bf16.msra.mxu1 %v7601_v31  ;;  %v7659_v27 = vld [vmem:[%s9859_s1 + $0x7e4] ss:$16 sps:$4 sm:$0xff]   ;;  %v1975_v31 = vld [vmem:[%s9860_s0 + $0x18] sm:$0xff] }
  0x8c   :  { %6882 = vmatprep.subr.bf16.mxu0 %v7602_v32  ;;  %6904 = vmatprep.subr.bf16.mxu1 %v7603_v33  ;;  %v7660_v28 = vld [vmem:[%s9859_s1 + $0x4e4] ss:$16 sps:$4 sm:$0xff]  }
  0x8d   :  { %v7661_v29 = vld [vmem:[%s9859_s1 + $0x6e4] ss:$16 sps:$4 sm:$0xff]  }
  0x8e   :  { %v1798_v30 = vld [vmem:[%s9860_s0 + $0x10] sm:$0xff] }
  0x8f   :  { %6883 = vmatpush3.bf16.msra.mxu0 %v7604_v34  ;;  %6905 = vmatpush3.bf16.msra.mxu1 %v7605_v35  ;;  %v6266_v32 = vcombine.low %v1798_v30, %v1798_v30  ;;  %v6267_v33 = vcombine.high %v1798_v30, %v1798_v30  ;;  %v6284_v34 = vcombine.low %v1975_v31, %v1975_v31  ;;  %v7686_v56 = vld [vmem:[%s9859_s1 + $0x9a4] ss:$16 sps:$4 sm:$0xff]  }
  0x90   :  { %6884 = vmatprep.subr.bf16.mxu0 %v7606_v36  ;;  %6906 = vmatprep.subr.bf16.mxu1 %v7607_v37  ;;  %v6285_v35 = vcombine.high %v1975_v31, %v1975_v31  ;;  %v7666_v36 = vld [vmem:[%s9859_s1 + $0x904] ss:$16 sps:$4 sm:$0xff]  }
  0x91   :  { %v7667_v37 = vld [vmem:[%s9859_s1 + $0xb04] ss:$16 sps:$4 sm:$0xff]  }
  0x92   :  { %v7688_v58 = vld [vmem:[%s9859_s1 + $0x8a4] ss:$16 sps:$4 sm:$0xff]  }
  0x93   :  { %6885 = vmatpush3.bf16.msra.mxu0 %v7608_v38  ;;  %6907 = vmatpush3.bf16.msra.mxu1 %v7609_v39  ;;  %v7668_v38 = vld [vmem:[%s9859_s1 + $0x804] ss:$16 sps:$4 sm:$0xff]  }
  0x94   :  { %6886 = vmatprep.subr.bf16.mxu0 %v7610_v40  ;;  %6908 = vmatprep.subr.bf16.mxu1 %v7611_v41  ;;  %v7669_v39 = vld [vmem:[%s9859_s1 + $0xa04] ss:$16 sps:$4 sm:$0xff]  }
  0x95   :  { %v7670_v40 = vld [vmem:[%s9859_s1 + $0x924] ss:$16 sps:$4 sm:$0xff]  }
  0x96   :  { %v7671_v41 = vld [vmem:[%s9859_s1 + $0xb24] ss:$16 sps:$4 sm:$0xff]  }
  0x97   :  { %6887 = vmatpush3.bf16.msra.mxu0 %v7612_v42  ;;  %6909 = vmatpush3.bf16.msra.mxu1 %v7613_v43  ;;  %v7672_v42 = vld [vmem:[%s9859_s1 + $0x824] ss:$16 sps:$4 sm:$0xff]  }
  0x98   :  { %6888 = vmatprep.subr.bf16.mxu0 %v7614_v44  ;;  %6910 = vmatprep.subr.bf16.mxu1 %v7615_v45  ;;  %v7673_v43 = vld [vmem:[%s9859_s1 + $0xa24] ss:$16 sps:$4 sm:$0xff]  }
  0x99   :  { %v7674_v44 = vld [vmem:[%s9859_s1 + $0x944] ss:$16 sps:$4 sm:$0xff]  }
  0x9a   :  { %v7675_v45 = vld [vmem:[%s9859_s1 + $0xb44] ss:$16 sps:$4 sm:$0xff]  }
  0x9b   :  { %6889 = vmatpush3.bf16.msra.mxu0 %v7616_v46  ;;  %6911 = vmatpush3.bf16.msra.mxu1 %v7617_v47  ;;  %v7676_v46 = vld [vmem:[%s9859_s1 + $0x844] ss:$16 sps:$4 sm:$0xff]  }
  0x9c   :  { %6890 = vmatprep.subr.bf16.mxu0 %v7618_v48  ;;  %6912 = vmatprep.subr.bf16.mxu1 %v7619_v49  ;;  %v7677_v47 = vld [vmem:[%s9859_s1 + $0xa44] ss:$16 sps:$4 sm:$0xff]  }
  0x9d   :  { %v7678_v48 = vld [vmem:[%s9859_s1 + $0x964] ss:$16 sps:$4 sm:$0xff]  }
  0x9e   :  { %v7679_v49 = vld [vmem:[%s9859_s1 + $0xb64] ss:$16 sps:$4 sm:$0xff]  }
  0x9f   :  { %6891 = vmatpush3.bf16.msra.mxu0 %v7620_v50  ;;  %6913 = vmatpush3.bf16.msra.mxu1 %v7621_v51  ;;  %v7680_v50 = vld [vmem:[%s9859_s1 + $0x864] ss:$16 sps:$4 sm:$0xff]  }
  0xa0   :  { %6892 = vmatprep.subr.bf16.mxu0 %v7622_v52  ;;  %6914 = vmatprep.subr.bf16.mxu1 %v7623_v53  ;;  %v7681_v51 = vld [vmem:[%s9859_s1 + $0xa64] ss:$16 sps:$4 sm:$0xff]  }
  0xa1   :  { %v7682_v52 = vld [vmem:[%s9859_s1 + $0x984] ss:$16 sps:$4 sm:$0xff]  }
  0xa2   :  { %v7683_v53 = vld [vmem:[%s9859_s1 + $0xb84] ss:$16 sps:$4 sm:$0xff]  }
  0xa3   :  { %6893 = vmatpush3.bf16.msra.mxu0 %v7624_v54  ;;  %6915 = vmatpush3.bf16.msra.mxu1 %v7625_v55  ;;  %v7684_v54 = vld [vmem:[%s9859_s1 + $0x884] ss:$16 sps:$4 sm:$0xff]  }
  0xa4   :  { %6922 = vmatprep.subr.bf16.mxu0 %v7630_v62  ;;  %6944 = vmatprep.subr.bf16.mxu1 %v7631_v63  ;;  %v7685_v55 = vld [vmem:[%s9859_s1 + $0xa84] ss:$16 sps:$4 sm:$0xff]  }
  0xa5   :  { %v7689_v59 = vld [vmem:[%s9859_s1 + $0xaa4] ss:$16 sps:$4 sm:$0xff]  }
  0xa6   :  { %1648 = vmatmul.mubr.bf16.vlgmr.msra.gmra.mrb[16].mxu0 %v6230_v57  ;;  %1791 = vmatmul.mubr.bf16.vlgmr.msra.gmra.mrb[16].mxu1 %v6248_v60  ;;  %v7687_v57 = vld [vmem:[%s9859_s1 + $0xba4] ss:$16 sps:$4 sm:$0xff]  }
  0xa7   :  { %6923 = vmatpush3.bf16.msra.mxu0 %v7632_v0  ;;  %6945 = vmatpush3.bf16.msra.mxu1 %v7633_v1  ;;  %v7690_v60 = vld [vmem:[%s9859_s1 + $0x9c4] ss:$16 sps:$4 sm:$0xff]  }
  0xa8   :  { %6924 = vmatprep.subr.bf16.mxu0 %v7634_v2  ;;  %6946 = vmatprep.subr.bf16.mxu1 %v7635_v3  ;;  %v7691_v61 = vld [vmem:[%s9859_s1 + $0xbc4] ss:$16 sps:$4 sm:$0xff]  }
  0xa9   :  { %1966 = vmatprep.mubr.bf16.mxu0 %v6267_v33  ;;  %2143 = vmatprep.mubr.bf16.mxu1 %v6285_v35  ;;  %v7692_v62 = vld [vmem:[%s9859_s1 + $0x8c4] ss:$16 sps:$4 sm:$0xff]  }
  0xaa   :  { %v7693_v63 = vld [vmem:[%s9859_s1 + $0xac4] ss:$16 sps:$4 sm:$0xff]  }
  0xab   :  { %6925 = vmatpush3.bf16.msra.mxu0 %v7636_v4  ;;  %6947 = vmatpush3.bf16.msra.mxu1 %v7637_v5  ;;  %v7694_v0 = vld [vmem:[%s9859_s1 + $0x9e4] ss:$16 sps:$4 sm:$0xff]   ;;  %v2329_v5 = vld [vmem:[%s9860_s0 + $0x28] sm:$0xff] }
  0xac   :  { %6926 = vmatprep.subr.bf16.mxu0 %v7638_v6  ;;  %6948 = vmatprep.subr.bf16.mxu1 %v7639_v7  ;;  %v7695_v1 = vld [vmem:[%s9859_s1 + $0xbe4] ss:$16 sps:$4 sm:$0xff]  }
  0xad   :  { %v7696_v2 = vld [vmem:[%s9859_s1 + $0x8e4] ss:$16 sps:$4 sm:$0xff]  }
  0xae   :  { %v7697_v3 = vld [vmem:[%s9859_s1 + $0xae4] ss:$16 sps:$4 sm:$0xff]  }
  0xaf   :  { %6927 = vmatpush3.bf16.msra.mxu0 %v7640_v8  ;;  %6949 = vmatpush3.bf16.msra.mxu1 %v7641_v9  ;;  %v2152_v4 = vld [vmem:[%s9860_s0 + $0x20] sm:$0xff]  ;;  %v6320_v8 = vcombine.low %v2329_v5, %v2329_v5 }
  0xb0   :  { %6928 = vmatprep.subr.bf16.mxu0 %v7642_v10  ;;  %6950 = vmatprep.subr.bf16.mxu1 %v7643_v11  ;;  %v6302_v6 = vcombine.low %v2152_v4, %v2152_v4  ;;  %v6303_v7 = vcombine.high %v2152_v4, %v2152_v4  ;;  %v7702_v9 = vld [vmem:[%s9859_s1 + $0xd04] ss:$16 sps:$4 sm:$0xff]   ;;  %v6321_v10 = vcombine.high %v2329_v5, %v2329_v5  ;;  %v7747_v4 = vld [vmem:[%s9859_s1 + $0x148] ss:$16 sps:$4 sm:$0xff]  }
  0xb1   :  { %v7703_v11 = vld [vmem:[%s9859_s1 + $0xf04] ss:$16 sps:$4 sm:$0xff]   ;;  %v7748_v5 = vld [vmem:[%s9859_s1 + $0x248] ss:$16 sps:$4 sm:$0xff]  }
  0xb3   :  { %6929 = vmatpush3.bf16.msra.mxu0 %v7644_v12  ;;  %6951 = vmatpush3.bf16.msra.mxu1 %v7645_v13  ;;  %v7704_v12 = vld [vmem:[%s9859_s1 + $0xc04] ss:$16 sps:$4 sm:$0xff]  }
  0xb4   :  { %6930 = vmatprep.subr.bf16.mxu0 %v7646_v14  ;;  %6952 = vmatprep.subr.bf16.mxu1 %v7647_v15  ;;  %v7705_v13 = vld [vmem:[%s9859_s1 + $0xe04] ss:$16 sps:$4 sm:$0xff]  }
  0xb5   :  { %v7706_v14 = vld [vmem:[%s9859_s1 + $0xd24] ss:$16 sps:$4 sm:$0xff]  }
  0xb6   :  { %v7707_v15 = vld [vmem:[%s9859_s1 + $0xf24] ss:$16 sps:$4 sm:$0xff]  }
  0xb7   :  { %6931 = vmatpush3.bf16.msra.mxu0 %v7648_v16  ;;  %6953 = vmatpush3.bf16.msra.mxu1 %v7649_v17  ;;  %v7708_v16 = vld [vmem:[%s9859_s1 + $0xc24] ss:$16 sps:$4 sm:$0xff]  }
  0xb8   :  { %6932 = vmatprep.subr.bf16.mxu0 %v7650_v18  ;;  %6954 = vmatprep.subr.bf16.mxu1 %v7651_v19  ;;  %v7709_v17 = vld [vmem:[%s9859_s1 + $0xe24] ss:$16 sps:$4 sm:$0xff]  }
  0xb9   :  { %v7710_v18 = vld [vmem:[%s9859_s1 + $0xd44] ss:$16 sps:$4 sm:$0xff]  }
  0xba   :  { %v7711_v19 = vld [vmem:[%s9859_s1 + $0xf44] ss:$16 sps:$4 sm:$0xff]  }
  0xbb   :  { %6933 = vmatpush3.bf16.msra.mxu0 %v7652_v20  ;;  %6955 = vmatpush3.bf16.msra.mxu1 %v7653_v21  ;;  %v7712_v20 = vld [vmem:[%s9859_s1 + $0xc44] ss:$16 sps:$4 sm:$0xff]  }
  0xbc   :  { %6934 = vmatprep.subr.bf16.mxu0 %v7654_v22  ;;  %6956 = vmatprep.subr.bf16.mxu1 %v7655_v23  ;;  %v7713_v21 = vld [vmem:[%s9859_s1 + $0xe44] ss:$16 sps:$4 sm:$0xff]  }
  0xbd   :  { %v7714_v22 = vld [vmem:[%s9859_s1 + $0xd64] ss:$16 sps:$4 sm:$0xff]  }
  0xbe   :  { %v7715_v23 = vld [vmem:[%s9859_s1 + $0xf64] ss:$16 sps:$4 sm:$0xff]  }
  0xbf   :  { %6935 = vmatpush3.bf16.msra.mxu0 %v7656_v24  ;;  %6957 = vmatpush3.bf16.msra.mxu1 %v7657_v25  ;;  %v7716_v24 = vld [vmem:[%s9859_s1 + $0xc64] ss:$16 sps:$4 sm:$0xff]  }
  0xc0   :  { %6936 = vmatprep.subr.bf16.mxu0 %v7658_v26  ;;  %6958 = vmatprep.subr.bf16.mxu1 %v7659_v27  ;;  %v7717_v25 = vld [vmem:[%s9859_s1 + $0xe64] ss:$16 sps:$4 sm:$0xff]  }
  0xc1   :  { %v7718_v26 = vld [vmem:[%s9859_s1 + $0xd84] ss:$16 sps:$4 sm:$0xff]  }
  0xc2   :  { %v7719_v27 = vld [vmem:[%s9859_s1 + $0xf84] ss:$16 sps:$4 sm:$0xff]  }
  0xc3   :  { %6937 = vmatpush3.bf16.msra.mxu0 %v7660_v28  ;;  %6959 = vmatpush3.bf16.msra.mxu1 %v7661_v29  ;;  %v7720_v28 = vld [vmem:[%s9859_s1 + $0xc84] ss:$16 sps:$4 sm:$0xff]  }
  0xc4   :  { %6966 = vmatprep.subr.bf16.mxu0 %v7666_v36  ;;  %6988 = vmatprep.subr.bf16.mxu1 %v7667_v37  ;;  %v7721_v29 = vld [vmem:[%s9859_s1 + $0xe84] ss:$16 sps:$4 sm:$0xff]  }
  0xc5   :  { %v7722_v36 = vld [vmem:[%s9859_s1 + $0xda4] ss:$16 sps:$4 sm:$0xff]  }
  0xc6   :  { %1967 = vmatmul.mubr.bf16.vlgmr.msra.gmra.mrb[20].mxu0 %v6266_v32  ;;  %2144 = vmatmul.mubr.bf16.vlgmr.msra.gmra.mrb[20].mxu1 %v6284_v34  ;;  %v7723_v37 = vld [vmem:[%s9859_s1 + $0xfa4] ss:$16 sps:$4 sm:$0xff]  }
  0xc7   :  { %6967 = vmatpush3.bf16.msra.mxu0 %v7668_v38  ;;  %6989 = vmatpush3.bf16.msra.mxu1 %v7669_v39 }
  0xc8   :  { %6968 = vmatprep.subr.bf16.mxu0 %v7670_v40  ;;  %6990 = vmatprep.subr.bf16.mxu1 %v7671_v41  ;;  %v7724_v41 = vld [vmem:[%s9859_s1 + $0xca4] ss:$16 sps:$4 sm:$0xff]  }
  0xc9   :  { %2320 = vmatprep.mubr.bf16.mxu0 %v6303_v7  ;;  %2497 = vmatprep.mubr.bf16.mxu1 %v6321_v10  ;;  %v7750_v7 = vld [vmem:[%s9859_s1 + $0x368] ss:$16 sps:$4 sm:$0xff]  }
  0xca   :  { %v7753_v10 = vld [vmem:[%s9859_s1 + $0x68] ss:$16 sps:$4 sm:$0xff]  }
  0xcb   :  { %6969 = vmatpush3.bf16.msra.mxu0 %v7672_v42  ;;  %6991 = vmatpush3.bf16.msra.mxu1 %v7673_v43  ;;  %v7725_v42 = vld [vmem:[%s9859_s1 + $0xea4] ss:$16 sps:$4 sm:$0xff]  }
  0xcc   :  { %6970 = vmatprep.subr.bf16.mxu0 %v7674_v44  ;;  %6992 = vmatprep.subr.bf16.mxu1 %v7675_v45  ;;  %v7726_v45 = vld [vmem:[%s9859_s1 + $0xdc4] ss:$16 sps:$4 sm:$0xff]  }
  0xcf   :  { %6971 = vmatpush3.bf16.msra.mxu0 %v7676_v46  ;;  %6993 = vmatpush3.bf16.msra.mxu1 %v7677_v47  ;;  %v7727_v46 = vld [vmem:[%s9859_s1 + $0xfc4] ss:$16 sps:$4 sm:$0xff]  }
  0xd0   :  { %6972 = vmatprep.subr.bf16.mxu0 %v7678_v48  ;;  %6994 = vmatprep.subr.bf16.mxu1 %v7679_v49  ;;  %v7728_v47 = vld [vmem:[%s9859_s1 + $0xcc4] ss:$16 sps:$4 sm:$0xff]  }
  0xd1   :  { %v7729_v48 = vld [vmem:[%s9859_s1 + $0xec4] ss:$16 sps:$4 sm:$0xff]  }
  0xd2   :  { %v7730_v49 = vld [vmem:[%s9859_s1 + $0xde4] ss:$16 sps:$4 sm:$0xff]  }
  0xd3   :  { %6973 = vmatpush3.bf16.msra.mxu0 %v7680_v50  ;;  %6995 = vmatpush3.bf16.msra.mxu1 %v7681_v51  ;;  %v7731_v50 = vld [vmem:[%s9859_s1 + $0xfe4] ss:$16 sps:$4 sm:$0xff]  }
  0xd4   :  { %6974 = vmatprep.subr.bf16.mxu0 %v7682_v52  ;;  %6996 = vmatprep.subr.bf16.mxu1 %v7683_v53  ;;  %v7732_v51 = vld [vmem:[%s9859_s1 + $0xce4] ss:$16 sps:$4 sm:$0xff]  }
  0xd5   :  { %v7733_v52 = vld [vmem:[%s9859_s1 + $0xee4] ss:$16 sps:$4 sm:$0xff]  }
  0xd6   :  { %v2506_v53 = vld [vmem:[%s9860_s0 + $0x30] sm:$0xff] }
  0xd7   :  { %6975 = vmatpush3.bf16.msra.mxu0 %v7684_v54  ;;  %6997 = vmatpush3.bf16.msra.mxu1 %v7685_v55  ;;  %v2683_v54 = vld [vmem:[%s9860_s0 + $0x38] sm:$0xff]  ;;  %v6338_v55 = vcombine.low %v2506_v53, %v2506_v53 }
  0xd8   :  { %6976 = vmatprep.subr.bf16.mxu0 %v7686_v56  ;;  %6998 = vmatprep.subr.bf16.mxu1 %v7687_v57  ;;  %v6339_v56 = vcombine.high %v2506_v53, %v2506_v53  ;;  %v6356_v57 = vcombine.low %v2683_v54, %v2683_v54  ;;  %v7782_v53 = vld [vmem:[%s9859_s1 + $0x548] ss:$16 sps:$4 sm:$0xff]  }
  0xdb   :  { %6977 = vmatpush3.bf16.msra.mxu0 %v7688_v58  ;;  %6999 = vmatpush3.bf16.msra.mxu1 %v7689_v59  ;;  %v6357_v58 = vcombine.high %v2683_v54, %v2683_v54  ;;  %v7738_v59 = vld [vmem:[%s9859_s1 + $0x308] ss:$16 sps:$4 sm:$0xff]  }
  0xdc   :  { %6978 = vmatprep.subr.bf16.mxu0 %v7690_v60  ;;  %7000 = vmatprep.subr.bf16.mxu1 %v7691_v61  ;;  %v7739_v60 = vld [vmem:[%s9859_s1 + $0x108] ss:$16 sps:$4 sm:$0xff]  }
  0xdd   :  { %v7740_v61 = vld [vmem:[%s9859_s1 + $0x208] ss:$16 sps:$4 sm:$0xff]  }
  0xde   :  { %v7783_v54 = vld [vmem:[%s9859_s1 + $0x748] ss:$16 sps:$4 sm:$0xff]  }
  0xdf   :  { %6979 = vmatpush3.bf16.msra.mxu0 %v7692_v62  ;;  %7001 = vmatpush3.bf16.msra.mxu1 %v7693_v63  ;;  %v7741_v62 = vld [vmem:[%s9859_s1 + $0x8] ss:$16 sps:$4 sm:$0xff]  }
  0xe0   :  { %6980 = vmatprep.subr.bf16.mxu0 %v7694_v0  ;;  %7002 = vmatprep.subr.bf16.mxu1 %v7695_v1  ;;  %v7742_v63 = vld [vmem:[%s9859_s1 + $0x328] ss:$16 sps:$4 sm:$0xff]  }
  0xe1   :  { %v7743_v0 = vld [vmem:[%s9859_s1 + $0x128] ss:$16 sps:$4 sm:$0xff]  }
  0xe2   :  { %v7744_v1 = vld [vmem:[%s9859_s1 + $0x228] ss:$16 sps:$4 sm:$0xff]  }
  0xe3   :  { %6981 = vmatpush3.bf16.msra.mxu0 %v7696_v2  ;;  %7003 = vmatpush3.bf16.msra.mxu1 %v7697_v3  ;;  %v7745_v2 = vld [vmem:[%s9859_s1 + $0x28] ss:$16 sps:$4 sm:$0xff]  }
  0xe4   :  { %7010 = vmatprep.subr.bf16.mxu0 %v7702_v9  ;;  %7032 = vmatprep.subr.bf16.mxu1 %v7703_v11  ;;  %v7746_v3 = vld [vmem:[%s9859_s1 + $0x348] ss:$16 sps:$4 sm:$0xff]  }
  0xe5   :  { %v7752_v9 = vld [vmem:[%s9859_s1 + $0x268] ss:$16 sps:$4 sm:$0xff]  }
  0xe6   :  { %2321 = vmatmul.mubr.bf16.vlgmr.msra.gmra.mrb[24].mxu0 %v6302_v6  ;;  %2498 = vmatmul.mubr.bf16.vlgmr.msra.gmra.mrb[24].mxu1 %v6320_v8  ;;  %v7749_v6 = vld [vmem:[%s9859_s1 + $0x48] ss:$16 sps:$4 sm:$0xff]  }
  0xe7   :  { %7011 = vmatpush3.bf16.msra.mxu0 %v7704_v12  ;;  %7033 = vmatpush3.bf16.msra.mxu1 %v7705_v13  ;;  %v7751_v8 = vld [vmem:[%s9859_s1 + $0x168] ss:$16 sps:$4 sm:$0xff]  }
  0xe8   :  { %7012 = vmatprep.subr.bf16.mxu0 %v7706_v14  ;;  %7034 = vmatprep.subr.bf16.mxu1 %v7707_v15  ;;  %v7754_v11 = vld [vmem:[%s9859_s1 + $0x388] ss:$16 sps:$4 sm:$0xff]  }
  0xe9   :  { %2674 = vmatprep.mubr.bf16.mxu0 %v6339_v56  ;;  %2851 = vmatprep.mubr.bf16.mxu1 %v6357_v58  ;;  %v7755_v12 = vld [vmem:[%s9859_s1 + $0x188] ss:$16 sps:$4 sm:$0xff]  }
  0xea   :  { %v7756_v13 = vld [vmem:[%s9859_s1 + $0x288] ss:$16 sps:$4 sm:$0xff]  }
  0xeb   :  { %7013 = vmatpush3.bf16.msra.mxu0 %v7708_v16  ;;  %7035 = vmatpush3.bf16.msra.mxu1 %v7709_v17  ;;  %v7757_v14 = vld [vmem:[%s9859_s1 + $0x88] ss:$16 sps:$4 sm:$0xff]  }
  0xec   :  { %7014 = vmatprep.subr.bf16.mxu0 %v7710_v18  ;;  %7036 = vmatprep.subr.bf16.mxu1 %v7711_v19  ;;  %v7785_v56 = vld [vmem:[%s9859_s1 + $0x648] ss:$16 sps:$4 sm:$0xff]  }
  0xed   :  { %v7787_v58 = vld [vmem:[%s9859_s1 + $0x768] ss:$16 sps:$4 sm:$0xff]  }
  0xef   :  { %7015 = vmatpush3.bf16.msra.mxu0 %v7712_v20  ;;  %7037 = vmatpush3.bf16.msra.mxu1 %v7713_v21  ;;  %v7758_v21 = vld [vmem:[%s9859_s1 + $0x3a8] ss:$16 sps:$4 sm:$0xff]  }
  0xf0   :  { %7016 = vmatprep.subr.bf16.mxu0 %v7714_v22  ;;  %7038 = vmatprep.subr.bf16.mxu1 %v7715_v23  ;;  %v7759_v22 = vld [vmem:[%s9859_s1 + $0x1a8] ss:$16 sps:$4 sm:$0xff]  }
  0xf3   :  { %7017 = vmatpush3.bf16.msra.mxu0 %v7716_v24  ;;  %7039 = vmatpush3.bf16.msra.mxu1 %v7717_v25 }
  0xf4   :  { %7018 = vmatprep.subr.bf16.mxu0 %v7718_v26  ;;  %7040 = vmatprep.subr.bf16.mxu1 %v7719_v27  ;;  %v7760_v26 = vld [vmem:[%s9859_s1 + $0x2a8] ss:$16 sps:$4 sm:$0xff]  }
  0xf5   :  { %v7761_v27 = vld [vmem:[%s9859_s1 + $0xa8] ss:$16 sps:$4 sm:$0xff]  }
  0xf6   :  { %v6718_v30 = vpop.f32.mrb[0].mxu0 }
  0xf7   :  { %v6719_v32 = vpop.f32.mrb[1].mxu0  ;;  %7019 = vmatpush3.bf16.msra.mxu0 %v7720_v28  ;;  %7041 = vmatpush3.bf16.msra.mxu1 %v7721_v29 }
  0xf8   :  { %v6740_v31 = vpop.f32.mrb[0].mxu1  ;;  %v6720_v34 = vadd.f32 %v6719_v32, %v6718_v30  ;;  %v6721_v38 = vpop.f32.mrb[2].mxu0  ;;  %7020 = vmatprep.subr.bf16.mxu0 %v7722_v36  ;;  %7042 = vmatprep.subr.bf16.mxu1 %v7723_v37  ;;  %v7763_v32 = vld [vmem:[%s9859_s1 + $0x1c8] ss:$16 sps:$4 sm:$0xff]  }
  0xf9   :  { %v6741_v33 = vpop.f32.mrb[1].mxu1  ;;  %v6722_v43 = vpop.f32.mrb[3].mxu0  ;;  %v7767_v36 = vld [vmem:[%s9859_s1 + $0x1e8] ss:$16 sps:$4 sm:$0xff]  }
  0xfa   :  { %v6742_v35 = vadd.f32 %v6741_v33, %v6740_v31  ;;  %v6743_v39 = vpop.f32.mrb[2].mxu1  ;;  %v7762_v31 = vld [vmem:[%s9859_s1 + $0x3c8] ss:$16 sps:$4 sm:$0xff]  }
  0xfb   :  { %v6744_v44 = vpop.f32.mrb[3].mxu1  ;;  %7021 = vmatpush3.bf16.msra.mxu0 %v7724_v41  ;;  %7043 = vmatpush3.bf16.msra.mxu1 %v7725_v42  ;;  %v7764_v33 = vld [vmem:[%s9859_s1 + $0x2c8] ss:$16 sps:$4 sm:$0xff]  }
  0xfc   :  { %v8872_v40 = vadd.f32 %v6742_v35, %v6720_v34  ;;  %7022 = vmatprep.subr.bf16.mxu0 %v7726_v45  ;;  %7044 = vmatprep.subr.bf16.mxu1 %v7727_v46  ;;  %v7765_v34 = vld [vmem:[%s9859_s1 + $0xc8] ss:$16 sps:$4 sm:$0xff]  }
  0xfd   :  { %v7766_v35 = vld [vmem:[%s9859_s1 + $0x3e8] ss:$16 sps:$4 sm:$0xff]  }
  0xfe   :  { %v7768_v37 = vld [vmem:[%s9859_s1 + $0x2e8] ss:$16 sps:$4 sm:$0xff]  }
  0xff   :  { %7023 = vmatpush3.bf16.msra.mxu0 %v7728_v47  ;;  %7045 = vmatpush3.bf16.msra.mxu1 %v7729_v48  ;;  %v7769_v38 = vld [vmem:[%s9859_s1 + $0xe8] ss:$16 sps:$4 sm:$0xff]  }
 0x100   :  { %7024 = vmatprep.subr.bf16.mxu0 %v7730_v49  ;;  %7046 = vmatprep.subr.bf16.mxu1 %v7731_v50  ;;  %v2904_v39 = vld [vmem:[%s9860_s0 + $0x8] sm:$0xff] }
 0x101   :  { %v6375_v41 = vcombine.low %v2904_v39, %v2904_v39  ;;  %v6376_v42 = vcombine.high %v2904_v39, %v2904_v39  ;;  %v7774_v45 = vld [vmem:[%s9859_s1 + $0x508] ss:$16 sps:$4 sm:$0xff]  }
 0x102   :  { %v7775_v46 = vld [vmem:[%s9859_s1 + $0x708] ss:$16 sps:$4 sm:$0xff]  }
 0x103   :  { %7025 = vmatpush3.bf16.msra.mxu0 %v7732_v51  ;;  %7047 = vmatpush3.bf16.msra.mxu1 %v7733_v52  ;;  %v7776_v47 = vld [vmem:[%s9859_s1 + $0x408] ss:$16 sps:$4 sm:$0xff]  }
 0x104   :  { %7054 = vmatprep.subr.bf16.mxu0 %v7738_v59  ;;  %7076 = vmatprep.subr.bf16.mxu1 %v7739_v60  ;;  %v7777_v48 = vld [vmem:[%s9859_s1 + $0x608] ss:$16 sps:$4 sm:$0xff]  }
 0x105   :  { %v7778_v49 = vld [vmem:[%s9859_s1 + $0x528] ss:$16 sps:$4 sm:$0xff]  }
 0x106   :  { %2675 = vmatmul.mubr.bf16.vlgmr.msra.gmra.mrb[28].mxu0 %v6338_v55  ;;  %2852 = vmatmul.mubr.bf16.vlgmr.msra.gmra.mrb[28].mxu1 %v6356_v57  ;;  %v7779_v50 = vld [vmem:[%s9859_s1 + $0x728] ss:$16 sps:$4 sm:$0xff]  }
 0x107   :  { %7055 = vmatpush3.bf16.msra.mxu0 %v7740_v61  ;;  %7077 = vmatpush3.bf16.msra.mxu1 %v7741_v62  ;;  %v7780_v51 = vld [vmem:[%s9859_s1 + $0x428] ss:$16 sps:$4 sm:$0xff]  }
 0x108   :  { %7056 = vmatprep.subr.bf16.mxu0 %v7742_v63  ;;  %7078 = vmatprep.subr.bf16.mxu1 %v7743_v0  ;;  %v7781_v52 = vld [vmem:[%s9859_s1 + $0x628] ss:$16 sps:$4 sm:$0xff]  }
 0x109   :  { %3072 = vmatprep.mubr.bf16.mxu0 %v6376_v42  ;;  %v7784_v55 = vld [vmem:[%s9859_s1 + $0x448] ss:$16 sps:$4 sm:$0xff]  }
 0x10a   :  { %v7786_v57 = vld [vmem:[%s9859_s1 + $0x568] ss:$16 sps:$4 sm:$0xff]  }
 0x10b   :  { %7057 = vmatpush3.bf16.msra.mxu0 %v7744_v1  ;;  %7079 = vmatpush3.bf16.msra.mxu1 %v7745_v2  ;;  %v7788_v59 = vld [vmem:[%s9859_s1 + $0x468] ss:$16 sps:$4 sm:$0xff]  }
 0x10c   :  { %7058 = vmatprep.subr.bf16.mxu0 %v7746_v3  ;;  %7080 = vmatprep.subr.bf16.mxu1 %v7747_v4  ;;  %v7789_v60 = vld [vmem:[%s9859_s1 + $0x668] ss:$16 sps:$4 sm:$0xff]  }
 0x10d   :  { %v7790_v61 = vld [vmem:[%s9859_s1 + $0x588] ss:$16 sps:$4 sm:$0xff]  }
 0x10e   :  { %v7791_v62 = vld [vmem:[%s9859_s1 + $0x788] ss:$16 sps:$4 sm:$0xff]  }
 0x10f   :  { %7059 = vmatpush3.bf16.msra.mxu0 %v7748_v5  ;;  %7081 = vmatpush3.bf16.msra.mxu1 %v7749_v6  ;;  %v7792_v63 = vld [vmem:[%s9859_s1 + $0x488] ss:$16 sps:$4 sm:$0xff]  }
 0x110   :  { %7060 = vmatprep.subr.bf16.mxu0 %v7750_v7  ;;  %7082 = vmatprep.subr.bf16.mxu1 %v7751_v8  ;;  %v7793_v0 = vld [vmem:[%s9859_s1 + $0x688] ss:$16 sps:$4 sm:$0xff]  }
 0x111   :  { %v7794_v7 = vld [vmem:[%s9859_s1 + $0x5a8] ss:$16 sps:$4 sm:$0xff]  }
 0x112   :  { %v7795_v8 = vld [vmem:[%s9859_s1 + $0x7a8] ss:$16 sps:$4 sm:$0xff]  }
 0x113   :  { %7061 = vmatpush3.bf16.msra.mxu0 %v7752_v9  ;;  %7083 = vmatpush3.bf16.msra.mxu1 %v7753_v10  ;;  %v7818_v39 = vld [vmem:[%s9859_s1 + $0x948] ss:$16 sps:$4 sm:$0xff]  }
 0x114   :  { %7062 = vmatprep.subr.bf16.mxu0 %v7754_v11  ;;  %7084 = vmatprep.subr.bf16.mxu1 %v7755_v12  ;;  %v7796_v12 = vld [vmem:[%s9859_s1 + $0x4a8] ss:$16 sps:$4 sm:$0xff]  }
 0x115   :  { %v7821_v42 = vld [vmem:[%s9859_s1 + $0xa48] ss:$16 sps:$4 sm:$0xff]  }
 0x117   :  { %v6762_v15 = vpop.f32.mrb[4].mxu0  ;;  %7063 = vmatpush3.bf16.msra.mxu0 %v7756_v13  ;;  %7085 = vmatpush3.bf16.msra.mxu1 %v7757_v14  ;;  %v7797_v13 = vld [vmem:[%s9859_s1 + $0x6a8] ss:$16 sps:$4 sm:$0xff]  }
 0x118   :  { %v6784_v16 = vpop.f32.mrb[4].mxu1  ;;  %v6763_v17 = vpop.f32.mrb[5].mxu0  ;;  %7064 = vmatprep.subr.bf16.mxu0 %v7758_v21  ;;  %7086 = vmatprep.subr.bf16.mxu1 %v7759_v22  ;;  %v7802_v21 = vld [vmem:[%s9859_s1 + $0x5e8] ss:$16 sps:$4 sm:$0xff]  }
 0x119   :  { %v6785_v18 = vpop.f32.mrb[5].mxu1  ;;  %v6764_v19 = vadd.f32 %v6763_v17, %v6762_v15  ;;  %v6765_v23 = vpop.f32.mrb[6].mxu0  ;;  %v7798_v17 = vld [vmem:[%s9859_s1 + $0x5c8] ss:$16 sps:$4 sm:$0xff]  }
 0x11a   :  { %v6786_v20 = vadd.f32 %v6785_v18, %v6784_v16  ;;  %v6787_v24 = vpop.f32.mrb[6].mxu1  ;;  %v6766_v28 = vpop.f32.mrb[7].mxu0  ;;  %v7799_v18 = vld [vmem:[%s9859_s1 + $0x7c8] ss:$16 sps:$4 sm:$0xff]  }
 0x11b   :  { %v549_v25 = vadd.f32 %v6764_v19, %v8872_v40  ;;  %v6788_v29 = vpop.f32.mrb[7].mxu1  ;;  %7065 = vmatpush3.bf16.msra.mxu0 %v7760_v26  ;;  %7087 = vmatpush3.bf16.msra.mxu1 %v7761_v27  ;;  %v2871_v40 = vld [vmem:[%s9860_s0] sm:$0xff]  ;;  %v7800_v19 = vld [vmem:[%s9859_s1 + $0x4c8] ss:$16 sps:$4 sm:$0xff]  }
 0x11c   :  { %7066 = vmatprep.subr.bf16.mxu0 %v7762_v31  ;;  %7088 = vmatprep.subr.bf16.mxu1 %v7763_v32  ;;  %v6393_v43 = vcombine.low %v2871_v40, %v2871_v40  ;;  %v6394_v44 = vcombine.high %v2871_v40, %v2871_v40  ;;  %v7803_v22 = vld [vmem:[%s9859_s1 + $0x7e8] ss:$16 sps:$4 sm:$0xff]  }
 0x11d   :  { %v8983_v30 = vadd.f32 %v6786_v20, %v549_v25  ;;  %v7801_v20 = vld [vmem:[%s9859_s1 + $0x6c8] ss:$16 sps:$4 sm:$0xff]   ;;  %v3223_v25 = vld [vmem:[%s9860_s0 + $0x10] sm:$0xff] }
 0x11e   :  { %3215 = vmatprep.mubr.bf16.mxu1 %v6394_v44  ;;  %v7804_v23 = vld [vmem:[%s9859_s1 + $0x4e8] ss:$16 sps:$4 sm:$0xff]   ;;  %v6411_v27 = vcombine.low %v3223_v25, %v3223_v25  ;;  %v6412_v28 = vcombine.high %v3223_v25, %v3223_v25 }
 0x11f   :  { %7067 = vmatpush3.bf16.msra.mxu0 %v7764_v33  ;;  %7089 = vmatpush3.bf16.msra.mxu1 %v7765_v34  ;;  %v7805_v24 = vld [vmem:[%s9859_s1 + $0x6e8] ss:$16 sps:$4 sm:$0xff]  }
 0x120   :  { %7068 = vmatprep.subr.bf16.mxu0 %v7766_v35  ;;  %7090 = vmatprep.subr.bf16.mxu1 %v7767_v36  ;;  %v3400_v26 = vld [vmem:[%s9860_s0 + $0x18] sm:$0xff] }
 0x121   :  { %v6429_v29 = vcombine.low %v3400_v26, %v3400_v26  ;;  %v7810_v31 = vld [vmem:[%s9859_s1 + $0x908] ss:$16 sps:$4 sm:$0xff]  }
 0x122   :  { %v7811_v32 = vld [vmem:[%s9859_s1 + $0xb08] ss:$16 sps:$4 sm:$0xff]  }
 0x123   :  { %7069 = vmatpush3.bf16.msra.mxu0 %v7768_v37  ;;  %7091 = vmatpush3.bf16.msra.mxu1 %v7769_v38  ;;  %v7812_v33 = vld [vmem:[%s9859_s1 + $0x808] ss:$16 sps:$4 sm:$0xff]  }
 0x124   :  { %7098 = vmatprep.subr.bf16.mxu0 %v7774_v45  ;;  %7120 = vmatprep.subr.bf16.mxu1 %v7775_v46  ;;  %v7813_v34 = vld [vmem:[%s9859_s1 + $0xa08] ss:$16 sps:$4 sm:$0xff]  }
 0x125   :  { %v7814_v35 = vld [vmem:[%s9859_s1 + $0x928] ss:$16 sps:$4 sm:$0xff]  }
 0x126   :  { %3073 = vmatmul.mubr.bf16.vlgmr.msra.gmra.mrb[32].mxu0 %v6375_v41  ;;  %3216 = vmatmul.mubr.bf16.vlgmr.msra.gmra.mrb[32].mxu1 %v6393_v43  ;;  %v7815_v36 = vld [vmem:[%s9859_s1 + $0xb28] ss:$16 sps:$4 sm:$0xff]  }
 0x127   :  { %7099 = vmatpush3.bf16.msra.mxu0 %v7776_v47  ;;  %7121 = vmatpush3.bf16.msra.mxu1 %v7777_v48  ;;  %v7816_v37 = vld [vmem:[%s9859_s1 + $0x828] ss:$16 sps:$4 sm:$0xff]  }
 0x128   :  { %7100 = vmatprep.subr.bf16.mxu0 %v7778_v49  ;;  %7122 = vmatprep.subr.bf16.mxu1 %v7779_v50  ;;  %v7817_v38 = vld [vmem:[%s9859_s1 + $0xa28] ss:$16 sps:$4 sm:$0xff]  }
 0x129   :  { %3391 = vmatprep.mubr.bf16.mxu0 %v6412_v28  ;;  %v7819_v40 = vld [vmem:[%s9859_s1 + $0xb48] ss:$16 sps:$4 sm:$0xff]  }
 0x12a   :  { %v7820_v41 = vld [vmem:[%s9859_s1 + $0x848] ss:$16 sps:$4 sm:$0xff]  }
 0x12b   :  { %7101 = vmatpush3.bf16.msra.mxu0 %v7780_v51  ;;  %7123 = vmatpush3.bf16.msra.mxu1 %v7781_v52  ;;  %v7822_v43 = vld [vmem:[%s9859_s1 + $0x968] ss:$16 sps:$4 sm:$0xff]  }
 0x12c   :  { %7102 = vmatprep.subr.bf16.mxu0 %v7782_v53  ;;  %7124 = vmatprep.subr.bf16.mxu1 %v7783_v54  ;;  %v7823_v44 = vld [vmem:[%s9859_s1 + $0xb68] ss:$16 sps:$4 sm:$0xff]  }
 0x12d   :  { %v7824_v45 = vld [vmem:[%s9859_s1 + $0x868] ss:$16 sps:$4 sm:$0xff]  }
 0x12e   :  { %v7825_v46 = vld [vmem:[%s9859_s1 + $0xa68] ss:$16 sps:$4 sm:$0xff]  }
 0x12f   :  { %7103 = vmatpush3.bf16.msra.mxu0 %v7784_v55  ;;  %7125 = vmatpush3.bf16.msra.mxu1 %v7785_v56  ;;  %v7826_v47 = vld [vmem:[%s9859_s1 + $0x988] ss:$16 sps:$4 sm:$0xff]  }
 0x130   :  { %7104 = vmatprep.subr.bf16.mxu0 %v7786_v57  ;;  %7126 = vmatprep.subr.bf16.mxu1 %v7787_v58  ;;  %v7827_v48 = vld [vmem:[%s9859_s1 + $0xb88] ss:$16 sps:$4 sm:$0xff]   ;;  %v6229_v58 = vld [vmem:[%s9861_s2] ss:$0 sm:$0xff] }
 0x131   :  { %v7828_v49 = vld [vmem:[%s9859_s1 + $0x888] ss:$16 sps:$4 sm:$0xff]  }
 0x132   :  { %v7829_v50 = vld [vmem:[%s9859_s1 + $0xa88] ss:$16 sps:$4 sm:$0xff]  }
 0x133   :  { %7105 = vmatpush3.bf16.msra.mxu0 %v7788_v59  ;;  %7127 = vmatpush3.bf16.msra.mxu1 %v7789_v60  ;;  %v7830_v57 = vld [vmem:[%s9859_s1 + $0x9a8] ss:$16 sps:$4 sm:$0xff]  }
 0x134   :  { %7106 = vmatprep.subr.bf16.mxu0 %v7790_v61  ;;  %7128 = vmatprep.subr.bf16.mxu1 %v7791_v62  ;;  %v7831_v59 = vld [vmem:[%s9859_s1 + $0xba8] ss:$16 sps:$4 sm:$0xff]  }
 0x135   :  { %v7850_v25 = vld [vmem:[%s9859_s1 + $0xd28] ss:$16 sps:$4 sm:$0xff]  }
 0x136   :  { %v7853_v28 = vld [vmem:[%s9859_s1 + $0xe28] ss:$16 sps:$4 sm:$0xff]  }
 0x137   :  { %7107 = vmatpush3.bf16.msra.mxu0 %v7792_v63  ;;  %7129 = vmatpush3.bf16.msra.mxu1 %v7793_v0  ;;  %v7832_v63 = vld [vmem:[%s9859_s1 + $0x8a8] ss:$16 sps:$4 sm:$0xff]  }
 0x138   :  { %v6828_v2 = vpop.f32.mrb[8].mxu1  ;;  %7108 = vmatprep.subr.bf16.mxu0 %v7794_v7  ;;  %7130 = vmatprep.subr.bf16.mxu1 %v7795_v8  ;;  %v7833_v0 = vld [vmem:[%s9859_s1 + $0xaa8] ss:$16 sps:$4 sm:$0xff]  }
 0x139   :  { %v6806_v1 = vpop.f32.mrb[8].mxu0  ;;  %v6829_v4 = vpop.f32.mrb[9].mxu1  ;;  %v7836_v7 = vld [vmem:[%s9859_s1 + $0x8c8] ss:$16 sps:$4 sm:$0xff]  }
 0x13a   :  { %v6807_v3 = vpop.f32.mrb[9].mxu0  ;;  %v6830_v6 = vadd.f32 %v6829_v4, %v6828_v2  ;;  %v6831_v10 = vpop.f32.mrb[10].mxu1  ;;  %v7834_v4 = vld [vmem:[%s9859_s1 + $0x9c8] ss:$16 sps:$4 sm:$0xff]  }
 0x13b   :  { %v6808_v5 = vadd.f32 %v6807_v3, %v6806_v1  ;;  %v6809_v9 = vpop.f32.mrb[10].mxu0  ;;  %v6832_v15 = vpop.f32.mrb[11].mxu1  ;;  %7109 = vmatpush3.bf16.msra.mxu0 %v7796_v12  ;;  %7131 = vmatpush3.bf16.msra.mxu1 %v7797_v13  ;;  %v3577_v10 = vld [vmem:[%s9860_s0 + $0x20] sm:$0xff] }
 0x13c   :  { %v6810_v14 = vpop.f32.mrb[11].mxu0  ;;  %7110 = vmatprep.subr.bf16.mxu0 %v7798_v17  ;;  %7132 = vmatprep.subr.bf16.mxu1 %v7799_v18  ;;  %v7837_v9 = vld [vmem:[%s9859_s1 + $0xac8] ss:$16 sps:$4 sm:$0xff]   ;;  %v6448_v12 = vcombine.high %v3577_v10, %v3577_v10  ;;  %v6447_v17 = vcombine.low %v3577_v10, %v3577_v10  ;;  %v7886_v10 = vld [vmem:[%s9859_s1 + $0x32c] ss:$16 sps:$4 sm:$0xff]  }
 0x13d   :  { %v903_v11 = vadd.f32 %v6808_v5, %v8983_v30  ;;  %v6430_v30 = vcombine.high %v3400_v26, %v3400_v26  ;;  %v7839_v14 = vld [vmem:[%s9859_s1 + $0xbe8] ss:$16 sps:$4 sm:$0xff]  }
 0x13e   :  { %v7840_v15 = vld [vmem:[%s9859_s1 + $0x8e8] ss:$16 sps:$4 sm:$0xff]  }
 0x13f   :  { %v9088_v16 = vadd.f32 %v6830_v6, %v903_v11  ;;  %7111 = vmatpush3.bf16.msra.mxu0 %v7800_v19  ;;  %7133 = vmatpush3.bf16.msra.mxu1 %v7801_v20  ;;  %v7835_v6 = vld [vmem:[%s9859_s1 + $0xbc8] ss:$16 sps:$4 sm:$0xff]  }
 0x140   :  { %7112 = vmatprep.subr.bf16.mxu0 %v7802_v21  ;;  %7134 = vmatprep.subr.bf16.mxu1 %v7803_v22  ;;  %v7838_v11 = vld [vmem:[%s9859_s1 + $0x9e8] ss:$16 sps:$4 sm:$0xff]  }
 0x141   :  { %3568 = vmatprep.mubr.bf16.mxu1 %v6430_v30  ;;  %v3754_v18 = vld [vmem:[%s9860_s0 + $0x28] sm:$0xff] }
 0x142   :  { %v6465_v19 = vcombine.low %v3754_v18, %v3754_v18  ;;  %v6466_v20 = vcombine.high %v3754_v18, %v3754_v18  ;;  %v7846_v21 = vld [vmem:[%s9859_s1 + $0xd08] ss:$16 sps:$4 sm:$0xff]   ;;  %v7894_v18 = vld [vmem:[%s9859_s1 + $0x36c] ss:$16 sps:$4 sm:$0xff]  }
 0x143   :  { %7113 = vmatpush3.bf16.msra.mxu0 %v7804_v23  ;;  %7135 = vmatpush3.bf16.msra.mxu1 %v7805_v24  ;;  %v7847_v22 = vld [vmem:[%s9859_s1 + $0xf08] ss:$16 sps:$4 sm:$0xff]  }
 0x144   :  { %7142 = vmatprep.subr.bf16.mxu0 %v7810_v31  ;;  %7164 = vmatprep.subr.bf16.mxu1 %v7811_v32  ;;  %v7848_v23 = vld [vmem:[%s9859_s1 + $0xc08] ss:$16 sps:$4 sm:$0xff]  }
 0x145   :  { %v7849_v24 = vld [vmem:[%s9859_s1 + $0xe08] ss:$16 sps:$4 sm:$0xff]  }
 0x146   :  { %3392 = vmatmul.mubr.bf16.vlgmr.msra.gmra.mrb[36].mxu0 %v6411_v27  ;;  %3569 = vmatmul.mubr.bf16.vlgmr.msra.gmra.mrb[36].mxu1 %v6429_v29  ;;  %v7851_v26 = vld [vmem:[%s9859_s1 + $0xf28] ss:$16 sps:$4 sm:$0xff]  }
 0x147   :  { %7143 = vmatpush3.bf16.msra.mxu0 %v7812_v33  ;;  %7165 = vmatpush3.bf16.msra.mxu1 %v7813_v34  ;;  %v7852_v27 = vld [vmem:[%s9859_s1 + $0xc28] ss:$16 sps:$4 sm:$0xff]  }
 0x148   :  { %7144 = vmatprep.subr.bf16.mxu0 %v7814_v35  ;;  %7166 = vmatprep.subr.bf16.mxu1 %v7815_v36  ;;  %v7854_v29 = vld [vmem:[%s9859_s1 + $0xd48] ss:$16 sps:$4 sm:$0xff]  }
 0x149   :  { %3745 = vmatprep.mubr.bf16.mxu0 %v6448_v12  ;;  %3922 = vmatprep.mubr.bf16.mxu1 %v6466_v20  ;;  %v7855_v30 = vld [vmem:[%s9859_s1 + $0xf48] ss:$16 sps:$4 sm:$0xff]   ;;  %v7888_v12 = vld [vmem:[%s9859_s1 + $0x22c] ss:$16 sps:$4 sm:$0xff]  }
 0x14a   :  { %v7856_v31 = vld [vmem:[%s9859_s1 + $0xc48] ss:$16 sps:$4 sm:$0xff]   ;;  %v7896_v20 = vld [vmem:[%s9859_s1 + $0x26c] ss:$16 sps:$4 sm:$0xff]  }
 0x14b   :  { %7145 = vmatpush3.bf16.msra.mxu0 %v7816_v37  ;;  %7167 = vmatpush3.bf16.msra.mxu1 %v7817_v38  ;;  %v7857_v32 = vld [vmem:[%s9859_s1 + $0xe48] ss:$16 sps:$4 sm:$0xff]  }
 0x14c   :  { %7146 = vmatprep.subr.bf16.mxu0 %v7818_v39  ;;  %7168 = vmatprep.subr.bf16.mxu1 %v7819_v40  ;;  %v7858_v33 = vld [vmem:[%s9859_s1 + $0xd68] ss:$16 sps:$4 sm:$0xff]  }
 0x14d   :  { %v7859_v34 = vld [vmem:[%s9859_s1 + $0xf68] ss:$16 sps:$4 sm:$0xff]  }
 0x14e   :  { %v7860_v35 = vld [vmem:[%s9859_s1 + $0xc68] ss:$16 sps:$4 sm:$0xff]  }
 0x14f   :  { %7147 = vmatpush3.bf16.msra.mxu0 %v7820_v41  ;;  %7169 = vmatpush3.bf16.msra.mxu1 %v7821_v42  ;;  %v7861_v36 = vld [vmem:[%s9859_s1 + $0xe68] ss:$16 sps:$4 sm:$0xff]  }
 0x150   :  { %7148 = vmatprep.subr.bf16.mxu0 %v7822_v43  ;;  %7170 = vmatprep.subr.bf16.mxu1 %v7823_v44  ;;  %v7862_v37 = vld [vmem:[%s9859_s1 + $0xd88] ss:$16 sps:$4 sm:$0xff]  }
 0x151   :  { %v7863_v38 = vld [vmem:[%s9859_s1 + $0xf88] ss:$16 sps:$4 sm:$0xff]  }
 0x152   :  { %v7864_v39 = vld [vmem:[%s9859_s1 + $0xc88] ss:$16 sps:$4 sm:$0xff]  }
 0x153   :  { %7149 = vmatpush3.bf16.msra.mxu0 %v7824_v45  ;;  %7171 = vmatpush3.bf16.msra.mxu1 %v7825_v46  ;;  %v7865_v40 = vld [vmem:[%s9859_s1 + $0xe88] ss:$16 sps:$4 sm:$0xff]  }
 0x154   :  { %7150 = vmatprep.subr.bf16.mxu0 %v7826_v47  ;;  %7172 = vmatprep.subr.bf16.mxu1 %v7827_v48  ;;  %v7866_v45 = vld [vmem:[%s9859_s1 + $0xda8] ss:$16 sps:$4 sm:$0xff]  }
 0x155   :  { %v7867_v48 = vld [vmem:[%s9859_s1 + $0xfa8] ss:$16 sps:$4 sm:$0xff]  }
 0x157   :  { %7151 = vmatpush3.bf16.msra.mxu0 %v7828_v49  ;;  %7173 = vmatpush3.bf16.msra.mxu1 %v7829_v50 }
 0x158   :  { %7152 = vmatprep.subr.bf16.mxu0 %v7830_v57  ;;  %7174 = vmatprep.subr.bf16.mxu1 %v7831_v59  ;;  %v7871_v57 = vld [vmem:[%s9859_s1 + $0xfc8] ss:$16 sps:$4 sm:$0xff]  }
 0x159   :  { %v6850_v51 = vpop.f32.mrb[12].mxu0  ;;  %v6872_v52 = vpop.f32.mrb[12].mxu1  ;;  %v7873_v59 = vld [vmem:[%s9859_s1 + $0xec8] ss:$16 sps:$4 sm:$0xff]  }
 0x15a   :  { %v6851_v53 = vpop.f32.mrb[13].mxu0  ;;  %v6873_v54 = vpop.f32.mrb[13].mxu1 }
 0x15b   :  { %v6852_v55 = vadd.f32 %v6851_v53, %v6850_v51  ;;  %v6874_v56 = vadd.f32 %v6873_v54, %v6872_v52  ;;  %v6853_v60 = vpop.f32.mrb[14].mxu0  ;;  %v6875_v61 = vpop.f32.mrb[14].mxu1  ;;  %7153 = vmatpush3.bf16.msra.mxu0 %v7832_v63  ;;  %7175 = vmatpush3.bf16.msra.mxu1 %v7833_v0  ;;  %v7868_v51 = vld [vmem:[%s9859_s1 + $0xca8] ss:$16 sps:$4 sm:$0xff]   ;;  %v3931_v0 = vld [vmem:[%s9860_s0 + $0x30] sm:$0xff] }
 0x15c   :  { %v6854_v2 = vpop.f32.mrb[15].mxu0  ;;  %v6876_v3 = vpop.f32.mrb[15].mxu1  ;;  %7154 = vmatprep.subr.bf16.mxu0 %v7834_v4  ;;  %7176 = vmatprep.subr.bf16.mxu1 %v7835_v6  ;;  %v7869_v53 = vld [vmem:[%s9859_s1 + $0xea8] ss:$16 sps:$4 sm:$0xff]   ;;  %v7882_v6 = vld [vmem:[%s9859_s1 + $0x30c] ss:$16 sps:$4 sm:$0xff]  }
 0x15d   :  { %v1257_v62 = vadd.f32 %v6852_v55, %v9088_v16  ;;  %v7841_v16 = vld [vmem:[%s9859_s1 + $0xae8] ss:$16 sps:$4 sm:$0xff]   ;;  %v6483_v2 = vcombine.low %v3931_v0, %v3931_v0  ;;  %v6484_v3 = vcombine.high %v3931_v0, %v3931_v0  ;;  %v7926_v0 = vld [vmem:[%s9859_s1 + $0x54c] ss:$16 sps:$4 sm:$0xff]  }
 0x15e   :  { %v7874_v60 = vld [vmem:[%s9859_s1 + $0xde8] ss:$16 sps:$4 sm:$0xff]  }
 0x15f   :  { %v1434_v1 = vadd.f32 %v6874_v56, %v1257_v62  ;;  %7155 = vmatpush3.bf16.msra.mxu0 %v7836_v7  ;;  %7177 = vmatpush3.bf16.msra.mxu1 %v7837_v9  ;;  %v7870_v56 = vld [vmem:[%s9859_s1 + $0xdc8] ss:$16 sps:$4 sm:$0xff]   ;;  %v7883_v7 = vld [vmem:[%s9859_s1 + $0x10c] ss:$16 sps:$4 sm:$0xff]  }
 0x160   :  { %7156 = vmatprep.subr.bf16.mxu0 %v7838_v11  ;;  %7178 = vmatprep.subr.bf16.mxu1 %v7839_v14  ;;  %v7875_v61 = vld [vmem:[%s9859_s1 + $0xfe8] ss:$16 sps:$4 sm:$0xff]   ;;  %v7885_v9 = vld [vmem:[%s9859_s1 + $0xc] ss:$16 sps:$4 sm:$0xff]  }
 0x161   :  { %v1442_v5 = vadd.f32 %v6229_v58, %v1434_v1  ;;  %v7872_v58 = vld [vmem:[%s9859_s1 + $0xcc8] ss:$16 sps:$4 sm:$0xff]   ;;  %v7887_v11 = vld [vmem:[%s9859_s1 + $0x12c] ss:$16 sps:$4 sm:$0xff]  }
 0x162   :  { %v7876_v62 = vld [vmem:[%s9859_s1 + $0xce8] ss:$16 sps:$4 sm:$0xff]   ;;  %v7890_v14 = vld [vmem:[%s9859_s1 + $0x34c] ss:$16 sps:$4 sm:$0xff]  }
 0x163   :  { %v1443_v8 = vmax.f32 %v1442_v5, 0.0  ;;  %7157 = vmatpush3.bf16.msra.mxu0 %v7840_v15  ;;  %7179 = vmatpush3.bf16.msra.mxu1 %v7841_v16  ;;  %v7877_v63 = vld [vmem:[%s9859_s1 + $0xee8] ss:$16 sps:$4 sm:$0xff]   ;;  %v7891_v15 = vld [vmem:[%s9859_s1 + $0x14c] ss:$16 sps:$4 sm:$0xff]  }
 0x164   :  { %7186 = vmatprep.subr.bf16.mxu0 %v7846_v21  ;;  %7208 = vmatprep.subr.bf16.mxu1 %v7847_v22  ;;  %v4108_v1 = vld [vmem:[%s9860_s0 + $0x38] sm:$0xff] }
 0x165   :  { %v1444_v13 = vpack.c.bf16 %v1443_v8, %v1443_v8  ;;  %v6501_v4 = vcombine.low %v4108_v1, %v4108_v1  ;;  %v6502_v5 = vcombine.high %v4108_v1, %v4108_v1  ;;  %v7884_v8 = vld [vmem:[%s9859_s1 + $0x20c] ss:$16 sps:$4 sm:$0xff]  }
 0x166   :  { %3746 = vmatmul.mubr.bf16.vlgmr.msra.gmra.mrb[40].mxu0 %v6447_v17  ;;  %3923 = vmatmul.mubr.bf16.vlgmr.msra.gmra.mrb[40].mxu1 %v6465_v19  ;;  %v7892_v16 = vld [vmem:[%s9859_s1 + $0x24c] ss:$16 sps:$4 sm:$0xff]  }
 0x167   :  { %1445 = vst [vmem:[#allocation2] sm:$0xf] %v1444_v13  ;;  %7187 = vmatpush3.bf16.msra.mxu0 %v7848_v23  ;;  %7209 = vmatpush3.bf16.msra.mxu1 %v7849_v24  ;;  %v7889_v13 = vld [vmem:[%s9859_s1 + $0x2c] ss:$16 sps:$4 sm:$0xff]  }
 0x168   :  { %7188 = vmatprep.subr.bf16.mxu0 %v7850_v25  ;;  %7210 = vmatprep.subr.bf16.mxu1 %v7851_v26  ;;  %v7893_v17 = vld [vmem:[%s9859_s1 + $0x4c] ss:$16 sps:$4 sm:$0xff]  }
 0x169   :  { %4099 = vmatprep.mubr.bf16.mxu0 %v6484_v3  ;;  %4276 = vmatprep.mubr.bf16.mxu1 %v6502_v5  ;;  %v7895_v19 = vld [vmem:[%s9859_s1 + $0x16c] ss:$16 sps:$4 sm:$0xff]  }
 0x16a   :  { %v7897_v21 = vld [vmem:[%s9859_s1 + $0x6c] ss:$16 sps:$4 sm:$0xff]  }
 0x16b   :  { %7189 = vmatpush3.bf16.msra.mxu0 %v7852_v27  ;;  %7211 = vmatpush3.bf16.msra.mxu1 %v7853_v28  ;;  %v7898_v22 = vld [vmem:[%s9859_s1 + $0x38c] ss:$16 sps:$4 sm:$0xff]  }
 0x16c   :  { %7190 = vmatprep.subr.bf16.mxu0 %v7854_v29  ;;  %7212 = vmatprep.subr.bf16.mxu1 %v7855_v30  ;;  %v7899_v23 = vld [vmem:[%s9859_s1 + $0x18c] ss:$16 sps:$4 sm:$0xff]  }
 0x16d   :  { %v7900_v24 = vld [vmem:[%s9859_s1 + $0x28c] ss:$16 sps:$4 sm:$0xff]  }
 0x16e   :  { %v7901_v25 = vld [vmem:[%s9859_s1 + $0x8c] ss:$16 sps:$4 sm:$0xff]  }
 0x16f   :  { %7191 = vmatpush3.bf16.msra.mxu0 %v7856_v31  ;;  %7213 = vmatpush3.bf16.msra.mxu1 %v7857_v32  ;;  %v7902_v30 = vld [vmem:[%s9859_s1 + $0x3ac] ss:$16 sps:$4 sm:$0xff]  }
 0x170   :  { %7192 = vmatprep.subr.bf16.mxu0 %v7858_v33  ;;  %7214 = vmatprep.subr.bf16.mxu1 %v7859_v34  ;;  %v7903_v33 = vld [vmem:[%s9859_s1 + $0x1ac] ss:$16 sps:$4 sm:$0xff]  }
 0x171   :  { %v7927_v1 = vld [vmem:[%s9859_s1 + $0x74c] ss:$16 sps:$4 sm:$0xff]  }
 0x172   :  { %v7929_v3 = vld [vmem:[%s9859_s1 + $0x64c] ss:$16 sps:$4 sm:$0xff]  }
 0x173   :  { %7193 = vmatpush3.bf16.msra.mxu0 %v7860_v35  ;;  %7215 = vmatpush3.bf16.msra.mxu1 %v7861_v36  ;;  %v7904_v36 = vld [vmem:[%s9859_s1 + $0x2ac] ss:$16 sps:$4 sm:$0xff]  }
 0x174   :  { %7194 = vmatprep.subr.bf16.mxu0 %v7862_v37  ;;  %7216 = vmatprep.subr.bf16.mxu1 %v7863_v38  ;;  %v7905_v38 = vld [vmem:[%s9859_s1 + $0xac] ss:$16 sps:$4 sm:$0xff]  }
 0x175   :  { %v7931_v5 = vld [vmem:[%s9859_s1 + $0x76c] ss:$16 sps:$4 sm:$0xff]  }
 0x177   :  { %7195 = vmatpush3.bf16.msra.mxu0 %v7864_v39  ;;  %7217 = vmatpush3.bf16.msra.mxu1 %v7865_v40 }
 0x178   :  { %7196 = vmatprep.subr.bf16.mxu0 %v7866_v45  ;;  %7218 = vmatprep.subr.bf16.mxu1 %v7867_v48  ;;  %v7909_v45 = vld [vmem:[%s9859_s1 + $0xcc] ss:$16 sps:$4 sm:$0xff]  }
 0x179   :  { %v6894_v41 = vpop.f32.mrb[16].mxu0  ;;  %v6916_v42 = vpop.f32.mrb[16].mxu1  ;;  %v7912_v48 = vld [vmem:[%s9859_s1 + $0x2ec] ss:$16 sps:$4 sm:$0xff]  }
 0x17a   :  { %v6895_v43 = vpop.f32.mrb[17].mxu0  ;;  %v6917_v44 = vpop.f32.mrb[17].mxu1 }
 0x17b   :  { %v6896_v46 = vadd.f32 %v6895_v43, %v6894_v41  ;;  %v6918_v47 = vadd.f32 %v6917_v44, %v6916_v42  ;;  %v6897_v49 = vpop.f32.mrb[18].mxu0  ;;  %v6919_v50 = vpop.f32.mrb[18].mxu1  ;;  %7197 = vmatpush3.bf16.msra.mxu0 %v7868_v51  ;;  %7219 = vmatpush3.bf16.msra.mxu1 %v7869_v53  ;;  %v7906_v42 = vld [vmem:[%s9859_s1 + $0x3cc] ss:$16 sps:$4 sm:$0xff]   ;;  %v4296_v51 = vld [vmem:[%s9860_s0] sm:$0xff] }
 0x17c   :  { %v6898_v54 = vpop.f32.mrb[19].mxu0  ;;  %v6920_v55 = vpop.f32.mrb[19].mxu1  ;;  %7198 = vmatprep.subr.bf16.mxu0 %v7870_v56  ;;  %7220 = vmatprep.subr.bf16.mxu1 %v7871_v57  ;;  %v7907_v43 = vld [vmem:[%s9859_s1 + $0x1cc] ss:$16 sps:$4 sm:$0xff]  }
 0x17d   :  { %v9295_v52 = vadd.f32 %v6918_v47, %v6896_v46  ;;  %v7908_v44 = vld [vmem:[%s9859_s1 + $0x2cc] ss:$16 sps:$4 sm:$0xff]   ;;  %v6538_v54 = vcombine.low %v4296_v51, %v4296_v51  ;;  %v6539_v55 = vcombine.high %v4296_v51, %v4296_v51 }
 0x17e   :  { %v7910_v46 = vld [vmem:[%s9859_s1 + $0x3ec] ss:$16 sps:$4 sm:$0xff]  }
 0x17f   :  { %7199 = vmatpush3.bf16.msra.mxu0 %v7872_v58  ;;  %7221 = vmatpush3.bf16.msra.mxu1 %v7873_v59  ;;  %v7911_v47 = vld [vmem:[%s9859_s1 + $0x1ec] ss:$16 sps:$4 sm:$0xff]  }
 0x180   :  { %7200 = vmatprep.subr.bf16.mxu0 %v7874_v60  ;;  %7222 = vmatprep.subr.bf16.mxu1 %v7875_v61  ;;  %v7913_v49 = vld [vmem:[%s9859_s1 + $0xec] ss:$16 sps:$4 sm:$0xff]  }
 0x181   :  { %v4329_v50 = vld [vmem:[%s9860_s0 + $0x8] sm:$0xff] }
 0x182   :  { %v6521_v53 = vcombine.high %v4329_v50, %v4329_v50  ;;  %v7918_v56 = vld [vmem:[%s9859_s1 + $0x50c] ss:$16 sps:$4 sm:$0xff]  }
 0x183   :  { %7201 = vmatpush3.bf16.msra.mxu0 %v7876_v62  ;;  %7223 = vmatpush3.bf16.msra.mxu1 %v7877_v63  ;;  %v7919_v57 = vld [vmem:[%s9859_s1 + $0x70c] ss:$16 sps:$4 sm:$0xff]  }
 0x184   :  { %7230 = vmatprep.subr.bf16.mxu0 %v7882_v6  ;;  %7252 = vmatprep.subr.bf16.mxu1 %v7883_v7  ;;  %v7920_v58 = vld [vmem:[%s9859_s1 + $0x40c] ss:$16 sps:$4 sm:$0xff]  }
 0x185   :  { %v7921_v59 = vld [vmem:[%s9859_s1 + $0x60c] ss:$16 sps:$4 sm:$0xff]  }
 0x186   :  { %4100 = vmatmul.mubr.bf16.vlgmr.msra.gmra.mrb[44].mxu0 %v6483_v2  ;;  %4277 = vmatmul.mubr.bf16.vlgmr.msra.gmra.mrb[44].mxu1 %v6501_v4  ;;  %v7922_v60 = vld [vmem:[%s9859_s1 + $0x52c] ss:$16 sps:$4 sm:$0xff]  }
 0x187   :  { %7231 = vmatpush3.bf16.msra.mxu0 %v7884_v8  ;;  %7253 = vmatpush3.bf16.msra.mxu1 %v7885_v9  ;;  %v7923_v61 = vld [vmem:[%s9859_s1 + $0x72c] ss:$16 sps:$4 sm:$0xff]  }
 0x188   :  { %7232 = vmatprep.subr.bf16.mxu0 %v7886_v10  ;;  %7254 = vmatprep.subr.bf16.mxu1 %v7887_v11  ;;  %v7924_v62 = vld [vmem:[%s9859_s1 + $0x42c] ss:$16 sps:$4 sm:$0xff]  }
 0x189   :  { %4497 = vmatprep.mubr.bf16.mxu0 %v6521_v53  ;;  %4640 = vmatprep.mubr.bf16.mxu1 %v6539_v55  ;;  %v7925_v63 = vld [vmem:[%s9859_s1 + $0x62c] ss:$16 sps:$4 sm:$0xff]  }
 0x18a   :  { %v7928_v2 = vld [vmem:[%s9859_s1 + $0x44c] ss:$16 sps:$4 sm:$0xff]  }
 0x18b   :  { %7233 = vmatpush3.bf16.msra.mxu0 %v7888_v12  ;;  %7255 = vmatpush3.bf16.msra.mxu1 %v7889_v13  ;;  %v7930_v4 = vld [vmem:[%s9859_s1 + $0x56c] ss:$16 sps:$4 sm:$0xff]  }
 0x18c   :  { %7234 = vmatprep.subr.bf16.mxu0 %v7890_v14  ;;  %7256 = vmatprep.subr.bf16.mxu1 %v7891_v15  ;;  %v7932_v6 = vld [vmem:[%s9859_s1 + $0x46c] ss:$16 sps:$4 sm:$0xff]  }
 0x18d   :  { %v7933_v7 = vld [vmem:[%s9859_s1 + $0x66c] ss:$16 sps:$4 sm:$0xff]  }
 0x18e   :  { %v7934_v8 = vld [vmem:[%s9859_s1 + $0x58c] ss:$16 sps:$4 sm:$0xff]  }
 0x18f   :  { %7235 = vmatpush3.bf16.msra.mxu0 %v7892_v16  ;;  %7257 = vmatpush3.bf16.msra.mxu1 %v7893_v17  ;;  %v7935_v9 = vld [vmem:[%s9859_s1 + $0x78c] ss:$16 sps:$4 sm:$0xff]  }
 0x190   :  { %7236 = vmatprep.subr.bf16.mxu0 %v7894_v18  ;;  %7258 = vmatprep.subr.bf16.mxu1 %v7895_v19  ;;  %v7936_v10 = vld [vmem:[%s9859_s1 + $0x48c] ss:$16 sps:$4 sm:$0xff]  }
 0x191   :  { %v7937_v11 = vld [vmem:[%s9859_s1 + $0x68c] ss:$16 sps:$4 sm:$0xff]  }
 0x192   :  { %v7938_v16 = vld [vmem:[%s9859_s1 + $0x5ac] ss:$16 sps:$4 sm:$0xff]  }
 0x193   :  { %7237 = vmatpush3.bf16.msra.mxu0 %v7896_v20  ;;  %7259 = vmatpush3.bf16.msra.mxu1 %v7897_v21  ;;  %v7939_v19 = vld [vmem:[%s9859_s1 + $0x7ac] ss:$16 sps:$4 sm:$0xff]  }
 0x194   :  { %7238 = vmatprep.subr.bf16.mxu0 %v7898_v22  ;;  %7260 = vmatprep.subr.bf16.mxu1 %v7899_v23  ;;  %v7940_v22 = vld [vmem:[%s9859_s1 + $0x4ac] ss:$16 sps:$4 sm:$0xff]  }
 0x195   :  { %v7963_v51 = vld [vmem:[%s9859_s1 + $0xb4c] ss:$16 sps:$4 sm:$0xff]  }
 0x196   :  { %v7965_v53 = vld [vmem:[%s9859_s1 + $0xa4c] ss:$16 sps:$4 sm:$0xff]  }
 0x197   :  { %7239 = vmatpush3.bf16.msra.mxu0 %v7900_v24  ;;  %7261 = vmatpush3.bf16.msra.mxu1 %v7901_v25  ;;  %v7941_v24 = vld [vmem:[%s9859_s1 + $0x6ac] ss:$16 sps:$4 sm:$0xff]  }
 0x198   :  { %7240 = vmatprep.subr.bf16.mxu0 %v7902_v30  ;;  %7262 = vmatprep.subr.bf16.mxu1 %v7903_v33  ;;  %v7944_v30 = vld [vmem:[%s9859_s1 + $0x4cc] ss:$16 sps:$4 sm:$0xff]  }
 0x199   :  { %v6938_v26 = vpop.f32.mrb[20].mxu0  ;;  %v6960_v27 = vpop.f32.mrb[20].mxu1  ;;  %v7947_v33 = vld [vmem:[%s9859_s1 + $0x7ec] ss:$16 sps:$4 sm:$0xff]  }
 0x19a   :  { %v6939_v28 = vpop.f32.mrb[21].mxu0  ;;  %v6961_v29 = vpop.f32.mrb[21].mxu1  ;;  %v7967_v55 = vld [vmem:[%s9859_s1 + $0xb6c] ss:$16 sps:$4 sm:$0xff]  }
 0x19b   :  { %v6940_v31 = vadd.f32 %v6939_v28, %v6938_v26  ;;  %v6962_v32 = vadd.f32 %v6961_v29, %v6960_v27  ;;  %v6941_v34 = vpop.f32.mrb[22].mxu0  ;;  %v6963_v35 = vpop.f32.mrb[22].mxu1  ;;  %7241 = vmatpush3.bf16.msra.mxu0 %v7904_v36  ;;  %7263 = vmatpush3.bf16.msra.mxu1 %v7905_v38  ;;  %v7942_v28 = vld [vmem:[%s9859_s1 + $0x5cc] ss:$16 sps:$4 sm:$0xff]   ;;  %v4648_v36 = vld [vmem:[%s9860_s0 + $0x10] sm:$0xff] }
 0x19c   :  { %v6942_v39 = vpop.f32.mrb[23].mxu0  ;;  %v6964_v40 = vpop.f32.mrb[23].mxu1  ;;  %7242 = vmatprep.subr.bf16.mxu0 %v7906_v42  ;;  %7264 = vmatprep.subr.bf16.mxu1 %v7907_v43  ;;  %v7943_v29 = vld [vmem:[%s9859_s1 + $0x7cc] ss:$16 sps:$4 sm:$0xff]   ;;  %v6556_v38 = vcombine.low %v4648_v36, %v4648_v36 }
 0x19d   :  { %v1974_v37 = vadd.f32 %v6940_v31, %v9295_v52  ;;  %v6520_v52 = vcombine.low %v4329_v50, %v4329_v50  ;;  %v7945_v31 = vld [vmem:[%s9859_s1 + $0x6cc] ss:$16 sps:$4 sm:$0xff]   ;;  %v6557_v39 = vcombine.high %v4648_v36, %v4648_v36 }
 0x19e   :  { %v7948_v34 = vld [vmem:[%s9859_s1 + $0x4ec] ss:$16 sps:$4 sm:$0xff]  }
 0x19f   :  { %v9403_v41 = vadd.f32 %v6962_v32, %v1974_v37  ;;  %7243 = vmatpush3.bf16.msra.mxu0 %v7908_v44  ;;  %7265 = vmatpush3.bf16.msra.mxu1 %v7909_v45  ;;  %v7946_v32 = vld [vmem:[%s9859_s1 + $0x5ec] ss:$16 sps:$4 sm:$0xff]  }
 0x1a0   :  { %7244 = vmatprep.subr.bf16.mxu0 %v7910_v46  ;;  %7266 = vmatprep.subr.bf16.mxu1 %v7911_v47  ;;  %v7949_v35 = vld [vmem:[%s9859_s1 + $0x6ec] ss:$16 sps:$4 sm:$0xff]  }
 0x1a1   :  { %v4825_v37 = vld [vmem:[%s9860_s0 + $0x18] sm:$0xff] }
 0x1a2   :  { %v6574_v40 = vcombine.low %v4825_v37, %v4825_v37  ;;  %v7954_v42 = vld [vmem:[%s9859_s1 + $0x90c] ss:$16 sps:$4 sm:$0xff]  }
 0x1a3   :  { %7245 = vmatpush3.bf16.msra.mxu0 %v7912_v48  ;;  %7267 = vmatpush3.bf16.msra.mxu1 %v7913_v49  ;;  %v7955_v43 = vld [vmem:[%s9859_s1 + $0xb0c] ss:$16 sps:$4 sm:$0xff]  }
 0x1a4   :  { %7274 = vmatprep.subr.bf16.mxu0 %v7918_v56  ;;  %7296 = vmatprep.subr.bf16.mxu1 %v7919_v57  ;;  %v7956_v44 = vld [vmem:[%s9859_s1 + $0x80c] ss:$16 sps:$4 sm:$0xff]  }
 0x1a5   :  { %v7957_v45 = vld [vmem:[%s9859_s1 + $0xa0c] ss:$16 sps:$4 sm:$0xff]  }
 0x1a6   :  { %4498 = vmatmul.mubr.bf16.vlgmr.msra.gmra.mrb[48].mxu0 %v6520_v52  ;;  %4641 = vmatmul.mubr.bf16.vlgmr.msra.gmra.mrb[48].mxu1 %v6538_v54  ;;  %v7958_v46 = vld [vmem:[%s9859_s1 + $0x92c] ss:$16 sps:$4 sm:$0xff]  }
 0x1a7   :  { %7275 = vmatpush3.bf16.msra.mxu0 %v7920_v58  ;;  %7297 = vmatpush3.bf16.msra.mxu1 %v7921_v59  ;;  %v7959_v47 = vld [vmem:[%s9859_s1 + $0xb2c] ss:$16 sps:$4 sm:$0xff]  }
 0x1a8   :  { %7276 = vmatprep.subr.bf16.mxu0 %v7922_v60  ;;  %7298 = vmatprep.subr.bf16.mxu1 %v7923_v61  ;;  %v7960_v48 = vld [vmem:[%s9859_s1 + $0x82c] ss:$16 sps:$4 sm:$0xff]  }
 0x1a9   :  { %4816 = vmatprep.mubr.bf16.mxu0 %v6557_v39  ;;  %v7961_v49 = vld [vmem:[%s9859_s1 + $0xa2c] ss:$16 sps:$4 sm:$0xff]  }
 0x1aa   :  { %v7962_v50 = vld [vmem:[%s9859_s1 + $0x94c] ss:$16 sps:$4 sm:$0xff]  }
 0x1ab   :  { %7277 = vmatpush3.bf16.msra.mxu0 %v7924_v62  ;;  %7299 = vmatpush3.bf16.msra.mxu1 %v7925_v63  ;;  %v7964_v52 = vld [vmem:[%s9859_s1 + $0x84c] ss:$16 sps:$4 sm:$0xff]  }
 0x1ac   :  { %7278 = vmatprep.subr.bf16.mxu0 %v7926_v0  ;;  %7300 = vmatprep.subr.bf16.mxu1 %v7927_v1  ;;  %v7966_v54 = vld [vmem:[%s9859_s1 + $0x96c] ss:$16 sps:$4 sm:$0xff]  }
 0x1ad   :  { %v7968_v56 = vld [vmem:[%s9859_s1 + $0x86c] ss:$16 sps:$4 sm:$0xff]  }
 0x1ae   :  { %v7969_v57 = vld [vmem:[%s9859_s1 + $0xa6c] ss:$16 sps:$4 sm:$0xff]  }
 0x1af   :  { %7279 = vmatpush3.bf16.msra.mxu0 %v7928_v2  ;;  %7301 = vmatpush3.bf16.msra.mxu1 %v7929_v3  ;;  %v7970_v58 = vld [vmem:[%s9859_s1 + $0x98c] ss:$16 sps:$4 sm:$0xff]  }
 0x1b0   :  { %7280 = vmatprep.subr.bf16.mxu0 %v7930_v4  ;;  %7302 = vmatprep.subr.bf16.mxu1 %v7931_v5  ;;  %v7971_v59 = vld [vmem:[%s9859_s1 + $0xb8c] ss:$16 sps:$4 sm:$0xff]  }
 0x1b1   :  { %v7972_v60 = vld [vmem:[%s9859_s1 + $0x88c] ss:$16 sps:$4 sm:$0xff]  }
 0x1b2   :  { %v7973_v61 = vld [vmem:[%s9859_s1 + $0xa8c] ss:$16 sps:$4 sm:$0xff]  }
 0x1b3   :  { %7281 = vmatpush3.bf16.msra.mxu0 %v7932_v6  ;;  %7303 = vmatpush3.bf16.msra.mxu1 %v7933_v7  ;;  %v7974_v2 = vld [vmem:[%s9859_s1 + $0x9ac] ss:$16 sps:$4 sm:$0xff]   ;;  %v6374_v6 = vld [vmem:[%s9861_s2 + $0x1] ss:$0 sm:$0xff] }
 0x1b4   :  { %7282 = vmatprep.subr.bf16.mxu0 %v7934_v8  ;;  %7304 = vmatprep.subr.bf16.mxu1 %v7935_v9  ;;  %v7975_v5 = vld [vmem:[%s9859_s1 + $0xbac] ss:$16 sps:$4 sm:$0xff]  }
 0x1b5   :  { %v7994_v36 = vld [vmem:[%s9859_s1 + $0xd2c] ss:$16 sps:$4 sm:$0xff]  }
 0x1b6   :  { %v7997_v39 = vld [vmem:[%s9859_s1 + $0xe2c] ss:$16 sps:$4 sm:$0xff]  }
 0x1b7   :  { %7283 = vmatpush3.bf16.msra.mxu0 %v7936_v10  ;;  %7305 = vmatpush3.bf16.msra.mxu1 %v7937_v11  ;;  %v7976_v10 = vld [vmem:[%s9859_s1 + $0x8ac] ss:$16 sps:$4 sm:$0xff]  }
 0x1b8   :  { %7284 = vmatprep.subr.bf16.mxu0 %v7938_v16  ;;  %7306 = vmatprep.subr.bf16.mxu1 %v7939_v19  ;;  %v7977_v11 = vld [vmem:[%s9859_s1 + $0xaac] ss:$16 sps:$4 sm:$0xff]  }
 0x1b9   :  { %v6982_v12 = vpop.f32.mrb[24].mxu0  ;;  %v7004_v13 = vpop.f32.mrb[24].mxu1  ;;  %v7979_v16 = vld [vmem:[%s9859_s1 + $0xbcc] ss:$16 sps:$4 sm:$0xff]  }
 0x1ba   :  { %v6983_v14 = vpop.f32.mrb[25].mxu0  ;;  %v7005_v15 = vpop.f32.mrb[25].mxu1  ;;  %v7981_v19 = vld [vmem:[%s9859_s1 + $0xacc] ss:$16 sps:$4 sm:$0xff]  }
 0x1bb   :  { %v6984_v17 = vadd.f32 %v6983_v14, %v6982_v12  ;;  %v7006_v18 = vadd.f32 %v7005_v15, %v7004_v13  ;;  %v6985_v20 = vpop.f32.mrb[26].mxu0  ;;  %v7007_v21 = vpop.f32.mrb[26].mxu1  ;;  %7285 = vmatpush3.bf16.msra.mxu0 %v7940_v22  ;;  %7307 = vmatpush3.bf16.msra.mxu1 %v7941_v24  ;;  %v7978_v15 = vld [vmem:[%s9859_s1 + $0x9cc] ss:$16 sps:$4 sm:$0xff]   ;;  %v5002_v22 = vld [vmem:[%s9860_s0 + $0x20] sm:$0xff] }
 0x1bc   :  { %v6986_v25 = vpop.f32.mrb[27].mxu0  ;;  %v7008_v26 = vpop.f32.mrb[27].mxu1  ;;  %7286 = vmatprep.subr.bf16.mxu0 %v7942_v28  ;;  %7308 = vmatprep.subr.bf16.mxu1 %v7943_v29  ;;  %v7982_v21 = vld [vmem:[%s9859_s1 + $0x9ec] ss:$16 sps:$4 sm:$0xff]   ;;  %v6593_v24 = vcombine.high %v5002_v22, %v5002_v22  ;;  %v6592_v28 = vcombine.low %v5002_v22, %v5002_v22 }
 0x1bd   :  { %v2328_v23 = vadd.f32 %v6984_v17, %v9403_v41  ;;  %v6575_v41 = vcombine.high %v4825_v37, %v4825_v37  ;;  %v7984_v26 = vld [vmem:[%s9859_s1 + $0x8ec] ss:$16 sps:$4 sm:$0xff]  }
 0x1be   :  { %v5179_v29 = vld [vmem:[%s9860_s0 + $0x28] sm:$0xff] }
 0x1bf   :  { %v9508_v27 = vadd.f32 %v7006_v18, %v2328_v23  ;;  %7287 = vmatpush3.bf16.msra.mxu0 %v7944_v30  ;;  %7309 = vmatpush3.bf16.msra.mxu1 %v7945_v31  ;;  %v7980_v18 = vld [vmem:[%s9859_s1 + $0x8cc] ss:$16 sps:$4 sm:$0xff]   ;;  %v6610_v30 = vcombine.low %v5179_v29, %v5179_v29  ;;  %v6611_v31 = vcombine.high %v5179_v29, %v5179_v29 }
 0x1c0   :  { %7288 = vmatprep.subr.bf16.mxu0 %v7946_v32  ;;  %7310 = vmatprep.subr.bf16.mxu1 %v7947_v33  ;;  %v7983_v23 = vld [vmem:[%s9859_s1 + $0xbec] ss:$16 sps:$4 sm:$0xff]  }
 0x1c1   :  { %4993 = vmatprep.mubr.bf16.mxu1 %v6575_v41  ;;  %v7990_v32 = vld [vmem:[%s9859_s1 + $0xd0c] ss:$16 sps:$4 sm:$0xff]  }
 0x1c2   :  { %v7991_v33 = vld [vmem:[%s9859_s1 + $0xf0c] ss:$16 sps:$4 sm:$0xff]  }
 0x1c3   :  { %7289 = vmatpush3.bf16.msra.mxu0 %v7948_v34  ;;  %7311 = vmatpush3.bf16.msra.mxu1 %v7949_v35  ;;  %v7992_v34 = vld [vmem:[%s9859_s1 + $0xc0c] ss:$16 sps:$4 sm:$0xff]  }
 0x1c4   :  { %7318 = vmatprep.subr.bf16.mxu0 %v7954_v42  ;;  %7340 = vmatprep.subr.bf16.mxu1 %v7955_v43  ;;  %v7993_v35 = vld [vmem:[%s9859_s1 + $0xe0c] ss:$16 sps:$4 sm:$0xff]  }
 0x1c5   :  { %v7995_v37 = vld [vmem:[%s9859_s1 + $0xf2c] ss:$16 sps:$4 sm:$0xff]  }
 0x1c6   :  { %4817 = vmatmul.mubr.bf16.vlgmr.msra.gmra.mrb[52].mxu0 %v6556_v38  ;;  %4994 = vmatmul.mubr.bf16.vlgmr.msra.gmra.mrb[52].mxu1 %v6574_v40  ;;  %v7996_v38 = vld [vmem:[%s9859_s1 + $0xc2c] ss:$16 sps:$4 sm:$0xff]  }
 0x1c7   :  { %7319 = vmatpush3.bf16.msra.mxu0 %v7956_v44  ;;  %7341 = vmatpush3.bf16.msra.mxu1 %v7957_v45  ;;  %v7998_v40 = vld [vmem:[%s9859_s1 + $0xd4c] ss:$16 sps:$4 sm:$0xff]  }
 0x1c8   :  { %7320 = vmatprep.subr.bf16.mxu0 %v7958_v46  ;;  %7342 = vmatprep.subr.bf16.mxu1 %v7959_v47  ;;  %v7999_v41 = vld [vmem:[%s9859_s1 + $0xf4c] ss:$16 sps:$4 sm:$0xff]  }
 0x1c9   :  { %5170 = vmatprep.mubr.bf16.mxu0 %v6593_v24  ;;  %5347 = vmatprep.mubr.bf16.mxu1 %v6611_v31  ;;  %v8000_v42 = vld [vmem:[%s9859_s1 + $0xc4c] ss:$16 sps:$4 sm:$0xff]   ;;  %v8033_v24 = vld [vmem:[%s9862_s3 + $0x10] sm:$0xff]  }
 0x1ca   :  { %v8001_v43 = vld [vmem:[%s9859_s1 + $0xe4c] ss:$16 sps:$4 sm:$0xff]  }
 0x1cb   :  { %7321 = vmatpush3.bf16.msra.mxu0 %v7960_v48  ;;  %7343 = vmatpush3.bf16.msra.mxu1 %v7961_v49  ;;  %v8002_v44 = vld [vmem:[%s9859_s1 + $0xd6c] ss:$16 sps:$4 sm:$0xff]  }
 0x1cc   :  { %7322 = vmatprep.subr.bf16.mxu0 %v7962_v50  ;;  %7344 = vmatprep.subr.bf16.mxu1 %v7963_v51  ;;  %v8003_v45 = vld [vmem:[%s9859_s1 + $0xf6c] ss:$16 sps:$4 sm:$0xff]  }
 0x1cd   :  { %v8004_v46 = vld [vmem:[%s9859_s1 + $0xc6c] ss:$16 sps:$4 sm:$0xff]  }
 0x1ce   :  { %v8005_v47 = vld [vmem:[%s9859_s1 + $0xe6c] ss:$16 sps:$4 sm:$0xff]  }
 0x1cf   :  { %7323 = vmatpush3.bf16.msra.mxu0 %v7964_v52  ;;  %7345 = vmatpush3.bf16.msra.mxu1 %v7965_v53  ;;  %v8006_v48 = vld [vmem:[%s9859_s1 + $0xd8c] ss:$16 sps:$4 sm:$0xff]  }
 0x1d0   :  { %7324 = vmatprep.subr.bf16.mxu0 %v7966_v54  ;;  %7346 = vmatprep.subr.bf16.mxu1 %v7967_v55  ;;  %v8007_v49 = vld [vmem:[%s9859_s1 + $0xf8c] ss:$16 sps:$4 sm:$0xff]  }
 0x1d1   :  { %v8008_v50 = vld [vmem:[%s9859_s1 + $0xc8c] ss:$16 sps:$4 sm:$0xff]  }
 0x1d2   :  { %v8009_v51 = vld [vmem:[%s9859_s1 + $0xe8c] ss:$16 sps:$4 sm:$0xff]  }
 0x1d3   :  { %7325 = vmatpush3.bf16.msra.mxu0 %v7968_v56  ;;  %7347 = vmatpush3.bf16.msra.mxu1 %v7969_v57  ;;  %v8010_v56 = vld [vmem:[%s9859_s1 + $0xdac] ss:$16 sps:$4 sm:$0xff]  }
 0x1d4   :  { %7326 = vmatprep.subr.bf16.mxu0 %v7970_v58  ;;  %7348 = vmatprep.subr.bf16.mxu1 %v7971_v59  ;;  %v8011_v59 = vld [vmem:[%s9859_s1 + $0xfac] ss:$16 sps:$4 sm:$0xff]  }
 0x1d5   :  { %v8031_v22 = vld [vmem:[%s9862_s3 + $0x8] sm:$0xff]  }
 0x1d7   :  { %7327 = vmatpush3.bf16.msra.mxu0 %v7972_v60  ;;  %7349 = vmatpush3.bf16.msra.mxu1 %v7973_v61 }
 0x1d8   :  { %7328 = vmatprep.subr.bf16.mxu0 %v7974_v2  ;;  %7350 = vmatprep.subr.bf16.mxu1 %v7975_v5  ;;  %v8016_v5 = vld [vmem:[%s9859_s1 + $0xccc] ss:$16 sps:$4 sm:$0xff]  }
 0x1d9   :  { %v7026_v62 = vpop.f32.mrb[28].mxu0  ;;  %v7048_v63 = vpop.f32.mrb[28].mxu1 }
 0x1da   :  { %v7027_v0 = vpop.f32.mrb[29].mxu0  ;;  %v7049_v1 = vpop.f32.mrb[29].mxu1 }
 0x1db   :  { %v7028_v3 = vadd.f32 %v7027_v0, %v7026_v62  ;;  %v7050_v4 = vadd.f32 %v7049_v1, %v7048_v63  ;;  %v7029_v7 = vpop.f32.mrb[30].mxu0  ;;  %v7051_v8 = vpop.f32.mrb[30].mxu1  ;;  %7329 = vmatpush3.bf16.msra.mxu0 %v7976_v10  ;;  %7351 = vmatpush3.bf16.msra.mxu1 %v7977_v11  ;;  %v8012_v63 = vld [vmem:[%s9859_s1 + $0xcac] ss:$16 sps:$4 sm:$0xff]   ;;  %v5356_v11 = vld [vmem:[%s9860_s0 + $0x30] sm:$0xff] }
 0x1dc   :  { %v7030_v12 = vpop.f32.mrb[31].mxu0  ;;  %v7052_v13 = vpop.f32.mrb[31].mxu1  ;;  %7330 = vmatprep.subr.bf16.mxu0 %v7978_v15  ;;  %7352 = vmatprep.subr.bf16.mxu1 %v7979_v16  ;;  %v8013_v0 = vld [vmem:[%s9859_s1 + $0xeac] ss:$16 sps:$4 sm:$0xff]  }
 0x1dd   :  { %v2682_v9 = vadd.f32 %v7028_v3, %v9508_v27  ;;  %v7985_v27 = vld [vmem:[%s9859_s1 + $0xaec] ss:$16 sps:$4 sm:$0xff]   ;;  %v6628_v12 = vcombine.low %v5356_v11, %v5356_v11  ;;  %v6629_v13 = vcombine.high %v5356_v11, %v5356_v11  ;;  %v6519_v11 = vld [vmem:[%s9861_s2 + $0x2] ss:$0 sm:$0xff] }
 0x1de   :  { %v8014_v3 = vld [vmem:[%s9859_s1 + $0xdcc] ss:$16 sps:$4 sm:$0xff]  }
 0x1df   :  { %v2859_v14 = vadd.f32 %v7050_v4, %v2682_v9  ;;  %7331 = vmatpush3.bf16.msra.mxu0 %v7980_v18  ;;  %7353 = vmatpush3.bf16.msra.mxu1 %v7981_v19  ;;  %v8015_v4 = vld [vmem:[%s9859_s1 + $0xfcc] ss:$16 sps:$4 sm:$0xff]   ;;  %v8027_v18 = vld [vmem:[%s9862_s3] sm:$0xff]  }
 0x1e0   :  { %7332 = vmatprep.subr.bf16.mxu0 %v7982_v21  ;;  %7354 = vmatprep.subr.bf16.mxu1 %v7983_v23  ;;  %v8018_v7 = vld [vmem:[%s9859_s1 + $0xdec] ss:$16 sps:$4 sm:$0xff]   ;;  %v8032_v23 = vld [vmem:[%s9862_s3 + $0x50] sm:$0xff]  }
 0x1e1   :  { %v2867_v17 = vadd.f32 %v6374_v6, %v2859_v14  ;;  %v8017_v6 = vld [vmem:[%s9859_s1 + $0xecc] ss:$16 sps:$4 sm:$0xff]  }
 0x1e2   :  { %v8019_v8 = vld [vmem:[%s9859_s1 + $0xfec] ss:$16 sps:$4 sm:$0xff]  }
 0x1e3   :  { %v2868_v20 = vmax.f32 %v2867_v17, 0.0  ;;  %7333 = vmatpush3.bf16.msra.mxu0 %v7984_v26  ;;  %7355 = vmatpush3.bf16.msra.mxu1 %v7985_v27  ;;  %v8020_v9 = vld [vmem:[%s9859_s1 + $0xcec] ss:$16 sps:$4 sm:$0xff]   ;;  %v8026_v17 = vld [vmem:[%s9862_s3 + $0x40] sm:$0xff]  }
 0x1e4   :  { %7362 = vmatprep.subr.bf16.mxu0 %v7990_v32  ;;  %7384 = vmatprep.subr.bf16.mxu1 %v7991_v33  ;;  %v8021_v10 = vld [vmem:[%s9859_s1 + $0xeec] ss:$16 sps:$4 sm:$0xff]  }
 0x1e5   :  { %v2869_v25 = vpack.c.bf16 %v2868_v20, %v2868_v20  ;;  %v5533_v14 = vld [vmem:[%s9860_s0 + $0x38] sm:$0xff]  ;;  %v8030_v21 = vld [vmem:[%s9862_s3 + $0x48] sm:$0xff]  }
 0x1e6   :  { %5171 = vmatmul.mubr.bf16.vlgmr.msra.gmra.mrb[56].mxu0 %v6592_v28  ;;  %5348 = vmatmul.mubr.bf16.vlgmr.msra.gmra.mrb[56].mxu1 %v6610_v30  ;;  %v6646_v15 = vcombine.low %v5533_v14, %v5533_v14  ;;  %v6647_v16 = vcombine.high %v5533_v14, %v5533_v14 }
 0x1e7   :  { %2870 = vst [vmem:[#allocation2 + $0x4] sm:$0xf] %v2869_v25  ;;  %7363 = vmatpush3.bf16.msra.mxu0 %v7992_v34  ;;  %7385 = vmatpush3.bf16.msra.mxu1 %v7993_v35  ;;  %v8034_v25 = vld [vmem:[%s9862_s3 + $0x58] sm:$0xff]   ;;  %v8036_v35 = vld [vmem:[%s9862_s3 + $0x60] sm:$0xff]  }
 0x1e8   :  { %7364 = vmatprep.subr.bf16.mxu0 %v7994_v36  ;;  %7386 = vmatprep.subr.bf16.mxu1 %v7995_v37  ;;  %v8035_v34 = vld [vmem:[%s9862_s3 + $0x18] sm:$0xff]  }
 0x1e9   :  { %5524 = vmatprep.mubr.bf16.mxu0 %v6629_v13  ;;  %5701 = vmatprep.mubr.bf16.mxu1 %v6647_v16  ;;  %v8048_v16 = vld [vmem:[%s9862_s3 + $0xd0] sm:$0xff]  }
 0x1eb   :  { %7365 = vmatpush3.bf16.msra.mxu0 %v7996_v38  ;;  %7387 = vmatpush3.bf16.msra.mxu1 %v7997_v39 }
 0x1ec   :  { %7366 = vmatprep.subr.bf16.mxu0 %v7998_v40  ;;  %7388 = vmatprep.subr.bf16.mxu1 %v7999_v41  ;;  %v8037_v40 = vld [vmem:[%s9862_s3 + $0x20] sm:$0xff]   ;;  %v8038_v41 = vld [vmem:[%s9862_s3 + $0x68] sm:$0xff]  }
 0x1ee   :  { %v5721_v19 = vld [vmem:[#allocation2] sm:$0xff] }
 0x1ef   :  { %7367 = vmatpush3.bf16.msra.mxu0 %v8000_v42  ;;  %7389 = vmatpush3.bf16.msra.mxu1 %v8001_v43  ;;  %v6667_v20 = vcombine.high %v5721_v19, %v5721_v19  ;;  %v8039_v42 = vld [vmem:[%s9862_s3 + $0x28] sm:$0xff]   ;;  %v8040_v43 = vld [vmem:[%s9862_s3 + $0x70] sm:$0xff]  }
 0x1f0   :  { %7368 = vmatprep.subr.bf16.mxu0 %v8002_v44  ;;  %7390 = vmatprep.subr.bf16.mxu1 %v8003_v45  ;;  %v8041_v44 = vld [vmem:[%s9862_s3 + $0x30] sm:$0xff]   ;;  %v8042_v45 = vld [vmem:[%s9862_s3 + $0x78] sm:$0xff]  }
 0x1f3   :  { %7369 = vmatpush3.bf16.msra.mxu0 %v8004_v46  ;;  %7391 = vmatpush3.bf16.msra.mxu1 %v8005_v47  ;;  %v8043_v46 = vld [vmem:[%s9862_s3 + $0x38] sm:$0xff]   ;;  %v6666_v47 = vcombine.low %v5721_v19, %v5721_v19 }
 0x1f4   :  { %7370 = vmatprep.subr.bf16.mxu0 %v8006_v48  ;;  %7392 = vmatprep.subr.bf16.mxu1 %v8007_v49  ;;  %v8051_v19 = vld [vmem:[%s9862_s3 + $0x98] sm:$0xff]  }
 0x1f7   :  { %7371 = vmatpush3.bf16.msra.mxu0 %v8008_v50  ;;  %7393 = vmatpush3.bf16.msra.mxu1 %v8009_v51 }
 0x1f8   :  { %7372 = vmatprep.subr.bf16.mxu0 %v8010_v56  ;;  %7394 = vmatprep.subr.bf16.mxu1 %v8011_v59 }
 0x1f9   :  { %v7070_v52 = vpop.f32.mrb[32].mxu0  ;;  %v7092_v53 = vpop.f32.mrb[32].mxu1 }
 0x1fa   :  { %v7071_v54 = vpop.f32.mrb[33].mxu0  ;;  %v7093_v55 = vpop.f32.mrb[33].mxu1 }
 0x1fb   :  { %v7072_v57 = vadd.f32 %v7071_v54, %v7070_v52  ;;  %v7094_v58 = vadd.f32 %v7093_v55, %v7092_v53  ;;  %v7073_v60 = vpop.f32.mrb[34].mxu0  ;;  %v7095_v61 = vpop.f32.mrb[34].mxu1  ;;  %7373 = vmatpush3.bf16.msra.mxu0 %v8012_v63  ;;  %7395 = vmatpush3.bf16.msra.mxu1 %v8013_v0  ;;  %v8047_v63 = vld [vmem:[%s9862_s3 + $0x88] sm:$0xff]  }
 0x1fc   :  { %v7074_v1 = vpop.f32.mrb[35].mxu0  ;;  %v7096_v2 = vpop.f32.mrb[35].mxu1  ;;  %7374 = vmatprep.subr.bf16.mxu0 %v8014_v3  ;;  %7396 = vmatprep.subr.bf16.mxu1 %v8015_v4  ;;  %v8044_v60 = vld [vmem:[%s9862_s3 + $0xc0] sm:$0xff]  }
 0x1fd   :  { %v9712_v62 = vadd.f32 %v7094_v58, %v7072_v57  ;;  %v8045_v61 = vld [vmem:[%s9862_s3 + $0x80] sm:$0xff]  }
 0x1ff   :  { %7375 = vmatpush3.bf16.msra.mxu0 %v8016_v5  ;;  %7397 = vmatpush3.bf16.msra.mxu1 %v8017_v6 }
 0x200   :  { %7376 = vmatprep.subr.bf16.mxu0 %v8018_v7  ;;  %7398 = vmatprep.subr.bf16.mxu1 %v8019_v8 }
 0x203   :  { %7377 = vmatpush3.bf16.msra.mxu0 %v8020_v9  ;;  %7399 = vmatpush3.bf16.msra.mxu1 %v8021_v10 }
 0x204   :  { %7406 = vmatprep.subr.bf16.mxu0 %v8026_v17  ;;  %7428 = vmatprep.subr.bf16.mxu1 %v8044_v60  ;;  %v8049_v17 = vld [vmem:[%s9862_s3 + $0x90] sm:$0xff]  }
 0x206   :  { %5525 = vmatmul.mubr.bf16.vlgmr.msra.gmra.mrb[60].mxu0 %v6628_v12  ;;  %5702 = vmatmul.mubr.bf16.vlgmr.msra.gmra.mrb[60].mxu1 %v6646_v15 }
 0x207   :  { %7407 = vmatpush3.bf16.msra.mxu0 %v8027_v18  ;;  %6032 = vmatprep.mubr.bf16.mxu0 %v6667_v20  ;;  %v8050_v18 = vld [vmem:[%s9862_s3 + $0xd8] sm:$0xff]   ;;  %v8052_v20 = vld [vmem:[%s9862_s3 + $0xe0] sm:$0xff]  }
 0x208   :  { %7408 = vmatprep.subr.bf16.mxu0 %v8030_v21  ;;  %7429 = vmatpush3.bf16.msra.mxu1 %v8045_v61  ;;  %v8053_v21 = vld [vmem:[%s9862_s3 + $0xa0] sm:$0xff]  }
 0x20b   :  { %7409 = vmatpush3.bf16.msra.mxu0 %v8031_v22  ;;  %v8054_v22 = vld [vmem:[%s9862_s3 + $0xe8] sm:$0xff]  }
 0x20c   :  { %7410 = vmatprep.subr.bf16.mxu0 %v8032_v23  ;;  %v8055_v23 = vld [vmem:[%s9862_s3 + $0xa8] sm:$0xff]  }
 0x20f   :  { %7411 = vmatpush3.bf16.msra.mxu0 %v8033_v24 }
 0x210   :  { %7412 = vmatprep.subr.bf16.mxu0 %v8034_v25  ;;  %v8056_v25 = vld [vmem:[%s9862_s3 + $0xf0] sm:$0xff]  }
 0x213   :  { %7413 = vmatpush3.bf16.msra.mxu0 %v8035_v34  ;;  %v8057_v34 = vld [vmem:[%s9862_s3 + $0xb0] sm:$0xff]  }
 0x214   :  { %7414 = vmatprep.subr.bf16.mxu0 %v8036_v35 }
 0x217   :  { %7415 = vmatpush3.bf16.msra.mxu0 %v8037_v40 }
 0x218   :  { %7416 = vmatprep.subr.bf16.mxu0 %v8038_v41 }
 0x219   :  { %v7114_v26 = vpop.f32.mrb[36].mxu0  ;;  %v7136_v27 = vpop.f32.mrb[36].mxu1 }
 0x21a   :  { %v7115_v28 = vpop.f32.mrb[37].mxu0  ;;  %v7137_v29 = vpop.f32.mrb[37].mxu1 }
 0x21b   :  { %v7116_v30 = vadd.f32 %v7115_v28, %v7114_v26  ;;  %v7138_v31 = vadd.f32 %v7137_v29, %v7136_v27  ;;  %v7117_v32 = vpop.f32.mrb[38].mxu0  ;;  %v7139_v33 = vpop.f32.mrb[38].mxu1  ;;  %7417 = vmatpush3.bf16.msra.mxu0 %v8039_v42 }
 0x21c   :  { %v7118_v36 = vpop.f32.mrb[39].mxu0  ;;  %v7140_v37 = vpop.f32.mrb[39].mxu1  ;;  %7418 = vmatprep.subr.bf16.mxu0 %v8040_v43 }
 0x21d   :  { %v3399_v38 = vadd.f32 %v7116_v30, %v9712_v62  ;;  %v8046_v62 = vld [vmem:[%s9862_s3 + $0xc8] sm:$0xff]   ;;  %v8058_v36 = vld [vmem:[%s9862_s3 + $0xf8] sm:$0xff]  }
 0x21e   :  { %7430 = vmatprep.subr.bf16.mxu1 %v8046_v62 }
 0x21f   :  { %v3576_v39 = vadd.f32 %v7138_v31, %v3399_v38  ;;  %7419 = vmatpush3.bf16.msra.mxu0 %v8041_v44  ;;  %7431 = vmatpush3.bf16.msra.mxu1 %v8047_v63  ;;  %v8059_v38 = vld [vmem:[%s9862_s3 + $0xb8] sm:$0xff]  }
 0x220   :  { %7420 = vmatprep.subr.bf16.mxu0 %v8042_v45  ;;  %7432 = vmatprep.subr.bf16.mxu1 %v8048_v16 }
 0x223   :  { %7421 = vmatpush3.bf16.msra.mxu0 %v8043_v46  ;;  %7433 = vmatpush3.bf16.msra.mxu1 %v8049_v17 }
 0x224   :  { %7434 = vmatprep.subr.bf16.mxu1 %v8050_v18 }
 0x226   :  { %6033 = vmatmul.mubr.bf16.vlgmr.msra.gmra.mrb[64].mxu0 %v6666_v47 }
 0x227   :  { %7435 = vmatpush3.bf16.msra.mxu1 %v8051_v19 }
 0x228   :  { %7436 = vmatprep.subr.bf16.mxu1 %v8052_v20 }
 0x22b   :  { %7437 = vmatpush3.bf16.msra.mxu1 %v8053_v21 }
 0x22c   :  { %7438 = vmatprep.subr.bf16.mxu1 %v8054_v22 }
 0x22f   :  { %7439 = vmatpush3.bf16.msra.mxu1 %v8055_v23  ;;  %v6665_v23 = vld [vmem:[%s9863_s4] ss:$0 sm:$0xff] }
 0x230   :  { %7440 = vmatprep.subr.bf16.mxu1 %v8056_v25 }
 0x233   :  { %7441 = vmatpush3.bf16.msra.mxu1 %v8057_v34 }
 0x234   :  { %7442 = vmatprep.subr.bf16.mxu1 %v8058_v36 }
 0x237   :  { %7443 = vmatpush3.bf16.msra.mxu1 %v8059_v38 }
 0x239   :  { %v7158_v48 = vpop.f32.mrb[40].mxu0  ;;  %v7180_v49 = vpop.f32.mrb[40].mxu1 }
 0x23a   :  { %v7159_v50 = vpop.f32.mrb[41].mxu0  ;;  %v7181_v52 = vpop.f32.mrb[41].mxu1 }
 0x23b   :  { %v7160_v51 = vadd.f32 %v7159_v50, %v7158_v48  ;;  %v7161_v53 = vpop.f32.mrb[42].mxu0  ;;  %v7182_v54 = vadd.f32 %v7181_v52, %v7180_v49  ;;  %v7183_v55 = vpop.f32.mrb[42].mxu1 }
 0x23c   :  { %v7162_v56 = vpop.f32.mrb[43].mxu0  ;;  %v7184_v58 = vpop.f32.mrb[43].mxu1 }
 0x23d   :  { %v3753_v57 = vadd.f32 %v7160_v51, %v3576_v39 }
 0x23f   :  { %v3930_v59 = vadd.f32 %v7182_v54, %v3753_v57 }
 0x259   :  { %v7202_v0 = vpop.f32.mrb[44].mxu0  ;;  %v7224_v1 = vpop.f32.mrb[44].mxu1 }
 0x25a   :  { %v7203_v2 = vpop.f32.mrb[45].mxu0  ;;  %v7225_v4 = vpop.f32.mrb[45].mxu1 }
 0x25b   :  { %v7204_v3 = vadd.f32 %v7203_v2, %v7202_v0  ;;  %v7205_v5 = vpop.f32.mrb[46].mxu0  ;;  %v7226_v6 = vadd.f32 %v7225_v4, %v7224_v1  ;;  %v7227_v7 = vpop.f32.mrb[46].mxu1 }
 0x25c   :  { %v7206_v8 = vpop.f32.mrb[47].mxu0  ;;  %v7228_v10 = vpop.f32.mrb[47].mxu1 }
 0x25d   :  { %v4107_v9 = vadd.f32 %v7204_v3, %v3930_v59  ;;  %v6664_v10 = vld [vmem:[%s9861_s2 + $0x3] ss:$0 sm:$0xff] }
 0x25f   :  { %v4284_v12 = vadd.f32 %v7226_v6, %v4107_v9 }
 0x261   :  { %v4292_v13 = vadd.f32 %v6519_v11, %v4284_v12 }
 0x263   :  { %v4293_v14 = vmax.f32 %v4292_v13, 0.0 }
 0x265   :  { %v4294_v15 = vpack.c.bf16 %v4293_v14, %v4293_v14 }
 0x267   :  { %4295 = vst [vmem:[#allocation2 + $0x8] sm:$0xf] %v4294_v15 }
 0x279   :  { %v7246_v24 = vpop.f32.mrb[48].mxu0  ;;  %v7268_v26 = vpop.f32.mrb[48].mxu1 }
 0x27a   :  { %v7247_v27 = vpop.f32.mrb[49].mxu0  ;;  %v7269_v29 = vpop.f32.mrb[49].mxu1 }
 0x27b   :  { %v7248_v28 = vadd.f32 %v7247_v27, %v7246_v24  ;;  %v7249_v30 = vpop.f32.mrb[50].mxu0  ;;  %v7270_v31 = vadd.f32 %v7269_v29, %v7268_v26  ;;  %v7271_v32 = vpop.f32.mrb[50].mxu1 }
 0x27c   :  { %v7250_v33 = vpop.f32.mrb[51].mxu0  ;;  %v7272_v35 = vpop.f32.mrb[51].mxu1 }
 0x27d   :  { %v4643_v37 = vadd.f32 %v7270_v31, %v7248_v28 }
 0x299   :  { %v7290_v39 = vpop.f32.mrb[52].mxu0  ;;  %v7312_v40 = vpop.f32.mrb[52].mxu1 }
 0x29a   :  { %v7291_v41 = vpop.f32.mrb[53].mxu0  ;;  %v7313_v43 = vpop.f32.mrb[53].mxu1 }
 0x29b   :  { %v7292_v42 = vadd.f32 %v7291_v41, %v7290_v39  ;;  %v7293_v44 = vpop.f32.mrb[54].mxu0  ;;  %v7314_v45 = vadd.f32 %v7313_v43, %v7312_v40  ;;  %v7315_v46 = vpop.f32.mrb[54].mxu1 }
 0x29c   :  { %v7294_v47 = vpop.f32.mrb[55].mxu0  ;;  %v7316_v49 = vpop.f32.mrb[55].mxu1 }
 0x29d   :  { %v4824_v48 = vadd.f32 %v7292_v42, %v4643_v37 }
 0x29f   :  { %v5001_v50 = vadd.f32 %v7314_v45, %v4824_v48 }
 0x2b9   :  { %v7334_v51 = vpop.f32.mrb[56].mxu0  ;;  %v7356_v52 = vpop.f32.mrb[56].mxu1 }
 0x2ba   :  { %v7335_v53 = vpop.f32.mrb[57].mxu0  ;;  %v7357_v55 = vpop.f32.mrb[57].mxu1 }
 0x2bb   :  { %v7336_v54 = vadd.f32 %v7335_v53, %v7334_v51  ;;  %v7337_v56 = vpop.f32.mrb[58].mxu0  ;;  %v7358_v57 = vadd.f32 %v7357_v55, %v7356_v52  ;;  %v7359_v58 = vpop.f32.mrb[58].mxu1 }
 0x2bc   :  { %v7338_v59 = vpop.f32.mrb[59].mxu0  ;;  %v7360_v61 = vpop.f32.mrb[59].mxu1 }
 0x2bd   :  { %v5178_v60 = vadd.f32 %v7336_v54, %v5001_v50 }
 0x2bf   :  { %v5355_v62 = vadd.f32 %v7358_v57, %v5178_v60 }
 0x2d9   :  { %v7378_v63 = vpop.f32.mrb[60].mxu0  ;;  %v7400_v0 = vpop.f32.mrb[60].mxu1 }
 0x2da   :  { %v7379_v1 = vpop.f32.mrb[61].mxu0  ;;  %v7401_v3 = vpop.f32.mrb[61].mxu1 }
 0x2db   :  { %v7380_v2 = vadd.f32 %v7379_v1, %v7378_v63  ;;  %v7381_v4 = vpop.f32.mrb[62].mxu0  ;;  %v7402_v5 = vadd.f32 %v7401_v3, %v7400_v0  ;;  %v7403_v6 = vpop.f32.mrb[62].mxu1 }
 0x2dc   :  { %v7382_v7 = vpop.f32.mrb[63].mxu0  ;;  %v7404_v9 = vpop.f32.mrb[63].mxu1 }
 0x2dd   :  { %v5532_v8 = vadd.f32 %v7380_v2, %v5355_v62 }
 0x2df   :  { %v5709_v11 = vadd.f32 %v7402_v5, %v5532_v8 }
 0x2e1   :  { %v5717_v12 = vadd.f32 %v6664_v10, %v5709_v11 }
 0x2e3   :  { %v5718_v13 = vmax.f32 %v5717_v12, 0.0 }
 0x2e5   :  { %v5719_v14 = vpack.c.bf16 %v5718_v13, %v5718_v13 }
 0x2e7   :  { %5720 = vst [vmem:[#allocation2 + $0xc] sm:$0xf] %v5719_v14 }
 0x2ee   :  { %v5722_v15 = vld [vmem:[#allocation2 + $0x8] sm:$0xff] }
 0x2ef   :  { %v6668_v16 = vcombine.low %v5722_v15, %v5722_v15  ;;  %v6669_v17 = vcombine.high %v5722_v15, %v5722_v15 }
 0x2f1   :  { %6072 = vmatprep.mubr.bf16.mxu1 %v6669_v17 }
 0x2f2   :  { %6073 = vmatmul.mubr.bf16.vlgmr.msra.gmra.mrb[64].mxu1 %v6668_v16 }
 0x2f9   :  { %v7422_v18 = vpop.f32.mrb[64].mxu0 }
 0x2fa   :  { %v7423_v19 = vpop.f32.mrb[65].mxu0 }
 0x2fb   :  { %v7424_v20 = vadd.f32 %v7423_v19, %v7422_v18  ;;  %v7425_v21 = vpop.f32.mrb[66].mxu0 }
 0x2fc   :  { %v7426_v22 = vpop.f32.mrb[67].mxu0 }
 0x2fd   :  { %v6035_v26 = vadd.f32 %v7424_v20, %v6665_v23 }
 0x3c5   :  { %v7444_v24 = vpop.f32.mrb[64].mxu1 }
 0x3c6   :  { %v7445_v25 = vpop.f32.mrb[65].mxu1 }
 0x3c7   :  { %v7446_v27 = vadd.f32 %v7445_v25, %v7444_v24  ;;  %v7447_v28 = vpop.f32.mrb[66].mxu1 }
 0x3c8   :  { %v7448_v29 = vpop.f32.mrb[67].mxu1 }
 0x3c9   :  { %v6075_v30 = vadd.f32 %v7446_v27, %v6035_v26 }
 0x3cb   :  { %6080 = vst [vmem:[%s9864_s5] sm:$0xff] %v6075_v30 }

</bundles_post_ra>
